<compile_context>
chip_gen: v6e
topology: v6e:2x2x1
jax: 0.10.0
libtpu: 0.0.40
codegen_flags: <defaults>
</compile_context>

<pallas_src>
import jax
import jax.numpy as jnp
from jax.experimental import pallas as pl
from jax.experimental.pallas import tpu as pltpu


# ----------------------------- kernels ------------------------------------ #

def _single_step_kernel(a_ref, b_ref, o_ref):
    # Whole K reduction in one MXU pass; fold "+ mm(a,b)" into *2 at the store.
    o_ref[...] = (
        2.0 * jnp.dot(a_ref[...], b_ref[...], preferred_element_type=jnp.float32)
    ).astype(o_ref.dtype)


def _multi_step_f32_kernel(a_ref, b_ref, o_ref):
    # f32 output: the output block's index_map ignores k, so it stays resident in
    # VMEM across the K axis — accumulate directly into it (no scratch, no copy).
    @pl.when(pl.program_id(2) == 0)
    def _():
        o_ref[...] = jnp.zeros_like(o_ref)

    o_ref[...] += jnp.dot(a_ref[...], b_ref[...], preferred_element_type=jnp.float32)

    @pl.when(pl.program_id(2) == pl.num_programs(2) - 1)
    def _():
        o_ref[...] = 2.0 * o_ref[...]


def _multi_step_acc_kernel(a_ref, b_ref, o_ref, acc_ref):
    # Narrow output dtype (e.g. bf16): keep an f32 accumulator, cast+store once.
    @pl.when(pl.program_id(2) == 0)
    def _():
        acc_ref[...] = jnp.zeros_like(acc_ref)

    acc_ref[...] += jnp.dot(a_ref[...], b_ref[...], preferred_element_type=jnp.float32)

    @pl.when(pl.program_id(2) == pl.num_programs(2) - 1)
    def _():
        o_ref[...] = (2.0 * acc_ref[...]).astype(o_ref.dtype)


# ----------------------------- helpers ------------------------------------ #

def _round_up(x, m):
    return ((x + m - 1) // m) * m


def _pick_tile(dim, preferred, align=128):
    """Lane/MXU-aligned tile, never larger than needed for the (padded) dim."""
    if dim >= preferred:
        return preferred
    return _round_up(dim, align)


def _vmem_limit_bytes():
    # Generation-aware scoped-VMEM budget: v7x has 64 MiB/TC, v5e/v6e have 128 MiB.
    cap = 128 * 1024 * 1024
    try:
        info = pltpu.get_tpu_info()
        for name in ("vmem_capacity_bytes", "vmem_size_bytes", "vmem_bytes"):
            v = getattr(info, name, None)
            if v:
                cap = int(v)
                break
    except Exception:
        pass
    if cap <= 64 * 1024 * 1024:        # v7x-class
        return 40 * 1024 * 1024
    return 64 * 1024 * 1024            # v5e / v6e


# ----------------------------- wrapper ------------------------------------ #

def mm_plus_mm(a, b, *, tm=512, tn=512, tk=1024):
    """Pallas equivalent of Model.forward: torch.mm(a, b) + torch.mm(a, b)."""
    M, K = a.shape
    K2, N = b.shape
    assert K == K2, "inner dims must match"

    out_dtype = jnp.result_type(a.dtype, b.dtype)

    tm = _pick_tile(M, tm)
    tn = _pick_tile(N, tn)
    tk = _pick_tile(K, tk)

    # Zero-pad to tile multiples (exact for matmul); tiles stay bounded & aligned.
    Mp, Np, Kp = _round_up(M, tm), _round_up(N, tn), _round_up(K, tk)
    if (Mp, Kp) != (M, K):
        a = jnp.pad(a, ((0, Mp - M), (0, Kp - K)))
    if (Kp, Np) != (K, N):
        b = jnp.pad(b, ((0, Kp - K), (0, Np - N)))

    gm, gn, gk = Mp // tm, Np // tn, Kp // tk

    itemsize_out = jnp.dtype(out_dtype).itemsize
    cost = pl.CostEstimate(
        flops=2 * M * N * K + M * N,
        transcendentals=0,
        bytes_accessed=(
            a.dtype.itemsize * M * K
            + b.dtype.itemsize * K * N
            + itemsize_out * M * N
        ),
    )
    vmem_limit = _vmem_limit_bytes()

    if gk == 1:
        # Fast path: whole reduction in one block per (i, j) tile — 2D grid.
        out = pl.pallas_call(
            _single_step_kernel,
            out_shape=jax.ShapeDtypeStruct((Mp, Np), out_dtype),
            grid_spec=pltpu.PrefetchScalarGridSpec(
                num_scalar_prefetch=0,
                grid=(gm, gn),
                in_specs=[
                    pl.BlockSpec((tm, Kp), lambda i, j: (i, 0)),
                    pl.BlockSpec((Kp, tn), lambda i, j: (0, j)),
                ],
                out_specs=pl.BlockSpec((tm, tn), lambda i, j: (i, j)),
            ),
            compiler_params=pltpu.CompilerParams(
                dimension_semantics=("parallel", "parallel"),
                vmem_limit_bytes=vmem_limit,
            ),
            cost_estimate=cost,
        )(a, b)
    else:
        if out_dtype == jnp.float32:
            kernel, scratch = _multi_step_f32_kernel, []
        else:
            kernel, scratch = _multi_step_acc_kernel, [pltpu.VMEM((tm, tn), jnp.float32)]
        out = pl.pallas_call(
            kernel,
            out_shape=jax.ShapeDtypeStruct((Mp, Np), out_dtype),
            grid_spec=pltpu.PrefetchScalarGridSpec(
                num_scalar_prefetch=0,
                grid=(gm, gn, gk),
                in_specs=[
                    pl.BlockSpec((tm, tk), lambda i, j, k: (i, k)),
                    pl.BlockSpec((tk, tn), lambda i, j, k: (k, j)),
                ],
                out_specs=pl.BlockSpec((tm, tn), lambda i, j, k: (i, j)),
                scratch_shapes=scratch,
            ),
            compiler_params=pltpu.CompilerParams(
                dimension_semantics=("parallel", "parallel", "arbitrary"),
                vmem_limit_bytes=vmem_limit,
            ),
            cost_estimate=cost,
        )(a, b)

    if (Mp, Np) != (M, N):
        out = out[:M, :N]
    return out


# ------------------------------- demo -------------------------------------- #

if __name__ == "__main__":
    key = jax.random.PRNGKey(0)
    k1, k2, k3, k4, k5, k6 = jax.random.split(key, 6)

    def _check(out, ref, tol):
        rel = jnp.max(jnp.abs(out - ref)) / (jnp.max(jnp.abs(ref)) + 1e-6)
        assert float(rel) < tol, f"relative error too large: {float(rel)}"

    # 1) MXU-aligned shape — exercises the single-K-step fast path.
    M, K, N = 512, 1024, 512
    x = jax.random.normal(k1, (M, K), dtype=jnp.float32)
    y = jax.random.normal(k2, (K, N), dtype=jnp.float32)
    out = mm_plus_mm(x, y)
    jax.block_until_ready(out)
    assert out.shape == (M, N)
    ref = 2.0 * jnp.dot(x, y, preferred_element_type=jnp.float32,
                        precision=jax.lax.Precision.HIGHEST)
    _check(out, ref, 2e-2)

    # 2) Non-divisible shape — exercises padding + multi-K-step f32 accumulation.
    M, K, N = 384, 2304, 640
    x = jax.random.normal(k3, (M, K), dtype=jnp.float32)
    y = jax.random.normal(k4, (K, N), dtype=jnp.float32)
    out = mm_plus_mm(x, y)
    jax.block_until_ready(out)
    assert out.shape == (M, N)
    ref = 2.0 * jnp.dot(x, y, preferred_element_type=jnp.float32,
                        precision=jax.lax.Precision.HIGHEST)
    _check(out, ref, 2e-2)

    # 3) bf16 inputs/output — exercises the f32-scratch accumulator kernel.
    M, K, N = 256, 2048, 256
    x = jax.random.normal(k5, (M, K), dtype=jnp.bfloat16)
    y = jax.random.normal(k6, (K, N), dtype=jnp.bfloat16)
    out = mm_plus_mm(x, y)
    jax.block_until_ready(out)
    assert out.shape == (M, N) and out.dtype == jnp.bfloat16
    ref = 2.0 * jnp.dot(x.astype(jnp.float32), y.astype(jnp.float32),
                        precision=jax.lax.Precision.HIGHEST)
    _check(out.astype(jnp.float32), ref, 2e-2)

    print("KERNEL_OK")
</pallas_src>

<mosaic_0001>
module attributes {stable_mosaic.version = 11 : i64} {
  func.func @_single_step_kernel(%arg0: i32, %arg1: i32, %arg2: memref<512x1024xf32, #tpu.memory_space<vmem>>, %arg3: memref<1024x512xf32, #tpu.memory_space<vmem>>, %arg4: memref<512x512xf32, #tpu.memory_space<vmem>>) attributes {dimension_semantics = [#tpu.dimension_semantics<parallel>, #tpu.dimension_semantics<parallel>], iteration_bounds = array<i64: 1, 1>, scalar_prefetch = 0 : i64, scratch_operands = 0 : i64, tpu.core_type = #tpu.core_type<tc>, window_params = [{transform_indices = @transform_0, window_bounds = array<i64: 512, 1024>}, {transform_indices = @transform_1, window_bounds = array<i64: 1024, 512>}, {transform_indices = @transform_2, window_bounds = array<i64: 512, 512>}]} {
    %c0 = arith.constant 0 : index
    %c0_0 = arith.constant 0 : index
    %0 = vector.load %arg2[%c0, %c0_0] : memref<512x1024xf32, #tpu.memory_space<vmem>>, vector<512x1024xf32>
    %c0_1 = arith.constant 0 : index
    %c0_2 = arith.constant 0 : index
    %1 = vector.load %arg3[%c0_1, %c0_2] : memref<1024x512xf32, #tpu.memory_space<vmem>>, vector<1024x512xf32>
    %cst = arith.constant dense<0.000000e+00> : vector<512x512xf32>
    %2 = tpu.matmul %0, %1, %cst {dimension_numbers = #tpu.dot_dimension_numbers<[1], [0], [0], [1], [0, 0, 1, 1], [], []>} : vector<512x1024xf32>, vector<1024x512xf32>, vector<512x512xf32> -> vector<512x512xf32>
    %cst_3 = arith.constant 2.000000e+00 : f32
    %3 = vector.broadcast %cst_3 : f32 to vector<512x512xf32>
    %4 = arith.mulf %3, %2 : vector<512x512xf32>
    %c0_4 = arith.constant 0 : index
    %c0_5 = arith.constant 0 : index
    %5 = vector.load %arg4[%c0_4, %c0_5] : memref<512x512xf32, #tpu.memory_space<vmem>>, vector<512x512xf32>
    tpu.vector_store %arg4[%c0_4, %c0_5], %4 {strides = array<i32>} : memref<512x512xf32, #tpu.memory_space<vmem>>, vector<512x512xf32>,
    return
  }
  func.func @transform_0(%arg0: i32, %arg1: i32) -> (i32, i32) {
    %c0_i32 = arith.constant 0 : i32
    %c0_i32_0 = arith.constant 0 : i32
    return %arg0, %c0_i32 : i32, i32
  }
  func.func @transform_1(%arg0: i32, %arg1: i32) -> (i32, i32) {
    %c0_i32 = arith.constant 0 : i32
    %c0_i32_0 = arith.constant 0 : i32
    return %c0_i32, %arg1 : i32, i32
  }
  func.func @transform_2(%arg0: i32, %arg1: i32) -> (i32, i32) {
    %c0_i32 = arith.constant 0 : i32
    return %arg0, %arg1 : i32, i32
  }
}

</mosaic_0001>

<bundles_post_ra>
// kernel: tpu_custom_call.1
= control target key start
LH: loop header
LB: loop body
LE: loop exit
PB: predicated region body
PF: predicated region fallthrough
CT: control target
= control target key end

     0   :  { %7 = vsyncpa [#allocation3], 0  ;;  %s6576_s0 = inlined_call_operand.hbm [shape: f32[512,1024], index: 0, kind: input, shape index: {}]   ;;  %s6577_s1 = inlined_call_operand.hbm [shape: f32[1024,512], index: 1, kind: input, shape index: {}]   ;;  %s6578_s2 = inlined_call_operand.hbm [shape: f32[512,512], index: 2, kind: output, shape index: {}]  }
   0x1   :  { %8 = vsyncpa [#allocation6], 0 }
   0x2   :  { %9 = vsyncpa [#allocation4], 0  ;;  %s5771_s9 = smov [#allocation2]  }
   0x3   :  { %s15_s10 = sshll.u32 %s5771_s9, 4  ;;  %s16_s10 = int_to_ptr.vmem [resolvable:$true] %s15_s10 }
   0x4   :  { %s5713_s11 = scalar_lea.vmem %s16_s10, 65536  ;;  %p5718_p1 = scmp.lt.s32.totalorder %s16_s10, %s16_s10 }
   0x5   :  { %p5714_p0 = scmp.ne.s32.totalorder %s16_s10, %s5713_s11  ;;  %p5719_p2 = scmp.lt.s32.totalorder %s5713_s11, %s5713_s11 }
   0x7   :  { %p5720_p3 = por %p5719_p2, %p5718_p1 }
   0x9   :  { %p5721_p4 = pnand %p5720_p3, %p5714_p0 }
   0xb   :  { %5724 = shalt.err (!%p5721_p4)
}
   0xc   :  { %s5772_s12 = smov 1024   ;;  %s5773_s13 = smov 64  }
   0xd   :  { %21 = dma.hbm_to_vmem [thread:$0]  %s6576_s0, 65536, %s16_s10, [#allocation3], %s5772_s12, %s5772_s12, %s5773_s13  }
   0xe   :  { %s5774_s16 = smov [#allocation5]  }
   0xf   :  { %s27_s17 = sshll.u32 %s5774_s16, 4  ;;  %s28_s17 = int_to_ptr.vmem [resolvable:$true] %s27_s17 }
  0x10   :  { %s5733_s18 = scalar_lea.vmem %s28_s17, 65536  ;;  %p5738_p6 = scmp.lt.s32.totalorder %s28_s17, %s28_s17 }
  0x11   :  { %p5734_p5 = scmp.ne.s32.totalorder %s28_s17, %s5733_s18  ;;  %p5739_p7 = scmp.lt.s32.totalorder %s5733_s18, %s5733_s18 }
  0x13   :  { %p5740_p8 = por %p5739_p7, %p5738_p6 }
  0x15   :  { %p5741_p9 = pnand %p5740_p8, %p5734_p5 }
  0x17   :  { %5744 = shalt.err (!%p5741_p9)
}
  0x18   :  { %s5775_s19 = smov 512   ;;  %s5776_s20 = smov 32  }
  0x19   :  { %33 = dma.hbm_to_vmem [thread:$0]  %s6577_s1, 65536, %s28_s17, [#allocation6], %s5775_s19, %s5775_s19, %s5776_s20  }
  0x1a   :  { %5765 = dma.done.wait [#allocation3], 65536  }
  0x1b   :  { %5766 = vsyncadd [#allocation3], 4294901760 }
  0x1c   :  { %5767 = dma.done.wait [#allocation6], 65536  }
  0x1d   :  { %5768 = vsyncadd [#allocation6], 4294901760  ;;  %v613_v0 = vld [vmem:[#allocation5 + $0x1e8] sm:$0xff]  ;;  %v612_v2 = vld [vmem:[#allocation5 + $0x1e0] sm:$0xff]  ;;  %s5777_s0 = smov [#allocation7]  }
  0x1e   :  { %v741_v1 = vld [vmem:[#allocation5 + $0x5e8] sm:$0xff]  ;;  %1064 = vmatprep.subr.mxu0 %v613_v0  ;;  %v740_v3 = vld [vmem:[#allocation5 + $0x5e0] sm:$0xff]  ;;  %s5173_s1 = sshll.u32 %s5777_s0, 4  ;;  %s5174_s1 = int_to_ptr.vmem [resolvable:$true] %s5173_s1 }
  0x1f   :  { %1513 = vmatprep.subr.mxu1 %v741_v1  ;;  %v609_v4 = vld [vmem:[#allocation5 + $0x1c8] sm:$0xff]  ;;  %1065 = vmatpush1.msra.mxu0 %v612_v2  ;;  %v608_v6 = vld [vmem:[#allocation5 + $0x1c0] sm:$0xff]  ;;  %s5745_s23 = scalar_lea.vmem %s5174_s1, 32768  ;;  %p5750_p11 = scmp.lt.s32.totalorder %s5174_s1, %s5174_s1 }
  0x20   :  { %v737_v5 = vld [vmem:[#allocation5 + $0x5c8] sm:$0xff]  ;;  %1514 = vmatpush1.msra.mxu1 %v740_v3  ;;  %v736_v7 = vld [vmem:[#allocation5 + $0x5c0] sm:$0xff]  ;;  %1066 = vmatprep.subr.mxu0 %v609_v4  ;;  %p5746_p10 = scmp.ne.s32.totalorder %s5174_s1, %s5745_s23  ;;  %p5751_p12 = scmp.lt.s32.totalorder %s5745_s23, %s5745_s23 }
  0x21   :  { %v605_v8 = vld [vmem:[#allocation5 + $0x1a8] sm:$0xff]  ;;  %1515 = vmatprep.subr.mxu1 %v737_v5  ;;  %v604_v10 = vld [vmem:[#allocation5 + $0x1a0] sm:$0xff]  ;;  %1067 = vmatpush1.msra.mxu0 %v608_v6 }
  0x22   :  { %v733_v9 = vld [vmem:[#allocation5 + $0x5a8] sm:$0xff]  ;;  %v732_v11 = vld [vmem:[#allocation5 + $0x5a0] sm:$0xff]  ;;  %1516 = vmatpush1.msra.mxu1 %v736_v7  ;;  %1068 = vmatprep.subr.mxu0 %v605_v8  ;;  %p5752_p13 = por %p5751_p12, %p5750_p11 }
  0x23   :  { %v601_v12 = vld [vmem:[#allocation5 + $0x188] sm:$0xff]  ;;  %1517 = vmatprep.subr.mxu1 %v733_v9  ;;  %v600_v14 = vld [vmem:[#allocation5 + $0x180] sm:$0xff]  ;;  %1069 = vmatpush1.msra.mxu0 %v604_v10 }
  0x24   :  { %v729_v13 = vld [vmem:[#allocation5 + $0x588] sm:$0xff]  ;;  %v728_v15 = vld [vmem:[#allocation5 + $0x580] sm:$0xff]  ;;  %1518 = vmatpush1.msra.mxu1 %v732_v11  ;;  %1070 = vmatprep.subr.mxu0 %v601_v12  ;;  %p5753_p0 = pnand %p5752_p13, %p5746_p10 }
  0x25   :  { %v597_v16 = vld [vmem:[#allocation5 + $0x168] sm:$0xff]  ;;  %1519 = vmatprep.subr.mxu1 %v729_v13  ;;  %v596_v18 = vld [vmem:[#allocation5 + $0x160] sm:$0xff]  ;;  %1071 = vmatpush1.msra.mxu0 %v600_v14 }
  0x26   :  { %v725_v17 = vld [vmem:[#allocation5 + $0x568] sm:$0xff]  ;;  %v724_v19 = vld [vmem:[#allocation5 + $0x560] sm:$0xff]  ;;  %1520 = vmatpush1.msra.mxu1 %v728_v15  ;;  %1072 = vmatprep.subr.mxu0 %v597_v16 }
  0x27   :  { %v593_v20 = vld [vmem:[#allocation5 + $0x148] sm:$0xff]  ;;  %1521 = vmatprep.subr.mxu1 %v725_v17  ;;  %v592_v22 = vld [vmem:[#allocation5 + $0x140] sm:$0xff]  ;;  %1073 = vmatpush1.msra.mxu0 %v596_v18 }
  0x28   :  { %v721_v21 = vld [vmem:[#allocation5 + $0x548] sm:$0xff]  ;;  %v720_v23 = vld [vmem:[#allocation5 + $0x540] sm:$0xff]  ;;  %1522 = vmatpush1.msra.mxu1 %v724_v19  ;;  %1074 = vmatprep.subr.mxu0 %v593_v20 }
  0x29   :  { %v589_v24 = vld [vmem:[#allocation5 + $0x128] sm:$0xff]  ;;  %1523 = vmatprep.subr.mxu1 %v721_v21  ;;  %v588_v26 = vld [vmem:[#allocation5 + $0x120] sm:$0xff]  ;;  %1075 = vmatpush1.msra.mxu0 %v592_v22 }
  0x2a   :  { %v717_v25 = vld [vmem:[#allocation5 + $0x528] sm:$0xff]  ;;  %v716_v27 = vld [vmem:[#allocation5 + $0x520] sm:$0xff]  ;;  %1524 = vmatpush1.msra.mxu1 %v720_v23  ;;  %1076 = vmatprep.subr.mxu0 %v589_v24 }
  0x2b   :  { %v585_v28 = vld [vmem:[#allocation5 + $0x108] sm:$0xff]  ;;  %1525 = vmatprep.subr.mxu1 %v717_v25  ;;  %v584_v30 = vld [vmem:[#allocation5 + $0x100] sm:$0xff]  ;;  %1077 = vmatpush1.msra.mxu0 %v588_v26 }
  0x2c   :  { %v713_v29 = vld [vmem:[#allocation5 + $0x508] sm:$0xff]  ;;  %v712_v31 = vld [vmem:[#allocation5 + $0x500] sm:$0xff]  ;;  %1526 = vmatpush1.msra.mxu1 %v716_v27  ;;  %1078 = vmatprep.subr.mxu0 %v585_v28 }
  0x2d   :  { %v581_v32 = vld [vmem:[#allocation5 + $0xe8] sm:$0xff]  ;;  %1527 = vmatprep.subr.mxu1 %v713_v29  ;;  %v580_v34 = vld [vmem:[#allocation5 + $0xe0] sm:$0xff]  ;;  %1079 = vmatpush1.msra.mxu0 %v584_v30 }
  0x2e   :  { %v709_v33 = vld [vmem:[#allocation5 + $0x4e8] sm:$0xff]  ;;  %v708_v35 = vld [vmem:[#allocation5 + $0x4e0] sm:$0xff]  ;;  %1528 = vmatpush1.msra.mxu1 %v712_v31  ;;  %1080 = vmatprep.subr.mxu0 %v581_v32 }
  0x2f   :  { %v577_v36 = vld [vmem:[#allocation5 + $0xc8] sm:$0xff]  ;;  %1529 = vmatprep.subr.mxu1 %v709_v33  ;;  %v576_v38 = vld [vmem:[#allocation5 + $0xc0] sm:$0xff]  ;;  %1081 = vmatpush1.msra.mxu0 %v580_v34 }
  0x30   :  { %v705_v37 = vld [vmem:[#allocation5 + $0x4c8] sm:$0xff]  ;;  %v704_v39 = vld [vmem:[#allocation5 + $0x4c0] sm:$0xff]  ;;  %1530 = vmatpush1.msra.mxu1 %v708_v35  ;;  %1082 = vmatprep.subr.mxu0 %v577_v36 }
  0x31   :  { %v573_v40 = vld [vmem:[#allocation5 + $0xa8] sm:$0xff]  ;;  %1531 = vmatprep.subr.mxu1 %v705_v37  ;;  %v572_v42 = vld [vmem:[#allocation5 + $0xa0] sm:$0xff]  ;;  %1083 = vmatpush1.msra.mxu0 %v576_v38 }
  0x32   :  { %v701_v41 = vld [vmem:[#allocation5 + $0x4a8] sm:$0xff]  ;;  %v700_v43 = vld [vmem:[#allocation5 + $0x4a0] sm:$0xff]  ;;  %1532 = vmatpush1.msra.mxu1 %v704_v39  ;;  %1084 = vmatprep.subr.mxu0 %v573_v40 }
  0x33   :  { %v569_v44 = vld [vmem:[#allocation5 + $0x88] sm:$0xff]  ;;  %1533 = vmatprep.subr.mxu1 %v701_v41  ;;  %v568_v46 = vld [vmem:[#allocation5 + $0x80] sm:$0xff]  ;;  %1085 = vmatpush1.msra.mxu0 %v572_v42 }
  0x34   :  { %v697_v45 = vld [vmem:[#allocation5 + $0x488] sm:$0xff]  ;;  %v696_v47 = vld [vmem:[#allocation5 + $0x480] sm:$0xff]  ;;  %1534 = vmatpush1.msra.mxu1 %v700_v43  ;;  %1086 = vmatprep.subr.mxu0 %v569_v44 }
  0x35   :  { %v565_v48 = vld [vmem:[#allocation5 + $0x68] sm:$0xff]  ;;  %1535 = vmatprep.subr.mxu1 %v697_v45  ;;  %v564_v50 = vld [vmem:[#allocation5 + $0x60] sm:$0xff]  ;;  %1087 = vmatpush1.msra.mxu0 %v568_v46 }
  0x36   :  { %v693_v49 = vld [vmem:[#allocation5 + $0x468] sm:$0xff]  ;;  %v692_v51 = vld [vmem:[#allocation5 + $0x460] sm:$0xff]  ;;  %1536 = vmatpush1.msra.mxu1 %v696_v47  ;;  %1088 = vmatprep.subr.mxu0 %v565_v48 }
  0x37   :  { %v561_v52 = vld [vmem:[#allocation5 + $0x48] sm:$0xff]  ;;  %1537 = vmatprep.subr.mxu1 %v693_v49  ;;  %v560_v54 = vld [vmem:[#allocation5 + $0x40] sm:$0xff]  ;;  %1089 = vmatpush1.msra.mxu0 %v564_v50 }
  0x38   :  { %v689_v53 = vld [vmem:[#allocation5 + $0x448] sm:$0xff]  ;;  %v688_v55 = vld [vmem:[#allocation5 + $0x440] sm:$0xff]  ;;  %1538 = vmatpush1.msra.mxu1 %v692_v51  ;;  %1090 = vmatprep.subr.mxu0 %v561_v52 }
  0x39   :  { %v557_v56 = vld [vmem:[#allocation5 + $0x28] sm:$0xff]  ;;  %1539 = vmatprep.subr.mxu1 %v689_v53  ;;  %v556_v58 = vld [vmem:[#allocation5 + $0x20] sm:$0xff]  ;;  %1091 = vmatpush1.msra.mxu0 %v560_v54 }
  0x3a   :  { %v685_v57 = vld [vmem:[#allocation5 + $0x428] sm:$0xff]  ;;  %v684_v59 = vld [vmem:[#allocation5 + $0x420] sm:$0xff]  ;;  %1540 = vmatpush1.msra.mxu1 %v688_v55  ;;  %1092 = vmatprep.subr.mxu0 %v557_v56 }
  0x3b   :  { %v553_v60 = vld [vmem:[#allocation5 + $0x8] sm:$0xff]  ;;  %1541 = vmatprep.subr.mxu1 %v685_v57  ;;  %v552_v62 = vld [vmem:[#allocation5] sm:$0xff]  ;;  %1093 = vmatpush1.msra.mxu0 %v556_v58 }
  0x3c   :  { %v681_v61 = vld [vmem:[#allocation5 + $0x408] sm:$0xff]  ;;  %v680_v63 = vld [vmem:[#allocation5 + $0x400] sm:$0xff]  ;;  %1542 = vmatpush1.msra.mxu1 %v684_v59  ;;  %1094 = vmatprep.subr.mxu0 %v553_v60 }
  0x3d   :  { %v677_v0 = vld [vmem:[#allocation5 + $0x3e8] sm:$0xff]  ;;  %1543 = vmatprep.subr.mxu1 %v681_v61  ;;  %v676_v2 = vld [vmem:[#allocation5 + $0x3e0] sm:$0xff]  ;;  %1095 = vmatpush1.msra.mxu0 %v552_v62 }
  0x3e   :  { %v805_v1 = vld [vmem:[#allocation5 + $0x7e8] sm:$0xff]  ;;  %v804_v3 = vld [vmem:[#allocation5 + $0x7e0] sm:$0xff]  ;;  %1544 = vmatpush1.msra.mxu1 %v680_v63  ;;  %1096 = vmatprep.subr.mxu0 %v677_v0 }
  0x3f   :  { %v673_v4 = vld [vmem:[#allocation5 + $0x3c8] sm:$0xff]  ;;  %1545 = vmatprep.subr.mxu1 %v805_v1  ;;  %v672_v6 = vld [vmem:[#allocation5 + $0x3c0] sm:$0xff]  ;;  %1097 = vmatpush2.msra.mxu0 %v676_v2  ;;  %v43_v1 = vld [vmem:[#allocation2 + $0x18] sm:$0xff] }
  0x40   :  { %v801_v5 = vld [vmem:[#allocation5 + $0x7c8] sm:$0xff]  ;;  %v800_v7 = vld [vmem:[#allocation5 + $0x7c0] sm:$0xff]  ;;  %1546 = vmatpush2.msra.mxu1 %v804_v3  ;;  %1098 = vmatprep.subr.mxu0 %v673_v4  ;;  %v42_v3 = vld [vmem:[#allocation2 + $0x10] sm:$0xff] }
  0x41   :  { %v669_v8 = vld [vmem:[#allocation5 + $0x3a8] sm:$0xff]  ;;  %1547 = vmatprep.subr.mxu1 %v801_v5  ;;  %v668_v10 = vld [vmem:[#allocation5 + $0x3a0] sm:$0xff]  ;;  %1099 = vmatpush2.msra.mxu0 %v672_v6 }
  0x42   :  { %v797_v9 = vld [vmem:[#allocation5 + $0x7a8] sm:$0xff]  ;;  %v796_v11 = vld [vmem:[#allocation5 + $0x7a0] sm:$0xff]  ;;  %1548 = vmatpush2.msra.mxu1 %v800_v7  ;;  %1100 = vmatprep.subr.mxu0 %v669_v8  ;;  %v51_v8 = vld [vmem:[#allocation2 + $0x58] sm:$0xff] }
  0x43   :  { %v665_v12 = vld [vmem:[#allocation5 + $0x388] sm:$0xff]  ;;  %1549 = vmatprep.subr.mxu1 %v797_v9  ;;  %v664_v14 = vld [vmem:[#allocation5 + $0x380] sm:$0xff]  ;;  %1101 = vmatpush2.msra.mxu0 %v668_v10 }
  0x44   :  { %v793_v13 = vld [vmem:[#allocation5 + $0x788] sm:$0xff]  ;;  %v792_v15 = vld [vmem:[#allocation5 + $0x780] sm:$0xff]  ;;  %1550 = vmatpush2.msra.mxu1 %v796_v11  ;;  %1102 = vmatprep.subr.mxu0 %v665_v12  ;;  %v50_v11 = vld [vmem:[#allocation2 + $0x50] sm:$0xff] }
  0x45   :  { %v661_v16 = vld [vmem:[#allocation5 + $0x368] sm:$0xff]  ;;  %1551 = vmatprep.subr.mxu1 %v793_v13  ;;  %v660_v18 = vld [vmem:[#allocation5 + $0x360] sm:$0xff]  ;;  %1103 = vmatpush2.msra.mxu0 %v664_v14  ;;  %v59_v13 = vld [vmem:[#allocation2 + $0x98] sm:$0xff] }
  0x46   :  { %v789_v17 = vld [vmem:[#allocation5 + $0x768] sm:$0xff]  ;;  %v788_v19 = vld [vmem:[#allocation5 + $0x760] sm:$0xff]  ;;  %1552 = vmatpush2.msra.mxu1 %v792_v15  ;;  %1104 = vmatprep.subr.mxu0 %v661_v16 }
  0x47   :  { %v657_v20 = vld [vmem:[#allocation5 + $0x348] sm:$0xff]  ;;  %1553 = vmatprep.subr.mxu1 %v789_v17  ;;  %v656_v22 = vld [vmem:[#allocation5 + $0x340] sm:$0xff]  ;;  %1105 = vmatpush2.msra.mxu0 %v660_v18 }
  0x48   :  { %v785_v21 = vld [vmem:[#allocation5 + $0x748] sm:$0xff]  ;;  %v784_v23 = vld [vmem:[#allocation5 + $0x740] sm:$0xff]  ;;  %1554 = vmatpush2.msra.mxu1 %v788_v19  ;;  %1106 = vmatprep.subr.mxu0 %v657_v20  ;;  %v58_v19 = vld [vmem:[#allocation2 + $0x90] sm:$0xff] }
  0x49   :  { %v653_v24 = vld [vmem:[#allocation5 + $0x328] sm:$0xff]  ;;  %1555 = vmatprep.subr.mxu1 %v785_v21  ;;  %v652_v26 = vld [vmem:[#allocation5 + $0x320] sm:$0xff]  ;;  %1107 = vmatpush2.msra.mxu0 %v656_v22  ;;  %v67_v21 = vld [vmem:[#allocation2 + $0xd8] sm:$0xff] }
  0x4a   :  { %v781_v25 = vld [vmem:[#allocation5 + $0x728] sm:$0xff]  ;;  %v780_v27 = vld [vmem:[#allocation5 + $0x720] sm:$0xff]  ;;  %1556 = vmatpush2.msra.mxu1 %v784_v23  ;;  %1108 = vmatprep.subr.mxu0 %v653_v24 }
  0x4b   :  { %v649_v28 = vld [vmem:[#allocation5 + $0x308] sm:$0xff]  ;;  %1557 = vmatprep.subr.mxu1 %v781_v25  ;;  %v648_v30 = vld [vmem:[#allocation5 + $0x300] sm:$0xff]  ;;  %1109 = vmatpush2.msra.mxu0 %v652_v26 }
  0x4c   :  { %v777_v29 = vld [vmem:[#allocation5 + $0x708] sm:$0xff]  ;;  %v776_v31 = vld [vmem:[#allocation5 + $0x700] sm:$0xff]  ;;  %1558 = vmatpush2.msra.mxu1 %v780_v27  ;;  %1110 = vmatprep.subr.mxu0 %v649_v28  ;;  %v66_v27 = vld [vmem:[#allocation2 + $0xd0] sm:$0xff] }
  0x4d   :  { %v645_v32 = vld [vmem:[#allocation5 + $0x2e8] sm:$0xff]  ;;  %1559 = vmatprep.subr.mxu1 %v777_v29  ;;  %v644_v34 = vld [vmem:[#allocation5 + $0x2e0] sm:$0xff]  ;;  %1111 = vmatpush2.msra.mxu0 %v648_v30  ;;  %v75_v29 = vld [vmem:[#allocation2 + $0x118] sm:$0xff] }
  0x4e   :  { %v773_v33 = vld [vmem:[#allocation5 + $0x6e8] sm:$0xff]  ;;  %v772_v35 = vld [vmem:[#allocation5 + $0x6e0] sm:$0xff]  ;;  %1560 = vmatpush2.msra.mxu1 %v776_v31  ;;  %1112 = vmatprep.subr.mxu0 %v645_v32 }
  0x4f   :  { %v641_v36 = vld [vmem:[#allocation5 + $0x2c8] sm:$0xff]  ;;  %1561 = vmatprep.subr.mxu1 %v773_v33  ;;  %v640_v38 = vld [vmem:[#allocation5 + $0x2c0] sm:$0xff]  ;;  %1113 = vmatpush2.msra.mxu0 %v644_v34 }
  0x50   :  { %v769_v37 = vld [vmem:[#allocation5 + $0x6c8] sm:$0xff]  ;;  %v768_v39 = vld [vmem:[#allocation5 + $0x6c0] sm:$0xff]  ;;  %1562 = vmatpush2.msra.mxu1 %v772_v35  ;;  %1114 = vmatprep.subr.mxu0 %v641_v36  ;;  %v74_v35 = vld [vmem:[#allocation2 + $0x110] sm:$0xff] }
  0x51   :  { %v637_v40 = vld [vmem:[#allocation5 + $0x2a8] sm:$0xff]  ;;  %1563 = vmatprep.subr.mxu1 %v769_v37  ;;  %v636_v42 = vld [vmem:[#allocation5 + $0x2a0] sm:$0xff]  ;;  %1115 = vmatpush2.msra.mxu0 %v640_v38  ;;  %v83_v37 = vld [vmem:[#allocation2 + $0x158] sm:$0xff] }
  0x52   :  { %v765_v41 = vld [vmem:[#allocation5 + $0x6a8] sm:$0xff]  ;;  %v764_v43 = vld [vmem:[#allocation5 + $0x6a0] sm:$0xff]  ;;  %1564 = vmatpush2.msra.mxu1 %v768_v39  ;;  %1116 = vmatprep.subr.mxu0 %v637_v40 }
  0x53   :  { %v633_v44 = vld [vmem:[#allocation5 + $0x288] sm:$0xff]  ;;  %1565 = vmatprep.subr.mxu1 %v765_v41  ;;  %v632_v46 = vld [vmem:[#allocation5 + $0x280] sm:$0xff]  ;;  %1117 = vmatpush2.msra.mxu0 %v636_v42 }
  0x54   :  { %v761_v45 = vld [vmem:[#allocation5 + $0x688] sm:$0xff]  ;;  %v760_v47 = vld [vmem:[#allocation5 + $0x680] sm:$0xff]  ;;  %1566 = vmatpush2.msra.mxu1 %v764_v43  ;;  %1118 = vmatprep.subr.mxu0 %v633_v44  ;;  %v82_v43 = vld [vmem:[#allocation2 + $0x150] sm:$0xff] }
  0x55   :  { %v629_v48 = vld [vmem:[#allocation5 + $0x268] sm:$0xff]  ;;  %1567 = vmatprep.subr.mxu1 %v761_v45  ;;  %v628_v50 = vld [vmem:[#allocation5 + $0x260] sm:$0xff]  ;;  %1119 = vmatpush2.msra.mxu0 %v632_v46  ;;  %v91_v45 = vld [vmem:[#allocation2 + $0x198] sm:$0xff] }
  0x56   :  { %v757_v49 = vld [vmem:[#allocation5 + $0x668] sm:$0xff]  ;;  %v756_v51 = vld [vmem:[#allocation5 + $0x660] sm:$0xff]  ;;  %1568 = vmatpush2.msra.mxu1 %v760_v47  ;;  %1120 = vmatprep.subr.mxu0 %v629_v48 }
  0x57   :  { %v625_v52 = vld [vmem:[#allocation5 + $0x248] sm:$0xff]  ;;  %1569 = vmatprep.subr.mxu1 %v757_v49  ;;  %v624_v54 = vld [vmem:[#allocation5 + $0x240] sm:$0xff]  ;;  %1121 = vmatpush2.msra.mxu0 %v628_v50 }
  0x58   :  { %v753_v53 = vld [vmem:[#allocation5 + $0x648] sm:$0xff]  ;;  %v752_v55 = vld [vmem:[#allocation5 + $0x640] sm:$0xff]  ;;  %1570 = vmatpush2.msra.mxu1 %v756_v51  ;;  %1122 = vmatprep.subr.mxu0 %v625_v52  ;;  %v90_v51 = vld [vmem:[#allocation2 + $0x190] sm:$0xff] }
  0x59   :  { %v621_v56 = vld [vmem:[#allocation5 + $0x228] sm:$0xff]  ;;  %1571 = vmatprep.subr.mxu1 %v753_v53  ;;  %v620_v58 = vld [vmem:[#allocation5 + $0x220] sm:$0xff]  ;;  %1123 = vmatpush2.msra.mxu0 %v624_v54  ;;  %v99_v53 = vld [vmem:[#allocation2 + $0x1d8] sm:$0xff] }
  0x5a   :  { %v749_v57 = vld [vmem:[#allocation5 + $0x628] sm:$0xff]  ;;  %v748_v59 = vld [vmem:[#allocation5 + $0x620] sm:$0xff]  ;;  %1572 = vmatpush2.msra.mxu1 %v752_v55  ;;  %1124 = vmatprep.subr.mxu0 %v621_v56 }
  0x5b   :  { %v617_v60 = vld [vmem:[#allocation5 + $0x208] sm:$0xff]  ;;  %1573 = vmatprep.subr.mxu1 %v749_v57  ;;  %v616_v62 = vld [vmem:[#allocation5 + $0x200] sm:$0xff]  ;;  %1125 = vmatpush2.msra.mxu0 %v620_v58 }
  0x5c   :  { %v745_v61 = vld [vmem:[#allocation5 + $0x608] sm:$0xff]  ;;  %1574 = vmatpush2.msra.mxu1 %v748_v59  ;;  %v744_v0 = vld [vmem:[#allocation5 + $0x600] sm:$0xff]  ;;  %1126 = vmatprep.subr.mxu0 %v617_v60  ;;  %v98_v59 = vld [vmem:[#allocation2 + $0x1d0] sm:$0xff] }
  0x5d   :  { %v41_v63 = vld [vmem:[#allocation2 + $0x8] sm:$0xff]  ;;  %1575 = vmatprep.subr.mxu1 %v745_v61  ;;  %v40_v2 = vld [vmem:[#allocation2] sm:$0xff]  ;;  %1127 = vmatpush2.msra.mxu0 %v616_v62  ;;  %v107_v61 = vld [vmem:[#allocation2 + $0x218] sm:$0xff] }
  0x5e   :  { %1128 = vmatprep.mubr.f32.mxu0 %v41_v63  ;;  %v869_v4 = vld [vmem:[#allocation5 + $0x9e8] sm:$0xff]  ;;  %1576 = vmatpush2.msra.mxu1 %v744_v0  ;;  %v868_v6 = vld [vmem:[#allocation5 + $0x9e0] sm:$0xff] }
  0x5f   :  { %v997_v5 = vld [vmem:[#allocation5 + $0xde8] sm:$0xff]  ;;  %1577 = vmatprep.mubr.f32.mxu1 %v43_v1  ;;  %1129 = vmatmul.mubr.f32.vlgmr.msra.gmra.mxu0 %v40_v2  ;;  %v996_v9 = vld [vmem:[#allocation5 + $0xde0] sm:$0xff] }
  0x60   :  { %v49_v7 = vld [vmem:[#allocation2 + $0x48] sm:$0xff]  ;;  %1578 = vmatmul.mubr.f32.vlgmr.msra.gmra.mxu1 %v42_v3  ;;  %1962 = vmatprep.subr.mxu0 %v869_v4  ;;  %v48_v10 = vld [vmem:[#allocation2 + $0x40] sm:$0xff]  ;;  %v106_v3 = vld [vmem:[#allocation2 + $0x210] sm:$0xff] }
  0x61   :  { %2411 = vmatprep.subr.mxu1 %v997_v5  ;;  %1963 = vmatpush1.msra.mxu0 %v868_v6  ;;  %v57_v12 = vld [vmem:[#allocation2 + $0x88] sm:$0xff]  ;;  %v864_v16 = vld [vmem:[#allocation5 + $0x9c0] sm:$0xff]  ;;  %v115_v5 = vld [vmem:[#allocation2 + $0x258] sm:$0xff] }
  0x62   :  { %1134 = vmatprep.mubr.f32.mxu0 %v49_v7  ;;  %1583 = vmatprep.mubr.f32.mxu1 %v51_v8  ;;  %v865_v14 = vld [vmem:[#allocation5 + $0x9c8] sm:$0xff]  ;;  %v992_v17 = vld [vmem:[#allocation5 + $0xdc0] sm:$0xff] }
  0x63   :  { %2412 = vmatpush1.msra.mxu1 %v996_v9  ;;  %v993_v15 = vld [vmem:[#allocation5 + $0xdc8] sm:$0xff]  ;;  %1135 = vmatmul.mubr.f32.gmra.mxu0 %v48_v10  ;;  %v56_v18 = vld [vmem:[#allocation2 + $0x80] sm:$0xff] }
  0x64   :  { %1584 = vmatmul.mubr.f32.gmra.mxu1 %v50_v11  ;;  %1140 = vmatprep.mubr.f32.mxu0 %v57_v12  ;;  %v65_v20 = vld [vmem:[#allocation2 + $0xc8] sm:$0xff]  ;;  %v860_v24 = vld [vmem:[#allocation5 + $0x9a0] sm:$0xff]  ;;  %v114_v11 = vld [vmem:[#allocation2 + $0x250] sm:$0xff] }
  0x65   :  { %1589 = vmatprep.mubr.f32.mxu1 %v59_v13  ;;  %1964 = vmatprep.subr.mxu0 %v865_v14  ;;  %v861_v22 = vld [vmem:[#allocation5 + $0x9a8] sm:$0xff]  ;;  %v988_v25 = vld [vmem:[#allocation5 + $0xda0] sm:$0xff]  ;;  %v123_v13 = vld [vmem:[#allocation2 + $0x298] sm:$0xff] }
  0x66   :  { %2413 = vmatprep.subr.mxu1 %v993_v15  ;;  %1965 = vmatpush1.msra.mxu0 %v864_v16  ;;  %v989_v23 = vld [vmem:[#allocation5 + $0xda8] sm:$0xff]  ;;  %v64_v26 = vld [vmem:[#allocation2 + $0xc0] sm:$0xff] }
  0x67   :  { %2414 = vmatpush1.msra.mxu1 %v992_v17  ;;  %1141 = vmatmul.mubr.f32.gmra.mxu0 %v56_v18  ;;  %v73_v28 = vld [vmem:[#allocation2 + $0x108] sm:$0xff]  ;;  %v856_v32 = vld [vmem:[#allocation5 + $0x980] sm:$0xff] }
  0x68   :  { %1590 = vmatmul.mubr.f32.gmra.mxu1 %v58_v19  ;;  %1146 = vmatprep.mubr.f32.mxu0 %v65_v20  ;;  %v857_v30 = vld [vmem:[#allocation5 + $0x988] sm:$0xff]  ;;  %v984_v33 = vld [vmem:[#allocation5 + $0xd80] sm:$0xff]  ;;  %v122_v19 = vld [vmem:[#allocation2 + $0x290] sm:$0xff] }
  0x69   :  { %1595 = vmatprep.mubr.f32.mxu1 %v67_v21  ;;  %1966 = vmatprep.subr.mxu0 %v861_v22  ;;  %v985_v31 = vld [vmem:[#allocation5 + $0xd88] sm:$0xff]  ;;  %v72_v34 = vld [vmem:[#allocation2 + $0x100] sm:$0xff]  ;;  %v131_v21 = vld [vmem:[#allocation2 + $0x2d8] sm:$0xff] }
  0x6a   :  { %2415 = vmatprep.subr.mxu1 %v989_v23  ;;  %1967 = vmatpush1.msra.mxu0 %v860_v24  ;;  %v81_v36 = vld [vmem:[#allocation2 + $0x148] sm:$0xff]  ;;  %v852_v40 = vld [vmem:[#allocation5 + $0x960] sm:$0xff] }
  0x6b   :  { %2416 = vmatpush1.msra.mxu1 %v988_v25  ;;  %1147 = vmatmul.mubr.f32.gmra.mxu0 %v64_v26  ;;  %v853_v38 = vld [vmem:[#allocation5 + $0x968] sm:$0xff]  ;;  %v980_v41 = vld [vmem:[#allocation5 + $0xd60] sm:$0xff] }
  0x6c   :  { %1596 = vmatmul.mubr.f32.gmra.mxu1 %v66_v27  ;;  %1152 = vmatprep.mubr.f32.mxu0 %v73_v28  ;;  %v981_v39 = vld [vmem:[#allocation5 + $0xd68] sm:$0xff]  ;;  %v80_v42 = vld [vmem:[#allocation2 + $0x140] sm:$0xff]  ;;  %v130_v27 = vld [vmem:[#allocation2 + $0x2d0] sm:$0xff] }
  0x6d   :  { %1601 = vmatprep.mubr.f32.mxu1 %v75_v29  ;;  %1968 = vmatprep.subr.mxu0 %v857_v30  ;;  %v89_v44 = vld [vmem:[#allocation2 + $0x188] sm:$0xff]  ;;  %v848_v48 = vld [vmem:[#allocation5 + $0x940] sm:$0xff]  ;;  %v139_v29 = vld [vmem:[#allocation2 + $0x318] sm:$0xff] }
  0x6e   :  { %2417 = vmatprep.subr.mxu1 %v985_v31  ;;  %1969 = vmatpush1.msra.mxu0 %v856_v32  ;;  %v849_v46 = vld [vmem:[#allocation5 + $0x948] sm:$0xff]  ;;  %v976_v49 = vld [vmem:[#allocation5 + $0xd40] sm:$0xff] }
  0x6f   :  { %2418 = vmatpush1.msra.mxu1 %v984_v33  ;;  %1153 = vmatmul.mubr.f32.gmra.mxu0 %v72_v34  ;;  %v977_v47 = vld [vmem:[#allocation5 + $0xd48] sm:$0xff]  ;;  %v88_v50 = vld [vmem:[#allocation2 + $0x180] sm:$0xff] }
  0x70   :  { %1602 = vmatmul.mubr.f32.gmra.mxu1 %v74_v35  ;;  %1158 = vmatprep.mubr.f32.mxu0 %v81_v36  ;;  %v97_v52 = vld [vmem:[#allocation2 + $0x1c8] sm:$0xff]  ;;  %v844_v56 = vld [vmem:[#allocation5 + $0x920] sm:$0xff]  ;;  %v138_v35 = vld [vmem:[#allocation2 + $0x310] sm:$0xff] }
  0x71   :  { %1607 = vmatprep.mubr.f32.mxu1 %v83_v37  ;;  %1970 = vmatprep.subr.mxu0 %v853_v38  ;;  %v845_v54 = vld [vmem:[#allocation5 + $0x928] sm:$0xff]  ;;  %v972_v57 = vld [vmem:[#allocation5 + $0xd20] sm:$0xff]  ;;  %v147_v37 = vld [vmem:[#allocation2 + $0x358] sm:$0xff] }
  0x72   :  { %2419 = vmatprep.subr.mxu1 %v981_v39  ;;  %1971 = vmatpush1.msra.mxu0 %v852_v40  ;;  %v973_v55 = vld [vmem:[#allocation5 + $0xd28] sm:$0xff]  ;;  %v96_v58 = vld [vmem:[#allocation2 + $0x1c0] sm:$0xff] }
  0x73   :  { %2420 = vmatpush1.msra.mxu1 %v980_v41  ;;  %1159 = vmatmul.mubr.f32.gmra.mxu0 %v80_v42  ;;  %v105_v60 = vld [vmem:[#allocation2 + $0x208] sm:$0xff]  ;;  %v840_v0 = vld [vmem:[#allocation5 + $0x900] sm:$0xff] }
  0x74   :  { %1608 = vmatmul.mubr.f32.gmra.mxu1 %v82_v43  ;;  %1164 = vmatprep.mubr.f32.mxu0 %v89_v44  ;;  %v841_v62 = vld [vmem:[#allocation5 + $0x908] sm:$0xff]  ;;  %v968_v1 = vld [vmem:[#allocation5 + $0xd00] sm:$0xff]  ;;  %v146_v43 = vld [vmem:[#allocation2 + $0x350] sm:$0xff] }
  0x75   :  { %1613 = vmatprep.mubr.f32.mxu1 %v91_v45  ;;  %1972 = vmatprep.subr.mxu0 %v849_v46  ;;  %v969_v63 = vld [vmem:[#allocation5 + $0xd08] sm:$0xff]  ;;  %v104_v2 = vld [vmem:[#allocation2 + $0x200] sm:$0xff]  ;;  %v155_v45 = vld [vmem:[#allocation2 + $0x398] sm:$0xff] }
  0x76   :  { %2421 = vmatprep.subr.mxu1 %v977_v47  ;;  %1973 = vmatpush1.msra.mxu0 %v848_v48  ;;  %v113_v4 = vld [vmem:[#allocation2 + $0x248] sm:$0xff]  ;;  %v836_v8 = vld [vmem:[#allocation5 + $0x8e0] sm:$0xff] }
  0x77   :  { %2422 = vmatpush1.msra.mxu1 %v976_v49  ;;  %1165 = vmatmul.mubr.f32.gmra.mxu0 %v88_v50  ;;  %v837_v6 = vld [vmem:[#allocation5 + $0x8e8] sm:$0xff]  ;;  %v964_v9 = vld [vmem:[#allocation5 + $0xce0] sm:$0xff] }
  0x78   :  { %1614 = vmatmul.mubr.f32.gmra.mxu1 %v90_v51  ;;  %1170 = vmatprep.mubr.f32.mxu0 %v97_v52  ;;  %v965_v7 = vld [vmem:[#allocation5 + $0xce8] sm:$0xff]  ;;  %v112_v10 = vld [vmem:[#allocation2 + $0x240] sm:$0xff]  ;;  %v154_v51 = vld [vmem:[#allocation2 + $0x390] sm:$0xff] }
  0x79   :  { %1619 = vmatprep.mubr.f32.mxu1 %v99_v53  ;;  %1974 = vmatprep.subr.mxu0 %v845_v54  ;;  %v121_v12 = vld [vmem:[#allocation2 + $0x288] sm:$0xff]  ;;  %v832_v16 = vld [vmem:[#allocation5 + $0x8c0] sm:$0xff]  ;;  %v163_v53 = vld [vmem:[#allocation2 + $0x3d8] sm:$0xff] }
  0x7a   :  { %2423 = vmatprep.subr.mxu1 %v973_v55  ;;  %1975 = vmatpush1.msra.mxu0 %v844_v56  ;;  %v833_v14 = vld [vmem:[#allocation5 + $0x8c8] sm:$0xff]  ;;  %v960_v17 = vld [vmem:[#allocation5 + $0xcc0] sm:$0xff] }
  0x7b   :  { %2424 = vmatpush1.msra.mxu1 %v972_v57  ;;  %1171 = vmatmul.mubr.f32.gmra.mxu0 %v96_v58  ;;  %v961_v15 = vld [vmem:[#allocation5 + $0xcc8] sm:$0xff]  ;;  %v120_v18 = vld [vmem:[#allocation2 + $0x280] sm:$0xff] }
  0x7c   :  { %1620 = vmatmul.mubr.f32.gmra.mxu1 %v98_v59  ;;  %1176 = vmatprep.mubr.f32.mxu0 %v105_v60  ;;  %v129_v20 = vld [vmem:[#allocation2 + $0x2c8] sm:$0xff]  ;;  %v828_v24 = vld [vmem:[#allocation5 + $0x8a0] sm:$0xff]  ;;  %v162_v59 = vld [vmem:[#allocation2 + $0x3d0] sm:$0xff] }
  0x7d   :  { %1625 = vmatprep.mubr.f32.mxu1 %v107_v61  ;;  %1976 = vmatprep.subr.mxu0 %v841_v62  ;;  %v829_v22 = vld [vmem:[#allocation5 + $0x8a8] sm:$0xff]  ;;  %v956_v25 = vld [vmem:[#allocation5 + $0xca0] sm:$0xff]  ;;  %v171_v61 = vld [vmem:[#allocation2 + $0x418] sm:$0xff] }
  0x7e   :  { %2425 = vmatprep.subr.mxu1 %v969_v63  ;;  %1977 = vmatpush1.msra.mxu0 %v840_v0  ;;  %v957_v23 = vld [vmem:[#allocation5 + $0xca8] sm:$0xff]  ;;  %v128_v26 = vld [vmem:[#allocation2 + $0x2c0] sm:$0xff] }
  0x7f   :  { %2426 = vmatpush1.msra.mxu1 %v968_v1  ;;  %1177 = vmatmul.mubr.f32.gmra.mxu0 %v104_v2  ;;  %v137_v28 = vld [vmem:[#allocation2 + $0x308] sm:$0xff]  ;;  %v824_v32 = vld [vmem:[#allocation5 + $0x880] sm:$0xff] }
  0x80   :  { %1626 = vmatmul.mubr.f32.gmra.mxu1 %v106_v3  ;;  %1182 = vmatprep.mubr.f32.mxu0 %v113_v4  ;;  %v825_v30 = vld [vmem:[#allocation5 + $0x888] sm:$0xff]  ;;  %v952_v33 = vld [vmem:[#allocation5 + $0xc80] sm:$0xff]  ;;  %v170_v3 = vld [vmem:[#allocation2 + $0x410] sm:$0xff] }
  0x81   :  { %1631 = vmatprep.mubr.f32.mxu1 %v115_v5  ;;  %1978 = vmatprep.subr.mxu0 %v837_v6  ;;  %v953_v31 = vld [vmem:[#allocation5 + $0xc88] sm:$0xff]  ;;  %v136_v34 = vld [vmem:[#allocation2 + $0x300] sm:$0xff]  ;;  %v179_v5 = vld [vmem:[#allocation2 + $0x458] sm:$0xff] }
  0x82   :  { %2427 = vmatprep.subr.mxu1 %v965_v7  ;;  %1979 = vmatpush1.msra.mxu0 %v836_v8  ;;  %v145_v36 = vld [vmem:[#allocation2 + $0x348] sm:$0xff]  ;;  %v820_v40 = vld [vmem:[#allocation5 + $0x860] sm:$0xff] }
  0x83   :  { %2428 = vmatpush1.msra.mxu1 %v964_v9  ;;  %1183 = vmatmul.mubr.f32.gmra.mxu0 %v112_v10  ;;  %v821_v38 = vld [vmem:[#allocation5 + $0x868] sm:$0xff]  ;;  %v948_v41 = vld [vmem:[#allocation5 + $0xc60] sm:$0xff] }
  0x84   :  { %1632 = vmatmul.mubr.f32.gmra.mxu1 %v114_v11  ;;  %1188 = vmatprep.mubr.f32.mxu0 %v121_v12  ;;  %v949_v39 = vld [vmem:[#allocation5 + $0xc68] sm:$0xff]  ;;  %v144_v42 = vld [vmem:[#allocation2 + $0x340] sm:$0xff]  ;;  %v178_v11 = vld [vmem:[#allocation2 + $0x450] sm:$0xff] }
  0x85   :  { %1637 = vmatprep.mubr.f32.mxu1 %v123_v13  ;;  %1980 = vmatprep.subr.mxu0 %v833_v14  ;;  %v153_v44 = vld [vmem:[#allocation2 + $0x388] sm:$0xff]  ;;  %v816_v48 = vld [vmem:[#allocation5 + $0x840] sm:$0xff]  ;;  %v187_v13 = vld [vmem:[#allocation2 + $0x498] sm:$0xff] }
  0x86   :  { %2429 = vmatprep.subr.mxu1 %v961_v15  ;;  %1981 = vmatpush1.msra.mxu0 %v832_v16  ;;  %v817_v46 = vld [vmem:[#allocation5 + $0x848] sm:$0xff]  ;;  %v944_v49 = vld [vmem:[#allocation5 + $0xc40] sm:$0xff] }
  0x87   :  { %2430 = vmatpush1.msra.mxu1 %v960_v17  ;;  %1189 = vmatmul.mubr.f32.gmra.mxu0 %v120_v18  ;;  %v945_v47 = vld [vmem:[#allocation5 + $0xc48] sm:$0xff]  ;;  %v152_v50 = vld [vmem:[#allocation2 + $0x380] sm:$0xff] }
  0x88   :  { %1638 = vmatmul.mubr.f32.gmra.mxu1 %v122_v19  ;;  %1194 = vmatprep.mubr.f32.mxu0 %v129_v20  ;;  %v161_v52 = vld [vmem:[#allocation2 + $0x3c8] sm:$0xff]  ;;  %v812_v56 = vld [vmem:[#allocation5 + $0x820] sm:$0xff]  ;;  %v186_v19 = vld [vmem:[#allocation2 + $0x490] sm:$0xff] }
  0x89   :  { %1643 = vmatprep.mubr.f32.mxu1 %v131_v21  ;;  %1982 = vmatprep.subr.mxu0 %v829_v22  ;;  %v813_v54 = vld [vmem:[#allocation5 + $0x828] sm:$0xff]  ;;  %v940_v57 = vld [vmem:[#allocation5 + $0xc20] sm:$0xff]  ;;  %v195_v21 = vld [vmem:[#allocation2 + $0x4d8] sm:$0xff] }
  0x8a   :  { %2431 = vmatprep.subr.mxu1 %v957_v23  ;;  %1983 = vmatpush1.msra.mxu0 %v828_v24  ;;  %v941_v55 = vld [vmem:[#allocation5 + $0xc28] sm:$0xff]  ;;  %v160_v58 = vld [vmem:[#allocation2 + $0x3c0] sm:$0xff] }
  0x8b   :  { %2432 = vmatpush1.msra.mxu1 %v956_v25  ;;  %1195 = vmatmul.mubr.f32.gmra.mxu0 %v128_v26  ;;  %v169_v60 = vld [vmem:[#allocation2 + $0x408] sm:$0xff]  ;;  %v808_v0 = vld [vmem:[#allocation5 + $0x800] sm:$0xff] }
  0x8c   :  { %1644 = vmatmul.mubr.f32.gmra.mxu1 %v130_v27  ;;  %1200 = vmatprep.mubr.f32.mxu0 %v137_v28  ;;  %v809_v62 = vld [vmem:[#allocation5 + $0x808] sm:$0xff]  ;;  %v936_v1 = vld [vmem:[#allocation5 + $0xc00] sm:$0xff]  ;;  %v194_v27 = vld [vmem:[#allocation2 + $0x4d0] sm:$0xff] }
  0x8d   :  { %1649 = vmatprep.mubr.f32.mxu1 %v139_v29  ;;  %1984 = vmatprep.subr.mxu0 %v825_v30  ;;  %v937_v63 = vld [vmem:[#allocation5 + $0xc08] sm:$0xff]  ;;  %v168_v2 = vld [vmem:[#allocation2 + $0x400] sm:$0xff]  ;;  %v203_v29 = vld [vmem:[#allocation2 + $0x518] sm:$0xff] }
  0x8e   :  { %2433 = vmatprep.subr.mxu1 %v953_v31  ;;  %1985 = vmatpush1.msra.mxu0 %v824_v32  ;;  %v177_v4 = vld [vmem:[#allocation2 + $0x448] sm:$0xff]  ;;  %v932_v8 = vld [vmem:[#allocation5 + $0xbe0] sm:$0xff] }
  0x8f   :  { %2434 = vmatpush1.msra.mxu1 %v952_v33  ;;  %1201 = vmatmul.mubr.f32.gmra.mxu0 %v136_v34  ;;  %v933_v6 = vld [vmem:[#allocation5 + $0xbe8] sm:$0xff]  ;;  %v1060_v9 = vld [vmem:[#allocation5 + $0xfe0] sm:$0xff] }
  0x90   :  { %1650 = vmatmul.mubr.f32.gmra.mxu1 %v138_v35  ;;  %1206 = vmatprep.mubr.f32.mxu0 %v145_v36  ;;  %v1061_v7 = vld [vmem:[#allocation5 + $0xfe8] sm:$0xff]  ;;  %v176_v10 = vld [vmem:[#allocation2 + $0x440] sm:$0xff]  ;;  %v202_v35 = vld [vmem:[#allocation2 + $0x510] sm:$0xff] }
  0x91   :  { %1655 = vmatprep.mubr.f32.mxu1 %v147_v37  ;;  %1986 = vmatprep.subr.mxu0 %v821_v38  ;;  %v185_v12 = vld [vmem:[#allocation2 + $0x488] sm:$0xff]  ;;  %v928_v16 = vld [vmem:[#allocation5 + $0xbc0] sm:$0xff]  ;;  %v211_v37 = vld [vmem:[#allocation2 + $0x558] sm:$0xff] }
  0x92   :  { %2435 = vmatprep.subr.mxu1 %v949_v39  ;;  %1987 = vmatpush1.msra.mxu0 %v820_v40  ;;  %v929_v14 = vld [vmem:[#allocation5 + $0xbc8] sm:$0xff]  ;;  %v1056_v17 = vld [vmem:[#allocation5 + $0xfc0] sm:$0xff] }
  0x93   :  { %2436 = vmatpush1.msra.mxu1 %v948_v41  ;;  %1207 = vmatmul.mubr.f32.gmra.mxu0 %v144_v42  ;;  %v1057_v15 = vld [vmem:[#allocation5 + $0xfc8] sm:$0xff]  ;;  %v184_v18 = vld [vmem:[#allocation2 + $0x480] sm:$0xff] }
  0x94   :  { %1656 = vmatmul.mubr.f32.gmra.mxu1 %v146_v43  ;;  %1212 = vmatprep.mubr.f32.mxu0 %v153_v44  ;;  %v193_v20 = vld [vmem:[#allocation2 + $0x4c8] sm:$0xff]  ;;  %v924_v24 = vld [vmem:[#allocation5 + $0xba0] sm:$0xff]  ;;  %v210_v43 = vld [vmem:[#allocation2 + $0x550] sm:$0xff] }
  0x95   :  { %1661 = vmatprep.mubr.f32.mxu1 %v155_v45  ;;  %1988 = vmatprep.subr.mxu0 %v817_v46  ;;  %v925_v22 = vld [vmem:[#allocation5 + $0xba8] sm:$0xff]  ;;  %v1052_v25 = vld [vmem:[#allocation5 + $0xfa0] sm:$0xff]  ;;  %v219_v45 = vld [vmem:[#allocation2 + $0x598] sm:$0xff] }
  0x96   :  { %2437 = vmatprep.subr.mxu1 %v945_v47  ;;  %1989 = vmatpush1.msra.mxu0 %v816_v48  ;;  %v1053_v23 = vld [vmem:[#allocation5 + $0xfa8] sm:$0xff]  ;;  %v192_v26 = vld [vmem:[#allocation2 + $0x4c0] sm:$0xff] }
  0x97   :  { %2438 = vmatpush1.msra.mxu1 %v944_v49  ;;  %1213 = vmatmul.mubr.f32.gmra.mxu0 %v152_v50  ;;  %v201_v28 = vld [vmem:[#allocation2 + $0x508] sm:$0xff]  ;;  %v920_v32 = vld [vmem:[#allocation5 + $0xb80] sm:$0xff] }
  0x98   :  { %1662 = vmatmul.mubr.f32.gmra.mxu1 %v154_v51  ;;  %1218 = vmatprep.mubr.f32.mxu0 %v161_v52  ;;  %v921_v30 = vld [vmem:[#allocation5 + $0xb88] sm:$0xff]  ;;  %v1048_v33 = vld [vmem:[#allocation5 + $0xf80] sm:$0xff]  ;;  %v218_v51 = vld [vmem:[#allocation2 + $0x590] sm:$0xff] }
  0x99   :  { %1667 = vmatprep.mubr.f32.mxu1 %v163_v53  ;;  %1990 = vmatprep.subr.mxu0 %v813_v54  ;;  %v1049_v31 = vld [vmem:[#allocation5 + $0xf88] sm:$0xff]  ;;  %v200_v34 = vld [vmem:[#allocation2 + $0x500] sm:$0xff]  ;;  %v227_v53 = vld [vmem:[#allocation2 + $0x5d8] sm:$0xff] }
  0x9a   :  { %2439 = vmatprep.subr.mxu1 %v941_v55  ;;  %1991 = vmatpush1.msra.mxu0 %v812_v56  ;;  %v209_v36 = vld [vmem:[#allocation2 + $0x548] sm:$0xff]  ;;  %v916_v40 = vld [vmem:[#allocation5 + $0xb60] sm:$0xff] }
  0x9b   :  { %2440 = vmatpush1.msra.mxu1 %v940_v57  ;;  %1219 = vmatmul.mubr.f32.gmra.mxu0 %v160_v58  ;;  %v917_v38 = vld [vmem:[#allocation5 + $0xb68] sm:$0xff]  ;;  %v1044_v41 = vld [vmem:[#allocation5 + $0xf60] sm:$0xff] }
  0x9c   :  { %1668 = vmatmul.mubr.f32.gmra.mxu1 %v162_v59  ;;  %1224 = vmatprep.mubr.f32.mxu0 %v169_v60  ;;  %v1045_v39 = vld [vmem:[#allocation5 + $0xf68] sm:$0xff]  ;;  %v208_v42 = vld [vmem:[#allocation2 + $0x540] sm:$0xff]  ;;  %v226_v59 = vld [vmem:[#allocation2 + $0x5d0] sm:$0xff] }
  0x9d   :  { %1673 = vmatprep.mubr.f32.mxu1 %v171_v61  ;;  %1992 = vmatprep.subr.mxu0 %v809_v62  ;;  %v217_v44 = vld [vmem:[#allocation2 + $0x588] sm:$0xff]  ;;  %v912_v48 = vld [vmem:[#allocation5 + $0xb40] sm:$0xff]  ;;  %v235_v61 = vld [vmem:[#allocation2 + $0x618] sm:$0xff] }
  0x9e   :  { %2441 = vmatprep.subr.mxu1 %v937_v63  ;;  %1993 = vmatpush1.msra.mxu0 %v808_v0  ;;  %v913_v46 = vld [vmem:[#allocation5 + $0xb48] sm:$0xff]  ;;  %v1040_v49 = vld [vmem:[#allocation5 + $0xf40] sm:$0xff] }
  0x9f   :  { %2442 = vmatpush1.msra.mxu1 %v936_v1  ;;  %1225 = vmatmul.mubr.f32.gmra.mxu0 %v168_v2  ;;  %v1041_v47 = vld [vmem:[#allocation5 + $0xf48] sm:$0xff]  ;;  %v216_v50 = vld [vmem:[#allocation2 + $0x580] sm:$0xff] }
  0xa0   :  { %1674 = vmatmul.mubr.f32.gmra.mxu1 %v170_v3  ;;  %1230 = vmatprep.mubr.f32.mxu0 %v177_v4  ;;  %v225_v52 = vld [vmem:[#allocation2 + $0x5c8] sm:$0xff]  ;;  %v908_v56 = vld [vmem:[#allocation5 + $0xb20] sm:$0xff]  ;;  %v234_v3 = vld [vmem:[#allocation2 + $0x610] sm:$0xff] }
  0xa1   :  { %1679 = vmatprep.mubr.f32.mxu1 %v179_v5  ;;  %1994 = vmatprep.subr.mxu0 %v933_v6  ;;  %v909_v54 = vld [vmem:[#allocation5 + $0xb28] sm:$0xff]  ;;  %v1036_v57 = vld [vmem:[#allocation5 + $0xf20] sm:$0xff]  ;;  %v243_v5 = vld [vmem:[#allocation2 + $0x658] sm:$0xff] }
  0xa2   :  { %2443 = vmatprep.subr.mxu1 %v1061_v7  ;;  %1995 = vmatpush2.msra.mxu0 %v932_v8  ;;  %v1037_v55 = vld [vmem:[#allocation5 + $0xf28] sm:$0xff]  ;;  %v224_v58 = vld [vmem:[#allocation2 + $0x5c0] sm:$0xff] }
  0xa3   :  { %2444 = vmatpush2.msra.mxu1 %v1060_v9  ;;  %1231 = vmatmul.mubr.f32.gmra.mxu0 %v176_v10  ;;  %v233_v60 = vld [vmem:[#allocation2 + $0x608] sm:$0xff]  ;;  %v904_v0 = vld [vmem:[#allocation5 + $0xb00] sm:$0xff] }
  0xa4   :  { %1680 = vmatmul.mubr.f32.gmra.mxu1 %v178_v11  ;;  %1236 = vmatprep.mubr.f32.mxu0 %v185_v12  ;;  %v905_v62 = vld [vmem:[#allocation5 + $0xb08] sm:$0xff]  ;;  %v1032_v1 = vld [vmem:[#allocation5 + $0xf00] sm:$0xff]  ;;  %v242_v11 = vld [vmem:[#allocation2 + $0x650] sm:$0xff] }
  0xa5   :  { %1685 = vmatprep.mubr.f32.mxu1 %v187_v13  ;;  %1996 = vmatprep.subr.mxu0 %v929_v14  ;;  %v1033_v63 = vld [vmem:[#allocation5 + $0xf08] sm:$0xff]  ;;  %v232_v2 = vld [vmem:[#allocation2 + $0x600] sm:$0xff]  ;;  %v251_v13 = vld [vmem:[#allocation2 + $0x698] sm:$0xff] }
  0xa6   :  { %2445 = vmatprep.subr.mxu1 %v1057_v15  ;;  %1997 = vmatpush2.msra.mxu0 %v928_v16  ;;  %v241_v4 = vld [vmem:[#allocation2 + $0x648] sm:$0xff]  ;;  %v900_v8 = vld [vmem:[#allocation5 + $0xae0] sm:$0xff] }
  0xa7   :  { %2446 = vmatpush2.msra.mxu1 %v1056_v17  ;;  %1237 = vmatmul.mubr.f32.gmra.mxu0 %v184_v18  ;;  %v901_v6 = vld [vmem:[#allocation5 + $0xae8] sm:$0xff]  ;;  %v1028_v9 = vld [vmem:[#allocation5 + $0xee0] sm:$0xff] }
  0xa8   :  { %1686 = vmatmul.mubr.f32.gmra.mxu1 %v186_v19  ;;  %1242 = vmatprep.mubr.f32.mxu0 %v193_v20  ;;  %v1029_v7 = vld [vmem:[#allocation5 + $0xee8] sm:$0xff]  ;;  %v240_v10 = vld [vmem:[#allocation2 + $0x640] sm:$0xff]  ;;  %v250_v19 = vld [vmem:[#allocation2 + $0x690] sm:$0xff] }
  0xa9   :  { %1691 = vmatprep.mubr.f32.mxu1 %v195_v21  ;;  %1998 = vmatprep.subr.mxu0 %v925_v22  ;;  %v249_v12 = vld [vmem:[#allocation2 + $0x688] sm:$0xff]  ;;  %v896_v16 = vld [vmem:[#allocation5 + $0xac0] sm:$0xff]  ;;  %v259_v21 = vld [vmem:[#allocation2 + $0x6d8] sm:$0xff] }
  0xaa   :  { %2447 = vmatprep.subr.mxu1 %v1053_v23  ;;  %1999 = vmatpush2.msra.mxu0 %v924_v24  ;;  %v897_v14 = vld [vmem:[#allocation5 + $0xac8] sm:$0xff]  ;;  %v1024_v17 = vld [vmem:[#allocation5 + $0xec0] sm:$0xff] }
  0xab   :  { %2448 = vmatpush2.msra.mxu1 %v1052_v25  ;;  %1243 = vmatmul.mubr.f32.gmra.mxu0 %v192_v26  ;;  %v1025_v15 = vld [vmem:[#allocation5 + $0xec8] sm:$0xff]  ;;  %v248_v18 = vld [vmem:[#allocation2 + $0x680] sm:$0xff] }
  0xac   :  { %1692 = vmatmul.mubr.f32.gmra.mxu1 %v194_v27  ;;  %1248 = vmatprep.mubr.f32.mxu0 %v201_v28  ;;  %v257_v20 = vld [vmem:[#allocation2 + $0x6c8] sm:$0xff]  ;;  %v892_v24 = vld [vmem:[#allocation5 + $0xaa0] sm:$0xff]  ;;  %v258_v27 = vld [vmem:[#allocation2 + $0x6d0] sm:$0xff] }
  0xad   :  { %1697 = vmatprep.mubr.f32.mxu1 %v203_v29  ;;  %2000 = vmatprep.subr.mxu0 %v921_v30  ;;  %v893_v22 = vld [vmem:[#allocation5 + $0xaa8] sm:$0xff]  ;;  %v1020_v25 = vld [vmem:[#allocation5 + $0xea0] sm:$0xff]  ;;  %v267_v29 = vld [vmem:[#allocation2 + $0x718] sm:$0xff] }
  0xae   :  { %2449 = vmatprep.subr.mxu1 %v1049_v31  ;;  %2001 = vmatpush2.msra.mxu0 %v920_v32  ;;  %v1021_v23 = vld [vmem:[#allocation5 + $0xea8] sm:$0xff]  ;;  %v256_v26 = vld [vmem:[#allocation2 + $0x6c0] sm:$0xff] }
  0xaf   :  { %2450 = vmatpush2.msra.mxu1 %v1048_v33  ;;  %1249 = vmatmul.mubr.f32.gmra.mxu0 %v200_v34  ;;  %v265_v28 = vld [vmem:[#allocation2 + $0x708] sm:$0xff]  ;;  %v888_v32 = vld [vmem:[#allocation5 + $0xa80] sm:$0xff] }
  0xb0   :  { %1698 = vmatmul.mubr.f32.gmra.mxu1 %v202_v35  ;;  %1254 = vmatprep.mubr.f32.mxu0 %v209_v36  ;;  %v889_v30 = vld [vmem:[#allocation5 + $0xa88] sm:$0xff]  ;;  %v1016_v33 = vld [vmem:[#allocation5 + $0xe80] sm:$0xff]  ;;  %v266_v35 = vld [vmem:[#allocation2 + $0x710] sm:$0xff] }
  0xb1   :  { %1703 = vmatprep.mubr.f32.mxu1 %v211_v37  ;;  %2002 = vmatprep.subr.mxu0 %v917_v38  ;;  %v1017_v31 = vld [vmem:[#allocation5 + $0xe88] sm:$0xff]  ;;  %v264_v34 = vld [vmem:[#allocation2 + $0x700] sm:$0xff]  ;;  %v275_v37 = vld [vmem:[#allocation2 + $0x758] sm:$0xff] }
  0xb2   :  { %2451 = vmatprep.subr.mxu1 %v1045_v39  ;;  %2003 = vmatpush2.msra.mxu0 %v916_v40  ;;  %v273_v36 = vld [vmem:[#allocation2 + $0x748] sm:$0xff]  ;;  %v884_v40 = vld [vmem:[#allocation5 + $0xa60] sm:$0xff] }
  0xb3   :  { %2452 = vmatpush2.msra.mxu1 %v1044_v41  ;;  %1255 = vmatmul.mubr.f32.gmra.mxu0 %v208_v42  ;;  %v885_v38 = vld [vmem:[#allocation5 + $0xa68] sm:$0xff]  ;;  %v1012_v41 = vld [vmem:[#allocation5 + $0xe60] sm:$0xff] }
  0xb4   :  { %1704 = vmatmul.mubr.f32.gmra.mxu1 %v210_v43  ;;  %1260 = vmatprep.mubr.f32.mxu0 %v217_v44  ;;  %v1013_v39 = vld [vmem:[#allocation5 + $0xe68] sm:$0xff]  ;;  %v272_v42 = vld [vmem:[#allocation2 + $0x740] sm:$0xff]  ;;  %v274_v43 = vld [vmem:[#allocation2 + $0x750] sm:$0xff] }
  0xb5   :  { %1709 = vmatprep.mubr.f32.mxu1 %v219_v45  ;;  %2004 = vmatprep.subr.mxu0 %v913_v46  ;;  %v281_v44 = vld [vmem:[#allocation2 + $0x788] sm:$0xff]  ;;  %v283_v45 = vld [vmem:[#allocation2 + $0x798] sm:$0xff] }
  0xb6   :  { %2453 = vmatprep.subr.mxu1 %v1041_v47  ;;  %2005 = vmatpush2.msra.mxu0 %v912_v48  ;;  %v881_v46 = vld [vmem:[#allocation5 + $0xa48] sm:$0xff]  ;;  %v880_v48 = vld [vmem:[#allocation5 + $0xa40] sm:$0xff] }
  0xb7   :  { %2454 = vmatpush2.msra.mxu1 %v1040_v49  ;;  %1261 = vmatmul.mubr.f32.gmra.mxu0 %v216_v50  ;;  %v1009_v47 = vld [vmem:[#allocation5 + $0xe48] sm:$0xff]  ;;  %v1008_v49 = vld [vmem:[#allocation5 + $0xe40] sm:$0xff] }
  0xb8   :  { %1710 = vmatmul.mubr.f32.gmra.mxu1 %v218_v51  ;;  %1266 = vmatprep.mubr.f32.mxu0 %v225_v52  ;;  %v280_v50 = vld [vmem:[#allocation2 + $0x780] sm:$0xff]  ;;  %v282_v51 = vld [vmem:[#allocation2 + $0x790] sm:$0xff]  ;;  %v289_v52 = vld [vmem:[#allocation2 + $0x7c8] sm:$0xff] }
  0xb9   :  { %1715 = vmatprep.mubr.f32.mxu1 %v227_v53  ;;  %2006 = vmatprep.subr.mxu0 %v909_v54  ;;  %v291_v53 = vld [vmem:[#allocation2 + $0x7d8] sm:$0xff]  ;;  %v877_v54 = vld [vmem:[#allocation5 + $0xa28] sm:$0xff] }
  0xba   :  { %2455 = vmatprep.subr.mxu1 %v1037_v55  ;;  %2007 = vmatpush2.msra.mxu0 %v908_v56  ;;  %v1005_v55 = vld [vmem:[#allocation5 + $0xe28] sm:$0xff]  ;;  %v876_v56 = vld [vmem:[#allocation5 + $0xa20] sm:$0xff] }
  0xbb   :  { %2456 = vmatpush2.msra.mxu1 %v1036_v57  ;;  %1267 = vmatmul.mubr.f32.gmra.mxu0 %v224_v58  ;;  %v1004_v57 = vld [vmem:[#allocation5 + $0xe20] sm:$0xff] }
  0xbc   :  { %1716 = vmatmul.mubr.f32.gmra.mxu1 %v226_v59  ;;  %1272 = vmatprep.mubr.f32.mxu0 %v233_v60  ;;  %v288_v58 = vld [vmem:[#allocation2 + $0x7c0] sm:$0xff]  ;;  %v290_v59 = vld [vmem:[#allocation2 + $0x7d0] sm:$0xff]  ;;  %v297_v60 = vld [vmem:[#allocation2 + $0x808] sm:$0xff] }
  0xbd   :  { %1721 = vmatprep.mubr.f32.mxu1 %v235_v61  ;;  %2008 = vmatprep.subr.mxu0 %v905_v62  ;;  %v299_v61 = vld [vmem:[#allocation2 + $0x818] sm:$0xff]  ;;  %v873_v62 = vld [vmem:[#allocation5 + $0xa08] sm:$0xff] }
  0xbe   :  { %2457 = vmatprep.subr.mxu1 %v1033_v63  ;;  %2009 = vmatpush2.msra.mxu0 %v904_v0  ;;  %v1001_v63 = vld [vmem:[#allocation5 + $0xe08] sm:$0xff]  ;;  %v872_v0 = vld [vmem:[#allocation5 + $0xa00] sm:$0xff] }
  0xbf   :  { %2458 = vmatpush2.msra.mxu1 %v1032_v1  ;;  %1273 = vmatmul.mubr.f32.gmra.mxu0 %v232_v2  ;;  %v1000_v1 = vld [vmem:[#allocation5 + $0xe00] sm:$0xff] }
  0xc0   :  { %1722 = vmatmul.mubr.f32.gmra.mxu1 %v234_v3  ;;  %1278 = vmatprep.mubr.f32.mxu0 %v241_v4  ;;  %v296_v2 = vld [vmem:[#allocation2 + $0x800] sm:$0xff]  ;;  %v298_v3 = vld [vmem:[#allocation2 + $0x810] sm:$0xff]  ;;  %v305_v4 = vld [vmem:[#allocation2 + $0x848] sm:$0xff] }
  0xc1   :  { %1727 = vmatprep.mubr.f32.mxu1 %v243_v5  ;;  %2010 = vmatprep.subr.mxu0 %v901_v6  ;;  %v307_v5 = vld [vmem:[#allocation2 + $0x858] sm:$0xff]  ;;  %v304_v6 = vld [vmem:[#allocation2 + $0x840] sm:$0xff] }
  0xc2   :  { %2459 = vmatprep.subr.mxu1 %v1029_v7  ;;  %2011 = vmatpush2.msra.mxu0 %v900_v8  ;;  %v306_v7 = vld [vmem:[#allocation2 + $0x850] sm:$0xff]  ;;  %v615_v8 = vld [vmem:[#allocation5 + $0x1f8] sm:$0xff] }
  0xc3   :  { %2460 = vmatpush2.msra.mxu1 %v1028_v9  ;;  %1279 = vmatmul.mubr.f32.gmra.mxu0 %v240_v10  ;;  %v313_v9 = vld [vmem:[#allocation2 + $0x888] sm:$0xff]  ;;  %v315_v10 = vld [vmem:[#allocation2 + $0x898] sm:$0xff] }
  0xc4   :  { %1728 = vmatmul.mubr.f32.gmra.mxu1 %v242_v11  ;;  %1284 = vmatprep.mubr.f32.mxu0 %v249_v12  ;;  %v743_v11 = vld [vmem:[#allocation5 + $0x5f8] sm:$0xff]  ;;  %v312_v12 = vld [vmem:[#allocation2 + $0x880] sm:$0xff] }
  0xc5   :  { %1733 = vmatprep.mubr.f32.mxu1 %v251_v13  ;;  %2012 = vmatprep.subr.mxu0 %v897_v14  ;;  %v314_v13 = vld [vmem:[#allocation2 + $0x890] sm:$0xff]  ;;  %v321_v14 = vld [vmem:[#allocation2 + $0x8c8] sm:$0xff] }
  0xc6   :  { %2461 = vmatprep.subr.mxu1 %v1025_v15  ;;  %2013 = vmatpush2.msra.mxu0 %v896_v16  ;;  %v323_v15 = vld [vmem:[#allocation2 + $0x8d8] sm:$0xff]  ;;  %v320_v16 = vld [vmem:[#allocation2 + $0x8c0] sm:$0xff] }
  0xc7   :  { %2462 = vmatpush2.msra.mxu1 %v1024_v17  ;;  %1285 = vmatmul.mubr.f32.gmra.mxu0 %v248_v18  ;;  %v322_v17 = vld [vmem:[#allocation2 + $0x8d0] sm:$0xff]  ;;  %v329_v18 = vld [vmem:[#allocation2 + $0x908] sm:$0xff] }
  0xc8   :  { %1734 = vmatmul.mubr.f32.gmra.mxu1 %v250_v19  ;;  %1290 = vmatprep.mubr.f32.mxu0 %v257_v20  ;;  %v331_v19 = vld [vmem:[#allocation2 + $0x918] sm:$0xff]  ;;  %v328_v20 = vld [vmem:[#allocation2 + $0x900] sm:$0xff] }
  0xc9   :  { %1739 = vmatprep.mubr.f32.mxu1 %v259_v21  ;;  %2014 = vmatprep.subr.mxu0 %v893_v22  ;;  %v330_v21 = vld [vmem:[#allocation2 + $0x910] sm:$0xff]  ;;  %v337_v22 = vld [vmem:[#allocation2 + $0x948] sm:$0xff] }
  0xca   :  { %2463 = vmatprep.subr.mxu1 %v1021_v23  ;;  %2015 = vmatpush2.msra.mxu0 %v892_v24  ;;  %v339_v23 = vld [vmem:[#allocation2 + $0x958] sm:$0xff]  ;;  %v336_v24 = vld [vmem:[#allocation2 + $0x940] sm:$0xff] }
  0xcb   :  { %2464 = vmatpush2.msra.mxu1 %v1020_v25  ;;  %1291 = vmatmul.mubr.f32.gmra.mxu0 %v256_v26  ;;  %v338_v25 = vld [vmem:[#allocation2 + $0x950] sm:$0xff]  ;;  %v345_v26 = vld [vmem:[#allocation2 + $0x988] sm:$0xff] }
  0xcc   :  { %1740 = vmatmul.mubr.f32.gmra.mxu1 %v258_v27  ;;  %1296 = vmatprep.mubr.f32.mxu0 %v265_v28  ;;  %v347_v27 = vld [vmem:[#allocation2 + $0x998] sm:$0xff]  ;;  %v344_v28 = vld [vmem:[#allocation2 + $0x980] sm:$0xff] }
  0xcd   :  { %1745 = vmatprep.mubr.f32.mxu1 %v267_v29  ;;  %2016 = vmatprep.subr.mxu0 %v889_v30  ;;  %v346_v29 = vld [vmem:[#allocation2 + $0x990] sm:$0xff]  ;;  %v353_v30 = vld [vmem:[#allocation2 + $0x9c8] sm:$0xff] }
  0xce   :  { %2465 = vmatprep.subr.mxu1 %v1017_v31  ;;  %2017 = vmatpush2.msra.mxu0 %v888_v32  ;;  %v355_v31 = vld [vmem:[#allocation2 + $0x9d8] sm:$0xff]  ;;  %v352_v32 = vld [vmem:[#allocation2 + $0x9c0] sm:$0xff] }
  0xcf   :  { %2466 = vmatpush2.msra.mxu1 %v1016_v33  ;;  %1297 = vmatmul.mubr.f32.gmra.mxu0 %v264_v34  ;;  %v354_v33 = vld [vmem:[#allocation2 + $0x9d0] sm:$0xff]  ;;  %v361_v34 = vld [vmem:[#allocation2 + $0xa08] sm:$0xff] }
  0xd0   :  { %1746 = vmatmul.mubr.f32.gmra.mxu1 %v266_v35  ;;  %1302 = vmatprep.mubr.f32.mxu0 %v273_v36  ;;  %v363_v35 = vld [vmem:[#allocation2 + $0xa18] sm:$0xff]  ;;  %v360_v36 = vld [vmem:[#allocation2 + $0xa00] sm:$0xff] }
  0xd1   :  { %1751 = vmatprep.mubr.f32.mxu1 %v275_v37  ;;  %2018 = vmatprep.subr.mxu0 %v885_v38  ;;  %v362_v37 = vld [vmem:[#allocation2 + $0xa10] sm:$0xff]  ;;  %v369_v38 = vld [vmem:[#allocation2 + $0xa48] sm:$0xff] }
  0xd2   :  { %2467 = vmatprep.subr.mxu1 %v1013_v39  ;;  %2019 = vmatpush2.msra.mxu0 %v884_v40  ;;  %v371_v39 = vld [vmem:[#allocation2 + $0xa58] sm:$0xff]  ;;  %v368_v40 = vld [vmem:[#allocation2 + $0xa40] sm:$0xff] }
  0xd3   :  { %2468 = vmatpush2.msra.mxu1 %v1012_v41  ;;  %1303 = vmatmul.mubr.f32.gmra.mxu0 %v272_v42  ;;  %v370_v41 = vld [vmem:[#allocation2 + $0xa50] sm:$0xff]  ;;  %v377_v42 = vld [vmem:[#allocation2 + $0xa88] sm:$0xff] }
  0xd4   :  { %1752 = vmatmul.mubr.f32.gmra.mxu1 %v274_v43  ;;  %1308 = vmatprep.mubr.f32.mxu0 %v281_v44  ;;  %v379_v43 = vld [vmem:[#allocation2 + $0xa98] sm:$0xff]  ;;  %v376_v44 = vld [vmem:[#allocation2 + $0xa80] sm:$0xff] }
  0xd5   :  { %1757 = vmatprep.mubr.f32.mxu1 %v283_v45  ;;  %2020 = vmatprep.subr.mxu0 %v881_v46  ;;  %v378_v45 = vld [vmem:[#allocation2 + $0xa90] sm:$0xff]  ;;  %v385_v46 = vld [vmem:[#allocation2 + $0xac8] sm:$0xff] }
  0xd6   :  { %2469 = vmatprep.subr.mxu1 %v1009_v47  ;;  %2021 = vmatpush2.msra.mxu0 %v880_v48  ;;  %v387_v47 = vld [vmem:[#allocation2 + $0xad8] sm:$0xff]  ;;  %v384_v48 = vld [vmem:[#allocation2 + $0xac0] sm:$0xff] }
  0xd7   :  { %2470 = vmatpush2.msra.mxu1 %v1008_v49  ;;  %1309 = vmatmul.mubr.f32.gmra.mxu0 %v280_v50  ;;  %v386_v49 = vld [vmem:[#allocation2 + $0xad0] sm:$0xff]  ;;  %v393_v50 = vld [vmem:[#allocation2 + $0xb08] sm:$0xff] }
  0xd8   :  { %1758 = vmatmul.mubr.f32.gmra.mxu1 %v282_v51  ;;  %1314 = vmatprep.mubr.f32.mxu0 %v289_v52  ;;  %v395_v51 = vld [vmem:[#allocation2 + $0xb18] sm:$0xff]  ;;  %v392_v52 = vld [vmem:[#allocation2 + $0xb00] sm:$0xff] }
  0xd9   :  { %1763 = vmatprep.mubr.f32.mxu1 %v291_v53  ;;  %2022 = vmatprep.subr.mxu0 %v877_v54  ;;  %v394_v53 = vld [vmem:[#allocation2 + $0xb10] sm:$0xff]  ;;  %v401_v54 = vld [vmem:[#allocation2 + $0xb48] sm:$0xff] }
  0xda   :  { %2471 = vmatprep.subr.mxu1 %v1005_v55  ;;  %2023 = vmatpush2.msra.mxu0 %v876_v56  ;;  %v403_v55 = vld [vmem:[#allocation2 + $0xb58] sm:$0xff]  ;;  %v400_v56 = vld [vmem:[#allocation2 + $0xb40] sm:$0xff] }
  0xdb   :  { %2472 = vmatpush2.msra.mxu1 %v1004_v57  ;;  %1315 = vmatmul.mubr.f32.gmra.mxu0 %v288_v58  ;;  %v402_v57 = vld [vmem:[#allocation2 + $0xb50] sm:$0xff]  ;;  %v409_v58 = vld [vmem:[#allocation2 + $0xb88] sm:$0xff] }
  0xdc   :  { %1764 = vmatmul.mubr.f32.gmra.mxu1 %v290_v59  ;;  %1320 = vmatprep.mubr.f32.mxu0 %v297_v60  ;;  %v411_v59 = vld [vmem:[#allocation2 + $0xb98] sm:$0xff]  ;;  %v408_v60 = vld [vmem:[#allocation2 + $0xb80] sm:$0xff] }
  0xdd   :  { %1769 = vmatprep.mubr.f32.mxu1 %v299_v61  ;;  %2024 = vmatprep.subr.mxu0 %v873_v62  ;;  %v410_v61 = vld [vmem:[#allocation2 + $0xb90] sm:$0xff]  ;;  %v417_v62 = vld [vmem:[#allocation2 + $0xbc8] sm:$0xff] }
  0xde   :  { %2473 = vmatprep.subr.mxu1 %v1001_v63  ;;  %2025 = vmatpush2.msra.mxu0 %v872_v0  ;;  %v419_v63 = vld [vmem:[#allocation2 + $0xbd8] sm:$0xff]  ;;  %v416_v0 = vld [vmem:[#allocation2 + $0xbc0] sm:$0xff] }
  0xdf   :  { %2474 = vmatpush2.msra.mxu1 %v1000_v1  ;;  %1321 = vmatmul.mubr.f32.gmra.mxu0 %v296_v2  ;;  %v418_v1 = vld [vmem:[#allocation2 + $0xbd0] sm:$0xff]  ;;  %v425_v2 = vld [vmem:[#allocation2 + $0xc08] sm:$0xff] }
  0xe0   :  { %1770 = vmatmul.mubr.f32.gmra.mxu1 %v298_v3  ;;  %1326 = vmatprep.mubr.f32.mxu0 %v305_v4  ;;  %v427_v3 = vld [vmem:[#allocation2 + $0xc18] sm:$0xff]  ;;  %v424_v4 = vld [vmem:[#allocation2 + $0xc00] sm:$0xff] }
  0xe1   :  { %1775 = vmatprep.mubr.f32.mxu1 %v307_v5  ;;  %2860 = vmatprep.subr.mxu0 %v615_v8  ;;  %v426_v5 = vld [vmem:[#allocation2 + $0xc10] sm:$0xff] }
  0xe2   :  { %3309 = vmatprep.subr.mxu1 %v743_v11  ;;  %v432_v11 = vld [vmem:[#allocation2 + $0xc40] sm:$0xff] }
  0xe3   :  { %1327 = vmatmul.mubr.f32.gmra.mxu0 %v304_v6  ;;  %v433_v6 = vld [vmem:[#allocation2 + $0xc48] sm:$0xff] }
  0xe4   :  { %1776 = vmatmul.mubr.f32.gmra.mxu1 %v306_v7  ;;  %1332 = vmatprep.mubr.f32.mxu0 %v313_v9  ;;  %v435_v7 = vld [vmem:[#allocation2 + $0xc58] sm:$0xff] }
  0xe5   :  { %1781 = vmatprep.mubr.f32.mxu1 %v315_v10 }
  0xe7   :  { %1333 = vmatmul.mubr.f32.gmra.mxu0 %v312_v12  ;;  %v434_v12 = vld [vmem:[#allocation2 + $0xc50] sm:$0xff] }
  0xe8   :  { %1782 = vmatmul.mubr.f32.gmra.mxu1 %v314_v13  ;;  %1338 = vmatprep.mubr.f32.mxu0 %v321_v14 }
  0xe9   :  { %1787 = vmatprep.mubr.f32.mxu1 %v323_v15  ;;  %v441_v15 = vld [vmem:[#allocation2 + $0xc88] sm:$0xff] }
  0xeb   :  { %1339 = vmatmul.mubr.f32.gmra.mxu0 %v320_v16  ;;  %v443_v16 = vld [vmem:[#allocation2 + $0xc98] sm:$0xff] }
  0xec   :  { %1788 = vmatmul.mubr.f32.gmra.mxu1 %v322_v17  ;;  %1344 = vmatprep.mubr.f32.mxu0 %v329_v18 }
  0xed   :  { %1793 = vmatprep.mubr.f32.mxu1 %v331_v19 }
  0xef   :  { %1345 = vmatmul.mubr.f32.gmra.mxu0 %v328_v20 }
  0xf0   :  { %1794 = vmatmul.mubr.f32.gmra.mxu1 %v330_v21  ;;  %1350 = vmatprep.mubr.f32.mxu0 %v337_v22  ;;  %v440_v21 = vld [vmem:[#allocation2 + $0xc80] sm:$0xff]  ;;  %v442_v22 = vld [vmem:[#allocation2 + $0xc90] sm:$0xff] }
  0xf1   :  { %1799 = vmatprep.mubr.f32.mxu1 %v339_v23 }
  0xf3   :  { %1351 = vmatmul.mubr.f32.gmra.mxu0 %v336_v24 }
  0xf4   :  { %1800 = vmatmul.mubr.f32.gmra.mxu1 %v338_v25  ;;  %1356 = vmatprep.mubr.f32.mxu0 %v345_v26  ;;  %v449_v25 = vld [vmem:[#allocation2 + $0xcc8] sm:$0xff]  ;;  %v451_v26 = vld [vmem:[#allocation2 + $0xcd8] sm:$0xff] }
  0xf5   :  { %1805 = vmatprep.mubr.f32.mxu1 %v347_v27 }
  0xf7   :  { %1357 = vmatmul.mubr.f32.gmra.mxu0 %v344_v28 }
  0xf8   :  { %1806 = vmatmul.mubr.f32.gmra.mxu1 %v346_v29  ;;  %1362 = vmatprep.mubr.f32.mxu0 %v353_v30 }
  0xf9   :  { %1811 = vmatprep.mubr.f32.mxu1 %v355_v31  ;;  %v448_v31 = vld [vmem:[#allocation2 + $0xcc0] sm:$0xff] }
  0xfb   :  { %1363 = vmatmul.mubr.f32.gmra.mxu0 %v352_v32  ;;  %v450_v32 = vld [vmem:[#allocation2 + $0xcd0] sm:$0xff] }
  0xfc   :  { %1812 = vmatmul.mubr.f32.gmra.mxu1 %v354_v33  ;;  %1368 = vmatprep.mubr.f32.mxu0 %v361_v34 }
  0xfd   :  { %1817 = vmatprep.mubr.f32.mxu1 %v363_v35  ;;  %v457_v35 = vld [vmem:[#allocation2 + $0xd08] sm:$0xff] }
  0xff   :  { %1369 = vmatmul.mubr.f32.gmra.mxu0 %v360_v36  ;;  %v459_v36 = vld [vmem:[#allocation2 + $0xd18] sm:$0xff] }
 0x100   :  { %1818 = vmatmul.mubr.f32.gmra.mxu1 %v362_v37  ;;  %1374 = vmatprep.mubr.f32.mxu0 %v369_v38 }
 0x101   :  { %1823 = vmatprep.mubr.f32.mxu1 %v371_v39 }
 0x103   :  { %1375 = vmatmul.mubr.f32.gmra.mxu0 %v368_v40 }
 0x104   :  { %1824 = vmatmul.mubr.f32.gmra.mxu1 %v370_v41  ;;  %1380 = vmatprep.mubr.f32.mxu0 %v377_v42  ;;  %v456_v41 = vld [vmem:[#allocation2 + $0xd00] sm:$0xff]  ;;  %v458_v42 = vld [vmem:[#allocation2 + $0xd10] sm:$0xff] }
 0x105   :  { %1829 = vmatprep.mubr.f32.mxu1 %v379_v43 }
 0x107   :  { %1381 = vmatmul.mubr.f32.gmra.mxu0 %v376_v44 }
 0x108   :  { %1830 = vmatmul.mubr.f32.gmra.mxu1 %v378_v45  ;;  %1386 = vmatprep.mubr.f32.mxu0 %v385_v46  ;;  %v465_v45 = vld [vmem:[#allocation2 + $0xd48] sm:$0xff]  ;;  %v467_v46 = vld [vmem:[#allocation2 + $0xd58] sm:$0xff] }
 0x109   :  { %1835 = vmatprep.mubr.f32.mxu1 %v387_v47 }
 0x10b   :  { %1387 = vmatmul.mubr.f32.gmra.mxu0 %v384_v48 }
 0x10c   :  { %1836 = vmatmul.mubr.f32.gmra.mxu1 %v386_v49  ;;  %1392 = vmatprep.mubr.f32.mxu0 %v393_v50 }
 0x10d   :  { %1841 = vmatprep.mubr.f32.mxu1 %v395_v51  ;;  %v464_v51 = vld [vmem:[#allocation2 + $0xd40] sm:$0xff] }
 0x10f   :  { %1393 = vmatmul.mubr.f32.gmra.mxu0 %v392_v52  ;;  %v466_v52 = vld [vmem:[#allocation2 + $0xd50] sm:$0xff] }
 0x110   :  { %1842 = vmatmul.mubr.f32.gmra.mxu1 %v394_v53  ;;  %1398 = vmatprep.mubr.f32.mxu0 %v401_v54 }
 0x111   :  { %1847 = vmatprep.mubr.f32.mxu1 %v403_v55  ;;  %v473_v55 = vld [vmem:[#allocation2 + $0xd88] sm:$0xff] }
 0x113   :  { %1399 = vmatmul.mubr.f32.gmra.mxu0 %v400_v56  ;;  %v475_v56 = vld [vmem:[#allocation2 + $0xd98] sm:$0xff] }
 0x114   :  { %1848 = vmatmul.mubr.f32.gmra.mxu1 %v402_v57  ;;  %1404 = vmatprep.mubr.f32.mxu0 %v409_v58 }
 0x115   :  { %1853 = vmatprep.mubr.f32.mxu1 %v411_v59 }
 0x117   :  { %1405 = vmatmul.mubr.f32.gmra.mxu0 %v408_v60 }
 0x118   :  { %1854 = vmatmul.mubr.f32.gmra.mxu1 %v410_v61  ;;  %1410 = vmatprep.mubr.f32.mxu0 %v417_v62  ;;  %v472_v61 = vld [vmem:[#allocation2 + $0xd80] sm:$0xff]  ;;  %v474_v62 = vld [vmem:[#allocation2 + $0xd90] sm:$0xff] }
 0x119   :  { %1859 = vmatprep.mubr.f32.mxu1 %v419_v63 }
 0x11b   :  { %1411 = vmatmul.mubr.f32.gmra.mxu0 %v416_v0 }
 0x11c   :  { %1860 = vmatmul.mubr.f32.gmra.mxu1 %v418_v1  ;;  %1416 = vmatprep.mubr.f32.mxu0 %v425_v2  ;;  %v481_v1 = vld [vmem:[#allocation2 + $0xdc8] sm:$0xff]  ;;  %v483_v2 = vld [vmem:[#allocation2 + $0xdd8] sm:$0xff] }
 0x11d   :  { %1865 = vmatprep.mubr.f32.mxu1 %v427_v3 }
 0x11f   :  { %v1130_v8 = vpop.f32.mrf.mxu0  ;;  %1417 = vmatmul.mubr.f32.gmra.mxu0 %v424_v4 }
 0x120   :  { %v1579_v9 = vpop.f32.mrf.mxu1  ;;  %1866 = vmatmul.mubr.f32.gmra.mxu1 %v426_v5  ;;  %1422 = vmatprep.mubr.f32.mxu0 %v433_v6 }
 0x121   :  { %v5802_v10 = vadd.f32 %v1579_v9, %v1130_v8  ;;  %1871 = vmatprep.mubr.f32.mxu1 %v435_v7  ;;  %v1132_v13 = vpop.f32.mrf.mxu0  ;;  %v480_v7 = vld [vmem:[#allocation2 + $0xdc0] sm:$0xff]  ;;  %v482_v8 = vld [vmem:[#allocation2 + $0xdd0] sm:$0xff] }
 0x122   :  { %v1581_v14 = vpop.f32.mrf.mxu1 }
 0x123   :  { %v5804_v17 = vadd.f32 %v1581_v14, %v1132_v13  ;;  %v1136_v18 = vpop.f32.mrf.mxu0  ;;  %1423 = vmatmul.mubr.f32.gmra.mxu0 %v432_v11  ;;  %v491_v13 = vld [vmem:[#allocation2 + $0xe18] sm:$0xff] }
 0x124   :  { %v1585_v19 = vpop.f32.mrf.mxu1  ;;  %1872 = vmatmul.mubr.f32.gmra.mxu1 %v434_v12  ;;  %1428 = vmatprep.mubr.f32.mxu0 %v441_v15  ;;  %v489_v12 = vld [vmem:[#allocation2 + $0xe08] sm:$0xff] }
 0x125   :  { %v5806_v20 = vadd.f32 %v1585_v19, %v1136_v18  ;;  %1877 = vmatprep.mubr.f32.mxu1 %v443_v16  ;;  %v1138_v23 = vpop.f32.mrf.mxu0  ;;  %v488_v19 = vld [vmem:[#allocation2 + $0xe00] sm:$0xff] }
 0x126   :  { %v1587_v24 = vpop.f32.mrf.mxu1 }
 0x127   :  { %v5808_v27 = vadd.f32 %v1587_v24, %v1138_v23  ;;  %v1142_v28 = vpop.f32.mrf.mxu0  ;;  %1429 = vmatmul.mubr.f32.gmra.mxu0 %v440_v21  ;;  %v490_v21 = vld [vmem:[#allocation2 + $0xe10] sm:$0xff]  ;;  %v497_v24 = vld [vmem:[#allocation2 + $0xe48] sm:$0xff] }
 0x128   :  { %v1591_v29 = vpop.f32.mrf.mxu1  ;;  %1878 = vmatmul.mubr.f32.gmra.mxu1 %v442_v22  ;;  %1434 = vmatprep.mubr.f32.mxu0 %v449_v25  ;;  %v499_v25 = vld [vmem:[#allocation2 + $0xe58] sm:$0xff] }
 0x129   :  { %v5810_v30 = vadd.f32 %v1591_v29, %v1142_v28  ;;  %1883 = vmatprep.mubr.f32.mxu1 %v451_v26  ;;  %v1144_v33 = vpop.f32.mrf.mxu0 }
 0x12a   :  { %v1593_v34 = vpop.f32.mrf.mxu1 }
 0x12b   :  { %v5812_v37 = vadd.f32 %v1593_v34, %v1144_v33  ;;  %v1148_v38 = vpop.f32.mrf.mxu0  ;;  %1435 = vmatmul.mubr.f32.gmra.mxu0 %v448_v31  ;;  %v498_v33 = vld [vmem:[#allocation2 + $0xe50] sm:$0xff] }
 0x12c   :  { %v1597_v39 = vpop.f32.mrf.mxu1  ;;  %1884 = vmatmul.mubr.f32.gmra.mxu1 %v450_v32  ;;  %1440 = vmatprep.mubr.f32.mxu0 %v457_v35  ;;  %v496_v32 = vld [vmem:[#allocation2 + $0xe40] sm:$0xff] }
 0x12d   :  { %v5814_v40 = vadd.f32 %v1597_v39, %v1148_v38  ;;  %1889 = vmatprep.mubr.f32.mxu1 %v459_v36  ;;  %v1150_v43 = vpop.f32.mrf.mxu0  ;;  %v505_v36 = vld [vmem:[#allocation2 + $0xe88] sm:$0xff]  ;;  %v507_v38 = vld [vmem:[#allocation2 + $0xe98] sm:$0xff] }
 0x12e   :  { %v1599_v44 = vpop.f32.mrf.mxu1 }
 0x12f   :  { %v5816_v47 = vadd.f32 %v1599_v44, %v1150_v43  ;;  %v1154_v48 = vpop.f32.mrf.mxu0  ;;  %1441 = vmatmul.mubr.f32.gmra.mxu0 %v456_v41  ;;  %v504_v44 = vld [vmem:[#allocation2 + $0xe80] sm:$0xff] }
 0x130   :  { %v1603_v49 = vpop.f32.mrf.mxu1  ;;  %1890 = vmatmul.mubr.f32.gmra.mxu1 %v458_v42  ;;  %1446 = vmatprep.mubr.f32.mxu0 %v465_v45  ;;  %v506_v45 = vld [vmem:[#allocation2 + $0xe90] sm:$0xff] }
 0x131   :  { %v5818_v50 = vadd.f32 %v1603_v49, %v1154_v48  ;;  %1895 = vmatprep.mubr.f32.mxu1 %v467_v46  ;;  %v1156_v53 = vpop.f32.mrf.mxu0  ;;  %v513_v49 = vld [vmem:[#allocation2 + $0xec8] sm:$0xff] }
 0x132   :  { %v1605_v54 = vpop.f32.mrf.mxu1 }
 0x133   :  { %v5820_v57 = vadd.f32 %v1605_v54, %v1156_v53  ;;  %v1160_v58 = vpop.f32.mrf.mxu0  ;;  %1447 = vmatmul.mubr.f32.gmra.mxu0 %v464_v51  ;;  %v515_v51 = vld [vmem:[#allocation2 + $0xed8] sm:$0xff] }
 0x134   :  { %v1609_v59 = vpop.f32.mrf.mxu1  ;;  %1896 = vmatmul.mubr.f32.gmra.mxu1 %v466_v52  ;;  %1452 = vmatprep.mubr.f32.mxu0 %v473_v55 }
 0x135   :  { %v5822_v60 = vadd.f32 %v1609_v59, %v1160_v58  ;;  %1901 = vmatprep.mubr.f32.mxu1 %v475_v56  ;;  %v1162_v63 = vpop.f32.mrf.mxu0  ;;  %v512_v56 = vld [vmem:[#allocation2 + $0xec0] sm:$0xff]  ;;  %v514_v58 = vld [vmem:[#allocation2 + $0xed0] sm:$0xff] }
 0x136   :  { %v1611_v0 = vpop.f32.mrf.mxu1 }
 0x137   :  { %v5824_v3 = vadd.f32 %v1611_v0, %v1162_v63  ;;  %v1166_v4 = vpop.f32.mrf.mxu0  ;;  %1453 = vmatmul.mubr.f32.gmra.mxu0 %v472_v61  ;;  %v523_v63 = vld [vmem:[#allocation2 + $0xf18] sm:$0xff] }
 0x138   :  { %v1615_v5 = vpop.f32.mrf.mxu1  ;;  %1902 = vmatmul.mubr.f32.gmra.mxu1 %v474_v62  ;;  %1458 = vmatprep.mubr.f32.mxu0 %v481_v1  ;;  %v521_v62 = vld [vmem:[#allocation2 + $0xf08] sm:$0xff] }
 0x139   :  { %v5826_v6 = vadd.f32 %v1615_v5, %v1166_v4  ;;  %1907 = vmatprep.mubr.f32.mxu1 %v483_v2  ;;  %v1168_v9 = vpop.f32.mrf.mxu0  ;;  %v520_v5 = vld [vmem:[#allocation2 + $0xf00] sm:$0xff] }
 0x13a   :  { %v1617_v11 = vpop.f32.mrf.mxu1 }
 0x13b   :  { %v5828_v14 = vadd.f32 %v1617_v11, %v1168_v9  ;;  %v1172_v15 = vpop.f32.mrf.mxu0  ;;  %1459 = vmatmul.mubr.f32.gmra.mxu0 %v480_v7  ;;  %v522_v7 = vld [vmem:[#allocation2 + $0xf10] sm:$0xff]  ;;  %v529_v11 = vld [vmem:[#allocation2 + $0xf48] sm:$0xff] }
 0x13c   :  { %v1621_v16 = vpop.f32.mrf.mxu1  ;;  %1908 = vmatmul.mubr.f32.gmra.mxu1 %v482_v8  ;;  %1464 = vmatprep.mubr.f32.mxu0 %v489_v12  ;;  %v531_v12 = vld [vmem:[#allocation2 + $0xf58] sm:$0xff] }
 0x13d   :  { %v5830_v18 = vadd.f32 %v1621_v16, %v1172_v15  ;;  %1913 = vmatprep.mubr.f32.mxu1 %v491_v13  ;;  %v1174_v22 = vpop.f32.mrf.mxu0 }
 0x13e   :  { %v1623_v23 = vpop.f32.mrf.mxu1 }
 0x13f   :  { %v5832_v26 = vadd.f32 %v1623_v23, %v1174_v22  ;;  %v1178_v28 = vpop.f32.mrf.mxu0  ;;  %1465 = vmatmul.mubr.f32.gmra.mxu0 %v488_v19  ;;  %v530_v22 = vld [vmem:[#allocation2 + $0xf50] sm:$0xff] }
 0x140   :  { %v1627_v29 = vpop.f32.mrf.mxu1  ;;  %1914 = vmatmul.mubr.f32.gmra.mxu1 %v490_v21  ;;  %1470 = vmatprep.mubr.f32.mxu0 %v497_v24  ;;  %v528_v21 = vld [vmem:[#allocation2 + $0xf40] sm:$0xff] }
 0x141   :  { %v5834_v31 = vadd.f32 %v1627_v29, %v1178_v28  ;;  %1919 = vmatprep.mubr.f32.mxu1 %v499_v25  ;;  %v1180_v34 = vpop.f32.mrf.mxu0  ;;  %v537_v25 = vld [vmem:[#allocation2 + $0xf88] sm:$0xff]  ;;  %v539_v28 = vld [vmem:[#allocation2 + $0xf98] sm:$0xff] }
 0x142   :  { %v1629_v35 = vpop.f32.mrf.mxu1 }
 0x143   :  { %v5836_v39 = vadd.f32 %v1629_v35, %v1180_v34  ;;  %v1184_v41 = vpop.f32.mrf.mxu0  ;;  %1471 = vmatmul.mubr.f32.gmra.mxu0 %v496_v32  ;;  %v536_v35 = vld [vmem:[#allocation2 + $0xf80] sm:$0xff] }
 0x144   :  { %v1633_v42 = vpop.f32.mrf.mxu1  ;;  %1920 = vmatmul.mubr.f32.gmra.mxu1 %v498_v33  ;;  %1476 = vmatprep.mubr.f32.mxu0 %v505_v36  ;;  %v538_v36 = vld [vmem:[#allocation2 + $0xf90] sm:$0xff] }
 0x145   :  { %v5838_v43 = vadd.f32 %v1633_v42, %v1184_v41  ;;  %1925 = vmatprep.mubr.f32.mxu1 %v507_v38  ;;  %v1186_v46 = vpop.f32.mrf.mxu0  ;;  %v545_v42 = vld [vmem:[#allocation2 + $0xfc8] sm:$0xff] }
 0x146   :  { %v1635_v48 = vpop.f32.mrf.mxu1 }
 0x147   :  { %v5840_v52 = vadd.f32 %v1635_v48, %v1186_v46  ;;  %v1190_v53 = vpop.f32.mrf.mxu0  ;;  %1477 = vmatmul.mubr.f32.gmra.mxu0 %v504_v44  ;;  %v547_v44 = vld [vmem:[#allocation2 + $0xfd8] sm:$0xff] }
 0x148   :  { %v1639_v54 = vpop.f32.mrf.mxu1  ;;  %1926 = vmatmul.mubr.f32.gmra.mxu1 %v506_v45  ;;  %1482 = vmatprep.mubr.f32.mxu0 %v513_v49 }
 0x149   :  { %v5842_v55 = vadd.f32 %v1639_v54, %v1190_v53  ;;  %1931 = vmatprep.mubr.f32.mxu1 %v515_v51  ;;  %v1192_v59 = vpop.f32.mrf.mxu0  ;;  %v544_v51 = vld [vmem:[#allocation2 + $0xfc0] sm:$0xff]  ;;  %v546_v53 = vld [vmem:[#allocation2 + $0xfd0] sm:$0xff] }
 0x14a   :  { %v1641_v61 = vpop.f32.mrf.mxu1 }
 0x14b   :  { %v5844_v0 = vadd.f32 %v1641_v61, %v1192_v59  ;;  %v1196_v1 = vpop.f32.mrf.mxu0  ;;  %1483 = vmatmul.mubr.f32.gmra.mxu0 %v512_v56  ;;  %v47_v59 = vld [vmem:[#allocation2 + $0x38] sm:$0xff] }
 0x14c   :  { %v1645_v2 = vpop.f32.mrf.mxu1  ;;  %1932 = vmatmul.mubr.f32.gmra.mxu1 %v514_v58  ;;  %1488 = vmatprep.mubr.f32.mxu0 %v521_v62  ;;  %v45_v58 = vld [vmem:[#allocation2 + $0x28] sm:$0xff] }
 0x14d   :  { %v5846_v4 = vadd.f32 %v1645_v2, %v1196_v1  ;;  %1937 = vmatprep.mubr.f32.mxu1 %v523_v63  ;;  %v1198_v8 = vpop.f32.mrf.mxu0  ;;  %v44_v2 = vld [vmem:[#allocation2 + $0x20] sm:$0xff] }
 0x14e   :  { %v1647_v9 = vpop.f32.mrf.mxu1 }
 0x14f   :  { %v5848_v13 = vadd.f32 %v1647_v9, %v1198_v8  ;;  %v1202_v15 = vpop.f32.mrf.mxu0  ;;  %1489 = vmatmul.mubr.f32.gmra.mxu0 %v520_v5  ;;  %v46_v5 = vld [vmem:[#allocation2 + $0x30] sm:$0xff] }
 0x150   :  { %v1651_v16 = vpop.f32.mrf.mxu1  ;;  %1938 = vmatmul.mubr.f32.gmra.mxu1 %v522_v7  ;;  %1494 = vmatprep.mubr.f32.mxu0 %v529_v11  ;;  %v614_v9 = vld [vmem:[#allocation5 + $0x1f0] sm:$0xff]  ;;  %v53_v11 = vld [vmem:[#allocation2 + $0x68] sm:$0xff] }
 0x151   :  { %v5850_v19 = vadd.f32 %v1651_v16, %v1202_v15  ;;  %1943 = vmatprep.mubr.f32.mxu1 %v531_v12  ;;  %v1204_v23 = vpop.f32.mrf.mxu0  ;;  %v55_v15 = vld [vmem:[#allocation2 + $0x78] sm:$0xff]  ;;  %v742_v16 = vld [vmem:[#allocation5 + $0x5f0] sm:$0xff] }
 0x152   :  { %v1653_v24 = vpop.f32.mrf.mxu1 }
 0x153   :  { %v5852_v29 = vadd.f32 %v1653_v24, %v1204_v23  ;;  %v1208_v32 = vpop.f32.mrf.mxu0  ;;  %1495 = vmatmul.mubr.f32.gmra.mxu0 %v528_v21  ;;  %v611_v23 = vld [vmem:[#allocation5 + $0x1d8] sm:$0xff] }
 0x154   :  { %v1657_v33 = vpop.f32.mrf.mxu1  ;;  %1944 = vmatmul.mubr.f32.gmra.mxu1 %v530_v22  ;;  %1500 = vmatprep.mubr.f32.mxu0 %v537_v25  ;;  %v739_v24 = vld [vmem:[#allocation5 + $0x5d8] sm:$0xff] }
 0x155   :  { %v5854_v34 = vadd.f32 %v1657_v33, %v1208_v32  ;;  %1949 = vmatprep.mubr.f32.mxu1 %v539_v28  ;;  %v1210_v38 = vpop.f32.mrf.mxu0  ;;  %v52_v28 = vld [vmem:[#allocation2 + $0x60] sm:$0xff]  ;;  %v54_v32 = vld [vmem:[#allocation2 + $0x70] sm:$0xff] }
 0x156   :  { %v1659_v41 = vpop.f32.mrf.mxu1 }
 0x157   :  { %v5856_v45 = vadd.f32 %v1659_v41, %v1210_v38  ;;  %v1214_v46 = vpop.f32.mrf.mxu0  ;;  %1501 = vmatmul.mubr.f32.gmra.mxu0 %v536_v35  ;;  %v63_v38 = vld [vmem:[#allocation2 + $0xb8] sm:$0xff] }
 0x158   :  { %v1663_v48 = vpop.f32.mrf.mxu1  ;;  %1950 = vmatmul.mubr.f32.gmra.mxu1 %v538_v36  ;;  %1506 = vmatprep.mubr.f32.mxu0 %v545_v42  ;;  %v61_v36 = vld [vmem:[#allocation2 + $0xa8] sm:$0xff]  ;;  %v610_v42 = vld [vmem:[#allocation5 + $0x1d0] sm:$0xff] }
 0x159   :  { %v5858_v49 = vadd.f32 %v1663_v48, %v1214_v46  ;;  %1955 = vmatprep.mubr.f32.mxu1 %v547_v44  ;;  %v1216_v54 = vpop.f32.mrf.mxu0  ;;  %v738_v44 = vld [vmem:[#allocation5 + $0x5d0] sm:$0xff] }
 0x15a   :  { %v1665_v56 = vpop.f32.mrf.mxu1 }
 0x15b   :  { %v5860_v61 = vadd.f32 %v1665_v56, %v1216_v54  ;;  %v1220_v62 = vpop.f32.mrf.mxu0  ;;  %1507 = vmatmul.mubr.f32.gmra.mxu0 %v544_v51  ;;  %v607_v51 = vld [vmem:[#allocation5 + $0x1b8] sm:$0xff]  ;;  %v60_v56 = vld [vmem:[#allocation2 + $0xa0] sm:$0xff] }
 0x15c   :  { %v1669_v63 = vpop.f32.mrf.mxu1  ;;  %1956 = vmatmul.mubr.f32.gmra.mxu1 %v546_v53  ;;  %2026 = vmatprep.mubr.f32.mxu0 %v45_v58  ;;  %v735_v53 = vld [vmem:[#allocation5 + $0x5b8] sm:$0xff]  ;;  %v62_v58 = vld [vmem:[#allocation2 + $0xb0] sm:$0xff] }
 0x15d   :  { %v5862_v1 = vadd.f32 %v1669_v63, %v1220_v62  ;;  %2475 = vmatprep.mubr.f32.mxu1 %v47_v59  ;;  %v1222_v7 = vpop.f32.mrf.mxu0  ;;  %v69_v63 = vld [vmem:[#allocation2 + $0xe8] sm:$0xff] }
 0x15e   :  { %v1671_v8 = vpop.f32.mrf.mxu1 }
 0x15f   :  { %v5864_v12 = vadd.f32 %v1671_v8, %v1222_v7  ;;  %v1226_v21 = vpop.f32.mrf.mxu0  ;;  %2027 = vmatmul.mubr.f32.vlgmr.msra.gmra.mxu0 %v44_v2  ;;  %v71_v2 = vld [vmem:[#allocation2 + $0xf8] sm:$0xff]  ;;  %v606_v7 = vld [vmem:[#allocation5 + $0x1b0] sm:$0xff] }
 0x160   :  { %v1675_v22 = vpop.f32.mrf.mxu1  ;;  %2476 = vmatmul.mubr.f32.vlgmr.msra.gmra.mxu1 %v46_v5  ;;  %2861 = vmatpush1.msra.mxu0 %v614_v9  ;;  %v734_v8 = vld [vmem:[#allocation5 + $0x5b0] sm:$0xff] }
 0x161   :  { %v5866_v25 = vadd.f32 %v1675_v22, %v1226_v21  ;;  %2032 = vmatprep.mubr.f32.mxu0 %v53_v11  ;;  %v1228_v33 = vpop.f32.mrf.mxu0  ;;  %2481 = vmatprep.mubr.f32.mxu1 %v55_v15  ;;  %v603_v15 = vld [vmem:[#allocation5 + $0x198] sm:$0xff]  ;;  %v68_v22 = vld [vmem:[#allocation2 + $0xe0] sm:$0xff] }
 0x162   :  { %v1677_v35 = vpop.f32.mrf.mxu1  ;;  %3310 = vmatpush1.msra.mxu1 %v742_v16  ;;  %2862 = vmatprep.subr.mxu0 %v611_v23  ;;  %v731_v16 = vld [vmem:[#allocation5 + $0x598] sm:$0xff]  ;;  %v70_v23 = vld [vmem:[#allocation2 + $0xf0] sm:$0xff] }
 0x163   :  { %v5868_v41 = vadd.f32 %v1677_v35, %v1228_v33  ;;  %3311 = vmatprep.subr.mxu1 %v739_v24  ;;  %v1232_v46 = vpop.f32.mrf.mxu0  ;;  %2033 = vmatmul.mubr.f32.gmra.mxu0 %v52_v28  ;;  %v79_v33 = vld [vmem:[#allocation2 + $0x138] sm:$0xff] }
 0x164   :  { %v1681_v48 = vpop.f32.mrf.mxu1  ;;  %2482 = vmatmul.mubr.f32.gmra.mxu1 %v54_v32  ;;  %2038 = vmatprep.mubr.f32.mxu0 %v61_v36  ;;  %v77_v32 = vld [vmem:[#allocation2 + $0x128] sm:$0xff]  ;;  %v602_v36 = vld [vmem:[#allocation5 + $0x190] sm:$0xff] }
 0x165   :  { %v5870_v54 = vadd.f32 %v1681_v48, %v1232_v46  ;;  %2487 = vmatprep.mubr.f32.mxu1 %v63_v38  ;;  %v1234_v59 = vpop.f32.mrf.mxu0  ;;  %2863 = vmatpush1.msra.mxu0 %v610_v42  ;;  %v730_v38 = vld [vmem:[#allocation5 + $0x590] sm:$0xff]  ;;  %v599_v46 = vld [vmem:[#allocation5 + $0x178] sm:$0xff] }
 0x166   :  { %v1683_v62 = vpop.f32.mrf.mxu1  ;;  %3312 = vmatpush1.msra.mxu1 %v738_v44  ;;  %2864 = vmatprep.subr.mxu0 %v607_v51  ;;  %v727_v48 = vld [vmem:[#allocation5 + $0x578] sm:$0xff] }
 0x167   :  { %v5872_v5 = vadd.f32 %v1683_v62, %v1234_v59  ;;  %3313 = vmatprep.subr.mxu1 %v735_v53  ;;  %v1238_v9 = vpop.f32.mrf.mxu0  ;;  %2039 = vmatmul.mubr.f32.gmra.mxu0 %v60_v56  ;;  %v76_v53 = vld [vmem:[#allocation2 + $0x120] sm:$0xff]  ;;  %v78_v56 = vld [vmem:[#allocation2 + $0x130] sm:$0xff]  ;;  %v85_v62 = vld [vmem:[#allocation2 + $0x168] sm:$0xff] }
 0x168   :  { %v1687_v11 = vpop.f32.mrf.mxu1  ;;  %2488 = vmatmul.mubr.f32.gmra.mxu1 %v62_v58  ;;  %2044 = vmatprep.mubr.f32.mxu0 %v69_v63  ;;  %v87_v63 = vld [vmem:[#allocation2 + $0x178] sm:$0xff] }
 0x169   :  { %v5874_v21 = vadd.f32 %v1687_v11, %v1238_v9  ;;  %2493 = vmatprep.mubr.f32.mxu1 %v71_v2  ;;  %v1240_v24 = vpop.f32.mrf.mxu0  ;;  %2865 = vmatpush1.msra.mxu0 %v606_v7  ;;  %v598_v7 = vld [vmem:[#allocation5 + $0x170] sm:$0xff] }
 0x16a   :  { %v1689_v28 = vpop.f32.mrf.mxu1  ;;  %3314 = vmatpush1.msra.mxu1 %v734_v8  ;;  %2866 = vmatprep.subr.mxu0 %v603_v15  ;;  %v726_v8 = vld [vmem:[#allocation5 + $0x570] sm:$0xff]  ;;  %v595_v15 = vld [vmem:[#allocation5 + $0x158] sm:$0xff] }
 0x16b   :  { %v5876_v35 = vadd.f32 %v1689_v28, %v1240_v24  ;;  %3315 = vmatprep.subr.mxu1 %v731_v16  ;;  %v1244_v42 = vpop.f32.mrf.mxu0  ;;  %2045 = vmatmul.mubr.f32.gmra.mxu0 %v68_v22  ;;  %v723_v16 = vld [vmem:[#allocation5 + $0x558] sm:$0xff]  ;;  %v86_v24 = vld [vmem:[#allocation2 + $0x170] sm:$0xff] }
 0x16c   :  { %v1693_v44 = vpop.f32.mrf.mxu1  ;;  %2494 = vmatmul.mubr.f32.gmra.mxu1 %v70_v23  ;;  %2050 = vmatprep.mubr.f32.mxu0 %v77_v32  ;;  %v84_v23 = vld [vmem:[#allocation2 + $0x160] sm:$0xff] }
 0x16d   :  { %v5878_v51 = vadd.f32 %v1693_v44, %v1244_v42  ;;  %2499 = vmatprep.mubr.f32.mxu1 %v79_v33  ;;  %v1246_v58 = vpop.f32.mrf.mxu0  ;;  %2867 = vmatpush1.msra.mxu0 %v602_v36  ;;  %v93_v33 = vld [vmem:[#allocation2 + $0x1a8] sm:$0xff]  ;;  %v95_v36 = vld [vmem:[#allocation2 + $0x1b8] sm:$0xff]  ;;  %v594_v42 = vld [vmem:[#allocation5 + $0x150] sm:$0xff] }
 0x16e   :  { %v1695_v59 = vpop.f32.mrf.mxu1  ;;  %3316 = vmatpush1.msra.mxu1 %v730_v38  ;;  %2868 = vmatprep.subr.mxu0 %v599_v46  ;;  %v722_v44 = vld [vmem:[#allocation5 + $0x550] sm:$0xff] }
 0x16f   :  { %v5880_v2 = vadd.f32 %v1695_v59, %v1246_v58  ;;  %3317 = vmatprep.subr.mxu1 %v727_v48  ;;  %v1250_v9 = vpop.f32.mrf.mxu0  ;;  %2051 = vmatmul.mubr.f32.gmra.mxu0 %v76_v53  ;;  %v591_v53 = vld [vmem:[#allocation5 + $0x138] sm:$0xff]  ;;  %v92_v59 = vld [vmem:[#allocation2 + $0x1a0] sm:$0xff] }
 0x170   :  { %v1699_v11 = vpop.f32.mrf.mxu1  ;;  %2500 = vmatmul.mubr.f32.gmra.mxu1 %v78_v56  ;;  %2056 = vmatprep.mubr.f32.mxu0 %v85_v62  ;;  %v719_v56 = vld [vmem:[#allocation5 + $0x538] sm:$0xff]  ;;  %v94_v62 = vld [vmem:[#allocation2 + $0x1b0] sm:$0xff] }
 0x171   :  { %v5882_v22 = vadd.f32 %v1699_v11, %v1250_v9  ;;  %2505 = vmatprep.mubr.f32.mxu1 %v87_v63  ;;  %v1252_v28 = vpop.f32.mrf.mxu0  ;;  %2869 = vmatpush1.msra.mxu0 %v598_v7  ;;  %v103_v9 = vld [vmem:[#allocation2 + $0x1f8] sm:$0xff] }
 0x172   :  { %v1701_v32 = vpop.f32.mrf.mxu1  ;;  %3318 = vmatpush1.msra.mxu1 %v726_v8  ;;  %2870 = vmatprep.subr.mxu0 %v595_v15  ;;  %v101_v8 = vld [vmem:[#allocation2 + $0x1e8] sm:$0xff]  ;;  %v590_v15 = vld [vmem:[#allocation5 + $0x130] sm:$0xff] }
 0x173   :  { %v5884_v38 = vadd.f32 %v1701_v32, %v1252_v28  ;;  %3319 = vmatprep.subr.mxu1 %v723_v16  ;;  %v1256_v46 = vpop.f32.mrf.mxu0  ;;  %2057 = vmatmul.mubr.f32.gmra.mxu0 %v84_v23  ;;  %v718_v16 = vld [vmem:[#allocation5 + $0x530] sm:$0xff]  ;;  %v587_v28 = vld [vmem:[#allocation5 + $0x118] sm:$0xff] }
 0x174   :  { %v1705_v48 = vpop.f32.mrf.mxu1  ;;  %2506 = vmatmul.mubr.f32.gmra.mxu1 %v86_v24  ;;  %2062 = vmatprep.mubr.f32.mxu0 %v93_v33  ;;  %v715_v32 = vld [vmem:[#allocation5 + $0x518] sm:$0xff] }
 0x175   :  { %v5886_v58 = vadd.f32 %v1705_v48, %v1256_v46  ;;  %2511 = vmatprep.mubr.f32.mxu1 %v95_v36  ;;  %v1258_v63 = vpop.f32.mrf.mxu0  ;;  %2871 = vmatpush1.msra.mxu0 %v594_v42  ;;  %v100_v36 = vld [vmem:[#allocation2 + $0x1e0] sm:$0xff]  ;;  %v102_v46 = vld [vmem:[#allocation2 + $0x1f0] sm:$0xff]  ;;  %v109_v48 = vld [vmem:[#allocation2 + $0x228] sm:$0xff] }
 0x176   :  { %v1707_v7 = vpop.f32.mrf.mxu1  ;;  %3320 = vmatpush1.msra.mxu1 %v722_v44  ;;  %2872 = vmatprep.subr.mxu0 %v591_v53 }
 0x177   :  { %v5888_v11 = vadd.f32 %v1707_v7, %v1258_v63  ;;  %3321 = vmatprep.subr.mxu1 %v719_v56  ;;  %v1262_v23 = vpop.f32.mrf.mxu0  ;;  %2063 = vmatmul.mubr.f32.gmra.mxu0 %v92_v59  ;;  %v111_v63 = vld [vmem:[#allocation2 + $0x238] sm:$0xff]  ;;  %v586_v56 = vld [vmem:[#allocation5 + $0x110] sm:$0xff] }
 0x178   :  { %v1711_v24 = vpop.f32.mrf.mxu1  ;;  %2512 = vmatmul.mubr.f32.gmra.mxu1 %v94_v62  ;;  %2068 = vmatprep.mubr.f32.mxu0 %v101_v8  ;;  %v714_v59 = vld [vmem:[#allocation5 + $0x510] sm:$0xff]  ;;  %v583_v8 = vld [vmem:[#allocation5 + $0xf8] sm:$0xff] }
 0x179   :  { %v5890_v33 = vadd.f32 %v1711_v24, %v1262_v23  ;;  %2517 = vmatprep.mubr.f32.mxu1 %v103_v9  ;;  %v1264_v42 = vpop.f32.mrf.mxu0  ;;  %2873 = vmatpush1.msra.mxu0 %v590_v15  ;;  %v711_v9 = vld [vmem:[#allocation5 + $0x4f8] sm:$0xff]  ;;  %v108_v24 = vld [vmem:[#allocation2 + $0x220] sm:$0xff] }
 0x17a   :  { %v1713_v44 = vpop.f32.mrf.mxu1  ;;  %3322 = vmatpush1.msra.mxu1 %v718_v16  ;;  %2874 = vmatprep.subr.mxu0 %v587_v28 }
 0x17b   :  { %6579 = vst [vmem:[#allocation11_spill] sm:$0xff] %v5890_v33  ;;  %v5892_v53 = vadd.f32 %v1713_v44, %v1264_v42  ;;  %3323 = vmatprep.subr.mxu1 %v715_v32  ;;  %v1268_v62 = vpop.f32.mrf.mxu0  ;;  %2069 = vmatmul.mubr.f32.gmra.mxu0 %v100_v36  ;;  %v110_v33 = vld [vmem:[#allocation2 + $0x230] sm:$0xff]  ;;  %v117_v42 = vld [vmem:[#allocation2 + $0x268] sm:$0xff]  ;;  %v119_v44 = vld [vmem:[#allocation2 + $0x278] sm:$0xff] }
 0x17c   :  { %v1717_v7 = vpop.f32.mrf.mxu1  ;;  %2518 = vmatmul.mubr.f32.gmra.mxu1 %v102_v46  ;;  %2074 = vmatprep.mubr.f32.mxu0 %v109_v48  ;;  %v582_v32 = vld [vmem:[#allocation5 + $0xf0] sm:$0xff]  ;;  %v579_v48 = vld [vmem:[#allocation5 + $0xd8] sm:$0xff] }
 0x17d   :  { %6580 = vst [vmem:[#allocation12_spill] sm:$0xff] %v5892_v53  ;;  %v5894_v23 = vadd.f32 %v1717_v7, %v1268_v62  ;;  %2523 = vmatprep.mubr.f32.mxu1 %v111_v63  ;;  %v1270_v15 = vpop.f32.mrf.mxu0  ;;  %2875 = vmatpush1.msra.mxu0 %v586_v56  ;;  %v710_v36 = vld [vmem:[#allocation5 + $0x4f0] sm:$0xff]  ;;  %v707_v63 = vld [vmem:[#allocation5 + $0x4d8] sm:$0xff]  ;;  %v116_v7 = vld [vmem:[#allocation2 + $0x260] sm:$0xff] }
 0x17e   :  { %v1719_v16 = vpop.f32.mrf.mxu1  ;;  %3324 = vmatpush1.msra.mxu1 %v714_v59  ;;  %2876 = vmatprep.subr.mxu0 %v583_v8 }
 0x17f   :  { %6581 = vst [vmem:[#allocation13_spill] sm:$0xff] %v5894_v23  ;;  %v5896_v28 = vadd.f32 %v1719_v16, %v1270_v15  ;;  %3325 = vmatprep.subr.mxu1 %v711_v9  ;;  %v1274_v46 = vpop.f32.mrf.mxu0  ;;  %2075 = vmatmul.mubr.f32.gmra.mxu0 %v108_v24  ;;  %v118_v23 = vld [vmem:[#allocation2 + $0x270] sm:$0xff]  ;;  %v125_v15 = vld [vmem:[#allocation2 + $0x2a8] sm:$0xff]  ;;  %v127_v16 = vld [vmem:[#allocation2 + $0x2b8] sm:$0xff] }
 0x180   :  { %v1723_v53 = vpop.f32.mrf.mxu1  ;;  %2524 = vmatmul.mubr.f32.gmra.mxu1 %v110_v33  ;;  %2080 = vmatprep.mubr.f32.mxu0 %v117_v42  ;;  %v578_v9 = vld [vmem:[#allocation5 + $0xd0] sm:$0xff]  ;;  %v703_v42 = vld [vmem:[#allocation5 + $0x4b8] sm:$0xff] }
 0x181   :  { %6582 = vst [vmem:[#allocation14_spill] sm:$0xff] %v5896_v28  ;;  %v5898_v62 = vadd.f32 %v1723_v53, %v1274_v46  ;;  %2529 = vmatprep.mubr.f32.mxu1 %v119_v44  ;;  %v1276_v56 = vpop.f32.mrf.mxu0  ;;  %2877 = vmatpush1.msra.mxu0 %v582_v32  ;;  %v706_v33 = vld [vmem:[#allocation5 + $0x4d0] sm:$0xff]  ;;  %v575_v53 = vld [vmem:[#allocation5 + $0xb8] sm:$0xff]  ;;  %v124_v46 = vld [vmem:[#allocation2 + $0x2a0] sm:$0xff] }
 0x182   :  { %v1725_v59 = vpop.f32.mrf.mxu1  ;;  %3326 = vmatpush1.msra.mxu1 %v710_v36  ;;  %2878 = vmatprep.subr.mxu0 %v579_v48 }
 0x183   :  { %6583 = vst [vmem:[#allocation15_spill] sm:$0xff] %v5898_v62  ;;  %v5900_v8 = vadd.f32 %v1725_v59, %v1276_v56  ;;  %3327 = vmatprep.subr.mxu1 %v707_v63  ;;  %v1280_v24 = vpop.f32.mrf.mxu0  ;;  %2081 = vmatmul.mubr.f32.gmra.mxu0 %v116_v7  ;;  %v126_v62 = vld [vmem:[#allocation2 + $0x2b0] sm:$0xff]  ;;  %v133_v56 = vld [vmem:[#allocation2 + $0x2e8] sm:$0xff]  ;;  %v135_v59 = vld [vmem:[#allocation2 + $0x2f8] sm:$0xff] }
 0x184   :  { %v1729_v28 = vpop.f32.mrf.mxu1  ;;  %2530 = vmatmul.mubr.f32.gmra.mxu1 %v118_v23  ;;  %2086 = vmatprep.mubr.f32.mxu0 %v125_v15  ;;  %v574_v63 = vld [vmem:[#allocation5 + $0xb0] sm:$0xff]  ;;  %v699_v15 = vld [vmem:[#allocation5 + $0x498] sm:$0xff] }
 0x185   :  { %6584 = vst [vmem:[#allocation16_spill] sm:$0xff] %v5900_v8  ;;  %v5902_v44 = vadd.f32 %v1729_v28, %v1280_v24  ;;  %2535 = vmatprep.mubr.f32.mxu1 %v127_v16  ;;  %v1282_v32 = vpop.f32.mrf.mxu0  ;;  %2879 = vmatpush1.msra.mxu0 %v578_v9  ;;  %v702_v23 = vld [vmem:[#allocation5 + $0x4b0] sm:$0xff]  ;;  %v571_v28 = vld [vmem:[#allocation5 + $0x98] sm:$0xff]  ;;  %v132_v24 = vld [vmem:[#allocation2 + $0x2e0] sm:$0xff] }
 0x186   :  { %v1731_v36 = vpop.f32.mrf.mxu1  ;;  %3328 = vmatpush1.msra.mxu1 %v706_v33  ;;  %2880 = vmatprep.subr.mxu0 %v575_v53 }
 0x187   :  { %6585 = vst [vmem:[#allocation17_spill] sm:$0xff] %v5902_v44  ;;  %v5904_v48 = vadd.f32 %v1731_v36, %v1282_v32  ;;  %3329 = vmatprep.subr.mxu1 %v703_v42  ;;  %v1286_v7 = vpop.f32.mrf.mxu0  ;;  %2087 = vmatmul.mubr.f32.gmra.mxu0 %v124_v46  ;;  %v134_v44 = vld [vmem:[#allocation2 + $0x2f0] sm:$0xff]  ;;  %v141_v32 = vld [vmem:[#allocation2 + $0x328] sm:$0xff]  ;;  %v143_v36 = vld [vmem:[#allocation2 + $0x338] sm:$0xff] }
 0x188   :  { %v1735_v8 = vpop.f32.mrf.mxu1  ;;  %2536 = vmatmul.mubr.f32.gmra.mxu1 %v126_v62  ;;  %2092 = vmatprep.mubr.f32.mxu0 %v133_v56  ;;  %v570_v42 = vld [vmem:[#allocation5 + $0x90] sm:$0xff]  ;;  %v695_v56 = vld [vmem:[#allocation5 + $0x478] sm:$0xff] }
 0x189   :  { %6586 = vst [vmem:[#allocation18_spill] sm:$0xff] %v5904_v48  ;;  %v5906_v16 = vadd.f32 %v1735_v8, %v1286_v7  ;;  %2541 = vmatprep.mubr.f32.mxu1 %v135_v59  ;;  %v1288_v9 = vpop.f32.mrf.mxu0  ;;  %2881 = vmatpush1.msra.mxu0 %v574_v63  ;;  %v698_v62 = vld [vmem:[#allocation5 + $0x490] sm:$0xff]  ;;  %v567_v8 = vld [vmem:[#allocation5 + $0x78] sm:$0xff]  ;;  %v140_v7 = vld [vmem:[#allocation2 + $0x320] sm:$0xff] }
 0x18a   :  { %v1737_v33 = vpop.f32.mrf.mxu1  ;;  %3330 = vmatpush1.msra.mxu1 %v702_v23  ;;  %2882 = vmatprep.subr.mxu0 %v571_v28 }
 0x18b   :  { %6587 = vst [vmem:[#allocation19_spill] sm:$0xff] %v5906_v16  ;;  %v5908_v53 = vadd.f32 %v1737_v33, %v1288_v9  ;;  %3331 = vmatprep.subr.mxu1 %v699_v15  ;;  %v1292_v46 = vpop.f32.mrf.mxu0  ;;  %2093 = vmatmul.mubr.f32.gmra.mxu0 %v132_v24  ;;  %v142_v16 = vld [vmem:[#allocation2 + $0x330] sm:$0xff]  ;;  %v149_v9 = vld [vmem:[#allocation2 + $0x368] sm:$0xff]  ;;  %v151_v33 = vld [vmem:[#allocation2 + $0x378] sm:$0xff] }
 0x18c   :  { %v1741_v48 = vpop.f32.mrf.mxu1  ;;  %2542 = vmatmul.mubr.f32.gmra.mxu1 %v134_v44  ;;  %2098 = vmatprep.mubr.f32.mxu0 %v141_v32  ;;  %v566_v15 = vld [vmem:[#allocation5 + $0x70] sm:$0xff]  ;;  %v691_v32 = vld [vmem:[#allocation5 + $0x458] sm:$0xff] }
 0x18d   :  { %6588 = vst [vmem:[#allocation20_spill] sm:$0xff] %v5908_v53  ;;  %v5910_v59 = vadd.f32 %v1741_v48, %v1292_v46  ;;  %2547 = vmatprep.mubr.f32.mxu1 %v143_v36  ;;  %v1294_v63 = vpop.f32.mrf.mxu0  ;;  %2883 = vmatpush1.msra.mxu0 %v570_v42  ;;  %v694_v44 = vld [vmem:[#allocation5 + $0x470] sm:$0xff]  ;;  %v563_v48 = vld [vmem:[#allocation5 + $0x58] sm:$0xff]  ;;  %v148_v46 = vld [vmem:[#allocation2 + $0x360] sm:$0xff] }
 0x18e   :  { %v1743_v23 = vpop.f32.mrf.mxu1  ;;  %3332 = vmatpush1.msra.mxu1 %v698_v62  ;;  %2884 = vmatprep.subr.mxu0 %v567_v8 }
 0x18f   :  { %6589 = vst [vmem:[#allocation21_spill] sm:$0xff] %v5910_v59  ;;  %v5912_v28 = vadd.f32 %v1743_v23, %v1294_v63  ;;  %3333 = vmatprep.subr.mxu1 %v695_v56  ;;  %v1298_v24 = vpop.f32.mrf.mxu0  ;;  %2099 = vmatmul.mubr.f32.gmra.mxu0 %v140_v7  ;;  %v150_v59 = vld [vmem:[#allocation2 + $0x370] sm:$0xff]  ;;  %v157_v63 = vld [vmem:[#allocation2 + $0x3a8] sm:$0xff]  ;;  %v159_v23 = vld [vmem:[#allocation2 + $0x3b8] sm:$0xff] }
 0x190   :  { %v1747_v53 = vpop.f32.mrf.mxu1  ;;  %2548 = vmatmul.mubr.f32.gmra.mxu1 %v142_v16  ;;  %2104 = vmatprep.mubr.f32.mxu0 %v149_v9  ;;  %v562_v56 = vld [vmem:[#allocation5 + $0x50] sm:$0xff]  ;;  %v687_v9 = vld [vmem:[#allocation5 + $0x438] sm:$0xff] }
 0x191   :  { %6590 = vst [vmem:[#allocation22_spill] sm:$0xff] %v5912_v28  ;;  %v5914_v36 = vadd.f32 %v1747_v53, %v1298_v24  ;;  %2553 = vmatprep.mubr.f32.mxu1 %v151_v33  ;;  %v1300_v42 = vpop.f32.mrf.mxu0  ;;  %2885 = vmatpush1.msra.mxu0 %v566_v15  ;;  %v690_v16 = vld [vmem:[#allocation5 + $0x450] sm:$0xff]  ;;  %v559_v53 = vld [vmem:[#allocation5 + $0x38] sm:$0xff]  ;;  %v156_v24 = vld [vmem:[#allocation2 + $0x3a0] sm:$0xff] }
 0x192   :  { %v1749_v62 = vpop.f32.mrf.mxu1  ;;  %3334 = vmatpush1.msra.mxu1 %v694_v44  ;;  %2886 = vmatprep.subr.mxu0 %v563_v48 }
 0x193   :  { %6591 = vst [vmem:[#allocation23_spill] sm:$0xff] %v5914_v36  ;;  %v5916_v8 = vadd.f32 %v1749_v62, %v1300_v42  ;;  %3335 = vmatprep.subr.mxu1 %v691_v32  ;;  %v1304_v7 = vpop.f32.mrf.mxu0  ;;  %2105 = vmatmul.mubr.f32.gmra.mxu0 %v148_v46  ;;  %v158_v36 = vld [vmem:[#allocation2 + $0x3b0] sm:$0xff]  ;;  %v165_v42 = vld [vmem:[#allocation2 + $0x3e8] sm:$0xff]  ;;  %v167_v62 = vld [vmem:[#allocation2 + $0x3f8] sm:$0xff] }
 0x194   :  { %v1753_v28 = vpop.f32.mrf.mxu1  ;;  %2554 = vmatmul.mubr.f32.gmra.mxu1 %v150_v59  ;;  %2110 = vmatprep.mubr.f32.mxu0 %v157_v63  ;;  %v558_v32 = vld [vmem:[#allocation5 + $0x30] sm:$0xff]  ;;  %v683_v63 = vld [vmem:[#allocation5 + $0x418] sm:$0xff] }
 0x195   :  { %6592 = vst [vmem:[#allocation24_spill] sm:$0xff] %v5916_v8  ;;  %v5918_v33 = vadd.f32 %v1753_v28, %v1304_v7  ;;  %2559 = vmatprep.mubr.f32.mxu1 %v159_v23  ;;  %v1306_v15 = vpop.f32.mrf.mxu0  ;;  %2887 = vmatpush1.msra.mxu0 %v562_v56  ;;  %v686_v59 = vld [vmem:[#allocation5 + $0x430] sm:$0xff]  ;;  %v555_v28 = vld [vmem:[#allocation5 + $0x18] sm:$0xff]  ;;  %v164_v7 = vld [vmem:[#allocation2 + $0x3e0] sm:$0xff] }
 0x196   :  { %v1755_v44 = vpop.f32.mrf.mxu1  ;;  %3336 = vmatpush1.msra.mxu1 %v690_v16  ;;  %2888 = vmatprep.subr.mxu0 %v559_v53 }
 0x197   :  { %6593 = vst [vmem:[#allocation25_spill] sm:$0xff] %v5918_v33  ;;  %v5920_v48 = vadd.f32 %v1755_v44, %v1306_v15  ;;  %3337 = vmatprep.subr.mxu1 %v687_v9  ;;  %v1310_v46 = vpop.f32.mrf.mxu0  ;;  %2111 = vmatmul.mubr.f32.gmra.mxu0 %v156_v24  ;;  %v166_v33 = vld [vmem:[#allocation2 + $0x3f0] sm:$0xff]  ;;  %v173_v15 = vld [vmem:[#allocation2 + $0x428] sm:$0xff]  ;;  %v175_v44 = vld [vmem:[#allocation2 + $0x438] sm:$0xff] }
 0x198   :  { %v1759_v8 = vpop.f32.mrf.mxu1  ;;  %2560 = vmatmul.mubr.f32.gmra.mxu1 %v158_v36  ;;  %2116 = vmatprep.mubr.f32.mxu0 %v165_v42  ;;  %v554_v9 = vld [vmem:[#allocation5 + $0x10] sm:$0xff]  ;;  %v807_v42 = vld [vmem:[#allocation5 + $0x7f8] sm:$0xff] }
 0x199   :  { %6594 = vst [vmem:[#allocation26_spill] sm:$0xff] %v5920_v48  ;;  %v5922_v23 = vadd.f32 %v1759_v8, %v1310_v46  ;;  %2565 = vmatprep.mubr.f32.mxu1 %v167_v62  ;;  %v1312_v56 = vpop.f32.mrf.mxu0  ;;  %2889 = vmatpush1.msra.mxu0 %v558_v32  ;;  %v682_v36 = vld [vmem:[#allocation5 + $0x410] sm:$0xff]  ;;  %v679_v8 = vld [vmem:[#allocation5 + $0x3f8] sm:$0xff]  ;;  %v172_v46 = vld [vmem:[#allocation2 + $0x420] sm:$0xff] }
 0x19a   :  { %v1761_v16 = vpop.f32.mrf.mxu1  ;;  %3338 = vmatpush1.msra.mxu1 %v686_v59  ;;  %2890 = vmatprep.subr.mxu0 %v555_v28 }
 0x19b   :  { %6595 = vst [vmem:[#allocation27_spill] sm:$0xff] %v5922_v23  ;;  %v5924_v53 = vadd.f32 %v1761_v16, %v1312_v56  ;;  %3339 = vmatprep.subr.mxu1 %v683_v63  ;;  %v1316_v24 = vpop.f32.mrf.mxu0  ;;  %2117 = vmatmul.mubr.f32.gmra.mxu0 %v164_v7  ;;  %v174_v23 = vld [vmem:[#allocation2 + $0x430] sm:$0xff]  ;;  %v181_v56 = vld [vmem:[#allocation2 + $0x468] sm:$0xff]  ;;  %v183_v16 = vld [vmem:[#allocation2 + $0x478] sm:$0xff] }
 0x19c   :  { %v1765_v48 = vpop.f32.mrf.mxu1  ;;  %2566 = vmatmul.mubr.f32.gmra.mxu1 %v166_v33  ;;  %2122 = vmatprep.mubr.f32.mxu0 %v173_v15  ;;  %v678_v63 = vld [vmem:[#allocation5 + $0x3f0] sm:$0xff]  ;;  %v803_v15 = vld [vmem:[#allocation5 + $0x7d8] sm:$0xff] }
 0x19d   :  { %6596 = vst [vmem:[#allocation28_spill] sm:$0xff] %v5924_v53  ;;  %v5926_v62 = vadd.f32 %v1765_v48, %v1316_v24  ;;  %2571 = vmatprep.mubr.f32.mxu1 %v175_v44  ;;  %v1318_v32 = vpop.f32.mrf.mxu0  ;;  %2891 = vmatpush1.msra.mxu0 %v554_v9  ;;  %v806_v33 = vld [vmem:[#allocation5 + $0x7f0] sm:$0xff]  ;;  %v675_v48 = vld [vmem:[#allocation5 + $0x3d8] sm:$0xff]  ;;  %v180_v24 = vld [vmem:[#allocation2 + $0x460] sm:$0xff] }
 0x19e   :  { %v1767_v59 = vpop.f32.mrf.mxu1  ;;  %3340 = vmatpush1.msra.mxu1 %v682_v36  ;;  %2892 = vmatprep.subr.mxu0 %v679_v8 }
 0x19f   :  { %6597 = vst [vmem:[#allocation29_spill] sm:$0xff] %v5926_v62  ;;  %v5928_v28 = vadd.f32 %v1767_v59, %v1318_v32  ;;  %3341 = vmatprep.subr.mxu1 %v807_v42  ;;  %v1322_v7 = vpop.f32.mrf.mxu0  ;;  %2123 = vmatmul.mubr.f32.gmra.mxu0 %v172_v46  ;;  %v182_v62 = vld [vmem:[#allocation2 + $0x470] sm:$0xff]  ;;  %v189_v32 = vld [vmem:[#allocation2 + $0x4a8] sm:$0xff]  ;;  %v191_v59 = vld [vmem:[#allocation2 + $0x4b8] sm:$0xff] }
 0x1a0   :  { %v1771_v53 = vpop.f32.mrf.mxu1  ;;  %2572 = vmatmul.mubr.f32.gmra.mxu1 %v174_v23  ;;  %2128 = vmatprep.mubr.f32.mxu0 %v181_v56  ;;  %v674_v42 = vld [vmem:[#allocation5 + $0x3d0] sm:$0xff]  ;;  %v799_v56 = vld [vmem:[#allocation5 + $0x7b8] sm:$0xff] }
 0x1a1   :  { %6598 = vst [vmem:[#allocation30_spill] sm:$0xff] %v5928_v28  ;;  %v5930_v44 = vadd.f32 %v1771_v53, %v1322_v7  ;;  %2577 = vmatprep.mubr.f32.mxu1 %v183_v16  ;;  %v1324_v9 = vpop.f32.mrf.mxu0  ;;  %2893 = vmatpush2.msra.mxu0 %v678_v63  ;;  %v802_v23 = vld [vmem:[#allocation5 + $0x7d0] sm:$0xff]  ;;  %v671_v53 = vld [vmem:[#allocation5 + $0x3b8] sm:$0xff]  ;;  %v188_v7 = vld [vmem:[#allocation2 + $0x4a0] sm:$0xff] }
 0x1a2   :  { %v1773_v36 = vpop.f32.mrf.mxu1  ;;  %3342 = vmatpush2.msra.mxu1 %v806_v33  ;;  %2894 = vmatprep.subr.mxu0 %v675_v48 }
 0x1a3   :  { %6599 = vst [vmem:[#allocation31_spill] sm:$0xff] %v5930_v44  ;;  %v5932_v8 = vadd.f32 %v1773_v36, %v1324_v9  ;;  %3343 = vmatprep.subr.mxu1 %v803_v15  ;;  %v1328_v46 = vpop.f32.mrf.mxu0  ;;  %2129 = vmatmul.mubr.f32.gmra.mxu0 %v180_v24  ;;  %v190_v44 = vld [vmem:[#allocation2 + $0x4b0] sm:$0xff]  ;;  %v197_v9 = vld [vmem:[#allocation2 + $0x4e8] sm:$0xff]  ;;  %v199_v36 = vld [vmem:[#allocation2 + $0x4f8] sm:$0xff] }
 0x1a4   :  { %v1777_v28 = vpop.f32.mrf.mxu1  ;;  %2578 = vmatmul.mubr.f32.gmra.mxu1 %v182_v62  ;;  %2134 = vmatprep.mubr.f32.mxu0 %v189_v32  ;;  %v670_v15 = vld [vmem:[#allocation5 + $0x3b0] sm:$0xff]  ;;  %v795_v32 = vld [vmem:[#allocation5 + $0x798] sm:$0xff] }
 0x1a5   :  { %6600 = vst [vmem:[#allocation32_spill] sm:$0xff] %v5932_v8  ;;  %v5934_v16 = vadd.f32 %v1777_v28, %v1328_v46  ;;  %2583 = vmatprep.mubr.f32.mxu1 %v191_v59  ;;  %v1330_v63 = vpop.f32.mrf.mxu0  ;;  %2895 = vmatpush2.msra.mxu0 %v674_v42  ;;  %v798_v62 = vld [vmem:[#allocation5 + $0x7b0] sm:$0xff]  ;;  %v667_v28 = vld [vmem:[#allocation5 + $0x398] sm:$0xff]  ;;  %v196_v46 = vld [vmem:[#allocation2 + $0x4e0] sm:$0xff] }
 0x1a6   :  { %v1779_v33 = vpop.f32.mrf.mxu1  ;;  %3344 = vmatpush2.msra.mxu1 %v802_v23  ;;  %2896 = vmatprep.subr.mxu0 %v671_v53 }
 0x1a7   :  { %6601 = vst [vmem:[#allocation33_spill] sm:$0xff] %v5934_v16  ;;  %v5936_v48 = vadd.f32 %v1779_v33, %v1330_v63  ;;  %3345 = vmatprep.subr.mxu1 %v799_v56  ;;  %v1334_v24 = vpop.f32.mrf.mxu0  ;;  %2135 = vmatmul.mubr.f32.gmra.mxu0 %v188_v7  ;;  %v198_v16 = vld [vmem:[#allocation2 + $0x4f0] sm:$0xff]  ;;  %v205_v63 = vld [vmem:[#allocation2 + $0x528] sm:$0xff]  ;;  %v207_v33 = vld [vmem:[#allocation2 + $0x538] sm:$0xff] }
 0x1a8   :  { %v1783_v8 = vpop.f32.mrf.mxu1  ;;  %2584 = vmatmul.mubr.f32.gmra.mxu1 %v190_v44  ;;  %2140 = vmatprep.mubr.f32.mxu0 %v197_v9  ;;  %v666_v56 = vld [vmem:[#allocation5 + $0x390] sm:$0xff]  ;;  %v791_v9 = vld [vmem:[#allocation5 + $0x778] sm:$0xff] }
 0x1a9   :  { %6602 = vst [vmem:[#allocation34_spill] sm:$0xff] %v5936_v48  ;;  %v5938_v59 = vadd.f32 %v1783_v8, %v1334_v24  ;;  %2589 = vmatprep.mubr.f32.mxu1 %v199_v36  ;;  %v1336_v42 = vpop.f32.mrf.mxu0  ;;  %2897 = vmatpush2.msra.mxu0 %v670_v15  ;;  %v794_v44 = vld [vmem:[#allocation5 + $0x790] sm:$0xff]  ;;  %v663_v8 = vld [vmem:[#allocation5 + $0x378] sm:$0xff]  ;;  %v204_v24 = vld [vmem:[#allocation2 + $0x520] sm:$0xff] }
 0x1aa   :  { %v1785_v23 = vpop.f32.mrf.mxu1  ;;  %3346 = vmatpush2.msra.mxu1 %v798_v62  ;;  %2898 = vmatprep.subr.mxu0 %v667_v28 }
 0x1ab   :  { %6603 = vst [vmem:[#allocation35_spill] sm:$0xff] %v5938_v59  ;;  %v5940_v53 = vadd.f32 %v1785_v23, %v1336_v42  ;;  %3347 = vmatprep.subr.mxu1 %v795_v32  ;;  %v1340_v7 = vpop.f32.mrf.mxu0  ;;  %2141 = vmatmul.mubr.f32.gmra.mxu0 %v196_v46  ;;  %v206_v59 = vld [vmem:[#allocation2 + $0x530] sm:$0xff]  ;;  %v213_v42 = vld [vmem:[#allocation2 + $0x568] sm:$0xff]  ;;  %v215_v23 = vld [vmem:[#allocation2 + $0x578] sm:$0xff] }
 0x1ac   :  { %v1789_v48 = vpop.f32.mrf.mxu1  ;;  %2590 = vmatmul.mubr.f32.gmra.mxu1 %v198_v16  ;;  %2146 = vmatprep.mubr.f32.mxu0 %v205_v63  ;;  %v662_v32 = vld [vmem:[#allocation5 + $0x370] sm:$0xff]  ;;  %v787_v63 = vld [vmem:[#allocation5 + $0x758] sm:$0xff] }
 0x1ad   :  { %6604 = vst [vmem:[#allocation36_spill] sm:$0xff] %v5940_v53  ;;  %v5942_v36 = vadd.f32 %v1789_v48, %v1340_v7  ;;  %2595 = vmatprep.mubr.f32.mxu1 %v207_v33  ;;  %v1342_v15 = vpop.f32.mrf.mxu0  ;;  %2899 = vmatpush2.msra.mxu0 %v666_v56  ;;  %v790_v16 = vld [vmem:[#allocation5 + $0x770] sm:$0xff]  ;;  %v659_v48 = vld [vmem:[#allocation5 + $0x358] sm:$0xff]  ;;  %v212_v7 = vld [vmem:[#allocation2 + $0x560] sm:$0xff] }
 0x1ae   :  { %v1791_v62 = vpop.f32.mrf.mxu1  ;;  %3348 = vmatpush2.msra.mxu1 %v794_v44  ;;  %2900 = vmatprep.subr.mxu0 %v663_v8 }
 0x1af   :  { %6605 = vst [vmem:[#allocation37_spill] sm:$0xff] %v5942_v36  ;;  %v5944_v28 = vadd.f32 %v1791_v62, %v1342_v15  ;;  %3349 = vmatprep.subr.mxu1 %v791_v9  ;;  %v1346_v46 = vpop.f32.mrf.mxu0  ;;  %2147 = vmatmul.mubr.f32.gmra.mxu0 %v204_v24  ;;  %v214_v36 = vld [vmem:[#allocation2 + $0x570] sm:$0xff]  ;;  %v221_v15 = vld [vmem:[#allocation2 + $0x5a8] sm:$0xff]  ;;  %v223_v62 = vld [vmem:[#allocation2 + $0x5b8] sm:$0xff] }
 0x1b0   :  { %v1795_v53 = vpop.f32.mrf.mxu1  ;;  %2596 = vmatmul.mubr.f32.gmra.mxu1 %v206_v59  ;;  %2152 = vmatprep.mubr.f32.mxu0 %v213_v42  ;;  %v658_v9 = vld [vmem:[#allocation5 + $0x350] sm:$0xff]  ;;  %v783_v42 = vld [vmem:[#allocation5 + $0x738] sm:$0xff] }
 0x1b1   :  { %6606 = vst [vmem:[#allocation38_spill] sm:$0xff] %v5944_v28  ;;  %v5946_v33 = vadd.f32 %v1795_v53, %v1346_v46  ;;  %2601 = vmatprep.mubr.f32.mxu1 %v215_v23  ;;  %v1348_v56 = vpop.f32.mrf.mxu0  ;;  %2901 = vmatpush2.msra.mxu0 %v662_v32  ;;  %v786_v59 = vld [vmem:[#allocation5 + $0x750] sm:$0xff]  ;;  %v655_v53 = vld [vmem:[#allocation5 + $0x338] sm:$0xff]  ;;  %v220_v46 = vld [vmem:[#allocation2 + $0x5a0] sm:$0xff] }
 0x1b2   :  { %v1797_v44 = vpop.f32.mrf.mxu1  ;;  %3350 = vmatpush2.msra.mxu1 %v790_v16  ;;  %2902 = vmatprep.subr.mxu0 %v659_v48 }
 0x1b3   :  { %6607 = vst [vmem:[#allocation39_spill] sm:$0xff] %v5946_v33  ;;  %v5948_v8 = vadd.f32 %v1797_v44, %v1348_v56  ;;  %3351 = vmatprep.subr.mxu1 %v787_v63  ;;  %v1352_v24 = vpop.f32.mrf.mxu0  ;;  %2153 = vmatmul.mubr.f32.gmra.mxu0 %v212_v7  ;;  %v222_v33 = vld [vmem:[#allocation2 + $0x5b0] sm:$0xff]  ;;  %v229_v56 = vld [vmem:[#allocation2 + $0x5e8] sm:$0xff]  ;;  %v231_v44 = vld [vmem:[#allocation2 + $0x5f8] sm:$0xff] }
 0x1b4   :  { %v1801_v28 = vpop.f32.mrf.mxu1  ;;  %2602 = vmatmul.mubr.f32.gmra.mxu1 %v214_v36  ;;  %2158 = vmatprep.mubr.f32.mxu0 %v221_v15  ;;  %v654_v63 = vld [vmem:[#allocation5 + $0x330] sm:$0xff]  ;;  %v779_v15 = vld [vmem:[#allocation5 + $0x718] sm:$0xff] }
 0x1b5   :  { %6608 = vst [vmem:[#allocation40_spill] sm:$0xff] %v5948_v8  ;;  %v5950_v23 = vadd.f32 %v1801_v28, %v1352_v24  ;;  %2607 = vmatprep.mubr.f32.mxu1 %v223_v62  ;;  %v1354_v32 = vpop.f32.mrf.mxu0  ;;  %2903 = vmatpush2.msra.mxu0 %v658_v9  ;;  %v782_v36 = vld [vmem:[#allocation5 + $0x730] sm:$0xff]  ;;  %v651_v28 = vld [vmem:[#allocation5 + $0x318] sm:$0xff]  ;;  %v228_v24 = vld [vmem:[#allocation2 + $0x5e0] sm:$0xff] }
 0x1b6   :  { %v1803_v16 = vpop.f32.mrf.mxu1  ;;  %3352 = vmatpush2.msra.mxu1 %v786_v59  ;;  %2904 = vmatprep.subr.mxu0 %v655_v53 }
 0x1b7   :  { %6609 = vst [vmem:[#allocation41_spill] sm:$0xff] %v5950_v23  ;;  %v5952_v48 = vadd.f32 %v1803_v16, %v1354_v32  ;;  %3353 = vmatprep.subr.mxu1 %v783_v42  ;;  %v1358_v7 = vpop.f32.mrf.mxu0  ;;  %2159 = vmatmul.mubr.f32.gmra.mxu0 %v220_v46  ;;  %v230_v23 = vld [vmem:[#allocation2 + $0x5f0] sm:$0xff]  ;;  %v237_v32 = vld [vmem:[#allocation2 + $0x628] sm:$0xff]  ;;  %v239_v16 = vld [vmem:[#allocation2 + $0x638] sm:$0xff] }
 0x1b8   :  { %v1807_v8 = vpop.f32.mrf.mxu1  ;;  %2608 = vmatmul.mubr.f32.gmra.mxu1 %v222_v33  ;;  %2164 = vmatprep.mubr.f32.mxu0 %v229_v56  ;;  %v650_v42 = vld [vmem:[#allocation5 + $0x310] sm:$0xff]  ;;  %v775_v56 = vld [vmem:[#allocation5 + $0x6f8] sm:$0xff] }
 0x1b9   :  { %6610 = vst [vmem:[#allocation42_spill] sm:$0xff] %v5952_v48  ;;  %v5954_v62 = vadd.f32 %v1807_v8, %v1358_v7  ;;  %2613 = vmatprep.mubr.f32.mxu1 %v231_v44  ;;  %v1360_v9 = vpop.f32.mrf.mxu0  ;;  %2905 = vmatpush2.msra.mxu0 %v654_v63  ;;  %v778_v33 = vld [vmem:[#allocation5 + $0x710] sm:$0xff]  ;;  %v647_v8 = vld [vmem:[#allocation5 + $0x2f8] sm:$0xff]  ;;  %v236_v7 = vld [vmem:[#allocation2 + $0x620] sm:$0xff] }
 0x1ba   :  { %v1809_v59 = vpop.f32.mrf.mxu1  ;;  %3354 = vmatpush2.msra.mxu1 %v782_v36  ;;  %2906 = vmatprep.subr.mxu0 %v651_v28 }
 0x1bb   :  { %6611 = vst [vmem:[#allocation43_spill] sm:$0xff] %v5954_v62  ;;  %v5956_v53 = vadd.f32 %v1809_v59, %v1360_v9  ;;  %3355 = vmatprep.subr.mxu1 %v779_v15  ;;  %v1364_v46 = vpop.f32.mrf.mxu0  ;;  %2165 = vmatmul.mubr.f32.gmra.mxu0 %v228_v24  ;;  %v238_v62 = vld [vmem:[#allocation2 + $0x630] sm:$0xff]  ;;  %v245_v9 = vld [vmem:[#allocation2 + $0x668] sm:$0xff]  ;;  %v247_v59 = vld [vmem:[#allocation2 + $0x678] sm:$0xff] }
 0x1bc   :  { %v1813_v48 = vpop.f32.mrf.mxu1  ;;  %2614 = vmatmul.mubr.f32.gmra.mxu1 %v230_v23  ;;  %2170 = vmatprep.mubr.f32.mxu0 %v237_v32  ;;  %v646_v15 = vld [vmem:[#allocation5 + $0x2f0] sm:$0xff]  ;;  %v771_v32 = vld [vmem:[#allocation5 + $0x6d8] sm:$0xff] }
 0x1bd   :  { %6612 = vst [vmem:[#allocation44_spill] sm:$0xff] %v5956_v53  ;;  %v5958_v44 = vadd.f32 %v1813_v48, %v1364_v46  ;;  %2619 = vmatprep.mubr.f32.mxu1 %v239_v16  ;;  %v1366_v63 = vpop.f32.mrf.mxu0  ;;  %2907 = vmatpush2.msra.mxu0 %v650_v42  ;;  %v774_v23 = vld [vmem:[#allocation5 + $0x6f0] sm:$0xff]  ;;  %v643_v48 = vld [vmem:[#allocation5 + $0x2d8] sm:$0xff]  ;;  %v244_v46 = vld [vmem:[#allocation2 + $0x660] sm:$0xff] }
 0x1be   :  { %v1815_v36 = vpop.f32.mrf.mxu1  ;;  %3356 = vmatpush2.msra.mxu1 %v778_v33  ;;  %2908 = vmatprep.subr.mxu0 %v647_v8 }
 0x1bf   :  { %6613 = vst [vmem:[#allocation45_spill] sm:$0xff] %v5958_v44  ;;  %v5960_v28 = vadd.f32 %v1815_v36, %v1366_v63  ;;  %3357 = vmatprep.subr.mxu1 %v775_v56  ;;  %v1370_v24 = vpop.f32.mrf.mxu0  ;;  %2171 = vmatmul.mubr.f32.gmra.mxu0 %v236_v7  ;;  %v246_v44 = vld [vmem:[#allocation2 + $0x670] sm:$0xff]  ;;  %v253_v63 = vld [vmem:[#allocation2 + $0x6a8] sm:$0xff]  ;;  %v255_v36 = vld [vmem:[#allocation2 + $0x6b8] sm:$0xff] }
 0x1c0   :  { %v1819_v53 = vpop.f32.mrf.mxu1  ;;  %2620 = vmatmul.mubr.f32.gmra.mxu1 %v238_v62  ;;  %2176 = vmatprep.mubr.f32.mxu0 %v245_v9  ;;  %v642_v56 = vld [vmem:[#allocation5 + $0x2d0] sm:$0xff]  ;;  %v767_v9 = vld [vmem:[#allocation5 + $0x6b8] sm:$0xff] }
 0x1c1   :  { %6614 = vst [vmem:[#allocation46_spill] sm:$0xff] %v5960_v28  ;;  %v5962_v16 = vadd.f32 %v1819_v53, %v1370_v24  ;;  %2625 = vmatprep.mubr.f32.mxu1 %v247_v59  ;;  %v1372_v42 = vpop.f32.mrf.mxu0  ;;  %2909 = vmatpush2.msra.mxu0 %v646_v15  ;;  %v770_v62 = vld [vmem:[#allocation5 + $0x6d0] sm:$0xff]  ;;  %v639_v53 = vld [vmem:[#allocation5 + $0x2b8] sm:$0xff]  ;;  %v252_v24 = vld [vmem:[#allocation2 + $0x6a0] sm:$0xff] }
 0x1c2   :  { %v1821_v33 = vpop.f32.mrf.mxu1  ;;  %3358 = vmatpush2.msra.mxu1 %v774_v23  ;;  %2910 = vmatprep.subr.mxu0 %v643_v48 }
 0x1c3   :  { %6615 = vst [vmem:[#allocation47_spill] sm:$0xff] %v5962_v16  ;;  %v5964_v8 = vadd.f32 %v1821_v33, %v1372_v42  ;;  %3359 = vmatprep.subr.mxu1 %v771_v32  ;;  %v1376_v7 = vpop.f32.mrf.mxu0  ;;  %2177 = vmatmul.mubr.f32.gmra.mxu0 %v244_v46  ;;  %v254_v16 = vld [vmem:[#allocation2 + $0x6b0] sm:$0xff]  ;;  %v261_v42 = vld [vmem:[#allocation2 + $0x6e8] sm:$0xff]  ;;  %v263_v33 = vld [vmem:[#allocation2 + $0x6f8] sm:$0xff] }
 0x1c4   :  { %v1825_v28 = vpop.f32.mrf.mxu1  ;;  %2626 = vmatmul.mubr.f32.gmra.mxu1 %v246_v44  ;;  %2182 = vmatprep.mubr.f32.mxu0 %v253_v63  ;;  %v638_v32 = vld [vmem:[#allocation5 + $0x2b0] sm:$0xff]  ;;  %v763_v63 = vld [vmem:[#allocation5 + $0x698] sm:$0xff] }
 0x1c5   :  { %6616 = vst [vmem:[#allocation48_spill] sm:$0xff] %v5964_v8  ;;  %v5966_v59 = vadd.f32 %v1825_v28, %v1376_v7  ;;  %2631 = vmatprep.mubr.f32.mxu1 %v255_v36  ;;  %v1378_v15 = vpop.f32.mrf.mxu0  ;;  %2911 = vmatpush2.msra.mxu0 %v642_v56  ;;  %v766_v44 = vld [vmem:[#allocation5 + $0x6b0] sm:$0xff]  ;;  %v635_v28 = vld [vmem:[#allocation5 + $0x298] sm:$0xff]  ;;  %v260_v7 = vld [vmem:[#allocation2 + $0x6e0] sm:$0xff] }
 0x1c6   :  { %v1827_v23 = vpop.f32.mrf.mxu1  ;;  %3360 = vmatpush2.msra.mxu1 %v770_v62  ;;  %2912 = vmatprep.subr.mxu0 %v639_v53 }
 0x1c7   :  { %6617 = vst [vmem:[#allocation49_spill] sm:$0xff] %v5966_v59  ;;  %v5968_v48 = vadd.f32 %v1827_v23, %v1378_v15  ;;  %3361 = vmatprep.subr.mxu1 %v767_v9  ;;  %v1382_v46 = vpop.f32.mrf.mxu0  ;;  %2183 = vmatmul.mubr.f32.gmra.mxu0 %v252_v24  ;;  %v262_v59 = vld [vmem:[#allocation2 + $0x6f0] sm:$0xff]  ;;  %v269_v15 = vld [vmem:[#allocation2 + $0x728] sm:$0xff]  ;;  %v271_v23 = vld [vmem:[#allocation2 + $0x738] sm:$0xff] }
 0x1c8   :  { %v1831_v8 = vpop.f32.mrf.mxu1  ;;  %2632 = vmatmul.mubr.f32.gmra.mxu1 %v254_v16  ;;  %2188 = vmatprep.mubr.f32.mxu0 %v261_v42  ;;  %v634_v9 = vld [vmem:[#allocation5 + $0x290] sm:$0xff]  ;;  %v759_v42 = vld [vmem:[#allocation5 + $0x678] sm:$0xff] }
 0x1c9   :  { %6618 = vst [vmem:[#allocation50_spill] sm:$0xff] %v5968_v48  ;;  %v5970_v36 = vadd.f32 %v1831_v8, %v1382_v46  ;;  %2637 = vmatprep.mubr.f32.mxu1 %v263_v33  ;;  %v1384_v56 = vpop.f32.mrf.mxu0  ;;  %2913 = vmatpush2.msra.mxu0 %v638_v32  ;;  %v762_v16 = vld [vmem:[#allocation5 + $0x690] sm:$0xff]  ;;  %v631_v8 = vld [vmem:[#allocation5 + $0x278] sm:$0xff]  ;;  %v268_v46 = vld [vmem:[#allocation2 + $0x720] sm:$0xff] }
 0x1ca   :  { %v1833_v62 = vpop.f32.mrf.mxu1  ;;  %3362 = vmatpush2.msra.mxu1 %v766_v44  ;;  %2914 = vmatprep.subr.mxu0 %v635_v28 }
 0x1cb   :  { %6619 = vst [vmem:[#allocation51_spill] sm:$0xff] %v5970_v36  ;;  %v5972_v53 = vadd.f32 %v1833_v62, %v1384_v56  ;;  %3363 = vmatprep.subr.mxu1 %v763_v63  ;;  %v1388_v24 = vpop.f32.mrf.mxu0  ;;  %2189 = vmatmul.mubr.f32.gmra.mxu0 %v260_v7  ;;  %v270_v36 = vld [vmem:[#allocation2 + $0x730] sm:$0xff]  ;;  %v277_v56 = vld [vmem:[#allocation2 + $0x768] sm:$0xff]  ;;  %v279_v62 = vld [vmem:[#allocation2 + $0x778] sm:$0xff] }
 0x1cc   :  { %v1837_v48 = vpop.f32.mrf.mxu1  ;;  %2638 = vmatmul.mubr.f32.gmra.mxu1 %v262_v59  ;;  %2194 = vmatprep.mubr.f32.mxu0 %v269_v15  ;;  %v630_v63 = vld [vmem:[#allocation5 + $0x270] sm:$0xff] }
 0x1cd   :  { %6620 = vst [vmem:[#allocation52_spill] sm:$0xff] %v5972_v53  ;;  %v5974_v33 = vadd.f32 %v1837_v48, %v1388_v24  ;;  %2643 = vmatprep.mubr.f32.mxu1 %v271_v23  ;;  %v1390_v32 = vpop.f32.mrf.mxu0  ;;  %2915 = vmatpush2.msra.mxu0 %v634_v9  ;;  %v758_v59 = vld [vmem:[#allocation5 + $0x670] sm:$0xff]  ;;  %v627_v48 = vld [vmem:[#allocation5 + $0x258] sm:$0xff]  ;;  %v276_v23 = vld [vmem:[#allocation2 + $0x760] sm:$0xff] }
 0x1ce   :  { %v1839_v44 = vpop.f32.mrf.mxu1  ;;  %3364 = vmatpush2.msra.mxu1 %v762_v16  ;;  %2916 = vmatprep.subr.mxu0 %v631_v8  ;;  %v278_v24 = vld [vmem:[#allocation2 + $0x770] sm:$0xff] }
 0x1cf   :  { %6621 = vst [vmem:[#allocation53_spill] sm:$0xff] %v5974_v33  ;;  %v5976_v28 = vadd.f32 %v1839_v44, %v1390_v32  ;;  %3365 = vmatprep.subr.mxu1 %v759_v42  ;;  %v1394_v7 = vpop.f32.mrf.mxu0  ;;  %2195 = vmatmul.mubr.f32.gmra.mxu0 %v268_v46  ;;  %v755_v33 = vld [vmem:[#allocation5 + $0x658] sm:$0xff]  ;;  %v285_v32 = vld [vmem:[#allocation2 + $0x7a8] sm:$0xff]  ;;  %v626_v42 = vld [vmem:[#allocation5 + $0x250] sm:$0xff] }
 0x1d0   :  { %v1843_v53 = vpop.f32.mrf.mxu1  ;;  %2644 = vmatmul.mubr.f32.gmra.mxu1 %v270_v36  ;;  %2200 = vmatprep.mubr.f32.mxu0 %v277_v56  ;;  %v287_v44 = vld [vmem:[#allocation2 + $0x7b8] sm:$0xff]  ;;  %v754_v36 = vld [vmem:[#allocation5 + $0x650] sm:$0xff] }
 0x1d1   :  { %6622 = vst [vmem:[#allocation54_spill] sm:$0xff] %v5976_v28  ;;  %v5978_v15 = vadd.f32 %v1843_v53, %v1394_v7  ;;  %2649 = vmatprep.mubr.f32.mxu1 %v279_v62  ;;  %v1396_v9 = vpop.f32.mrf.mxu0  ;;  %2917 = vmatpush2.msra.mxu0 %v630_v63  ;;  %v284_v62 = vld [vmem:[#allocation2 + $0x7a0] sm:$0xff]  ;;  %v286_v7 = vld [vmem:[#allocation2 + $0x7b0] sm:$0xff]  ;;  %v293_v63 = vld [vmem:[#allocation2 + $0x7e8] sm:$0xff] }
 0x1d2   :  { %v1845_v16 = vpop.f32.mrf.mxu1  ;;  %3366 = vmatpush2.msra.mxu1 %v758_v59  ;;  %2918 = vmatprep.subr.mxu0 %v627_v48  ;;  %v295_v59 = vld [vmem:[#allocation2 + $0x7f8] sm:$0xff] }
 0x1d3   :  { %6623 = vst [vmem:[#allocation55_spill] sm:$0xff] %v5978_v15  ;;  %v5980_v8 = vadd.f32 %v1845_v16, %v1396_v9  ;;  %3367 = vmatprep.subr.mxu1 %v755_v33  ;;  %v1400_v46 = vpop.f32.mrf.mxu0  ;;  %2201 = vmatmul.mubr.f32.gmra.mxu0 %v276_v23  ;;  %v623_v33 = vld [vmem:[#allocation5 + $0x238] sm:$0xff]  ;;  %v292_v23 = vld [vmem:[#allocation2 + $0x7e0] sm:$0xff] }
 0x1d4   :  { %v1849_v53 = vpop.f32.mrf.mxu1  ;;  %2650 = vmatmul.mubr.f32.gmra.mxu1 %v278_v24  ;;  %2206 = vmatprep.mubr.f32.mxu0 %v285_v32  ;;  %v622_v24 = vld [vmem:[#allocation5 + $0x230] sm:$0xff] }
 0x1d5   :  { %6624 = vst [vmem:[#allocation56_spill] sm:$0xff] %v5980_v8  ;;  %v5982_v56 = vadd.f32 %v1849_v53, %v1400_v46  ;;  %2655 = vmatprep.mubr.f32.mxu1 %v287_v44  ;;  %v1402_v15 = vpop.f32.mrf.mxu0  ;;  %2919 = vmatpush2.msra.mxu0 %v626_v42  ;;  %v294_v32 = vld [vmem:[#allocation2 + $0x7f0] sm:$0xff]  ;;  %v751_v44 = vld [vmem:[#allocation5 + $0x638] sm:$0xff]  ;;  %v301_v42 = vld [vmem:[#allocation2 + $0x828] sm:$0xff] }
 0x1d6   :  { %v1851_v28 = vpop.f32.mrf.mxu1  ;;  %3368 = vmatpush2.msra.mxu1 %v754_v36  ;;  %v750_v53 = vld [vmem:[#allocation5 + $0x630] sm:$0xff]  ;;  %v303_v36 = vld [vmem:[#allocation2 + $0x838] sm:$0xff]  ;;  %2920 = vmatprep.subr.mxu0 %v623_v33 }
 0x1d7   :  { %6625 = vst [vmem:[#allocation57_spill] sm:$0xff] %v5982_v56  ;;  %v5984_v48 = vadd.f32 %v1851_v28, %v1402_v15  ;;  %v1406_v9 = vpop.f32.mrf.mxu0  ;;  %2207 = vmatmul.mubr.f32.gmra.mxu0 %v284_v62  ;;  %3369 = vmatprep.subr.mxu1 %v751_v44  ;;  %v311_v44 = vld [vmem:[#allocation2 + $0x878] sm:$0xff] }
 0x1d8   :  { %v1855_v16 = vpop.f32.mrf.mxu1  ;;  %2656 = vmatmul.mubr.f32.gmra.mxu1 %v286_v7  ;;  %2212 = vmatprep.mubr.f32.mxu0 %v293_v63  ;;  %v300_v7 = vld [vmem:[#allocation2 + $0x820] sm:$0xff]  ;;  %v302_v63 = vld [vmem:[#allocation2 + $0x830] sm:$0xff] }
 0x1d9   :  { %6626 = vst [vmem:[#allocation58_spill] sm:$0xff] %v5984_v48  ;;  %v5986_v46 = vadd.f32 %v1855_v16, %v1406_v9  ;;  %2661 = vmatprep.mubr.f32.mxu1 %v295_v59  ;;  %v1408_v56 = vpop.f32.mrf.mxu0  ;;  %2921 = vmatpush2.msra.mxu0 %v622_v24  ;;  %v309_v9 = vld [vmem:[#allocation2 + $0x868] sm:$0xff]  ;;  %v619_v16 = vld [vmem:[#allocation5 + $0x218] sm:$0xff] }
 0x1da   :  { %v1857_v8 = vpop.f32.mrf.mxu1  ;;  %3370 = vmatpush2.msra.mxu1 %v750_v53  ;;  %2922 = vmatprep.subr.mxu0 %v619_v16  ;;  %v317_v16 = vld [vmem:[#allocation2 + $0x8a8] sm:$0xff] }
 0x1db   :  { %6627 = vst [vmem:[#allocation59_spill] sm:$0xff] %v5986_v46  ;;  %v5988_v28 = vadd.f32 %v1857_v8, %v1408_v56  ;;  %v1412_v15 = vpop.f32.mrf.mxu0  ;;  %2213 = vmatmul.mubr.f32.gmra.mxu0 %v292_v23  ;;  %v747_v46 = vld [vmem:[#allocation5 + $0x618] sm:$0xff]  ;;  %v618_v8 = vld [vmem:[#allocation5 + $0x210] sm:$0xff] }
 0x1dc   :  { %v1861_v62 = vpop.f32.mrf.mxu1  ;;  %2662 = vmatmul.mubr.f32.gmra.mxu1 %v294_v32  ;;  %2218 = vmatprep.mubr.f32.mxu0 %v301_v42  ;;  %v746_v56 = vld [vmem:[#allocation5 + $0x610] sm:$0xff]  ;;  %v308_v42 = vld [vmem:[#allocation2 + $0x860] sm:$0xff] }
 0x1dd   :  { %6628 = vst [vmem:[#allocation60_spill] sm:$0xff] %v5988_v28  ;;  %v5990_v59 = vadd.f32 %v1861_v62, %v1412_v15  ;;  %2667 = vmatprep.mubr.f32.mxu1 %v303_v36  ;;  %v1414_v48 = vpop.f32.mrf.mxu0  ;;  %3371 = vmatprep.subr.mxu1 %v747_v46  ;;  %v310_v36 = vld [vmem:[#allocation2 + $0x870] sm:$0xff]  ;;  %v455_v28 = vld [vmem:[#allocation2 + $0xcf8] sm:$0xff] }
 0x1de   :  { %v1863_v33 = vpop.f32.mrf.mxu1  ;;  %2923 = vmatpush2.msra.mxu0 %v618_v8  ;;  %3372 = vmatpush2.msra.mxu1 %v746_v56  ;;  %v325_v56 = vld [vmem:[#allocation2 + $0x8e8] sm:$0xff] }
 0x1df   :  { %6629 = vst [vmem:[#allocation61_spill] sm:$0xff] %v5990_v59  ;;  %v5992_v24 = vadd.f32 %v1863_v33, %v1414_v48  ;;  %v1418_v23 = vpop.f32.mrf.mxu0  ;;  %2219 = vmatmul.mubr.f32.gmra.mxu0 %v300_v7  ;;  %v319_v59 = vld [vmem:[#allocation2 + $0x8b8] sm:$0xff]  ;;  %v316_v7 = vld [vmem:[#allocation2 + $0x8a0] sm:$0xff] }
 0x1e0   :  { %v1867_v32 = vpop.f32.mrf.mxu1  ;;  %2668 = vmatmul.mubr.f32.gmra.mxu1 %v302_v63  ;;  %2224 = vmatprep.mubr.f32.mxu0 %v309_v9  ;;  %v318_v63 = vld [vmem:[#allocation2 + $0x8b0] sm:$0xff] }
 0x1e1   :  { %6630 = vst [vmem:[#allocation62_spill] sm:$0xff] %v5992_v24  ;;  %v5994_v53 = vadd.f32 %v1867_v32, %v1418_v23  ;;  %2673 = vmatprep.mubr.f32.mxu1 %v311_v44  ;;  %v1420_v15 = vpop.f32.mrf.mxu0  ;;  %v327_v23 = vld [vmem:[#allocation2 + $0x8f8] sm:$0xff] }
 0x1e2   :  { %v1869_v62 = vpop.f32.mrf.mxu1 }
 0x1e3   :  { %6631 = vst [vmem:[#allocation63_spill] sm:$0xff] %v5994_v53  ;;  %v5996_v46 = vadd.f32 %v1869_v62, %v1420_v15  ;;  %v1424_v48 = vpop.f32.mrf.mxu0  ;;  %2225 = vmatmul.mubr.f32.gmra.mxu0 %v308_v42  ;;  %v871_v53 = vld [vmem:[#allocation5 + $0x9f8] sm:$0xff]  ;;  %v324_v42 = vld [vmem:[#allocation2 + $0x8e0] sm:$0xff] }
 0x1e4   :  { %v1873_v33 = vpop.f32.mrf.mxu1  ;;  %2674 = vmatmul.mubr.f32.gmra.mxu1 %v310_v36  ;;  %2230 = vmatprep.mubr.f32.mxu0 %v317_v16  ;;  %v326_v36 = vld [vmem:[#allocation2 + $0x8f0] sm:$0xff] }
 0x1e5   :  { %6632 = vst [vmem:[#allocation64_spill] sm:$0xff] %v5996_v46  ;;  %v5998_v8 = vadd.f32 %v1873_v33, %v1424_v48  ;;  %2679 = vmatprep.mubr.f32.mxu1 %v319_v59  ;;  %v1426_v9 = vpop.f32.mrf.mxu0  ;;  %v999_v59 = vld [vmem:[#allocation5 + $0xdf8] sm:$0xff]  ;;  %v333_v33 = vld [vmem:[#allocation2 + $0x928] sm:$0xff]  ;;  %3758 = vmatprep.subr.mxu0 %v871_v53 }
 0x1e6   :  { %v1875_v44 = vpop.f32.mrf.mxu1  ;;  %4207 = vmatprep.subr.mxu1 %v999_v59 }
 0x1e7   :  { %6633 = vst [vmem:[#allocation65_spill] sm:$0xff] %v5998_v8  ;;  %v6000_v32 = vadd.f32 %v1875_v44, %v1426_v9  ;;  %v1430_v24 = vpop.f32.mrf.mxu0  ;;  %2231 = vmatmul.mubr.f32.gmra.mxu0 %v316_v7  ;;  %v335_v8 = vld [vmem:[#allocation2 + $0x938] sm:$0xff] }
 0x1e8   :  { %v1879_v15 = vpop.f32.mrf.mxu1  ;;  %2680 = vmatmul.mubr.f32.gmra.mxu1 %v318_v63  ;;  %2236 = vmatprep.mubr.f32.mxu0 %v325_v56  ;;  %v334_v63 = vld [vmem:[#allocation2 + $0x930] sm:$0xff] }
 0x1e9   :  { %6634 = vst [vmem:[#allocation66_spill] sm:$0xff] %v6000_v32  ;;  %v6002_v62 = vadd.f32 %v1879_v15, %v1430_v24  ;;  %2685 = vmatprep.mubr.f32.mxu1 %v327_v23  ;;  %v1432_v16 = vpop.f32.mrf.mxu0  ;;  %v332_v24 = vld [vmem:[#allocation2 + $0x920] sm:$0xff]  ;;  %v341_v15 = vld [vmem:[#allocation2 + $0x968] sm:$0xff] }
 0x1ea   :  { %v1881_v48 = vpop.f32.mrf.mxu1 }
 0x1eb   :  { %6635 = vst [vmem:[#allocation67_spill] sm:$0xff] %v6002_v62  ;;  %v6004_v9 = vadd.f32 %v1881_v48, %v1432_v16  ;;  %v1436_v44 = vpop.f32.mrf.mxu0  ;;  %2237 = vmatmul.mubr.f32.gmra.mxu0 %v324_v42  ;;  %v343_v62 = vld [vmem:[#allocation2 + $0x978] sm:$0xff]  ;;  %v342_v42 = vld [vmem:[#allocation2 + $0x970] sm:$0xff]  ;;  %v349_v48 = vld [vmem:[#allocation2 + $0x9a8] sm:$0xff] }
 0x1ec   :  { %v1885_v32 = vpop.f32.mrf.mxu1  ;;  %2686 = vmatmul.mubr.f32.gmra.mxu1 %v326_v36  ;;  %2242 = vmatprep.mubr.f32.mxu0 %v333_v33  ;;  %v351_v33 = vld [vmem:[#allocation2 + $0x9b8] sm:$0xff] }
 0x1ed   :  { %6636 = vst [vmem:[#allocation68_spill] sm:$0xff] %v6004_v9  ;;  %v6006_v7 = vadd.f32 %v1885_v32, %v1436_v44  ;;  %2691 = vmatprep.mubr.f32.mxu1 %v335_v8  ;;  %v1438_v56 = vpop.f32.mrf.mxu0  ;;  %v340_v32 = vld [vmem:[#allocation2 + $0x960] sm:$0xff] }
 0x1ee   :  { %v1887_v23 = vpop.f32.mrf.mxu1 }
 0x1ef   :  { %6637 = vst [vmem:[#allocation69_spill] sm:$0xff] %v6006_v7  ;;  %v6008_v46 = vadd.f32 %v1887_v23, %v1438_v56  ;;  %v1442_v53 = vpop.f32.mrf.mxu0  ;;  %2243 = vmatmul.mubr.f32.gmra.mxu0 %v332_v24  ;;  %v348_v24 = vld [vmem:[#allocation2 + $0x9a0] sm:$0xff] }
 0x1f0   :  { %v1891_v59 = vpop.f32.mrf.mxu1  ;;  %2692 = vmatmul.mubr.f32.gmra.mxu1 %v334_v63  ;;  %2248 = vmatprep.mubr.f32.mxu0 %v341_v15  ;;  %v350_v63 = vld [vmem:[#allocation2 + $0x9b0] sm:$0xff]  ;;  %v357_v15 = vld [vmem:[#allocation2 + $0x9e8] sm:$0xff] }
 0x1f1   :  { %6638 = vst [vmem:[#allocation70_spill] sm:$0xff] %v6008_v46  ;;  %v6010_v16 = vadd.f32 %v1891_v59, %v1442_v53  ;;  %2697 = vmatprep.mubr.f32.mxu1 %v343_v62  ;;  %v1444_v36 = vpop.f32.mrf.mxu0  ;;  %v359_v53 = vld [vmem:[#allocation2 + $0x9f8] sm:$0xff] }
 0x1f2   :  { %v1893_v8 = vpop.f32.mrf.mxu1 }
 0x1f3   :  { %6639 = vst [vmem:[#allocation71_spill] sm:$0xff] %v6010_v16  ;;  %v6012_v44 = vadd.f32 %v1893_v8, %v1444_v36  ;;  %v1448_v7 = vpop.f32.mrf.mxu0  ;;  %2249 = vmatmul.mubr.f32.gmra.mxu0 %v340_v32  ;;  %v365_v8 = vld [vmem:[#allocation2 + $0xa28] sm:$0xff] }
 0x1f4   :  { %v1897_v9 = vpop.f32.mrf.mxu1  ;;  %2698 = vmatmul.mubr.f32.gmra.mxu1 %v342_v42  ;;  %2254 = vmatprep.mubr.f32.mxu0 %v349_v48  ;;  %v367_v48 = vld [vmem:[#allocation2 + $0xa38] sm:$0xff] }
 0x1f5   :  { %6640 = vst [vmem:[#allocation72_spill] sm:$0xff] %v6012_v44  ;;  %v6014_v56 = vadd.f32 %v1897_v9, %v1448_v7  ;;  %2703 = vmatprep.mubr.f32.mxu1 %v351_v33  ;;  %v1450_v23 = vpop.f32.mrf.mxu0  ;;  %v356_v9 = vld [vmem:[#allocation2 + $0x9e0] sm:$0xff]  ;;  %v358_v7 = vld [vmem:[#allocation2 + $0x9f0] sm:$0xff] }
 0x1f6   :  { %v1899_v62 = vpop.f32.mrf.mxu1 }
 0x1f7   :  { %6641 = vst [vmem:[#allocation73_spill] sm:$0xff] %v6014_v56  ;;  %v6016_v59 = vadd.f32 %v1899_v62, %v1450_v23  ;;  %v1454_v16 = vpop.f32.mrf.mxu0  ;;  %2255 = vmatmul.mubr.f32.gmra.mxu0 %v348_v24  ;;  %v373_v62 = vld [vmem:[#allocation2 + $0xa68] sm:$0xff] }
 0x1f8   :  { %v1903_v46 = vpop.f32.mrf.mxu1  ;;  %2704 = vmatmul.mubr.f32.gmra.mxu1 %v350_v63  ;;  %2260 = vmatprep.mubr.f32.mxu0 %v357_v15  ;;  %v375_v15 = vld [vmem:[#allocation2 + $0xa78] sm:$0xff] }
 0x1f9   :  { %6642 = vst [vmem:[#allocation74_spill] sm:$0xff] %v6016_v59  ;;  %v6018_v36 = vadd.f32 %v1903_v46, %v1454_v16  ;;  %2709 = vmatprep.mubr.f32.mxu1 %v359_v53  ;;  %v1456_v32 = vpop.f32.mrf.mxu0  ;;  %v364_v46 = vld [vmem:[#allocation2 + $0xa20] sm:$0xff]  ;;  %v366_v16 = vld [vmem:[#allocation2 + $0xa30] sm:$0xff] }
 0x1fa   :  { %v1905_v42 = vpop.f32.mrf.mxu1 }
 0x1fb   :  { %6643 = vst [vmem:[#allocation75_spill] sm:$0xff] %v6018_v36  ;;  %v6020_v33 = vadd.f32 %v1905_v42, %v1456_v32  ;;  %v1460_v56 = vpop.f32.mrf.mxu0  ;;  %2261 = vmatmul.mubr.f32.gmra.mxu0 %v356_v9  ;;  %v381_v42 = vld [vmem:[#allocation2 + $0xaa8] sm:$0xff] }
 0x1fc   :  { %v1909_v44 = vpop.f32.mrf.mxu1  ;;  %2710 = vmatmul.mubr.f32.gmra.mxu1 %v358_v7  ;;  %2266 = vmatprep.mubr.f32.mxu0 %v365_v8  ;;  %v383_v8 = vld [vmem:[#allocation2 + $0xab8] sm:$0xff] }
 0x1fd   :  { %6644 = vst [vmem:[#allocation76_spill] sm:$0xff] %v6020_v33  ;;  %v6022_v23 = vadd.f32 %v1909_v44, %v1460_v56  ;;  %2715 = vmatprep.mubr.f32.mxu1 %v367_v48  ;;  %v1462_v24 = vpop.f32.mrf.mxu0  ;;  %v372_v44 = vld [vmem:[#allocation2 + $0xa60] sm:$0xff]  ;;  %v374_v56 = vld [vmem:[#allocation2 + $0xa70] sm:$0xff] }
 0x1fe   :  { %v1911_v63 = vpop.f32.mrf.mxu1 }
 0x1ff   :  { %6645 = vst [vmem:[#allocation77_spill] sm:$0xff] %v6022_v23  ;;  %v6024_v53 = vadd.f32 %v1911_v63, %v1462_v24  ;;  %v1466_v36 = vpop.f32.mrf.mxu0  ;;  %2267 = vmatmul.mubr.f32.gmra.mxu0 %v364_v46  ;;  %v389_v63 = vld [vmem:[#allocation2 + $0xae8] sm:$0xff] }
 0x200   :  { %v1915_v59 = vpop.f32.mrf.mxu1  ;;  %2716 = vmatmul.mubr.f32.gmra.mxu1 %v366_v16  ;;  %2272 = vmatprep.mubr.f32.mxu0 %v373_v62  ;;  %v391_v62 = vld [vmem:[#allocation2 + $0xaf8] sm:$0xff] }
 0x201   :  { %6646 = vst [vmem:[#allocation78_spill] sm:$0xff] %v6024_v53  ;;  %v6026_v32 = vadd.f32 %v1915_v59, %v1466_v36  ;;  %2721 = vmatprep.mubr.f32.mxu1 %v375_v15  ;;  %v1468_v9 = vpop.f32.mrf.mxu0  ;;  %v380_v59 = vld [vmem:[#allocation2 + $0xaa0] sm:$0xff]  ;;  %v382_v36 = vld [vmem:[#allocation2 + $0xab0] sm:$0xff] }
 0x202   :  { %v1917_v7 = vpop.f32.mrf.mxu1 }
 0x203   :  { %6647 = vst [vmem:[#allocation79_spill] sm:$0xff] %v6026_v32  ;;  %v6028_v48 = vadd.f32 %v1917_v7, %v1468_v9  ;;  %v1472_v23 = vpop.f32.mrf.mxu0  ;;  %2273 = vmatmul.mubr.f32.gmra.mxu0 %v372_v44  ;;  %v397_v7 = vld [vmem:[#allocation2 + $0xb28] sm:$0xff] }
 0x204   :  { %v1921_v33 = vpop.f32.mrf.mxu1  ;;  %2722 = vmatmul.mubr.f32.gmra.mxu1 %v374_v56  ;;  %2278 = vmatprep.mubr.f32.mxu0 %v381_v42  ;;  %v399_v42 = vld [vmem:[#allocation2 + $0xb38] sm:$0xff] }
 0x205   :  { %6648 = vst [vmem:[#allocation80_spill] sm:$0xff] %v6028_v48  ;;  %v6030_v24 = vadd.f32 %v1921_v33, %v1472_v23  ;;  %2727 = vmatprep.mubr.f32.mxu1 %v383_v8  ;;  %v1474_v46 = vpop.f32.mrf.mxu0  ;;  %v388_v33 = vld [vmem:[#allocation2 + $0xae0] sm:$0xff]  ;;  %v390_v23 = vld [vmem:[#allocation2 + $0xaf0] sm:$0xff] }
 0x206   :  { %v1923_v16 = vpop.f32.mrf.mxu1 }
 0x207   :  { %6649 = vst [vmem:[#allocation81_spill] sm:$0xff] %v6030_v24  ;;  %v6032_v15 = vadd.f32 %v1923_v16, %v1474_v46  ;;  %v1478_v32 = vpop.f32.mrf.mxu0  ;;  %2279 = vmatmul.mubr.f32.gmra.mxu0 %v380_v59  ;;  %v405_v16 = vld [vmem:[#allocation2 + $0xb68] sm:$0xff] }
 0x208   :  { %v1927_v53 = vpop.f32.mrf.mxu1  ;;  %2728 = vmatmul.mubr.f32.gmra.mxu1 %v382_v36  ;;  %2284 = vmatprep.mubr.f32.mxu0 %v389_v63  ;;  %v407_v63 = vld [vmem:[#allocation2 + $0xb78] sm:$0xff] }
 0x209   :  { %6650 = vst [vmem:[#allocation82_spill] sm:$0xff] %v6032_v15  ;;  %v6034_v9 = vadd.f32 %v1927_v53, %v1478_v32  ;;  %2733 = vmatprep.mubr.f32.mxu1 %v391_v62  ;;  %v1480_v44 = vpop.f32.mrf.mxu0  ;;  %v396_v53 = vld [vmem:[#allocation2 + $0xb20] sm:$0xff]  ;;  %v398_v32 = vld [vmem:[#allocation2 + $0xb30] sm:$0xff] }
 0x20a   :  { %v1929_v56 = vpop.f32.mrf.mxu1 }
 0x20b   :  { %6651 = vst [vmem:[#allocation83_spill] sm:$0xff] %v6034_v9  ;;  %v6036_v8 = vadd.f32 %v1929_v56, %v1480_v44  ;;  %v1484_v24 = vpop.f32.mrf.mxu0  ;;  %2285 = vmatmul.mubr.f32.gmra.mxu0 %v388_v33  ;;  %v413_v56 = vld [vmem:[#allocation2 + $0xba8] sm:$0xff] }
 0x20c   :  { %v1933_v48 = vpop.f32.mrf.mxu1  ;;  %2734 = vmatmul.mubr.f32.gmra.mxu1 %v390_v23  ;;  %2290 = vmatprep.mubr.f32.mxu0 %v397_v7  ;;  %v415_v7 = vld [vmem:[#allocation2 + $0xbb8] sm:$0xff] }
 0x20d   :  { %6652 = vst [vmem:[#allocation84_spill] sm:$0xff] %v6036_v8  ;;  %v6038_v46 = vadd.f32 %v1933_v48, %v1484_v24  ;;  %2739 = vmatprep.mubr.f32.mxu1 %v399_v42  ;;  %v1486_v59 = vpop.f32.mrf.mxu0  ;;  %v404_v48 = vld [vmem:[#allocation2 + $0xb60] sm:$0xff]  ;;  %v406_v24 = vld [vmem:[#allocation2 + $0xb70] sm:$0xff] }
 0x20e   :  { %v1935_v36 = vpop.f32.mrf.mxu1 }
 0x20f   :  { %6653 = vst [vmem:[#allocation85_spill] sm:$0xff] %v6038_v46  ;;  %v6040_v62 = vadd.f32 %v1935_v36, %v1486_v59  ;;  %v1490_v9 = vpop.f32.mrf.mxu0  ;;  %2291 = vmatmul.mubr.f32.gmra.mxu0 %v396_v53  ;;  %v421_v36 = vld [vmem:[#allocation2 + $0xbe8] sm:$0xff] }
 0x210   :  { %v1939_v15 = vpop.f32.mrf.mxu1  ;;  %2740 = vmatmul.mubr.f32.gmra.mxu1 %v398_v32  ;;  %2296 = vmatprep.mubr.f32.mxu0 %v405_v16  ;;  %v423_v16 = vld [vmem:[#allocation2 + $0xbf8] sm:$0xff] }
 0x211   :  { %6654 = vst [vmem:[#allocation86_spill] sm:$0xff] %v6040_v62  ;;  %v6042_v44 = vadd.f32 %v1939_v15, %v1490_v9  ;;  %2745 = vmatprep.mubr.f32.mxu1 %v407_v63  ;;  %v1492_v33 = vpop.f32.mrf.mxu0  ;;  %v412_v15 = vld [vmem:[#allocation2 + $0xba0] sm:$0xff]  ;;  %v414_v9 = vld [vmem:[#allocation2 + $0xbb0] sm:$0xff] }
 0x212   :  { %v1941_v23 = vpop.f32.mrf.mxu1 }
 0x213   :  { %6655 = vst [vmem:[#allocation87_spill] sm:$0xff] %v6042_v44  ;;  %v6044_v42 = vadd.f32 %v1941_v23, %v1492_v33  ;;  %v1496_v46 = vpop.f32.mrf.mxu0  ;;  %2297 = vmatmul.mubr.f32.gmra.mxu0 %v404_v48  ;;  %v429_v23 = vld [vmem:[#allocation2 + $0xc28] sm:$0xff] }
 0x214   :  { %v1945_v8 = vpop.f32.mrf.mxu1  ;;  %2746 = vmatmul.mubr.f32.gmra.mxu1 %v406_v24  ;;  %2302 = vmatprep.mubr.f32.mxu0 %v413_v56  ;;  %v431_v56 = vld [vmem:[#allocation2 + $0xc38] sm:$0xff] }
 0x215   :  { %6656 = vst [vmem:[#allocation88_spill] sm:$0xff] %v6044_v42  ;;  %v6046_v59 = vadd.f32 %v1945_v8, %v1496_v46  ;;  %2751 = vmatprep.mubr.f32.mxu1 %v415_v7  ;;  %v1498_v53 = vpop.f32.mrf.mxu0  ;;  %v420_v8 = vld [vmem:[#allocation2 + $0xbe0] sm:$0xff]  ;;  %v422_v46 = vld [vmem:[#allocation2 + $0xbf0] sm:$0xff] }
 0x216   :  { %v1947_v32 = vpop.f32.mrf.mxu1 }
 0x217   :  { %6657 = vst [vmem:[#allocation89_spill] sm:$0xff] %v6046_v59  ;;  %v6048_v63 = vadd.f32 %v1947_v32, %v1498_v53  ;;  %v1502_v44 = vpop.f32.mrf.mxu0  ;;  %2303 = vmatmul.mubr.f32.gmra.mxu0 %v412_v15  ;;  %v437_v32 = vld [vmem:[#allocation2 + $0xc68] sm:$0xff] }
 0x218   :  { %v1951_v62 = vpop.f32.mrf.mxu1  ;;  %2752 = vmatmul.mubr.f32.gmra.mxu1 %v414_v9  ;;  %2308 = vmatprep.mubr.f32.mxu0 %v421_v36  ;;  %v439_v36 = vld [vmem:[#allocation2 + $0xc78] sm:$0xff] }
 0x219   :  { %6658 = vst [vmem:[#allocation90_spill] sm:$0xff] %v6048_v63  ;;  %v6050_v33 = vadd.f32 %v1951_v62, %v1502_v44  ;;  %2757 = vmatprep.mubr.f32.mxu1 %v423_v16  ;;  %v1504_v48 = vpop.f32.mrf.mxu0  ;;  %v428_v62 = vld [vmem:[#allocation2 + $0xc20] sm:$0xff]  ;;  %v430_v44 = vld [vmem:[#allocation2 + $0xc30] sm:$0xff] }
 0x21a   :  { %v1953_v24 = vpop.f32.mrf.mxu1 }
 0x21b   :  { %6659 = vst [vmem:[#allocation91_spill] sm:$0xff] %v6050_v33  ;;  %v6052_v7 = vadd.f32 %v1953_v24, %v1504_v48  ;;  %v1508_v59 = vpop.f32.mrf.mxu0  ;;  %2309 = vmatmul.mubr.f32.gmra.mxu0 %v420_v8 }
 0x21c   :  { %v1957_v42 = vpop.f32.mrf.mxu1  ;;  %2758 = vmatmul.mubr.f32.gmra.mxu1 %v422_v46  ;;  %2314 = vmatprep.mubr.f32.mxu0 %v429_v23  ;;  %v445_v23 = vld [vmem:[#allocation2 + $0xca8] sm:$0xff] }
 0x21d   :  { %6660 = vst [vmem:[#allocation92_spill] sm:$0xff] %v6052_v7  ;;  %v6054_v53 = vadd.f32 %v1957_v42, %v1508_v59  ;;  %2763 = vmatprep.mubr.f32.mxu1 %v431_v56  ;;  %v1510_v15 = vpop.f32.mrf.mxu0  ;;  %v436_v42 = vld [vmem:[#allocation2 + $0xc60] sm:$0xff]  ;;  %v438_v59 = vld [vmem:[#allocation2 + $0xc70] sm:$0xff]  ;;  %v447_v56 = vld [vmem:[#allocation2 + $0xcb8] sm:$0xff] }
 0x21e   :  { %v1959_v9 = vpop.f32.mrf.mxu1 }
 0x21f   :  { %6661 = vst [vmem:[#allocation93_spill] sm:$0xff] %v6054_v53  ;;  %v6056_v16 = vadd.f32 %v1959_v9, %v1510_v15  ;;  %v2028_v33 = vpop.f32.mrf.mxu0  ;;  %2315 = vmatmul.mubr.f32.gmra.mxu0 %v428_v62 }
 0x220   :  { %v2477_v48 = vpop.f32.mrf.mxu1  ;;  %2764 = vmatmul.mubr.f32.gmra.mxu1 %v430_v44  ;;  %v2029_v24 = vadd.f32 %v2028_v33, %v5802_v10  ;;  %2320 = vmatprep.mubr.f32.mxu0 %v437_v32  ;;  %v444_v10 = vld [vmem:[#allocation2 + $0xca0] sm:$0xff]  ;;  %v446_v33 = vld [vmem:[#allocation2 + $0xcb0] sm:$0xff] }
 0x221   :  { %6662 = vst [vmem:[#allocation94_spill] sm:$0xff] %v6056_v16  ;;  %2769 = vmatprep.mubr.f32.mxu1 %v439_v36  ;;  %v2030_v8 = vpop.f32.mrf.mxu0  ;;  %v453_v16 = vld [vmem:[#allocation2 + $0xce8] sm:$0xff] }
 0x222   :  { %v2479_v46 = vpop.f32.mrf.mxu1  ;;  %v2478_v53 = vadd.f32 %v2477_v48, %v2029_v24  ;;  %v2031_v7 = vadd.f32 %v2030_v8, %v5804_v17  ;;  %v454_v8 = vld [vmem:[#allocation2 + $0xcf0] sm:$0xff] }
 0x223   :  { %v2034_v63 = vpop.f32.mrf.mxu0  ;;  %2321 = vmatmul.mubr.f32.gmra.mxu0 %v436_v42 }
 0x224   :  { %v2483_v15 = vpop.f32.mrf.mxu1  ;;  %2770 = vmatmul.mubr.f32.gmra.mxu1 %v438_v59  ;;  %v4656_v62 = vmul.f32 2.0, %v2478_v53  ;;  %v2480_v9 = vadd.f32 %v2479_v46, %v2031_v7  ;;  %v2035_v44 = vadd.f32 %v2034_v63, %v5806_v20  ;;  %2326 = vmatprep.mubr.f32.mxu0 %v445_v23  ;;  %v452_v53 = vld [vmem:[#allocation2 + $0xce0] sm:$0xff] }
 0x225   :  { %2775 = vmatprep.mubr.f32.mxu1 %v447_v56  ;;  %v2036_v32 = vpop.f32.mrf.mxu0  ;;  %v461_v56 = vld [vmem:[#allocation2 + $0xd28] sm:$0xff] }
 0x226   :  { %v2485_v36 = vpop.f32.mrf.mxu1  ;;  %4912 = vst [vmem:[#allocation7] sm:$0xff] %v4656_v62  ;;  %v4657_v48 = vmul.f32 2.0, %v2480_v9  ;;  %v2484_v24 = vadd.f32 %v2483_v15, %v2035_v44  ;;  %v2037_v17 = vadd.f32 %v2036_v32, %v5808_v27  ;;  %v463_v62 = vld [vmem:[#allocation2 + $0xd38] sm:$0xff]  ;;  %v462_v32 = vld [vmem:[#allocation2 + $0xd30] sm:$0xff] }
 0x227   :  { %v2040_v42 = vpop.f32.mrf.mxu0  ;;  %2327 = vmatmul.mubr.f32.gmra.mxu0 %v444_v10 }
 0x228   :  { %v2489_v59 = vpop.f32.mrf.mxu1  ;;  %2776 = vmatmul.mubr.f32.gmra.mxu1 %v446_v33  ;;  %4913 = vst [vmem:[#allocation7 + $0x8] sm:$0xff] %v4657_v48  ;;  %v4660_v7 = vmul.f32 2.0, %v2484_v24  ;;  %v2486_v20 = vadd.f32 %v2485_v36, %v2037_v17  ;;  %v2041_v63 = vadd.f32 %v2040_v42, %v5810_v30  ;;  %2332 = vmatprep.mubr.f32.mxu0 %v453_v16  ;;  %v460_v16 = vld [vmem:[#allocation2 + $0xd20] sm:$0xff]  ;;  %v469_v24 = vld [vmem:[#allocation2 + $0xd68] sm:$0xff]  ;;  %v471_v17 = vld [vmem:[#allocation2 + $0xd78] sm:$0xff] }
 0x229   :  { %2781 = vmatprep.mubr.f32.mxu1 %v455_v28  ;;  %v2042_v46 = vpop.f32.mrf.mxu0 }
 0x22a   :  { %v2491_v23 = vpop.f32.mrf.mxu1  ;;  %4916 = vst [vmem:[#allocation7 + $0x20] sm:$0xff] %v4660_v7  ;;  %v4661_v15 = vmul.f32 2.0, %v2486_v20  ;;  %v2490_v27 = vadd.f32 %v2489_v59, %v2041_v63  ;;  %v2043_v9 = vadd.f32 %v2042_v46, %v5812_v37  ;;  %v470_v46 = vld [vmem:[#allocation2 + $0xd70] sm:$0xff] }
 0x22b   :  { %v2046_v44 = vpop.f32.mrf.mxu0  ;;  %2333 = vmatmul.mubr.f32.gmra.mxu0 %v452_v53 }
 0x22c   :  { %v2495_v10 = vpop.f32.mrf.mxu1  ;;  %2782 = vmatmul.mubr.f32.gmra.mxu1 %v454_v8  ;;  %4917 = vst [vmem:[#allocation7 + $0x28] sm:$0xff] %v4661_v15  ;;  %v4664_v33 = vmul.f32 2.0, %v2490_v27  ;;  %v2492_v30 = vadd.f32 %v2491_v23, %v2043_v9  ;;  %v2047_v28 = vadd.f32 %v2046_v44, %v5814_v40  ;;  %2338 = vmatprep.mubr.f32.mxu0 %v461_v56  ;;  %v468_v8 = vld [vmem:[#allocation2 + $0xd60] sm:$0xff]  ;;  %v479_v15 = vld [vmem:[#allocation2 + $0xdb8] sm:$0xff] }
 0x22d   :  { %2787 = vmatprep.mubr.f32.mxu1 %v463_v62  ;;  %v2048_v36 = vpop.f32.mrf.mxu0  ;;  %v477_v62 = vld [vmem:[#allocation2 + $0xda8] sm:$0xff] }
 0x22e   :  { %v2497_v48 = vpop.f32.mrf.mxu1  ;;  %4920 = vst [vmem:[#allocation7 + $0x40] sm:$0xff] %v4664_v33  ;;  %v4665_v42 = vmul.f32 2.0, %v2492_v30  ;;  %v2496_v37 = vadd.f32 %v2495_v10, %v2047_v28  ;;  %v2049_v59 = vadd.f32 %v2048_v36, %v5816_v47  ;;  %v476_v28 = vld [vmem:[#allocation2 + $0xda0] sm:$0xff] }
 0x22f   :  { %v2052_v7 = vpop.f32.mrf.mxu0  ;;  %2339 = vmatmul.mubr.f32.gmra.mxu0 %v460_v16  ;;  %v478_v16 = vld [vmem:[#allocation2 + $0xdb0] sm:$0xff] }
 0x230   :  { %v2501_v20 = vpop.f32.mrf.mxu1  ;;  %2788 = vmatmul.mubr.f32.gmra.mxu1 %v462_v32  ;;  %4921 = vst [vmem:[#allocation7 + $0x48] sm:$0xff] %v4665_v42  ;;  %v4668_v63 = vmul.f32 2.0, %v2496_v37  ;;  %v2498_v40 = vadd.f32 %v2497_v48, %v2049_v59  ;;  %v2053_v53 = vadd.f32 %v2052_v7, %v5818_v50  ;;  %2344 = vmatprep.mubr.f32.mxu0 %v469_v24  ;;  %v485_v48 = vld [vmem:[#allocation2 + $0xde8] sm:$0xff]  ;;  %v487_v24 = vld [vmem:[#allocation2 + $0xdf8] sm:$0xff] }
 0x231   :  { %2793 = vmatprep.mubr.f32.mxu1 %v471_v17  ;;  %v2054_v23 = vpop.f32.mrf.mxu0 }
 0x232   :  { %v2503_v56 = vpop.f32.mrf.mxu1  ;;  %4924 = vst [vmem:[#allocation7 + $0x60] sm:$0xff] %v4668_v63  ;;  %v4669_v27 = vmul.f32 2.0, %v2498_v40  ;;  %v2502_v47 = vadd.f32 %v2501_v20, %v2053_v53  ;;  %v2055_v9 = vadd.f32 %v2054_v23, %v5820_v57  ;;  %v484_v63 = vld [vmem:[#allocation2 + $0xde0] sm:$0xff]  ;;  %v486_v40 = vld [vmem:[#allocation2 + $0xdf0] sm:$0xff]  ;;  %v495_v23 = vld [vmem:[#allocation2 + $0xe38] sm:$0xff] }
 0x233   :  { %v2058_v44 = vpop.f32.mrf.mxu0  ;;  %2345 = vmatmul.mubr.f32.gmra.mxu0 %v468_v8 }
 0x234   :  { %v2507_v10 = vpop.f32.mrf.mxu1  ;;  %2794 = vmatmul.mubr.f32.gmra.mxu1 %v470_v46  ;;  %4925 = vst [vmem:[#allocation7 + $0x68] sm:$0xff] %v4669_v27  ;;  %v4672_v33 = vmul.f32 2.0, %v2502_v47  ;;  %v2504_v50 = vadd.f32 %v2503_v56, %v2055_v9  ;;  %v2059_v30 = vadd.f32 %v2058_v44, %v5822_v60  ;;  %2350 = vmatprep.mubr.f32.mxu0 %v477_v62  ;;  %v493_v46 = vld [vmem:[#allocation2 + $0xe28] sm:$0xff]  ;;  %v492_v44 = vld [vmem:[#allocation2 + $0xe20] sm:$0xff] }
 0x235   :  { %2799 = vmatprep.mubr.f32.mxu1 %v479_v15  ;;  %v2060_v32 = vpop.f32.mrf.mxu0 }
 0x236   :  { %v2509_v36 = vpop.f32.mrf.mxu1  ;;  %4928 = vst [vmem:[#allocation7 + $0x80] sm:$0xff] %v4672_v33  ;;  %v4673_v17 = vmul.f32 2.0, %v2504_v50  ;;  %v2508_v57 = vadd.f32 %v2507_v10, %v2059_v30  ;;  %v2061_v42 = vadd.f32 %v2060_v32, %v5824_v3  ;;  %v494_v10 = vld [vmem:[#allocation2 + $0xe30] sm:$0xff]  ;;  %v501_v30 = vld [vmem:[#allocation2 + $0xe68] sm:$0xff] }
 0x237   :  { %v2064_v37 = vpop.f32.mrf.mxu0  ;;  %2351 = vmatmul.mubr.f32.gmra.mxu0 %v476_v28  ;;  %v503_v28 = vld [vmem:[#allocation2 + $0xe78] sm:$0xff] }
 0x238   :  { %v2513_v59 = vpop.f32.mrf.mxu1  ;;  %2800 = vmatmul.mubr.f32.gmra.mxu1 %v478_v16  ;;  %4929 = vst [vmem:[#allocation7 + $0x88] sm:$0xff] %v4673_v17  ;;  %v4676_v7 = vmul.f32 2.0, %v2508_v57  ;;  %v2510_v60 = vadd.f32 %v2509_v36, %v2061_v42  ;;  %v2065_v20 = vadd.f32 %v2064_v37, %v5826_v6  ;;  %2356 = vmatprep.mubr.f32.mxu0 %v485_v48  ;;  %v500_v57 = vld [vmem:[#allocation2 + $0xe60] sm:$0xff]  ;;  %v502_v42 = vld [vmem:[#allocation2 + $0xe70] sm:$0xff] }
 0x239   :  { %2805 = vmatprep.mubr.f32.mxu1 %v487_v24  ;;  %v2066_v53 = vpop.f32.mrf.mxu0 }
 0x23a   :  { %v2515_v8 = vpop.f32.mrf.mxu1  ;;  %4932 = vst [vmem:[#allocation7 + $0xa0] sm:$0xff] %v4676_v7  ;;  %v4677_v56 = vmul.f32 2.0, %v2510_v60  ;;  %v2514_v3 = vadd.f32 %v2513_v59, %v2065_v20  ;;  %v2067_v62 = vadd.f32 %v2066_v53, %v5828_v14  ;;  %v509_v7 = vld [vmem:[#allocation2 + $0xea8] sm:$0xff]  ;;  %v511_v60 = vld [vmem:[#allocation2 + $0xeb8] sm:$0xff] }
 0x23b   :  { %v2070_v15 = vpop.f32.mrf.mxu0  ;;  %2357 = vmatmul.mubr.f32.gmra.mxu0 %v484_v63 }
 0x23c   :  { %v2519_v27 = vpop.f32.mrf.mxu1  ;;  %2806 = vmatmul.mubr.f32.gmra.mxu1 %v486_v40  ;;  %4933 = vst [vmem:[#allocation7 + $0xa8] sm:$0xff] %v4677_v56  ;;  %v4680_v47 = vmul.f32 2.0, %v2514_v3  ;;  %v2516_v6 = vadd.f32 %v2515_v8, %v2067_v62  ;;  %v2071_v9 = vadd.f32 %v2070_v15, %v5830_v18  ;;  %2362 = vmatprep.mubr.f32.mxu0 %v493_v46  ;;  %v510_v56 = vld [vmem:[#allocation2 + $0xeb0] sm:$0xff]  ;;  %v517_v15 = vld [vmem:[#allocation2 + $0xee8] sm:$0xff] }
 0x23d   :  { %2811 = vmatprep.mubr.f32.mxu1 %v495_v23  ;;  %v2072_v33 = vpop.f32.mrf.mxu0  ;;  %v508_v23 = vld [vmem:[#allocation2 + $0xea0] sm:$0xff] }
 0x23e   :  { %v2521_v50 = vpop.f32.mrf.mxu1  ;;  %4936 = vst [vmem:[#allocation7 + $0xc0] sm:$0xff] %v4680_v47  ;;  %v4681_v16 = vmul.f32 2.0, %v2516_v6  ;;  %v2520_v14 = vadd.f32 %v2519_v27, %v2071_v9  ;;  %v2073_v32 = vadd.f32 %v2072_v33, %v5832_v26  ;;  %v519_v27 = vld [vmem:[#allocation2 + $0xef8] sm:$0xff] }
 0x23f   :  { %v2076_v36 = vpop.f32.mrf.mxu0  ;;  %2363 = vmatmul.mubr.f32.gmra.mxu0 %v492_v44 }
 0x240   :  { %v2525_v48 = vpop.f32.mrf.mxu1  ;;  %2812 = vmatmul.mubr.f32.gmra.mxu1 %v494_v10  ;;  %4937 = vst [vmem:[#allocation7 + $0xc8] sm:$0xff] %v4681_v16  ;;  %v4684_v24 = vmul.f32 2.0, %v2520_v14  ;;  %v2522_v18 = vadd.f32 %v2521_v50, %v2073_v32  ;;  %v2077_v17 = vadd.f32 %v2076_v36, %v5834_v31  ;;  %2368 = vmatprep.mubr.f32.mxu0 %v501_v30  ;;  %v516_v50 = vld [vmem:[#allocation2 + $0xee0] sm:$0xff]  ;;  %v518_v30 = vld [vmem:[#allocation2 + $0xef0] sm:$0xff]  ;;  %v525_v14 = vld [vmem:[#allocation2 + $0xf28] sm:$0xff] }
 0x241   :  { %2817 = vmatprep.mubr.f32.mxu1 %v503_v28  ;;  %v2078_v37 = vpop.f32.mrf.mxu0  ;;  %v527_v32 = vld [vmem:[#allocation2 + $0xf38] sm:$0xff] }
 0x242   :  { %v2527_v59 = vpop.f32.mrf.mxu1  ;;  %4940 = vst [vmem:[#allocation7 + $0xe0] sm:$0xff] %v4684_v24  ;;  %v4685_v20 = vmul.f32 2.0, %v2522_v18  ;;  %v2526_v26 = vadd.f32 %v2525_v48, %v2077_v17  ;;  %v2079_v63 = vadd.f32 %v2078_v37, %v5836_v39  ;;  %v526_v37 = vld [vmem:[#allocation2 + $0xf30] sm:$0xff] }
 0x243   :  { %v2082_v40 = vpop.f32.mrf.mxu0  ;;  %2369 = vmatmul.mubr.f32.gmra.mxu0 %v500_v57 }
 0x244   :  { %v2531_v53 = vpop.f32.mrf.mxu1  ;;  %2818 = vmatmul.mubr.f32.gmra.mxu1 %v502_v42  ;;  %4941 = vst [vmem:[#allocation7 + $0xe8] sm:$0xff] %v4685_v20  ;;  %v4688_v8 = vmul.f32 2.0, %v2526_v26  ;;  %v2528_v31 = vadd.f32 %v2527_v59, %v2079_v63  ;;  %v2083_v46 = vadd.f32 %v2082_v40, %v5838_v43  ;;  %2374 = vmatprep.mubr.f32.mxu0 %v509_v7  ;;  %v524_v42 = vld [vmem:[#allocation2 + $0xf20] sm:$0xff]  ;;  %v535_v20 = vld [vmem:[#allocation2 + $0xf78] sm:$0xff] }
 0x245   :  { %2823 = vmatprep.mubr.f32.mxu1 %v511_v60  ;;  %v2084_v3 = vpop.f32.mrf.mxu0  ;;  %v533_v60 = vld [vmem:[#allocation2 + $0xf68] sm:$0xff] }
 0x246   :  { %v2533_v62 = vpop.f32.mrf.mxu1  ;;  %4944 = vst [vmem:[#allocation7 + $0x100] sm:$0xff] %v4688_v8  ;;  %v4689_v47 = vmul.f32 2.0, %v2528_v31  ;;  %v2532_v39 = vadd.f32 %v2531_v53, %v2083_v46  ;;  %v2085_v6 = vadd.f32 %v2084_v3, %v5840_v52  ;;  %v532_v46 = vld [vmem:[#allocation2 + $0xf60] sm:$0xff] }
 0x247   :  { %v2088_v9 = vpop.f32.mrf.mxu0  ;;  %2375 = vmatmul.mubr.f32.gmra.mxu0 %v508_v23  ;;  %v534_v23 = vld [vmem:[#allocation2 + $0xf70] sm:$0xff] }
 0x248   :  { %v2537_v44 = vpop.f32.mrf.mxu1  ;;  %2824 = vmatmul.mubr.f32.gmra.mxu1 %v510_v56  ;;  %4945 = vst [vmem:[#allocation7 + $0x108] sm:$0xff] %v4689_v47  ;;  %v4692_v10 = vmul.f32 2.0, %v2532_v39  ;;  %v2534_v43 = vadd.f32 %v2533_v62, %v2085_v6  ;;  %v2089_v33 = vadd.f32 %v2088_v9, %v5842_v55  ;;  %2380 = vmatprep.mubr.f32.mxu0 %v517_v15  ;;  %v541_v62 = vld [vmem:[#allocation2 + $0xfa8] sm:$0xff]  ;;  %v543_v15 = vld [vmem:[#allocation2 + $0xfb8] sm:$0xff] }
 0x249   :  { %2829 = vmatprep.mubr.f32.mxu1 %v519_v27  ;;  %v2090_v28 = vpop.f32.mrf.mxu0 }
 0x24a   :  { %v2539_v16 = vpop.f32.mrf.mxu1  ;;  %4948 = vst [vmem:[#allocation7 + $0x120] sm:$0xff] %v4692_v10  ;;  %v4693_v36 = vmul.f32 2.0, %v2534_v43  ;;  %v2538_v52 = vadd.f32 %v2537_v44, %v2089_v33  ;;  %v2091_v48 = vadd.f32 %v2090_v28, %v5844_v0  ;;  %v540_v10 = vld [vmem:[#allocation2 + $0xfa0] sm:$0xff]  ;;  %v542_v43 = vld [vmem:[#allocation2 + $0xfb0] sm:$0xff]  ;;  %v551_v28 = vld [vmem:[#allocation2 + $0xff8] sm:$0xff] }
 0x24b   :  { %v2094_v24 = vpop.f32.mrf.mxu0  ;;  %2381 = vmatmul.mubr.f32.gmra.mxu0 %v516_v50 }
 0x24c   :  { %v2543_v18 = vpop.f32.mrf.mxu1  ;;  %2830 = vmatmul.mubr.f32.gmra.mxu1 %v518_v30  ;;  %4949 = vst [vmem:[#allocation7 + $0x128] sm:$0xff] %v4693_v36  ;;  %v4696_v17 = vmul.f32 2.0, %v2538_v52  ;;  %v2540_v55 = vadd.f32 %v2539_v16, %v2091_v48  ;;  %v2095_v57 = vadd.f32 %v2094_v24, %v5846_v4  ;;  %2386 = vmatprep.mubr.f32.mxu0 %v525_v14  ;;  %v549_v30 = vld [vmem:[#allocation2 + $0xfe8] sm:$0xff]  ;;  %v548_v24 = vld [vmem:[#allocation2 + $0xfe0] sm:$0xff] }
 0x24d   :  { %2835 = vmatprep.mubr.f32.mxu1 %v527_v32  ;;  %v2096_v59 = vpop.f32.mrf.mxu0 }
 0x24e   :  { %v2545_v7 = vpop.f32.mrf.mxu1  ;;  %4952 = vst [vmem:[#allocation7 + $0x140] sm:$0xff] %v4696_v17  ;;  %v4697_v26 = vmul.f32 2.0, %v2540_v55  ;;  %v2544_v0 = vadd.f32 %v2543_v18, %v2095_v57  ;;  %v2097_v63 = vadd.f32 %v2096_v59, %v5848_v13  ;;  %v550_v18 = vld [vmem:[#allocation2 + $0xff0] sm:$0xff] }
 0x24f   :  { %v2100_v40 = vpop.f32.mrf.mxu0  ;;  %2387 = vmatmul.mubr.f32.gmra.mxu0 %v524_v42 }
 0x250   :  { %v2549_v53 = vpop.f32.mrf.mxu1  ;;  %2836 = vmatmul.mubr.f32.gmra.mxu1 %v526_v37  ;;  %4953 = vst [vmem:[#allocation7 + $0x148] sm:$0xff] %v4697_v26  ;;  %v4700_v8 = vmul.f32 2.0, %v2544_v0  ;;  %v2546_v4 = vadd.f32 %v2545_v7, %v2097_v63  ;;  %v2101_v31 = vadd.f32 %v2100_v40, %v5850_v19  ;;  %2392 = vmatprep.mubr.f32.mxu0 %v533_v60  ;;  %v5194_v26 = vld [vmem:[#allocation2 + $0x18] sm:$0xff]  ;;  %v870_v40 = vld [vmem:[#allocation5 + $0x9f0] sm:$0xff] }
 0x251   :  { %2841 = vmatprep.mubr.f32.mxu1 %v535_v20  ;;  %v2102_v56 = vpop.f32.mrf.mxu0  ;;  %v5193_v20 = vld [vmem:[#allocation2 + $0x8] sm:$0xff] }
 0x252   :  { %v2551_v3 = vpop.f32.mrf.mxu1  ;;  %4956 = vst [vmem:[#allocation7 + $0x160] sm:$0xff] %v4700_v8  ;;  %v4701_v27 = vmul.f32 2.0, %v2546_v4  ;;  %v2550_v13 = vadd.f32 %v2549_v53, %v2101_v31  ;;  %v2103_v47 = vadd.f32 %v2102_v56, %v5852_v29  ;;  %v998_v4 = vld [vmem:[#allocation5 + $0xdf0] sm:$0xff] }
 0x253   :  { %v2106_v39 = vpop.f32.mrf.mxu0  ;;  %2393 = vmatmul.mubr.f32.gmra.mxu0 %v532_v46  ;;  %v5196_v56 = vld [vmem:[#allocation2 + $0x10] sm:$0xff] }
 0x254   :  { %v2555_v6 = vpop.f32.mrf.mxu1  ;;  %2842 = vmatmul.mubr.f32.gmra.mxu1 %v534_v23  ;;  %4957 = vst [vmem:[#allocation7 + $0x168] sm:$0xff] %v4701_v27  ;;  %v4704_v9 = vmul.f32 2.0, %v2550_v13  ;;  %v2552_v19 = vadd.f32 %v2551_v3, %v2103_v47  ;;  %v2107_v44 = vadd.f32 %v2106_v39, %v5854_v34  ;;  %2398 = vmatprep.mubr.f32.mxu0 %v541_v62  ;;  %v5195_v23 = vld [vmem:[#allocation2] sm:$0xff]  ;;  %v995_v3 = vld [vmem:[#allocation5 + $0xdd8] sm:$0xff]  ;;  %v5197_v13 = vld [vmem:[#allocation2 + $0x48] sm:$0xff] }
 0x255   :  { %2847 = vmatprep.mubr.f32.mxu1 %v543_v15  ;;  %v2108_v33 = vpop.f32.mrf.mxu0 }
 0x256   :  { %v2557_v50 = vpop.f32.mrf.mxu1  ;;  %4960 = vst [vmem:[#allocation7 + $0x180] sm:$0xff] %v4704_v9  ;;  %v4705_v16 = vmul.f32 2.0, %v2552_v19  ;;  %v2556_v29 = vadd.f32 %v2555_v6, %v2107_v44  ;;  %v2109_v14 = vadd.f32 %v2108_v33, %v5856_v45  ;;  %v866_v44 = vld [vmem:[#allocation5 + $0x9d0] sm:$0xff] }
 0x257   :  { %v2112_v32 = vpop.f32.mrf.mxu0  ;;  %2399 = vmatmul.mubr.f32.gmra.mxu0 %v540_v10  ;;  %v994_v10 = vld [vmem:[#allocation5 + $0xdd0] sm:$0xff] }
 0x258   :  { %v2561_v36 = vpop.f32.mrf.mxu1  ;;  %2848 = vmatmul.mubr.f32.gmra.mxu1 %v542_v43  ;;  %4961 = vst [vmem:[#allocation7 + $0x188] sm:$0xff] %v4705_v16  ;;  %v4708_v52 = vmul.f32 2.0, %v2556_v29  ;;  %v2558_v34 = vadd.f32 %v2557_v50, %v2109_v14  ;;  %v2113_v48 = vadd.f32 %v2112_v32, %v5858_v49  ;;  %2404 = vmatprep.mubr.f32.mxu0 %v549_v30  ;;  %v5200_v50 = vld [vmem:[#allocation2 + $0x50] sm:$0xff]  ;;  %v863_v30 = vld [vmem:[#allocation5 + $0x9b8] sm:$0xff]  ;;  %v5201_v32 = vld [vmem:[#allocation2 + $0x88] sm:$0xff] }
 0x259   :  { %2853 = vmatprep.mubr.f32.mxu1 %v551_v28  ;;  %v2114_v17 = vpop.f32.mrf.mxu0  ;;  %v991_v28 = vld [vmem:[#allocation5 + $0xdb8] sm:$0xff] }
 0x25a   :  { %v2563_v55 = vpop.f32.mrf.mxu1  ;;  %4964 = vst [vmem:[#allocation7 + $0x1a0] sm:$0xff] %v4708_v52  ;;  %v4709_v57 = vmul.f32 2.0, %v2558_v34  ;;  %v2562_v42 = vadd.f32 %v2561_v36, %v2113_v48  ;;  %v2115_v45 = vadd.f32 %v2114_v17, %v5860_v61  ;;  %v990_v17 = vld [vmem:[#allocation5 + $0xdb0] sm:$0xff] }
 0x25b   :  { %v2118_v37 = vpop.f32.mrf.mxu0  ;;  %2405 = vmatmul.mubr.f32.gmra.mxu0 %v548_v24 }
 0x25c   :  { %v2567_v59 = vpop.f32.mrf.mxu1  ;;  %2854 = vmatmul.mubr.f32.gmra.mxu1 %v550_v18  ;;  %4965 = vst [vmem:[#allocation7 + $0x1a8] sm:$0xff] %v4709_v57  ;;  %v4712_v7 = vmul.f32 2.0, %v2562_v42  ;;  %v2564_v60 = vadd.f32 %v2563_v55, %v2115_v45  ;;  %v2119_v49 = vadd.f32 %v2118_v37, %v5862_v1  ;;  %2924 = vmatprep.mubr.f32.mxu0 %v5193_v20  ;;  %v867_v1 = vld [vmem:[#allocation5 + $0x9d8] sm:$0xff]  ;;  %v862_v18 = vld [vmem:[#allocation5 + $0x9b0] sm:$0xff] }
 0x25d   :  { %3373 = vmatprep.mubr.f32.mxu1 %v5194_v26  ;;  %v2120_v0 = vpop.f32.mrf.mxu0  ;;  %v5204_v42 = vld [vmem:[#allocation2 + $0x90] sm:$0xff]  ;;  %v859_v45 = vld [vmem:[#allocation5 + $0x998] sm:$0xff] }
 0x25e   :  { %v2569_v63 = vpop.f32.mrf.mxu1  ;;  %4968 = vst [vmem:[#allocation7 + $0x1c0] sm:$0xff] %v4712_v7  ;;  %v4713_v53 = vmul.f32 2.0, %v2564_v60  ;;  %v2568_v8 = vadd.f32 %v2567_v59, %v2119_v49  ;;  %v2121_v61 = vadd.f32 %v2120_v0, %v5864_v12  ;;  %v5198_v12 = vld [vmem:[#allocation2 + $0x58] sm:$0xff]  ;;  %v5205_v49 = vld [vmem:[#allocation2 + $0xc8] sm:$0xff] }
 0x25f   :  { %v2124_v31 = vpop.f32.mrf.mxu0  ;;  %2925 = vmatmul.mubr.f32.vlgmr.msra.gmra.mxu0 %v5195_v23  ;;  %v987_v37 = vld [vmem:[#allocation5 + $0xd98] sm:$0xff] }
 0x260   :  { %v2573_v46 = vpop.f32.mrf.mxu1  ;;  %3374 = vmatmul.mubr.f32.vlgmr.msra.gmra.mxu1 %v5196_v56  ;;  %4969 = vst [vmem:[#allocation7 + $0x1c8] sm:$0xff] %v4713_v53  ;;  %v4716_v62 = vmul.f32 2.0, %v2568_v8  ;;  %v2570_v15 = vadd.f32 %v2569_v63, %v2121_v61  ;;  %v2125_v27 = vadd.f32 %v2124_v31, %v5866_v25  ;;  %3759 = vmatpush1.msra.mxu0 %v870_v40  ;;  %v5199_v25 = vld [vmem:[#allocation2 + $0x40] sm:$0xff]  ;;  %v858_v53 = vld [vmem:[#allocation5 + $0x990] sm:$0xff]  ;;  %v983_v23 = vld [vmem:[#allocation5 + $0xd78] sm:$0xff] }
 0x261   :  { %2930 = vmatprep.mubr.f32.mxu0 %v5197_v13  ;;  %v2126_v47 = vpop.f32.mrf.mxu0  ;;  %3379 = vmatprep.mubr.f32.mxu1 %v5198_v12  ;;  %v986_v8 = vld [vmem:[#allocation5 + $0xd90] sm:$0xff] }
 0x262   :  { %v2575_v39 = vpop.f32.mrf.mxu1  ;;  %4208 = vmatpush1.msra.mxu1 %v998_v4  ;;  %4972 = vst [vmem:[#allocation7 + $0x1e0] sm:$0xff] %v4716_v62  ;;  %v4717_v6 = vmul.f32 2.0, %v2570_v15  ;;  %v2574_v9 = vadd.f32 %v2573_v46, %v2125_v27  ;;  %v2127_v19 = vadd.f32 %v2126_v47, %v5868_v41  ;;  %3760 = vmatprep.subr.mxu0 %v867_v1  ;;  %v5202_v41 = vld [vmem:[#allocation2 + $0x98] sm:$0xff]  ;;  %v5208_v31 = vld [vmem:[#allocation2 + $0xd0] sm:$0xff]  ;;  %v5209_v62 = vld [vmem:[#allocation2 + $0x108] sm:$0xff] }
 0x263   :  { %4209 = vmatprep.subr.mxu1 %v995_v3  ;;  %v2130_v43 = vpop.f32.mrf.mxu0  ;;  %2931 = vmatmul.mubr.f32.gmra.mxu0 %v5199_v25  ;;  %v855_v46 = vld [vmem:[#allocation5 + $0x978] sm:$0xff]  ;;  %v854_v12 = vld [vmem:[#allocation5 + $0x970] sm:$0xff] }
 0x264   :  { %v2579_v33 = vpop.f32.mrf.mxu1  ;;  %3380 = vmatmul.mubr.f32.gmra.mxu1 %v5200_v50  ;;  %4973 = vst [vmem:[#allocation7 + $0x1e8] sm:$0xff] %v4717_v6  ;;  %v4720_v16 = vmul.f32 2.0, %v2574_v9  ;;  %v2576_v29 = vadd.f32 %v2575_v39, %v2127_v19  ;;  %v2131_v14 = vadd.f32 %v2130_v43, %v5870_v54  ;;  %2936 = vmatprep.mubr.f32.mxu0 %v5201_v32  ;;  %v5203_v54 = vld [vmem:[#allocation2 + $0x80] sm:$0xff]  ;;  %v982_v6 = vld [vmem:[#allocation5 + $0xd70] sm:$0xff]  ;;  %v979_v43 = vld [vmem:[#allocation5 + $0xd58] sm:$0xff] }
 0x265   :  { %3385 = vmatprep.mubr.f32.mxu1 %v5202_v41  ;;  %v2132_v36 = vpop.f32.mrf.mxu0  ;;  %3761 = vmatpush1.msra.mxu0 %v866_v44  ;;  %v5212_v44 = vld [vmem:[#allocation2 + $0x110] sm:$0xff] }
 0x266   :  { %v2581_v52 = vpop.f32.mrf.mxu1  ;;  %4210 = vmatpush1.msra.mxu1 %v994_v10  ;;  %4976 = vst [vmem:[#allocation7 + $0x200] sm:$0xff] %v4720_v16  ;;  %v4721_v34 = vmul.f32 2.0, %v2576_v29  ;;  %v2580_v48 = vadd.f32 %v2579_v33, %v2131_v14  ;;  %v2133_v24 = vadd.f32 %v2132_v36, %v5872_v5  ;;  %3762 = vmatprep.subr.mxu0 %v863_v30  ;;  %v5206_v5 = vld [vmem:[#allocation2 + $0xd8] sm:$0xff]  ;;  %v5213_v30 = vld [vmem:[#allocation2 + $0x148] sm:$0xff]  ;;  %v850_v41 = vld [vmem:[#allocation5 + $0x950] sm:$0xff] }
 0x267   :  { %4211 = vmatprep.subr.mxu1 %v991_v28  ;;  %v2136_v55 = vpop.f32.mrf.mxu0  ;;  %2937 = vmatmul.mubr.f32.gmra.mxu0 %v5203_v54  ;;  %v851_v10 = vld [vmem:[#allocation5 + $0x958] sm:$0xff]  ;;  %v978_v36 = vld [vmem:[#allocation5 + $0xd50] sm:$0xff]  ;;  %v5217_v54 = vld [vmem:[#allocation2 + $0x188] sm:$0xff] }
 0x268   :  { %v2585_v57 = vpop.f32.mrf.mxu1  ;;  %3386 = vmatmul.mubr.f32.gmra.mxu1 %v5204_v42  ;;  %4977 = vst [vmem:[#allocation7 + $0x208] sm:$0xff] %v4721_v34  ;;  %v4724_v59 = vmul.f32 2.0, %v2580_v48  ;;  %v2582_v7 = vadd.f32 %v2581_v52, %v2133_v24  ;;  %v2137_v60 = vadd.f32 %v2136_v55, %v5874_v21  ;;  %2942 = vmatprep.mubr.f32.mxu0 %v5205_v49  ;;  %v5207_v21 = vld [vmem:[#allocation2 + $0xc0] sm:$0xff]  ;;  %v5216_v48 = vld [vmem:[#allocation2 + $0x150] sm:$0xff]  ;;  %v847_v24 = vld [vmem:[#allocation5 + $0x938] sm:$0xff] }
 0x269   :  { %3391 = vmatprep.mubr.f32.mxu1 %v5206_v5  ;;  %v2138_v20 = vpop.f32.mrf.mxu0  ;;  %3763 = vmatpush1.msra.mxu0 %v862_v18  ;;  %v975_v18 = vld [vmem:[#allocation5 + $0xd38] sm:$0xff]  ;;  %v974_v49 = vld [vmem:[#allocation5 + $0xd30] sm:$0xff] }
 0x26a   :  { %v2587_v26 = vpop.f32.mrf.mxu1  ;;  %4212 = vmatpush1.msra.mxu1 %v990_v17  ;;  %4980 = vst [vmem:[#allocation7 + $0x220] sm:$0xff] %v4724_v59  ;;  %v4725_v0 = vmul.f32 2.0, %v2582_v7  ;;  %v2586_v63 = vadd.f32 %v2585_v57, %v2137_v60  ;;  %v2139_v40 = vadd.f32 %v2138_v20, %v5876_v35  ;;  %3764 = vmatprep.subr.mxu0 %v859_v45  ;;  %v5210_v35 = vld [vmem:[#allocation2 + $0x118] sm:$0xff]  ;;  %v846_v60 = vld [vmem:[#allocation5 + $0x930] sm:$0xff] }
 0x26b   :  { %4213 = vmatprep.subr.mxu1 %v987_v37  ;;  %v2142_v61 = vpop.f32.mrf.mxu0  ;;  %2943 = vmatmul.mubr.f32.gmra.mxu0 %v5207_v21 }
 0x26c   :  { %v2591_v4 = vpop.f32.mrf.mxu1  ;;  %3392 = vmatmul.mubr.f32.gmra.mxu1 %v5208_v31  ;;  %4981 = vst [vmem:[#allocation7 + $0x228] sm:$0xff] %v4725_v0  ;;  %v4728_v56 = vmul.f32 2.0, %v2586_v63  ;;  %v2588_v1 = vadd.f32 %v2587_v26, %v2139_v40  ;;  %v2143_v3 = vadd.f32 %v2142_v61, %v5878_v51  ;;  %2948 = vmatprep.mubr.f32.mxu0 %v5209_v62  ;;  %v5211_v51 = vld [vmem:[#allocation2 + $0x100] sm:$0xff]  ;;  %v5220_v26 = vld [vmem:[#allocation2 + $0x190] sm:$0xff]  ;;  %v843_v0 = vld [vmem:[#allocation5 + $0x918] sm:$0xff] }
 0x26d   :  { %3397 = vmatprep.mubr.f32.mxu1 %v5210_v35  ;;  %v2144_v15 = vpop.f32.mrf.mxu0  ;;  %3765 = vmatpush1.msra.mxu0 %v858_v53  ;;  %v971_v63 = vld [vmem:[#allocation5 + $0xd18] sm:$0xff]  ;;  %v970_v62 = vld [vmem:[#allocation5 + $0xd10] sm:$0xff] }
 0x26e   :  { %v2593_v27 = vpop.f32.mrf.mxu1  ;;  %4214 = vmatpush1.msra.mxu1 %v986_v8  ;;  %4984 = vst [vmem:[#allocation7 + $0x240] sm:$0xff] %v4728_v56  ;;  %v4729_v13 = vmul.f32 2.0, %v2588_v1  ;;  %v2592_v47 = vadd.f32 %v2591_v4, %v2143_v3  ;;  %v2145_v39 = vadd.f32 %v2144_v15, %v5880_v2  ;;  %3766 = vmatprep.subr.mxu0 %v855_v46  ;;  %v5214_v2 = vld [vmem:[#allocation2 + $0x158] sm:$0xff]  ;;  %v6663_v8 = vld [vmem:[#allocation11_spill] sm:$0xff]  ;;  %v5221_v4 = vld [vmem:[#allocation2 + $0x1c8] sm:$0xff] }
 0x26f   :  { %4215 = vmatprep.subr.mxu1 %v983_v23  ;;  %v2148_v9 = vpop.f32.mrf.mxu0  ;;  %2949 = vmatmul.mubr.f32.gmra.mxu0 %v5211_v51  ;;  %v6664_v56 = vld [vmem:[#allocation12_spill] sm:$0xff]  ;;  %v842_v3 = vld [vmem:[#allocation5 + $0x910] sm:$0xff] }
 0x270   :  { %v2597_v19 = vpop.f32.mrf.mxu1  ;;  %3398 = vmatmul.mubr.f32.gmra.mxu1 %v5212_v44  ;;  %4985 = vst [vmem:[#allocation7 + $0x248] sm:$0xff] %v4729_v13  ;;  %v4732_v33 = vmul.f32 2.0, %v2592_v47  ;;  %v2594_v25 = vadd.f32 %v2593_v27, %v2145_v39  ;;  %v2149_v50 = vadd.f32 %v2148_v9, %v5882_v22  ;;  %2954 = vmatprep.mubr.f32.mxu0 %v5213_v30  ;;  %v5215_v22 = vld [vmem:[#allocation2 + $0x140] sm:$0xff]  ;;  %v5224_v13 = vld [vmem:[#allocation2 + $0x1d0] sm:$0xff]  ;;  %v839_v47 = vld [vmem:[#allocation5 + $0x8f8] sm:$0xff] }
 0x271   :  { %3403 = vmatprep.mubr.f32.mxu1 %v5214_v2  ;;  %v2150_v28 = vpop.f32.mrf.mxu0  ;;  %3767 = vmatpush1.msra.mxu0 %v854_v12  ;;  %v5223_v27 = vld [vmem:[#allocation2 + $0x1c0] sm:$0xff]  ;;  %v967_v39 = vld [vmem:[#allocation5 + $0xcf8] sm:$0xff]  ;;  %v6665_v9 = vld [vmem:[#allocation13_spill] sm:$0xff] }
 0x272   :  { %v2599_v16 = vpop.f32.mrf.mxu1  ;;  %4216 = vmatpush1.msra.mxu1 %v982_v6  ;;  %4988 = vst [vmem:[#allocation7 + $0x260] sm:$0xff] %v4732_v33  ;;  %v4733_v29 = vmul.f32 2.0, %v2594_v25  ;;  %v2598_v14 = vadd.f32 %v2597_v19, %v2149_v50  ;;  %v2151_v32 = vadd.f32 %v2150_v28, %v5884_v38  ;;  %3768 = vmatprep.subr.mxu0 %v851_v10  ;;  %v5218_v38 = vld [vmem:[#allocation2 + $0x198] sm:$0xff]  ;;  %v5225_v51 = vld [vmem:[#allocation2 + $0x208] sm:$0xff]  ;;  %v838_v2 = vld [vmem:[#allocation5 + $0x8f0] sm:$0xff] }
 0x273   :  { %4217 = vmatprep.subr.mxu1 %v979_v43  ;;  %v2154_v52 = vpop.f32.mrf.mxu0  ;;  %2955 = vmatmul.mubr.f32.gmra.mxu0 %v5215_v22  ;;  %v5226_v44 = vld [vmem:[#allocation2 + $0x218] sm:$0xff]  ;;  %v966_v28 = vld [vmem:[#allocation5 + $0xcf0] sm:$0xff]  ;;  %v6667_v22 = vld [vmem:[#allocation15_spill] sm:$0xff] }
 0x274   :  { %v2603_v34 = vpop.f32.mrf.mxu1  ;;  %3404 = vmatmul.mubr.f32.gmra.mxu1 %v5216_v48  ;;  %4989 = vst [vmem:[#allocation7 + $0x268] sm:$0xff] %v4733_v29  ;;  %v4736_v17 = vmul.f32 2.0, %v2598_v14  ;;  %v2600_v55 = vadd.f32 %v2599_v16, %v2151_v32  ;;  %v2155_v57 = vadd.f32 %v2154_v52, %v5886_v58  ;;  %2960 = vmatprep.mubr.f32.mxu0 %v5217_v54  ;;  %v5219_v58 = vld [vmem:[#allocation2 + $0x180] sm:$0xff]  ;;  %v6666_v50 = vld [vmem:[#allocation14_spill] sm:$0xff]  ;;  %v5228_v32 = vld [vmem:[#allocation2 + $0x210] sm:$0xff] }
 0x275   :  { %3409 = vmatprep.mubr.f32.mxu1 %v5218_v38  ;;  %v2156_v42 = vpop.f32.mrf.mxu0  ;;  %3769 = vmatpush1.msra.mxu0 %v850_v41  ;;  %v5227_v14 = vld [vmem:[#allocation2 + $0x200] sm:$0xff]  ;;  %v835_v41 = vld [vmem:[#allocation5 + $0x8d8] sm:$0xff]  ;;  %v6668_v38 = vld [vmem:[#allocation16_spill] sm:$0xff] }
 0x276   :  { %v2605_v45 = vpop.f32.mrf.mxu1  ;;  %4218 = vmatpush1.msra.mxu1 %v978_v36  ;;  %4992 = vst [vmem:[#allocation7 + $0x280] sm:$0xff] %v4736_v17  ;;  %v4737_v37 = vmul.f32 2.0, %v2600_v55  ;;  %v2604_v59 = vadd.f32 %v2603_v34, %v2155_v57  ;;  %v2157_v7 = vadd.f32 %v2156_v42, %v5888_v11  ;;  %3770 = vmatprep.subr.mxu0 %v847_v24  ;;  %v5222_v11 = vld [vmem:[#allocation2 + $0x1d8] sm:$0xff]  ;;  %v5229_v24 = vld [vmem:[#allocation2 + $0x248] sm:$0xff] }
 0x277   :  { %4219 = vmatprep.subr.mxu1 %v975_v18  ;;  %v2160_v5 = vpop.f32.mrf.mxu0  ;;  %2961 = vmatmul.mubr.f32.gmra.mxu0 %v5219_v58  ;;  %v963_v36 = vld [vmem:[#allocation5 + $0xcd8] sm:$0xff] }
 0x278   :  { %v2609_v20 = vpop.f32.mrf.mxu1  ;;  %3410 = vmatmul.mubr.f32.gmra.mxu1 %v5220_v26  ;;  %4993 = vst [vmem:[#allocation7 + $0x288] sm:$0xff] %v4737_v37  ;;  %v4740_v40 = vmul.f32 2.0, %v2604_v59  ;;  %v2606_v53 = vadd.f32 %v2605_v45, %v2157_v7  ;;  %v2161_v61 = vadd.f32 %v2160_v5, %v6663_v8  ;;  %2966 = vmatprep.mubr.f32.mxu0 %v5221_v4  ;;  %v5230_v18 = vld [vmem:[#allocation2 + $0x258] sm:$0xff]  ;;  %v834_v45 = vld [vmem:[#allocation5 + $0x8d0] sm:$0xff] }
 0x279   :  { %3415 = vmatprep.mubr.f32.mxu1 %v5222_v11  ;;  %v2162_v21 = vpop.f32.mrf.mxu0  ;;  %3771 = vmatpush1.msra.mxu0 %v846_v60  ;;  %v962_v37 = vld [vmem:[#allocation5 + $0xcd0] sm:$0xff]  ;;  %v5231_v60 = vld [vmem:[#allocation2 + $0x240] sm:$0xff]  ;;  %v831_v5 = vld [vmem:[#allocation5 + $0x8b8] sm:$0xff] }
 0x27a   :  { %v2611_v31 = vpop.f32.mrf.mxu1  ;;  %4220 = vmatpush1.msra.mxu1 %v974_v49  ;;  %4996 = vst [vmem:[#allocation7 + $0x2a0] sm:$0xff] %v4740_v40  ;;  %v4741_v46 = vmul.f32 2.0, %v2606_v53  ;;  %v2610_v23 = vadd.f32 %v2609_v20, %v2161_v61  ;;  %v2163_v1 = vadd.f32 %v2162_v21, %v6664_v56  ;;  %3772 = vmatprep.subr.mxu0 %v843_v0  ;;  %v5232_v49 = vld [vmem:[#allocation2 + $0x250] sm:$0xff]  ;;  %v959_v20 = vld [vmem:[#allocation5 + $0xcb8] sm:$0xff]  ;;  %v5233_v40 = vld [vmem:[#allocation2 + $0x288] sm:$0xff] }
 0x27b   :  { %4221 = vmatprep.subr.mxu1 %v971_v63  ;;  %v2166_v35 = vpop.f32.mrf.mxu0  ;;  %2967 = vmatmul.mubr.f32.gmra.mxu0 %v5223_v27  ;;  %v6669_v0 = vld [vmem:[#allocation17_spill] sm:$0xff]  ;;  %v5234_v53 = vld [vmem:[#allocation2 + $0x298] sm:$0xff] }
 0x27c   :  { %v2615_v15 = vpop.f32.mrf.mxu1  ;;  %3416 = vmatmul.mubr.f32.gmra.mxu1 %v5224_v13  ;;  %4997 = vst [vmem:[#allocation7 + $0x2a8] sm:$0xff] %v4741_v46  ;;  %v4744_v12 = vmul.f32 2.0, %v2610_v23  ;;  %v2612_v6 = vadd.f32 %v2611_v31, %v2163_v1  ;;  %v2167_v19 = vadd.f32 %v2166_v35, %v6665_v9  ;;  %2972 = vmatprep.mubr.f32.mxu0 %v5225_v51  ;;  %v6670_v21 = vld [vmem:[#allocation18_spill] sm:$0xff]  ;;  %v830_v46 = vld [vmem:[#allocation5 + $0x8b0] sm:$0xff] }
 0x27d   :  { %3421 = vmatprep.mubr.f32.mxu1 %v5226_v44  ;;  %v2168_v10 = vpop.f32.mrf.mxu0  ;;  %3773 = vmatpush1.msra.mxu0 %v842_v3  ;;  %v958_v23 = vld [vmem:[#allocation5 + $0xcb0] sm:$0xff]  ;;  %v5235_v3 = vld [vmem:[#allocation2 + $0x280] sm:$0xff]  ;;  %v827_v35 = vld [vmem:[#allocation5 + $0x898] sm:$0xff] }
 0x27e   :  { %v2617_v43 = vpop.f32.mrf.mxu1  ;;  %4222 = vmatpush1.msra.mxu1 %v970_v62  ;;  %5000 = vst [vmem:[#allocation7 + $0x2c0] sm:$0xff] %v4744_v12  ;;  %v4745_v33 = vmul.f32 2.0, %v2612_v6  ;;  %v2616_v25 = vadd.f32 %v2615_v15, %v2167_v19  ;;  %v2169_v30 = vadd.f32 %v2168_v10, %v6666_v50  ;;  %3774 = vmatprep.subr.mxu0 %v839_v47  ;;  %v5236_v62 = vld [vmem:[#allocation2 + $0x290] sm:$0xff]  ;;  %v955_v15 = vld [vmem:[#allocation5 + $0xc98] sm:$0xff]  ;;  %v6671_v47 = vld [vmem:[#allocation19_spill] sm:$0xff] }
 0x27f   :  { %4223 = vmatprep.subr.mxu1 %v967_v39  ;;  %v2172_v16 = vpop.f32.mrf.mxu0  ;;  %2973 = vmatmul.mubr.f32.gmra.mxu0 %v5227_v14  ;;  %v5237_v12 = vld [vmem:[#allocation2 + $0x2c8] sm:$0xff]  ;;  %v5238_v6 = vld [vmem:[#allocation2 + $0x2d8] sm:$0xff] }
 0x280   :  { %v2621_v29 = vpop.f32.mrf.mxu1  ;;  %3422 = vmatmul.mubr.f32.gmra.mxu1 %v5228_v32  ;;  %5001 = vst [vmem:[#allocation7 + $0x2c8] sm:$0xff] %v4745_v33  ;;  %v4748_v52 = vmul.f32 2.0, %v2616_v25  ;;  %v2618_v34 = vadd.f32 %v2617_v43, %v2169_v30  ;;  %v2173_v48 = vadd.f32 %v2172_v16, %v6667_v22  ;;  %2978 = vmatprep.mubr.f32.mxu0 %v5229_v24  ;;  %v6672_v10 = vld [vmem:[#allocation20_spill] sm:$0xff]  ;;  %v826_v33 = vld [vmem:[#allocation5 + $0x890] sm:$0xff]  ;;  %v823_v16 = vld [vmem:[#allocation5 + $0x878] sm:$0xff] }
 0x281   :  { %3427 = vmatprep.mubr.f32.mxu1 %v5230_v18  ;;  %v2174_v17 = vpop.f32.mrf.mxu0  ;;  %3775 = vmatpush1.msra.mxu0 %v838_v2  ;;  %v954_v25 = vld [vmem:[#allocation5 + $0xc90] sm:$0xff]  ;;  %v5239_v2 = vld [vmem:[#allocation2 + $0x2c0] sm:$0xff] }
 0x282   :  { %v2623_v55 = vpop.f32.mrf.mxu1  ;;  %4224 = vmatpush1.msra.mxu1 %v966_v28  ;;  %5004 = vst [vmem:[#allocation7 + $0x2e0] sm:$0xff] %v4748_v52  ;;  %v4749_v57 = vmul.f32 2.0, %v2618_v34  ;;  %v2622_v54 = vadd.f32 %v2621_v29, %v2173_v48  ;;  %v2175_v42 = vadd.f32 %v2174_v17, %v6668_v38  ;;  %3776 = vmatprep.subr.mxu0 %v835_v41  ;;  %v5240_v28 = vld [vmem:[#allocation2 + $0x2d0] sm:$0xff]  ;;  %v951_v29 = vld [vmem:[#allocation5 + $0xc78] sm:$0xff]  ;;  %v5241_v52 = vld [vmem:[#allocation2 + $0x308] sm:$0xff] }
 0x283   :  { %4225 = vmatprep.subr.mxu1 %v963_v36  ;;  %v2178_v59 = vpop.f32.mrf.mxu0  ;;  %2979 = vmatmul.mubr.f32.gmra.mxu0 %v5231_v60  ;;  %v6673_v41 = vld [vmem:[#allocation21_spill] sm:$0xff]  ;;  %v5242_v34 = vld [vmem:[#allocation2 + $0x318] sm:$0xff] }
 0x284   :  { %v2627_v7 = vpop.f32.mrf.mxu1  ;;  %3428 = vmatmul.mubr.f32.gmra.mxu1 %v5232_v49  ;;  %5005 = vst [vmem:[#allocation7 + $0x2e8] sm:$0xff] %v4749_v57  ;;  %v4752_v58 = vmul.f32 2.0, %v2622_v54  ;;  %v2624_v26 = vadd.f32 %v2623_v55, %v2175_v42  ;;  %v2179_v63 = vadd.f32 %v2178_v59, %v6669_v0  ;;  %2984 = vmatprep.mubr.f32.mxu0 %v5233_v40  ;;  %v6674_v17 = vld [vmem:[#allocation22_spill] sm:$0xff]  ;;  %v822_v57 = vld [vmem:[#allocation5 + $0x870] sm:$0xff] }
 0x285   :  { %3433 = vmatprep.mubr.f32.mxu1 %v5234_v53  ;;  %v2180_v8 = vpop.f32.mrf.mxu0  ;;  %3777 = vmatpush1.msra.mxu0 %v834_v45  ;;  %v950_v54 = vld [vmem:[#allocation5 + $0xc70] sm:$0xff]  ;;  %v5243_v45 = vld [vmem:[#allocation2 + $0x300] sm:$0xff]  ;;  %v819_v59 = vld [vmem:[#allocation5 + $0x858] sm:$0xff] }
 0x286   :  { %v2629_v61 = vpop.f32.mrf.mxu1  ;;  %4226 = vmatpush1.msra.mxu1 %v962_v37  ;;  %5008 = vst [vmem:[#allocation7 + $0x300] sm:$0xff] %v4752_v58  ;;  %v4753_v4 = vmul.f32 2.0, %v2624_v26  ;;  %v2628_v11 = vadd.f32 %v2627_v7, %v2179_v63  ;;  %v2181_v31 = vadd.f32 %v2180_v8, %v6670_v21  ;;  %3778 = vmatprep.subr.mxu0 %v831_v5  ;;  %v5244_v37 = vld [vmem:[#allocation2 + $0x310] sm:$0xff]  ;;  %v947_v7 = vld [vmem:[#allocation5 + $0xc58] sm:$0xff]  ;;  %v6675_v5 = vld [vmem:[#allocation23_spill] sm:$0xff] }
 0x287   :  { %4227 = vmatprep.subr.mxu1 %v959_v20  ;;  %v2184_v56 = vpop.f32.mrf.mxu0  ;;  %2985 = vmatmul.mubr.f32.gmra.mxu0 %v5235_v3  ;;  %v5245_v58 = vld [vmem:[#allocation2 + $0x348] sm:$0xff]  ;;  %v5246_v26 = vld [vmem:[#allocation2 + $0x358] sm:$0xff] }
 0x288   :  { %v2633_v1 = vpop.f32.mrf.mxu1  ;;  %3434 = vmatmul.mubr.f32.gmra.mxu1 %v5236_v62  ;;  %5009 = vst [vmem:[#allocation7 + $0x308] sm:$0xff] %v4753_v4  ;;  %v4756_v27 = vmul.f32 2.0, %v2628_v11  ;;  %v2630_v13 = vadd.f32 %v2629_v61, %v2181_v31  ;;  %v2185_v39 = vadd.f32 %v2184_v56, %v6671_v47  ;;  %2990 = vmatprep.mubr.f32.mxu0 %v5237_v12  ;;  %v6676_v8 = vld [vmem:[#allocation24_spill] sm:$0xff]  ;;  %v818_v4 = vld [vmem:[#allocation5 + $0x850] sm:$0xff]  ;;  %v815_v56 = vld [vmem:[#allocation5 + $0x838] sm:$0xff] }
 0x289   :  { %3439 = vmatprep.mubr.f32.mxu1 %v5238_v6  ;;  %v2186_v9 = vpop.f32.mrf.mxu0  ;;  %3779 = vmatpush1.msra.mxu0 %v830_v46  ;;  %v946_v11 = vld [vmem:[#allocation5 + $0xc50] sm:$0xff]  ;;  %v5247_v46 = vld [vmem:[#allocation2 + $0x340] sm:$0xff] }
 0x28a   :  { %v2635_v19 = vpop.f32.mrf.mxu1  ;;  %4228 = vmatpush1.msra.mxu1 %v958_v23  ;;  %5012 = vst [vmem:[#allocation7 + $0x320] sm:$0xff] %v4756_v27  ;;  %v4757_v51 = vmul.f32 2.0, %v2630_v13  ;;  %v2634_v44 = vadd.f32 %v2633_v1, %v2185_v39  ;;  %v2187_v43 = vadd.f32 %v2186_v9, %v6672_v10  ;;  %3780 = vmatprep.subr.mxu0 %v827_v35  ;;  %v5248_v23 = vld [vmem:[#allocation2 + $0x350] sm:$0xff]  ;;  %v943_v1 = vld [vmem:[#allocation5 + $0xc38] sm:$0xff]  ;;  %v5249_v27 = vld [vmem:[#allocation2 + $0x388] sm:$0xff] }
 0x28b   :  { %4229 = vmatprep.subr.mxu1 %v955_v15  ;;  %v2190_v50 = vpop.f32.mrf.mxu0  ;;  %2991 = vmatmul.mubr.f32.gmra.mxu0 %v5239_v2  ;;  %v6677_v35 = vld [vmem:[#allocation25_spill] sm:$0xff]  ;;  %v5250_v13 = vld [vmem:[#allocation2 + $0x398] sm:$0xff] }
 0x28c   :  { %v2639_v30 = vpop.f32.mrf.mxu1  ;;  %3440 = vmatmul.mubr.f32.gmra.mxu1 %v5240_v28  ;;  %5013 = vst [vmem:[#allocation7 + $0x328] sm:$0xff] %v4757_v51  ;;  %v4760_v14 = vmul.f32 2.0, %v2634_v44  ;;  %v2636_v32 = vadd.f32 %v2635_v19, %v2187_v43  ;;  %v2191_v36 = vadd.f32 %v2190_v50, %v6673_v41  ;;  %2996 = vmatprep.mubr.f32.mxu0 %v5241_v52  ;;  %v6678_v9 = vld [vmem:[#allocation26_spill] sm:$0xff]  ;;  %v814_v51 = vld [vmem:[#allocation5 + $0x830] sm:$0xff] }
 0x28d   :  { %3445 = vmatprep.mubr.f32.mxu1 %v5242_v34  ;;  %v2192_v22 = vpop.f32.mrf.mxu0  ;;  %3781 = vmatpush1.msra.mxu0 %v826_v33  ;;  %v942_v44 = vld [vmem:[#allocation5 + $0xc30] sm:$0xff]  ;;  %v5251_v33 = vld [vmem:[#allocation2 + $0x380] sm:$0xff]  ;;  %v811_v50 = vld [vmem:[#allocation5 + $0x818] sm:$0xff] }
 0x28e   :  { %v2641_v48 = vpop.f32.mrf.mxu1  ;;  %4230 = vmatpush1.msra.mxu1 %v954_v25  ;;  %5016 = vst [vmem:[#allocation7 + $0x340] sm:$0xff] %v4760_v14  ;;  %v4761_v24 = vmul.f32 2.0, %v2636_v32  ;;  %v2640_v18 = vadd.f32 %v2639_v30, %v2191_v36  ;;  %v2193_v55 = vadd.f32 %v2192_v22, %v6674_v17  ;;  %3782 = vmatprep.subr.mxu0 %v823_v16  ;;  %v5252_v25 = vld [vmem:[#allocation2 + $0x390] sm:$0xff]  ;;  %v939_v30 = vld [vmem:[#allocation5 + $0xc18] sm:$0xff]  ;;  %v6679_v16 = vld [vmem:[#allocation27_spill] sm:$0xff] }
 0x28f   :  { %4231 = vmatprep.subr.mxu1 %v951_v29  ;;  %v2196_v38 = vpop.f32.mrf.mxu0  ;;  %2997 = vmatmul.mubr.f32.gmra.mxu0 %v5243_v45  ;;  %v5253_v14 = vld [vmem:[#allocation2 + $0x3c8] sm:$0xff]  ;;  %v5254_v32 = vld [vmem:[#allocation2 + $0x3d8] sm:$0xff] }
 0x290   :  { %v2645_v42 = vpop.f32.mrf.mxu1  ;;  %3446 = vmatmul.mubr.f32.gmra.mxu1 %v5244_v37  ;;  %5017 = vst [vmem:[#allocation7 + $0x348] sm:$0xff] %v4761_v24  ;;  %v4764_v60 = vmul.f32 2.0, %v2640_v18  ;;  %v2642_v49 = vadd.f32 %v2641_v48, %v2193_v55  ;;  %v2197_v20 = vadd.f32 %v2196_v38, %v6675_v5  ;;  %3002 = vmatprep.mubr.f32.mxu0 %v5245_v58  ;;  %v6680_v22 = vld [vmem:[#allocation28_spill] sm:$0xff]  ;;  %v810_v24 = vld [vmem:[#allocation5 + $0x810] sm:$0xff]  ;;  %v935_v38 = vld [vmem:[#allocation5 + $0xbf8] sm:$0xff] }
 0x291   :  { %3451 = vmatprep.mubr.f32.mxu1 %v5246_v26  ;;  %v2198_v0 = vpop.f32.mrf.mxu0  ;;  %3783 = vmatpush1.msra.mxu0 %v822_v57  ;;  %v938_v18 = vld [vmem:[#allocation5 + $0xc10] sm:$0xff]  ;;  %v5255_v57 = vld [vmem:[#allocation2 + $0x3c0] sm:$0xff] }
 0x292   :  { %v2647_v63 = vpop.f32.mrf.mxu1  ;;  %4232 = vmatpush1.msra.mxu1 %v950_v54  ;;  %5020 = vst [vmem:[#allocation7 + $0x360] sm:$0xff] %v4764_v60  ;;  %v4765_v40 = vmul.f32 2.0, %v2642_v49  ;;  %v2646_v53 = vadd.f32 %v2645_v42, %v2197_v20  ;;  %v2199_v61 = vadd.f32 %v2198_v0, %v6676_v8  ;;  %3784 = vmatprep.subr.mxu0 %v819_v59  ;;  %v5256_v54 = vld [vmem:[#allocation2 + $0x3d0] sm:$0xff]  ;;  %v1063_v42 = vld [vmem:[#allocation5 + $0xff8] sm:$0xff]  ;;  %v5257_v60 = vld [vmem:[#allocation2 + $0x408] sm:$0xff] }
 0x293   :  { %4233 = vmatprep.subr.mxu1 %v947_v7  ;;  %v2202_v21 = vpop.f32.mrf.mxu0  ;;  %3003 = vmatmul.mubr.f32.gmra.mxu0 %v5247_v46  ;;  %v6681_v59 = vld [vmem:[#allocation29_spill] sm:$0xff]  ;;  %v5258_v49 = vld [vmem:[#allocation2 + $0x418] sm:$0xff] }
 0x294   :  { %v2651_v31 = vpop.f32.mrf.mxu1  ;;  %3452 = vmatmul.mubr.f32.gmra.mxu1 %v5248_v23  ;;  %5021 = vst [vmem:[#allocation7 + $0x368] sm:$0xff] %v4765_v40  ;;  %v4768_v3 = vmul.f32 2.0, %v2646_v53  ;;  %v2648_v62 = vadd.f32 %v2647_v63, %v2199_v61  ;;  %v2203_v15 = vadd.f32 %v2202_v21, %v6677_v35  ;;  %3008 = vmatprep.mubr.f32.mxu0 %v5249_v27  ;;  %v6682_v0 = vld [vmem:[#allocation30_spill] sm:$0xff]  ;;  %v934_v40 = vld [vmem:[#allocation5 + $0xbf0] sm:$0xff] }
 0x295   :  { %3457 = vmatprep.mubr.f32.mxu1 %v5250_v13  ;;  %v2204_v47 = vpop.f32.mrf.mxu0  ;;  %3785 = vmatpush1.msra.mxu0 %v818_v4  ;;  %v1062_v53 = vld [vmem:[#allocation5 + $0xff0] sm:$0xff]  ;;  %v5259_v4 = vld [vmem:[#allocation2 + $0x400] sm:$0xff]  ;;  %v931_v21 = vld [vmem:[#allocation5 + $0xbd8] sm:$0xff] }
 0x296   :  { %v2653_v39 = vpop.f32.mrf.mxu1  ;;  %4234 = vmatpush1.msra.mxu1 %v946_v11  ;;  %5024 = vst [vmem:[#allocation7 + $0x380] sm:$0xff] %v4768_v3  ;;  %v4769_v12 = vmul.f32 2.0, %v2648_v62  ;;  %v2652_v6 = vadd.f32 %v2651_v31, %v2203_v15  ;;  %v2205_v19 = vadd.f32 %v2204_v47, %v6678_v9  ;;  %3786 = vmatprep.subr.mxu0 %v815_v56  ;;  %v5260_v11 = vld [vmem:[#allocation2 + $0x410] sm:$0xff]  ;;  %v1059_v31 = vld [vmem:[#allocation5 + $0xfd8] sm:$0xff]  ;;  %v6683_v56 = vld [vmem:[#allocation31_spill] sm:$0xff] }
 0x297   :  { %4235 = vmatprep.subr.mxu1 %v943_v1  ;;  %v2208_v10 = vpop.f32.mrf.mxu0  ;;  %3009 = vmatmul.mubr.f32.gmra.mxu0 %v5251_v33  ;;  %v5261_v3 = vld [vmem:[#allocation2 + $0x448] sm:$0xff]  ;;  %v5262_v62 = vld [vmem:[#allocation2 + $0x458] sm:$0xff] }
 0x298   :  { %v2657_v43 = vpop.f32.mrf.mxu1  ;;  %3458 = vmatmul.mubr.f32.gmra.mxu1 %v5252_v25  ;;  %5025 = vst [vmem:[#allocation7 + $0x388] sm:$0xff] %v4769_v12  ;;  %v4772_v2 = vmul.f32 2.0, %v2652_v6  ;;  %v2654_v28 = vadd.f32 %v2653_v39, %v2205_v19  ;;  %v2209_v29 = vadd.f32 %v2208_v10, %v6679_v16  ;;  %3014 = vmatprep.mubr.f32.mxu0 %v5253_v14  ;;  %v6684_v47 = vld [vmem:[#allocation32_spill] sm:$0xff]  ;;  %v930_v12 = vld [vmem:[#allocation5 + $0xbd0] sm:$0xff]  ;;  %v927_v10 = vld [vmem:[#allocation5 + $0xbb8] sm:$0xff] }
 0x299   :  { %3463 = vmatprep.mubr.f32.mxu1 %v5254_v32  ;;  %v2210_v41 = vpop.f32.mrf.mxu0  ;;  %3787 = vmatpush1.msra.mxu0 %v814_v51  ;;  %v1058_v6 = vld [vmem:[#allocation5 + $0xfd0] sm:$0xff]  ;;  %v5263_v51 = vld [vmem:[#allocation2 + $0x440] sm:$0xff] }
 0x29a   :  { %v2659_v36 = vpop.f32.mrf.mxu1  ;;  %4236 = vmatpush1.msra.mxu1 %v942_v44  ;;  %5028 = vst [vmem:[#allocation7 + $0x3a0] sm:$0xff] %v4772_v2  ;;  %v4773_v52 = vmul.f32 2.0, %v2654_v28  ;;  %v2658_v34 = vadd.f32 %v2657_v43, %v2209_v29  ;;  %v2211_v48 = vadd.f32 %v2210_v41, %v6680_v22  ;;  %3788 = vmatprep.subr.mxu0 %v811_v50  ;;  %v5264_v44 = vld [vmem:[#allocation2 + $0x450] sm:$0xff]  ;;  %v1055_v43 = vld [vmem:[#allocation5 + $0xfb8] sm:$0xff]  ;;  %v5265_v2 = vld [vmem:[#allocation2 + $0x488] sm:$0xff] }
 0x29b   :  { %4237 = vmatprep.subr.mxu1 %v939_v30  ;;  %v2214_v17 = vpop.f32.mrf.mxu0  ;;  %3015 = vmatmul.mubr.f32.gmra.mxu0 %v5255_v57  ;;  %v6685_v50 = vld [vmem:[#allocation33_spill] sm:$0xff]  ;;  %v5266_v28 = vld [vmem:[#allocation2 + $0x498] sm:$0xff] }
 0x29c   :  { %v2663_v55 = vpop.f32.mrf.mxu1  ;;  %3464 = vmatmul.mubr.f32.gmra.mxu1 %v5256_v54  ;;  %5029 = vst [vmem:[#allocation7 + $0x3a8] sm:$0xff] %v4773_v52  ;;  %v4776_v45 = vmul.f32 2.0, %v2658_v34  ;;  %v2660_v37 = vadd.f32 %v2659_v36, %v2211_v48  ;;  %v2215_v7 = vadd.f32 %v2214_v17, %v6681_v59  ;;  %3020 = vmatprep.mubr.f32.mxu0 %v5257_v60  ;;  %v6686_v41 = vld [vmem:[#allocation34_spill] sm:$0xff]  ;;  %v926_v52 = vld [vmem:[#allocation5 + $0xbb0] sm:$0xff] }
 0x29d   :  { %3469 = vmatprep.mubr.f32.mxu1 %v5258_v49  ;;  %v2216_v5 = vpop.f32.mrf.mxu0  ;;  %3789 = vmatpush1.msra.mxu0 %v810_v24  ;;  %v1054_v34 = vld [vmem:[#allocation5 + $0xfb0] sm:$0xff]  ;;  %v5267_v24 = vld [vmem:[#allocation2 + $0x480] sm:$0xff]  ;;  %v923_v17 = vld [vmem:[#allocation5 + $0xb98] sm:$0xff] }
 0x29e   :  { %v2665_v20 = vpop.f32.mrf.mxu1  ;;  %4238 = vmatpush1.msra.mxu1 %v938_v18  ;;  %5032 = vst [vmem:[#allocation7 + $0x3c0] sm:$0xff] %v4776_v45  ;;  %v4777_v58 = vmul.f32 2.0, %v2660_v37  ;;  %v2664_v26 = vadd.f32 %v2663_v55, %v2215_v7  ;;  %v2217_v63 = vadd.f32 %v2216_v5, %v6682_v0  ;;  %3790 = vmatprep.subr.mxu0 %v935_v38  ;;  %v5268_v18 = vld [vmem:[#allocation2 + $0x490] sm:$0xff]  ;;  %v1051_v55 = vld [vmem:[#allocation5 + $0xf98] sm:$0xff]  ;;  %v6687_v38 = vld [vmem:[#allocation35_spill] sm:$0xff] }
 0x29f   :  { %4239 = vmatprep.subr.mxu1 %v1063_v42  ;;  %v2220_v8 = vpop.f32.mrf.mxu0  ;;  %3021 = vmatmul.mubr.f32.gmra.mxu0 %v5259_v4  ;;  %v5269_v45 = vld [vmem:[#allocation2 + $0x4c8] sm:$0xff]  ;;  %v5270_v37 = vld [vmem:[#allocation2 + $0x4d8] sm:$0xff] }
 0x2a0   :  { %v2669_v61 = vpop.f32.mrf.mxu1  ;;  %3470 = vmatmul.mubr.f32.gmra.mxu1 %v5260_v11  ;;  %5033 = vst [vmem:[#allocation7 + $0x3c8] sm:$0xff] %v4777_v58  ;;  %v4780_v46 = vmul.f32 2.0, %v2664_v26  ;;  %v2666_v23 = vadd.f32 %v2665_v20, %v2217_v63  ;;  %v2221_v1 = vadd.f32 %v2220_v8, %v6683_v56  ;;  %3026 = vmatprep.mubr.f32.mxu0 %v5261_v3  ;;  %v6688_v5 = vld [vmem:[#allocation36_spill] sm:$0xff]  ;;  %v922_v58 = vld [vmem:[#allocation5 + $0xb90] sm:$0xff]  ;;  %v919_v8 = vld [vmem:[#allocation5 + $0xb78] sm:$0xff] }
 0x2a1   :  { %3475 = vmatprep.mubr.f32.mxu1 %v5262_v62  ;;  %v2222_v35 = vpop.f32.mrf.mxu0  ;;  %3791 = vmatpush2.msra.mxu0 %v934_v40  ;;  %v1050_v26 = vld [vmem:[#allocation5 + $0xf90] sm:$0xff]  ;;  %v5271_v40 = vld [vmem:[#allocation2 + $0x4c0] sm:$0xff] }
 0x2a2   :  { %v2671_v15 = vpop.f32.mrf.mxu1  ;;  %4240 = vmatpush2.msra.mxu1 %v1062_v53  ;;  %5036 = vst [vmem:[#allocation7 + $0x3e0] sm:$0xff] %v4780_v46  ;;  %v4781_v27 = vmul.f32 2.0, %v2666_v23  ;;  %v2670_v13 = vadd.f32 %v2669_v61, %v2221_v1  ;;  %v2223_v39 = vadd.f32 %v2222_v35, %v6684_v47  ;;  %3792 = vmatprep.subr.mxu0 %v931_v21  ;;  %v5272_v53 = vld [vmem:[#allocation2 + $0x4d0] sm:$0xff]  ;;  %v1047_v61 = vld [vmem:[#allocation5 + $0xf78] sm:$0xff]  ;;  %v5273_v46 = vld [vmem:[#allocation2 + $0x508] sm:$0xff] }
 0x2a3   :  { %4241 = vmatprep.subr.mxu1 %v1059_v31  ;;  %v2226_v9 = vpop.f32.mrf.mxu0  ;;  %3027 = vmatmul.mubr.f32.gmra.mxu0 %v5263_v51  ;;  %v6689_v21 = vld [vmem:[#allocation37_spill] sm:$0xff]  ;;  %v5274_v23 = vld [vmem:[#allocation2 + $0x518] sm:$0xff] }
 0x2a4   :  { %v2675_v19 = vpop.f32.mrf.mxu1  ;;  %3476 = vmatmul.mubr.f32.gmra.mxu1 %v5264_v44  ;;  %5037 = vst [vmem:[#allocation7 + $0x3e8] sm:$0xff] %v4781_v27  ;;  %v4784_v33 = vmul.f32 2.0, %v2670_v13  ;;  %v2672_v25 = vadd.f32 %v2671_v15, %v2223_v39  ;;  %v2227_v30 = vadd.f32 %v2226_v9, %v6685_v50  ;;  %3032 = vmatprep.mubr.f32.mxu0 %v5265_v2  ;;  %v6690_v35 = vld [vmem:[#allocation38_spill] sm:$0xff]  ;;  %v918_v27 = vld [vmem:[#allocation5 + $0xb70] sm:$0xff] }
 0x2a5   :  { %3481 = vmatprep.mubr.f32.mxu1 %v5266_v28  ;;  %v2228_v16 = vpop.f32.mrf.mxu0  ;;  %3793 = vmatpush2.msra.mxu0 %v930_v12  ;;  %v1046_v13 = vld [vmem:[#allocation5 + $0xf70] sm:$0xff]  ;;  %v5275_v12 = vld [vmem:[#allocation2 + $0x500] sm:$0xff]  ;;  %v915_v9 = vld [vmem:[#allocation5 + $0xb58] sm:$0xff] }
 0x2a6   :  { %v2677_v29 = vpop.f32.mrf.mxu1  ;;  %4242 = vmatpush2.msra.mxu1 %v1058_v6  ;;  %5040 = vst [vmem:[#allocation7 + $0x400] sm:$0xff] %v4784_v33  ;;  %v4785_v14 = vmul.f32 2.0, %v2672_v25  ;;  %v2676_v32 = vadd.f32 %v2675_v19, %v2227_v30  ;;  %v2229_v36 = vadd.f32 %v2228_v16, %v6686_v41  ;;  %3794 = vmatprep.subr.mxu0 %v927_v10  ;;  %v5276_v6 = vld [vmem:[#allocation2 + $0x510] sm:$0xff]  ;;  %v1043_v19 = vld [vmem:[#allocation5 + $0xf58] sm:$0xff]  ;;  %v6691_v10 = vld [vmem:[#allocation39_spill] sm:$0xff] }
 0x2a7   :  { %4243 = vmatprep.subr.mxu1 %v1055_v43  ;;  %v2232_v22 = vpop.f32.mrf.mxu0  ;;  %3033 = vmatmul.mubr.f32.gmra.mxu0 %v5267_v24  ;;  %v5277_v33 = vld [vmem:[#allocation2 + $0x548] sm:$0xff]  ;;  %v5278_v25 = vld [vmem:[#allocation2 + $0x558] sm:$0xff] }
 0x2a8   :  { %v2681_v48 = vpop.f32.mrf.mxu1  ;;  %3482 = vmatmul.mubr.f32.gmra.mxu1 %v5268_v18  ;;  %5041 = vst [vmem:[#allocation7 + $0x408] sm:$0xff] %v4785_v14  ;;  %v4788_v57 = vmul.f32 2.0, %v2676_v32  ;;  %v2678_v54 = vadd.f32 %v2677_v29, %v2229_v36  ;;  %v2233_v42 = vadd.f32 %v2232_v22, %v6687_v38  ;;  %3038 = vmatprep.mubr.f32.mxu0 %v5269_v45  ;;  %v6692_v16 = vld [vmem:[#allocation40_spill] sm:$0xff]  ;;  %v914_v14 = vld [vmem:[#allocation5 + $0xb50] sm:$0xff]  ;;  %v911_v22 = vld [vmem:[#allocation5 + $0xb38] sm:$0xff] }
 0x2a9   :  { %3487 = vmatprep.mubr.f32.mxu1 %v5270_v37  ;;  %v2234_v59 = vpop.f32.mrf.mxu0  ;;  %3795 = vmatpush2.msra.mxu0 %v926_v52  ;;  %v1042_v32 = vld [vmem:[#allocation5 + $0xf50] sm:$0xff]  ;;  %v5279_v52 = vld [vmem:[#allocation2 + $0x540] sm:$0xff] }
 0x2aa   :  { %v2683_v7 = vpop.f32.mrf.mxu1  ;;  %4244 = vmatpush2.msra.mxu1 %v1054_v34  ;;  %5044 = vst [vmem:[#allocation7 + $0x420] sm:$0xff] %v4788_v57  ;;  %v4789_v60 = vmul.f32 2.0, %v2678_v54  ;;  %v2682_v49 = vadd.f32 %v2681_v48, %v2233_v42  ;;  %v2235_v20 = vadd.f32 %v2234_v59, %v6688_v5  ;;  %3796 = vmatprep.subr.mxu0 %v923_v17  ;;  %v5280_v34 = vld [vmem:[#allocation2 + $0x550] sm:$0xff]  ;;  %v1039_v48 = vld [vmem:[#allocation5 + $0xf38] sm:$0xff]  ;;  %v5281_v57 = vld [vmem:[#allocation2 + $0x588] sm:$0xff] }
 0x2ab   :  { %4245 = vmatprep.subr.mxu1 %v1051_v55  ;;  %v2238_v0 = vpop.f32.mrf.mxu0  ;;  %3039 = vmatmul.mubr.f32.gmra.mxu0 %v5271_v40  ;;  %v6693_v17 = vld [vmem:[#allocation41_spill] sm:$0xff]  ;;  %v5282_v54 = vld [vmem:[#allocation2 + $0x598] sm:$0xff] }
 0x2ac   :  { %v2687_v63 = vpop.f32.mrf.mxu1  ;;  %3488 = vmatmul.mubr.f32.gmra.mxu1 %v5272_v53  ;;  %5045 = vst [vmem:[#allocation7 + $0x428] sm:$0xff] %v4789_v60  ;;  %v4792_v4 = vmul.f32 2.0, %v2682_v49  ;;  %v2684_v11 = vadd.f32 %v2683_v7, %v2235_v20  ;;  %v2239_v31 = vadd.f32 %v2238_v0, %v6689_v21  ;;  %3044 = vmatprep.mubr.f32.mxu0 %v5273_v46  ;;  %v6694_v59 = vld [vmem:[#allocation42_spill] sm:$0xff]  ;;  %v910_v60 = vld [vmem:[#allocation5 + $0xb30] sm:$0xff] }
 0x2ad   :  { %3493 = vmatprep.mubr.f32.mxu1 %v5274_v23  ;;  %v2240_v56 = vpop.f32.mrf.mxu0  ;;  %3797 = vmatpush2.msra.mxu0 %v922_v58  ;;  %v1038_v49 = vld [vmem:[#allocation5 + $0xf30] sm:$0xff]  ;;  %v5283_v58 = vld [vmem:[#allocation2 + $0x580] sm:$0xff]  ;;  %v907_v0 = vld [vmem:[#allocation5 + $0xb18] sm:$0xff] }
 0x2ae   :  { %v2689_v1 = vpop.f32.mrf.mxu1  ;;  %4246 = vmatpush2.msra.mxu1 %v1050_v26  ;;  %5048 = vst [vmem:[#allocation7 + $0x440] sm:$0xff] %v4792_v4  ;;  %v4793_v3 = vmul.f32 2.0, %v2684_v11  ;;  %v2688_v62 = vadd.f32 %v2687_v63, %v2239_v31  ;;  %v2241_v15 = vadd.f32 %v2240_v56, %v6690_v35  ;;  %3798 = vmatprep.subr.mxu0 %v919_v8  ;;  %v5284_v26 = vld [vmem:[#allocation2 + $0x590] sm:$0xff]  ;;  %v1035_v63 = vld [vmem:[#allocation5 + $0xf18] sm:$0xff]  ;;  %v6695_v8 = vld [vmem:[#allocation43_spill] sm:$0xff] }
 0x2af   :  { %4247 = vmatprep.subr.mxu1 %v1047_v61  ;;  %v2244_v47 = vpop.f32.mrf.mxu0  ;;  %3045 = vmatmul.mubr.f32.gmra.mxu0 %v5275_v12  ;;  %v5285_v4 = vld [vmem:[#allocation2 + $0x5c8] sm:$0xff]  ;;  %v5286_v11 = vld [vmem:[#allocation2 + $0x5d8] sm:$0xff] }
 0x2b0   :  { %v2693_v39 = vpop.f32.mrf.mxu1  ;;  %3494 = vmatmul.mubr.f32.gmra.mxu1 %v5276_v6  ;;  %5049 = vst [vmem:[#allocation7 + $0x448] sm:$0xff] %v4793_v3  ;;  %v4796_v51 = vmul.f32 2.0, %v2688_v62  ;;  %v2690_v44 = vadd.f32 %v2689_v1, %v2241_v15  ;;  %v2245_v43 = vadd.f32 %v2244_v47, %v6691_v10  ;;  %3050 = vmatprep.mubr.f32.mxu0 %v5277_v33  ;;  %v6696_v56 = vld [vmem:[#allocation44_spill] sm:$0xff]  ;;  %v906_v3 = vld [vmem:[#allocation5 + $0xb10] sm:$0xff]  ;;  %v903_v47 = vld [vmem:[#allocation5 + $0xaf8] sm:$0xff] }
 0x2b1   :  { %3499 = vmatprep.mubr.f32.mxu1 %v5278_v25  ;;  %v2246_v50 = vpop.f32.mrf.mxu0  ;;  %3799 = vmatpush2.msra.mxu0 %v918_v27  ;;  %v1034_v62 = vld [vmem:[#allocation5 + $0xf10] sm:$0xff]  ;;  %v5287_v27 = vld [vmem:[#allocation2 + $0x5c0] sm:$0xff] }
 0x2b2   :  { %v2695_v30 = vpop.f32.mrf.mxu1  ;;  %4248 = vmatpush2.msra.mxu1 %v1046_v13  ;;  %5052 = vst [vmem:[#allocation7 + $0x460] sm:$0xff] %v4796_v51  ;;  %v4797_v2 = vmul.f32 2.0, %v2690_v44  ;;  %v2694_v28 = vadd.f32 %v2693_v39, %v2245_v43  ;;  %v2247_v29 = vadd.f32 %v2246_v50, %v6692_v16  ;;  %3800 = vmatprep.subr.mxu0 %v915_v9  ;;  %v5288_v13 = vld [vmem:[#allocation2 + $0x5d0] sm:$0xff]  ;;  %v1031_v39 = vld [vmem:[#allocation5 + $0xef8] sm:$0xff]  ;;  %v5289_v51 = vld [vmem:[#allocation2 + $0x608] sm:$0xff] }
 0x2b3   :  { %4249 = vmatprep.subr.mxu1 %v1043_v19  ;;  %v2250_v41 = vpop.f32.mrf.mxu0  ;;  %3051 = vmatmul.mubr.f32.gmra.mxu0 %v5279_v52  ;;  %v6697_v9 = vld [vmem:[#allocation45_spill] sm:$0xff]  ;;  %v5290_v44 = vld [vmem:[#allocation2 + $0x618] sm:$0xff] }
 0x2b4   :  { %v2699_v36 = vpop.f32.mrf.mxu1  ;;  %3500 = vmatmul.mubr.f32.gmra.mxu1 %v5280_v34  ;;  %5053 = vst [vmem:[#allocation7 + $0x468] sm:$0xff] %v4797_v2  ;;  %v4800_v24 = vmul.f32 2.0, %v2694_v28  ;;  %v2696_v18 = vadd.f32 %v2695_v30, %v2247_v29  ;;  %v2251_v55 = vadd.f32 %v2250_v41, %v6693_v17  ;;  %3056 = vmatprep.mubr.f32.mxu0 %v5281_v57  ;;  %v6698_v50 = vld [vmem:[#allocation46_spill] sm:$0xff]  ;;  %v902_v2 = vld [vmem:[#allocation5 + $0xaf0] sm:$0xff] }
 0x2b5   :  { %3505 = vmatprep.mubr.f32.mxu1 %v5282_v54  ;;  %v2252_v38 = vpop.f32.mrf.mxu0  ;;  %3801 = vmatpush2.msra.mxu0 %v914_v14  ;;  %v1030_v28 = vld [vmem:[#allocation5 + $0xef0] sm:$0xff]  ;;  %v5291_v14 = vld [vmem:[#allocation2 + $0x600] sm:$0xff]  ;;  %v899_v41 = vld [vmem:[#allocation5 + $0xad8] sm:$0xff] }
 0x2b6   :  { %v2701_v42 = vpop.f32.mrf.mxu1  ;;  %4250 = vmatpush2.msra.mxu1 %v1042_v32  ;;  %5056 = vst [vmem:[#allocation7 + $0x480] sm:$0xff] %v4800_v24  ;;  %v4801_v45 = vmul.f32 2.0, %v2696_v18  ;;  %v2700_v37 = vadd.f32 %v2699_v36, %v2251_v55  ;;  %v2253_v7 = vadd.f32 %v2252_v38, %v6694_v59  ;;  %3802 = vmatprep.subr.mxu0 %v911_v22  ;;  %v5292_v32 = vld [vmem:[#allocation2 + $0x610] sm:$0xff]  ;;  %v1027_v36 = vld [vmem:[#allocation5 + $0xed8] sm:$0xff]  ;;  %v6699_v22 = vld [vmem:[#allocation47_spill] sm:$0xff] }
 0x2b7   :  { %4251 = vmatprep.subr.mxu1 %v1039_v48  ;;  %v2256_v5 = vpop.f32.mrf.mxu0  ;;  %3057 = vmatmul.mubr.f32.gmra.mxu0 %v5283_v58  ;;  %v5293_v24 = vld [vmem:[#allocation2 + $0x648] sm:$0xff]  ;;  %v5294_v18 = vld [vmem:[#allocation2 + $0x658] sm:$0xff] }
 0x2b8   :  { %v2705_v20 = vpop.f32.mrf.mxu1  ;;  %3506 = vmatmul.mubr.f32.gmra.mxu1 %v5284_v26  ;;  %5057 = vst [vmem:[#allocation7 + $0x488] sm:$0xff] %v4801_v45  ;;  %v4804_v40 = vmul.f32 2.0, %v2700_v37  ;;  %v2702_v53 = vadd.f32 %v2701_v42, %v2253_v7  ;;  %v2257_v61 = vadd.f32 %v2256_v5, %v6695_v8  ;;  %3062 = vmatprep.mubr.f32.mxu0 %v5285_v4  ;;  %v6700_v38 = vld [vmem:[#allocation48_spill] sm:$0xff]  ;;  %v898_v45 = vld [vmem:[#allocation5 + $0xad0] sm:$0xff]  ;;  %v895_v5 = vld [vmem:[#allocation5 + $0xab8] sm:$0xff] }
 0x2b9   :  { %3511 = vmatprep.mubr.f32.mxu1 %v5286_v11  ;;  %v2258_v21 = vpop.f32.mrf.mxu0  ;;  %3803 = vmatpush2.msra.mxu0 %v910_v60  ;;  %v1026_v37 = vld [vmem:[#allocation5 + $0xed0] sm:$0xff]  ;;  %v5295_v60 = vld [vmem:[#allocation2 + $0x640] sm:$0xff] }
 0x2ba   :  { %v2707_v31 = vpop.f32.mrf.mxu1  ;;  %4252 = vmatpush2.msra.mxu1 %v1038_v49  ;;  %5060 = vst [vmem:[#allocation7 + $0x4a0] sm:$0xff] %v4804_v40  ;;  %v4805_v46 = vmul.f32 2.0, %v2702_v53  ;;  %v2706_v23 = vadd.f32 %v2705_v20, %v2257_v61  ;;  %v2259_v1 = vadd.f32 %v2258_v21, %v6696_v56  ;;  %3804 = vmatprep.subr.mxu0 %v907_v0  ;;  %v5296_v49 = vld [vmem:[#allocation2 + $0x650] sm:$0xff]  ;;  %v1023_v20 = vld [vmem:[#allocation5 + $0xeb8] sm:$0xff]  ;;  %v5297_v40 = vld [vmem:[#allocation2 + $0x688] sm:$0xff] }
 0x2bb   :  { %4253 = vmatprep.subr.mxu1 %v1035_v63  ;;  %v2262_v35 = vpop.f32.mrf.mxu0  ;;  %3063 = vmatmul.mubr.f32.gmra.mxu0 %v5287_v27  ;;  %v6701_v0 = vld [vmem:[#allocation49_spill] sm:$0xff]  ;;  %v5298_v53 = vld [vmem:[#allocation2 + $0x698] sm:$0xff] }
 0x2bc   :  { %v2711_v15 = vpop.f32.mrf.mxu1  ;;  %3512 = vmatmul.mubr.f32.gmra.mxu1 %v5288_v13  ;;  %5061 = vst [vmem:[#allocation7 + $0x4a8] sm:$0xff] %v4805_v46  ;;  %v4808_v12 = vmul.f32 2.0, %v2706_v23  ;;  %v2708_v6 = vadd.f32 %v2707_v31, %v2259_v1  ;;  %v2263_v19 = vadd.f32 %v2262_v35, %v6697_v9  ;;  %3068 = vmatprep.mubr.f32.mxu0 %v5289_v51  ;;  %v6702_v21 = vld [vmem:[#allocation50_spill] sm:$0xff]  ;;  %v894_v46 = vld [vmem:[#allocation5 + $0xab0] sm:$0xff] }
 0x2bd   :  { %3517 = vmatprep.mubr.f32.mxu1 %v5290_v44  ;;  %v2264_v10 = vpop.f32.mrf.mxu0  ;;  %3805 = vmatpush2.msra.mxu0 %v906_v3  ;;  %v1022_v23 = vld [vmem:[#allocation5 + $0xeb0] sm:$0xff]  ;;  %v5299_v3 = vld [vmem:[#allocation2 + $0x680] sm:$0xff]  ;;  %v891_v35 = vld [vmem:[#allocation5 + $0xa98] sm:$0xff] }
 0x2be   :  { %v2713_v43 = vpop.f32.mrf.mxu1  ;;  %4254 = vmatpush2.msra.mxu1 %v1034_v62  ;;  %5064 = vst [vmem:[#allocation7 + $0x4c0] sm:$0xff] %v4808_v12  ;;  %v4809_v33 = vmul.f32 2.0, %v2708_v6  ;;  %v2712_v25 = vadd.f32 %v2711_v15, %v2263_v19  ;;  %v2265_v30 = vadd.f32 %v2264_v10, %v6698_v50  ;;  %3806 = vmatprep.subr.mxu0 %v903_v47  ;;  %v5300_v62 = vld [vmem:[#allocation2 + $0x690] sm:$0xff]  ;;  %v1019_v15 = vld [vmem:[#allocation5 + $0xe98] sm:$0xff]  ;;  %v6703_v47 = vld [vmem:[#allocation51_spill] sm:$0xff] }
 0x2bf   :  { %4255 = vmatprep.subr.mxu1 %v1031_v39  ;;  %v2268_v16 = vpop.f32.mrf.mxu0  ;;  %3069 = vmatmul.mubr.f32.gmra.mxu0 %v5291_v14  ;;  %v5301_v12 = vld [vmem:[#allocation2 + $0x6c8] sm:$0xff]  ;;  %v5302_v6 = vld [vmem:[#allocation2 + $0x6d8] sm:$0xff] }
 0x2c0   :  { %v2717_v29 = vpop.f32.mrf.mxu1  ;;  %3518 = vmatmul.mubr.f32.gmra.mxu1 %v5292_v32  ;;  %5065 = vst [vmem:[#allocation7 + $0x4c8] sm:$0xff] %v4809_v33  ;;  %v4812_v52 = vmul.f32 2.0, %v2712_v25  ;;  %v2714_v34 = vadd.f32 %v2713_v43, %v2265_v30  ;;  %v2269_v48 = vadd.f32 %v2268_v16, %v6699_v22  ;;  %3074 = vmatprep.mubr.f32.mxu0 %v5293_v24  ;;  %v6704_v10 = vld [vmem:[#allocation52_spill] sm:$0xff]  ;;  %v890_v33 = vld [vmem:[#allocation5 + $0xa90] sm:$0xff]  ;;  %v887_v16 = vld [vmem:[#allocation5 + $0xa78] sm:$0xff] }
 0x2c1   :  { %3523 = vmatprep.mubr.f32.mxu1 %v5294_v18  ;;  %v2270_v17 = vpop.f32.mrf.mxu0  ;;  %3807 = vmatpush2.msra.mxu0 %v902_v2  ;;  %v1018_v25 = vld [vmem:[#allocation5 + $0xe90] sm:$0xff]  ;;  %v5303_v2 = vld [vmem:[#allocation2 + $0x6c0] sm:$0xff] }
 0x2c2   :  { %v2719_v55 = vpop.f32.mrf.mxu1  ;;  %4256 = vmatpush2.msra.mxu1 %v1030_v28  ;;  %5068 = vst [vmem:[#allocation7 + $0x4e0] sm:$0xff] %v4812_v52  ;;  %v4813_v57 = vmul.f32 2.0, %v2714_v34  ;;  %v2718_v54 = vadd.f32 %v2717_v29, %v2269_v48  ;;  %v2271_v42 = vadd.f32 %v2270_v17, %v6700_v38  ;;  %3808 = vmatprep.subr.mxu0 %v899_v41  ;;  %v5304_v28 = vld [vmem:[#allocation2 + $0x6d0] sm:$0xff]  ;;  %v1015_v29 = vld [vmem:[#allocation5 + $0xe78] sm:$0xff]  ;;  %v5305_v52 = vld [vmem:[#allocation2 + $0x708] sm:$0xff] }
 0x2c3   :  { %4257 = vmatprep.subr.mxu1 %v1027_v36  ;;  %v2274_v59 = vpop.f32.mrf.mxu0  ;;  %3075 = vmatmul.mubr.f32.gmra.mxu0 %v5295_v60  ;;  %v6705_v41 = vld [vmem:[#allocation53_spill] sm:$0xff]  ;;  %v5306_v34 = vld [vmem:[#allocation2 + $0x718] sm:$0xff] }
 0x2c4   :  { %v2723_v7 = vpop.f32.mrf.mxu1  ;;  %3524 = vmatmul.mubr.f32.gmra.mxu1 %v5296_v49  ;;  %5069 = vst [vmem:[#allocation7 + $0x4e8] sm:$0xff] %v4813_v57  ;;  %v4816_v58 = vmul.f32 2.0, %v2718_v54  ;;  %v2720_v26 = vadd.f32 %v2719_v55, %v2271_v42  ;;  %v2275_v63 = vadd.f32 %v2274_v59, %v6701_v0  ;;  %3080 = vmatprep.mubr.f32.mxu0 %v5297_v40  ;;  %v6706_v17 = vld [vmem:[#allocation54_spill] sm:$0xff]  ;;  %v886_v57 = vld [vmem:[#allocation5 + $0xa70] sm:$0xff] }
 0x2c5   :  { %3529 = vmatprep.mubr.f32.mxu1 %v5298_v53  ;;  %v2276_v8 = vpop.f32.mrf.mxu0  ;;  %3809 = vmatpush2.msra.mxu0 %v898_v45  ;;  %v1014_v54 = vld [vmem:[#allocation5 + $0xe70] sm:$0xff]  ;;  %v5307_v45 = vld [vmem:[#allocation2 + $0x700] sm:$0xff]  ;;  %v883_v59 = vld [vmem:[#allocation5 + $0xa58] sm:$0xff] }
 0x2c6   :  { %v2725_v61 = vpop.f32.mrf.mxu1  ;;  %4258 = vmatpush2.msra.mxu1 %v1026_v37  ;;  %5072 = vst [vmem:[#allocation7 + $0x500] sm:$0xff] %v4816_v58  ;;  %v4817_v4 = vmul.f32 2.0, %v2720_v26  ;;  %v2724_v11 = vadd.f32 %v2723_v7, %v2275_v63  ;;  %v2277_v31 = vadd.f32 %v2276_v8, %v6702_v21  ;;  %3810 = vmatprep.subr.mxu0 %v895_v5  ;;  %v5308_v37 = vld [vmem:[#allocation2 + $0x710] sm:$0xff]  ;;  %v1011_v7 = vld [vmem:[#allocation5 + $0xe58] sm:$0xff]  ;;  %v6707_v5 = vld [vmem:[#allocation55_spill] sm:$0xff] }
 0x2c7   :  { %4259 = vmatprep.subr.mxu1 %v1023_v20  ;;  %v2280_v56 = vpop.f32.mrf.mxu0  ;;  %3081 = vmatmul.mubr.f32.gmra.mxu0 %v5299_v3  ;;  %v5309_v58 = vld [vmem:[#allocation2 + $0x748] sm:$0xff]  ;;  %v5310_v26 = vld [vmem:[#allocation2 + $0x758] sm:$0xff] }
 0x2c8   :  { %v2729_v1 = vpop.f32.mrf.mxu1  ;;  %3530 = vmatmul.mubr.f32.gmra.mxu1 %v5300_v62  ;;  %5073 = vst [vmem:[#allocation7 + $0x508] sm:$0xff] %v4817_v4  ;;  %v4820_v27 = vmul.f32 2.0, %v2724_v11  ;;  %v2726_v13 = vadd.f32 %v2725_v61, %v2277_v31  ;;  %v2281_v39 = vadd.f32 %v2280_v56, %v6703_v47  ;;  %3086 = vmatprep.mubr.f32.mxu0 %v5301_v12  ;;  %v6708_v8 = vld [vmem:[#allocation56_spill] sm:$0xff]  ;;  %v882_v4 = vld [vmem:[#allocation5 + $0xa50] sm:$0xff]  ;;  %v879_v56 = vld [vmem:[#allocation5 + $0xa38] sm:$0xff] }
 0x2c9   :  { %3535 = vmatprep.mubr.f32.mxu1 %v5302_v6  ;;  %v2282_v9 = vpop.f32.mrf.mxu0  ;;  %3811 = vmatpush2.msra.mxu0 %v894_v46  ;;  %v1010_v11 = vld [vmem:[#allocation5 + $0xe50] sm:$0xff]  ;;  %v5311_v46 = vld [vmem:[#allocation2 + $0x740] sm:$0xff] }
 0x2ca   :  { %v2731_v19 = vpop.f32.mrf.mxu1  ;;  %4260 = vmatpush2.msra.mxu1 %v1022_v23  ;;  %5076 = vst [vmem:[#allocation7 + $0x520] sm:$0xff] %v4820_v27  ;;  %v4821_v51 = vmul.f32 2.0, %v2726_v13  ;;  %v2730_v44 = vadd.f32 %v2729_v1, %v2281_v39  ;;  %v2283_v43 = vadd.f32 %v2282_v9, %v6704_v10  ;;  %3812 = vmatprep.subr.mxu0 %v891_v35  ;;  %v5312_v23 = vld [vmem:[#allocation2 + $0x750] sm:$0xff]  ;;  %v1007_v1 = vld [vmem:[#allocation5 + $0xe38] sm:$0xff]  ;;  %v5313_v27 = vld [vmem:[#allocation2 + $0x788] sm:$0xff] }
 0x2cb   :  { %4261 = vmatprep.subr.mxu1 %v1019_v15  ;;  %v2286_v50 = vpop.f32.mrf.mxu0  ;;  %3087 = vmatmul.mubr.f32.gmra.mxu0 %v5303_v2  ;;  %v6709_v35 = vld [vmem:[#allocation57_spill] sm:$0xff]  ;;  %v5314_v13 = vld [vmem:[#allocation2 + $0x798] sm:$0xff]  ;;  %v6711_v2 = vld [vmem:[#allocation59_spill] sm:$0xff] }
 0x2cc   :  { %v2735_v30 = vpop.f32.mrf.mxu1  ;;  %3536 = vmatmul.mubr.f32.gmra.mxu1 %v5304_v28  ;;  %5077 = vst [vmem:[#allocation7 + $0x528] sm:$0xff] %v4821_v51  ;;  %v4824_v14 = vmul.f32 2.0, %v2730_v44  ;;  %v2732_v32 = vadd.f32 %v2731_v19, %v2283_v43  ;;  %v2287_v36 = vadd.f32 %v2286_v50, %v6705_v41  ;;  %3092 = vmatprep.mubr.f32.mxu0 %v5305_v52  ;;  %v6710_v9 = vld [vmem:[#allocation58_spill] sm:$0xff]  ;;  %v878_v51 = vld [vmem:[#allocation5 + $0xa30] sm:$0xff] }
 0x2cd   :  { %3541 = vmatprep.mubr.f32.mxu1 %v5306_v34  ;;  %v2288_v22 = vpop.f32.mrf.mxu0  ;;  %3813 = vmatpush2.msra.mxu0 %v890_v33  ;;  %v1006_v44 = vld [vmem:[#allocation5 + $0xe30] sm:$0xff]  ;;  %v5315_v33 = vld [vmem:[#allocation2 + $0x780] sm:$0xff]  ;;  %v6712_v34 = vld [vmem:[#allocation60_spill] sm:$0xff] }
 0x2ce   :  { %v2737_v48 = vpop.f32.mrf.mxu1  ;;  %4262 = vmatpush2.msra.mxu1 %v1018_v25  ;;  %5080 = vst [vmem:[#allocation7 + $0x540] sm:$0xff] %v4824_v14  ;;  %v4825_v24 = vmul.f32 2.0, %v2732_v32  ;;  %v2736_v18 = vadd.f32 %v2735_v30, %v2287_v36  ;;  %v2289_v55 = vadd.f32 %v2288_v22, %v6706_v17  ;;  %3814 = vmatprep.subr.mxu0 %v887_v16  ;;  %v5316_v25 = vld [vmem:[#allocation2 + $0x790] sm:$0xff]  ;;  %v5317_v16 = vld [vmem:[#allocation2 + $0x7c8] sm:$0xff]  ;;  %v875_v14 = vld [vmem:[#allocation5 + $0xa18] sm:$0xff] }
 0x2cf   :  { %4263 = vmatprep.subr.mxu1 %v1015_v29  ;;  %v2292_v38 = vpop.f32.mrf.mxu0  ;;  %3093 = vmatmul.mubr.f32.gmra.mxu0 %v5307_v45  ;;  %v5318_v29 = vld [vmem:[#allocation2 + $0x7d8] sm:$0xff]  ;;  %v6713_v45 = vld [vmem:[#allocation61_spill] sm:$0xff] }
 0x2d0   :  { %v2741_v42 = vpop.f32.mrf.mxu1  ;;  %3542 = vmatmul.mubr.f32.gmra.mxu1 %v5308_v37  ;;  %5081 = vst [vmem:[#allocation7 + $0x548] sm:$0xff] %v4825_v24  ;;  %v4828_v60 = vmul.f32 2.0, %v2736_v18  ;;  %v2738_v49 = vadd.f32 %v2737_v48, %v2289_v55  ;;  %v2293_v20 = vadd.f32 %v2292_v38, %v6707_v5  ;;  %3098 = vmatprep.mubr.f32.mxu0 %v5309_v58  ;;  %v874_v48 = vld [vmem:[#allocation5 + $0xa10] sm:$0xff]  ;;  %v1003_v24 = vld [vmem:[#allocation5 + $0xe18] sm:$0xff]  ;;  %v5319_v55 = vld [vmem:[#allocation2 + $0x7c0] sm:$0xff] }
 0x2d1   :  { %3547 = vmatprep.mubr.f32.mxu1 %v5310_v26  ;;  %v2294_v0 = vpop.f32.mrf.mxu0  ;;  %3815 = vmatpush2.msra.mxu0 %v886_v57  ;;  %v5320_v57 = vld [vmem:[#allocation2 + $0x7d0] sm:$0xff]  ;;  %v6714_v58 = vld [vmem:[#allocation62_spill] sm:$0xff] }
 0x2d2   :  { %v2743_v63 = vpop.f32.mrf.mxu1  ;;  %4264 = vmatpush2.msra.mxu1 %v1014_v54  ;;  %5084 = vst [vmem:[#allocation7 + $0x560] sm:$0xff] %v4828_v60  ;;  %v4829_v40 = vmul.f32 2.0, %v2738_v49  ;;  %v2742_v53 = vadd.f32 %v2741_v42, %v2293_v20  ;;  %v2295_v61 = vadd.f32 %v2294_v0, %v6708_v8  ;;  %3816 = vmatprep.subr.mxu0 %v883_v59  ;;  %v1002_v54 = vld [vmem:[#allocation5 + $0xe10] sm:$0xff]  ;;  %v5321_v59 = vld [vmem:[#allocation2 + $0x808] sm:$0xff] }
 0x2d3   :  { %4265 = vmatprep.subr.mxu1 %v1011_v7  ;;  %v2298_v21 = vpop.f32.mrf.mxu0  ;;  %3099 = vmatmul.mubr.f32.gmra.mxu0 %v5311_v46  ;;  %v5322_v7 = vld [vmem:[#allocation2 + $0x818] sm:$0xff] }
 0x2d4   :  { %v2747_v31 = vpop.f32.mrf.mxu1  ;;  %3548 = vmatmul.mubr.f32.gmra.mxu1 %v5312_v23  ;;  %5085 = vst [vmem:[#allocation7 + $0x568] sm:$0xff] %v4829_v40  ;;  %v4832_v3 = vmul.f32 2.0, %v2742_v53  ;;  %v2744_v62 = vadd.f32 %v2743_v63, %v2295_v61  ;;  %v2299_v15 = vadd.f32 %v2298_v21, %v6709_v35  ;;  %3104 = vmatprep.mubr.f32.mxu0 %v5313_v27  ;;  %v5323_v40 = vld [vmem:[#allocation2 + $0x800] sm:$0xff]  ;;  %v5324_v53 = vld [vmem:[#allocation2 + $0x810] sm:$0xff]  ;;  %v5325_v21 = vld [vmem:[#allocation2 + $0x848] sm:$0xff] }
 0x2d5   :  { %3553 = vmatprep.mubr.f32.mxu1 %v5314_v13  ;;  %v2300_v47 = vpop.f32.mrf.mxu0  ;;  %3817 = vmatpush2.msra.mxu0 %v882_v4  ;;  %v6715_v4 = vld [vmem:[#allocation63_spill] sm:$0xff]  ;;  %v5328_v13 = vld [vmem:[#allocation2 + $0x850] sm:$0xff] }
 0x2d6   :  { %v2749_v39 = vpop.f32.mrf.mxu1  ;;  %4266 = vmatpush2.msra.mxu1 %v1010_v11  ;;  %5088 = vst [vmem:[#allocation7 + $0x580] sm:$0xff] %v4832_v3  ;;  %v4833_v12 = vmul.f32 2.0, %v2744_v62  ;;  %v2748_v6 = vadd.f32 %v2747_v31, %v2299_v15  ;;  %v2301_v19 = vadd.f32 %v2300_v47, %v6710_v9  ;;  %3818 = vmatprep.subr.mxu0 %v879_v56  ;;  %v5326_v31 = vld [vmem:[#allocation2 + $0x858] sm:$0xff]  ;;  %v6716_v3 = vld [vmem:[#allocation64_spill] sm:$0xff]  ;;  %v5327_v27 = vld [vmem:[#allocation2 + $0x840] sm:$0xff] }
 0x2d7   :  { %4267 = vmatprep.subr.mxu1 %v1007_v1  ;;  %v2304_v10 = vpop.f32.mrf.mxu0  ;;  %3105 = vmatmul.mubr.f32.gmra.mxu0 %v5315_v33  ;;  %v5329_v9 = vld [vmem:[#allocation2 + $0x888] sm:$0xff]  ;;  %v6718_v33 = vld [vmem:[#allocation66_spill] sm:$0xff] }
 0x2d8   :  { %v2753_v43 = vpop.f32.mrf.mxu1  ;;  %3554 = vmatmul.mubr.f32.gmra.mxu1 %v5316_v25  ;;  %5089 = vst [vmem:[#allocation7 + $0x588] sm:$0xff] %v4833_v12  ;;  %v4836_v50 = vmul.f32 2.0, %v2748_v6  ;;  %v2750_v30 = vadd.f32 %v2749_v39, %v2301_v19  ;;  %v2305_v28 = vadd.f32 %v2304_v10, %v6711_v2  ;;  %3110 = vmatprep.mubr.f32.mxu0 %v5317_v16  ;;  %v6717_v12 = vld [vmem:[#allocation65_spill] sm:$0xff]  ;;  %v5330_v19 = vld [vmem:[#allocation2 + $0x898] sm:$0xff]  ;;  %v5331_v2 = vld [vmem:[#allocation2 + $0x880] sm:$0xff] }
 0x2d9   :  { %3559 = vmatprep.mubr.f32.mxu1 %v5318_v29  ;;  %v2306_v32 = vpop.f32.mrf.mxu0  ;;  %3819 = vmatpush2.msra.mxu0 %v878_v51 }
 0x2da   :  { %v2755_v41 = vpop.f32.mrf.mxu1  ;;  %4268 = vmatpush2.msra.mxu1 %v1006_v44  ;;  %5092 = vst [vmem:[#allocation7 + $0x5a0] sm:$0xff] %v4836_v50  ;;  %v4837_v36 = vmul.f32 2.0, %v2750_v30  ;;  %v2754_v52 = vadd.f32 %v2753_v43, %v2305_v28  ;;  %v2307_v22 = vadd.f32 %v2306_v32, %v6712_v34  ;;  %3820 = vmatprep.subr.mxu0 %v875_v14  ;;  %v5332_v28 = vld [vmem:[#allocation2 + $0x890] sm:$0xff]  ;;  %v6719_v14 = vld [vmem:[#allocation67_spill] sm:$0xff] }
 0x2db   :  { %v2310_v18 = vpop.f32.mrf.mxu0  ;;  %3111 = vmatmul.mubr.f32.gmra.mxu0 %v5319_v55  ;;  %4269 = vmatprep.subr.mxu1 %v1003_v24  ;;  %v6720_v24 = vld [vmem:[#allocation68_spill] sm:$0xff] }
 0x2dc   :  { %v2759_v17 = vpop.f32.mrf.mxu1  ;;  %3560 = vmatmul.mubr.f32.gmra.mxu1 %v5320_v57  ;;  %5093 = vst [vmem:[#allocation7 + $0x5a8] sm:$0xff] %v4837_v36  ;;  %v4840_v38 = vmul.f32 2.0, %v2754_v52  ;;  %v2756_v42 = vadd.f32 %v2755_v41, %v2307_v22  ;;  %v2311_v37 = vadd.f32 %v2310_v18, %v6713_v45  ;;  %3116 = vmatprep.mubr.f32.mxu0 %v5321_v59  ;;  %v5333_v41 = vld [vmem:[#allocation2 + $0x8c8] sm:$0xff]  ;;  %v5334_v36 = vld [vmem:[#allocation2 + $0x8d8] sm:$0xff]  ;;  %v5335_v57 = vld [vmem:[#allocation2 + $0x8c0] sm:$0xff] }
 0x2dd   :  { %3565 = vmatprep.mubr.f32.mxu1 %v5322_v7  ;;  %v2312_v60 = vpop.f32.mrf.mxu0  ;;  %3821 = vmatpush2.msra.mxu0 %v874_v48  ;;  %v6721_v45 = vld [vmem:[#allocation69_spill] sm:$0xff]  ;;  %v5337_v59 = vld [vmem:[#allocation2 + $0x908] sm:$0xff]  ;;  %v5338_v7 = vld [vmem:[#allocation2 + $0x918] sm:$0xff] }
 0x2de   :  { %v2761_v49 = vpop.f32.mrf.mxu1  ;;  %5096 = vst [vmem:[#allocation7 + $0x5c0] sm:$0xff] %v4840_v38  ;;  %v4841_v5 = vmul.f32 2.0, %v2756_v42  ;;  %v2760_v20 = vadd.f32 %v2759_v17, %v2311_v37  ;;  %v2313_v26 = vadd.f32 %v2312_v60, %v6714_v58  ;;  %4270 = vmatpush2.msra.mxu1 %v1002_v54  ;;  %v5336_v54 = vld [vmem:[#allocation2 + $0x8d0] sm:$0xff]  ;;  %v6722_v58 = vld [vmem:[#allocation70_spill] sm:$0xff] }
 0x2df   :  { %v2316_v0 = vpop.f32.mrf.mxu0  ;;  %3117 = vmatmul.mubr.f32.gmra.mxu0 %v5323_v40  ;;  %v5339_v40 = vld [vmem:[#allocation2 + $0x900] sm:$0xff] }
 0x2e0   :  { %v2765_v63 = vpop.f32.mrf.mxu1  ;;  %3566 = vmatmul.mubr.f32.gmra.mxu1 %v5324_v53  ;;  %5097 = vst [vmem:[#allocation7 + $0x5c8] sm:$0xff] %v4841_v5  ;;  %v4844_v8 = vmul.f32 2.0, %v2760_v20  ;;  %v2762_v61 = vadd.f32 %v2761_v49, %v2313_v26  ;;  %v2317_v11 = vadd.f32 %v2316_v0, %v6715_v4  ;;  %3122 = vmatprep.mubr.f32.mxu0 %v5325_v21  ;;  %v5340_v53 = vld [vmem:[#allocation2 + $0x910] sm:$0xff]  ;;  %v6723_v4 = vld [vmem:[#allocation71_spill] sm:$0xff]  ;;  %v5341_v21 = vld [vmem:[#allocation2 + $0x948] sm:$0xff] }
 0x2e1   :  { %3571 = vmatprep.mubr.f32.mxu1 %v5326_v31  ;;  %v2318_v46 = vpop.f32.mrf.mxu0  ;;  %v5342_v31 = vld [vmem:[#allocation2 + $0x958] sm:$0xff] }
 0x2e2   :  { %v2767_v23 = vpop.f32.mrf.mxu1  ;;  %5100 = vst [vmem:[#allocation7 + $0x5e0] sm:$0xff] %v4844_v8  ;;  %v4845_v56 = vmul.f32 2.0, %v2762_v61  ;;  %v2766_v1 = vadd.f32 %v2765_v63, %v2317_v11  ;;  %v2319_v62 = vadd.f32 %v2318_v46, %v6716_v3  ;;  %v6724_v3 = vld [vmem:[#allocation72_spill] sm:$0xff] }
 0x2e3   :  { %v2322_v35 = vpop.f32.mrf.mxu0  ;;  %3123 = vmatmul.mubr.f32.gmra.mxu0 %v5327_v27  ;;  %v5343_v27 = vld [vmem:[#allocation2 + $0x940] sm:$0xff] }
 0x2e4   :  { %v2771_v15 = vpop.f32.mrf.mxu1  ;;  %3572 = vmatmul.mubr.f32.gmra.mxu1 %v5328_v13  ;;  %5101 = vst [vmem:[#allocation7 + $0x5e8] sm:$0xff] %v4845_v56  ;;  %v4848_v47 = vmul.f32 2.0, %v2766_v1  ;;  %v2768_v39 = vadd.f32 %v2767_v23, %v2319_v62  ;;  %v2323_v6 = vadd.f32 %v2322_v35, %v6717_v12  ;;  %3128 = vmatprep.mubr.f32.mxu0 %v5329_v9  ;;  %v5344_v13 = vld [vmem:[#allocation2 + $0x950] sm:$0xff]  ;;  %v5345_v9 = vld [vmem:[#allocation2 + $0x988] sm:$0xff] }
 0x2e5   :  { %3577 = vmatprep.mubr.f32.mxu1 %v5330_v19  ;;  %v2324_v51 = vpop.f32.mrf.mxu0  ;;  %v6725_v12 = vld [vmem:[#allocation73_spill] sm:$0xff]  ;;  %v5346_v19 = vld [vmem:[#allocation2 + $0x998] sm:$0xff] }
 0x2e6   :  { %v2773_v44 = vpop.f32.mrf.mxu1  ;;  %5104 = vst [vmem:[#allocation7 + $0x600] sm:$0xff] %v4848_v47  ;;  %v4849_v10 = vmul.f32 2.0, %v2768_v39  ;;  %v2772_v43 = vadd.f32 %v2771_v15, %v2323_v6  ;;  %v2325_v25 = vadd.f32 %v2324_v51, %v6718_v33  ;;  %v6726_v33 = vld [vmem:[#allocation74_spill] sm:$0xff] }
 0x2e7   :  { %v2328_v50 = vpop.f32.mrf.mxu0  ;;  %3129 = vmatmul.mubr.f32.gmra.mxu0 %v5331_v2  ;;  %v5347_v2 = vld [vmem:[#allocation2 + $0x980] sm:$0xff] }
 0x2e8   :  { %v2777_v30 = vpop.f32.mrf.mxu1  ;;  %3578 = vmatmul.mubr.f32.gmra.mxu1 %v5332_v28  ;;  %5105 = vst [vmem:[#allocation7 + $0x608] sm:$0xff] %v4849_v10  ;;  %v4852_v16 = vmul.f32 2.0, %v2772_v43  ;;  %v2774_v29 = vadd.f32 %v2773_v44, %v2325_v25  ;;  %v2329_v32 = vadd.f32 %v2328_v50, %v6719_v14  ;;  %3134 = vmatprep.mubr.f32.mxu0 %v5333_v41  ;;  %v5348_v28 = vld [vmem:[#allocation2 + $0x990] sm:$0xff]  ;;  %v6727_v14 = vld [vmem:[#allocation75_spill] sm:$0xff]  ;;  %v5349_v41 = vld [vmem:[#allocation2 + $0x9c8] sm:$0xff] }
 0x2e9   :  { %3583 = vmatprep.mubr.f32.mxu1 %v5334_v36  ;;  %v2330_v52 = vpop.f32.mrf.mxu0  ;;  %v5350_v36 = vld [vmem:[#allocation2 + $0x9d8] sm:$0xff] }
 0x2ea   :  { %v2779_v34 = vpop.f32.mrf.mxu1  ;;  %5108 = vst [vmem:[#allocation7 + $0x620] sm:$0xff] %v4852_v16  ;;  %v4853_v22 = vmul.f32 2.0, %v2774_v29  ;;  %v2778_v48 = vadd.f32 %v2777_v30, %v2329_v32  ;;  %v2331_v18 = vadd.f32 %v2330_v52, %v6720_v24  ;;  %v6728_v24 = vld [vmem:[#allocation76_spill] sm:$0xff] }
 0x2eb   :  { %v2334_v17 = vpop.f32.mrf.mxu0  ;;  %3135 = vmatmul.mubr.f32.gmra.mxu0 %v5335_v57  ;;  %v5351_v57 = vld [vmem:[#allocation2 + $0x9c0] sm:$0xff] }
 0x2ec   :  { %v2783_v55 = vpop.f32.mrf.mxu1  ;;  %3584 = vmatmul.mubr.f32.gmra.mxu1 %v5336_v54  ;;  %5109 = vst [vmem:[#allocation7 + $0x628] sm:$0xff] %v4853_v22  ;;  %v4856_v38 = vmul.f32 2.0, %v2778_v48  ;;  %v2780_v42 = vadd.f32 %v2779_v34, %v2331_v18  ;;  %v2335_v37 = vadd.f32 %v2334_v17, %v6721_v45  ;;  %3140 = vmatprep.mubr.f32.mxu0 %v5337_v59  ;;  %v5352_v54 = vld [vmem:[#allocation2 + $0x9d0] sm:$0xff]  ;;  %v5353_v59 = vld [vmem:[#allocation2 + $0xa08] sm:$0xff] }
 0x2ed   :  { %3589 = vmatprep.mubr.f32.mxu1 %v5338_v7  ;;  %v2336_v60 = vpop.f32.mrf.mxu0  ;;  %v6729_v45 = vld [vmem:[#allocation77_spill] sm:$0xff]  ;;  %v5354_v7 = vld [vmem:[#allocation2 + $0xa18] sm:$0xff] }
 0x2ee   :  { %v2785_v49 = vpop.f32.mrf.mxu1  ;;  %5112 = vst [vmem:[#allocation7 + $0x640] sm:$0xff] %v4856_v38  ;;  %v4857_v5 = vmul.f32 2.0, %v2780_v42  ;;  %v2784_v20 = vadd.f32 %v2783_v55, %v2335_v37  ;;  %v2337_v26 = vadd.f32 %v2336_v60, %v6722_v58  ;;  %v6730_v58 = vld [vmem:[#allocation78_spill] sm:$0xff] }
 0x2ef   :  { %v2340_v0 = vpop.f32.mrf.mxu0  ;;  %3141 = vmatmul.mubr.f32.gmra.mxu0 %v5339_v40  ;;  %v5355_v40 = vld [vmem:[#allocation2 + $0xa00] sm:$0xff] }
 0x2f0   :  { %v2789_v63 = vpop.f32.mrf.mxu1  ;;  %3590 = vmatmul.mubr.f32.gmra.mxu1 %v5340_v53  ;;  %5113 = vst [vmem:[#allocation7 + $0x648] sm:$0xff] %v4857_v5  ;;  %v4860_v8 = vmul.f32 2.0, %v2784_v20  ;;  %v2786_v61 = vadd.f32 %v2785_v49, %v2337_v26  ;;  %v2341_v11 = vadd.f32 %v2340_v0, %v6723_v4  ;;  %3146 = vmatprep.mubr.f32.mxu0 %v5341_v21  ;;  %v5356_v53 = vld [vmem:[#allocation2 + $0xa10] sm:$0xff]  ;;  %v6731_v4 = vld [vmem:[#allocation79_spill] sm:$0xff]  ;;  %v5357_v21 = vld [vmem:[#allocation2 + $0xa48] sm:$0xff] }
 0x2f1   :  { %3595 = vmatprep.mubr.f32.mxu1 %v5342_v31  ;;  %v2342_v46 = vpop.f32.mrf.mxu0  ;;  %v5358_v31 = vld [vmem:[#allocation2 + $0xa58] sm:$0xff] }
 0x2f2   :  { %v2791_v23 = vpop.f32.mrf.mxu1  ;;  %5116 = vst [vmem:[#allocation7 + $0x660] sm:$0xff] %v4860_v8  ;;  %v4861_v56 = vmul.f32 2.0, %v2786_v61  ;;  %v2790_v1 = vadd.f32 %v2789_v63, %v2341_v11  ;;  %v2343_v62 = vadd.f32 %v2342_v46, %v6724_v3  ;;  %v6732_v3 = vld [vmem:[#allocation80_spill] sm:$0xff] }
 0x2f3   :  { %v2346_v35 = vpop.f32.mrf.mxu0  ;;  %3147 = vmatmul.mubr.f32.gmra.mxu0 %v5343_v27  ;;  %v5359_v27 = vld [vmem:[#allocation2 + $0xa40] sm:$0xff] }
 0x2f4   :  { %v2795_v15 = vpop.f32.mrf.mxu1  ;;  %3596 = vmatmul.mubr.f32.gmra.mxu1 %v5344_v13  ;;  %5117 = vst [vmem:[#allocation7 + $0x668] sm:$0xff] %v4861_v56  ;;  %v4864_v47 = vmul.f32 2.0, %v2790_v1  ;;  %v2792_v39 = vadd.f32 %v2791_v23, %v2343_v62  ;;  %v2347_v6 = vadd.f32 %v2346_v35, %v6725_v12  ;;  %3152 = vmatprep.mubr.f32.mxu0 %v5345_v9  ;;  %v5360_v13 = vld [vmem:[#allocation2 + $0xa50] sm:$0xff]  ;;  %v5361_v9 = vld [vmem:[#allocation2 + $0xa88] sm:$0xff] }
 0x2f5   :  { %3601 = vmatprep.mubr.f32.mxu1 %v5346_v19  ;;  %v2348_v51 = vpop.f32.mrf.mxu0  ;;  %v6733_v12 = vld [vmem:[#allocation81_spill] sm:$0xff]  ;;  %v5362_v19 = vld [vmem:[#allocation2 + $0xa98] sm:$0xff] }
 0x2f6   :  { %v2797_v44 = vpop.f32.mrf.mxu1  ;;  %5120 = vst [vmem:[#allocation7 + $0x680] sm:$0xff] %v4864_v47  ;;  %v4865_v10 = vmul.f32 2.0, %v2792_v39  ;;  %v2796_v43 = vadd.f32 %v2795_v15, %v2347_v6  ;;  %v2349_v25 = vadd.f32 %v2348_v51, %v6726_v33  ;;  %v6734_v33 = vld [vmem:[#allocation82_spill] sm:$0xff] }
 0x2f7   :  { %v2352_v50 = vpop.f32.mrf.mxu0  ;;  %3153 = vmatmul.mubr.f32.gmra.mxu0 %v5347_v2  ;;  %v5363_v2 = vld [vmem:[#allocation2 + $0xa80] sm:$0xff] }
 0x2f8   :  { %v2801_v30 = vpop.f32.mrf.mxu1  ;;  %3602 = vmatmul.mubr.f32.gmra.mxu1 %v5348_v28  ;;  %5121 = vst [vmem:[#allocation7 + $0x688] sm:$0xff] %v4865_v10  ;;  %v4868_v16 = vmul.f32 2.0, %v2796_v43  ;;  %v2798_v29 = vadd.f32 %v2797_v44, %v2349_v25  ;;  %v2353_v32 = vadd.f32 %v2352_v50, %v6727_v14  ;;  %3158 = vmatprep.mubr.f32.mxu0 %v5349_v41  ;;  %v5364_v28 = vld [vmem:[#allocation2 + $0xa90] sm:$0xff]  ;;  %v6735_v14 = vld [vmem:[#allocation83_spill] sm:$0xff]  ;;  %v5365_v41 = vld [vmem:[#allocation2 + $0xac8] sm:$0xff] }
 0x2f9   :  { %3607 = vmatprep.mubr.f32.mxu1 %v5350_v36  ;;  %v2354_v52 = vpop.f32.mrf.mxu0  ;;  %v5366_v36 = vld [vmem:[#allocation2 + $0xad8] sm:$0xff] }
 0x2fa   :  { %v2803_v34 = vpop.f32.mrf.mxu1  ;;  %5124 = vst [vmem:[#allocation7 + $0x6a0] sm:$0xff] %v4868_v16  ;;  %v4869_v22 = vmul.f32 2.0, %v2798_v29  ;;  %v2802_v48 = vadd.f32 %v2801_v30, %v2353_v32  ;;  %v2355_v18 = vadd.f32 %v2354_v52, %v6728_v24  ;;  %v6736_v24 = vld [vmem:[#allocation84_spill] sm:$0xff] }
 0x2fb   :  { %v2358_v17 = vpop.f32.mrf.mxu0  ;;  %3159 = vmatmul.mubr.f32.gmra.mxu0 %v5351_v57  ;;  %v5367_v57 = vld [vmem:[#allocation2 + $0xac0] sm:$0xff] }
 0x2fc   :  { %v2807_v55 = vpop.f32.mrf.mxu1  ;;  %3608 = vmatmul.mubr.f32.gmra.mxu1 %v5352_v54  ;;  %5125 = vst [vmem:[#allocation7 + $0x6a8] sm:$0xff] %v4869_v22  ;;  %v4872_v38 = vmul.f32 2.0, %v2802_v48  ;;  %v2804_v42 = vadd.f32 %v2803_v34, %v2355_v18  ;;  %v2359_v37 = vadd.f32 %v2358_v17, %v6729_v45  ;;  %3164 = vmatprep.mubr.f32.mxu0 %v5353_v59  ;;  %v5368_v54 = vld [vmem:[#allocation2 + $0xad0] sm:$0xff]  ;;  %v5369_v59 = vld [vmem:[#allocation2 + $0xb08] sm:$0xff] }
 0x2fd   :  { %3613 = vmatprep.mubr.f32.mxu1 %v5354_v7  ;;  %v2360_v60 = vpop.f32.mrf.mxu0  ;;  %v6737_v45 = vld [vmem:[#allocation85_spill] sm:$0xff]  ;;  %v5370_v7 = vld [vmem:[#allocation2 + $0xb18] sm:$0xff] }
 0x2fe   :  { %v2809_v49 = vpop.f32.mrf.mxu1  ;;  %5128 = vst [vmem:[#allocation7 + $0x6c0] sm:$0xff] %v4872_v38  ;;  %v4873_v5 = vmul.f32 2.0, %v2804_v42  ;;  %v2808_v20 = vadd.f32 %v2807_v55, %v2359_v37  ;;  %v2361_v26 = vadd.f32 %v2360_v60, %v6730_v58  ;;  %v6738_v58 = vld [vmem:[#allocation86_spill] sm:$0xff] }
 0x2ff   :  { %v2364_v0 = vpop.f32.mrf.mxu0  ;;  %3165 = vmatmul.mubr.f32.gmra.mxu0 %v5355_v40  ;;  %v5371_v40 = vld [vmem:[#allocation2 + $0xb00] sm:$0xff] }
 0x300   :  { %v2813_v63 = vpop.f32.mrf.mxu1  ;;  %3614 = vmatmul.mubr.f32.gmra.mxu1 %v5356_v53  ;;  %5129 = vst [vmem:[#allocation7 + $0x6c8] sm:$0xff] %v4873_v5  ;;  %v4876_v8 = vmul.f32 2.0, %v2808_v20  ;;  %v2810_v61 = vadd.f32 %v2809_v49, %v2361_v26  ;;  %v2365_v11 = vadd.f32 %v2364_v0, %v6731_v4  ;;  %3170 = vmatprep.mubr.f32.mxu0 %v5357_v21  ;;  %v5372_v53 = vld [vmem:[#allocation2 + $0xb10] sm:$0xff]  ;;  %v6739_v4 = vld [vmem:[#allocation87_spill] sm:$0xff]  ;;  %v5373_v21 = vld [vmem:[#allocation2 + $0xb48] sm:$0xff] }
 0x301   :  { %3619 = vmatprep.mubr.f32.mxu1 %v5358_v31  ;;  %v2366_v46 = vpop.f32.mrf.mxu0  ;;  %v5374_v31 = vld [vmem:[#allocation2 + $0xb58] sm:$0xff] }
 0x302   :  { %v2815_v23 = vpop.f32.mrf.mxu1  ;;  %5132 = vst [vmem:[#allocation7 + $0x6e0] sm:$0xff] %v4876_v8  ;;  %v4877_v56 = vmul.f32 2.0, %v2810_v61  ;;  %v2814_v1 = vadd.f32 %v2813_v63, %v2365_v11  ;;  %v2367_v62 = vadd.f32 %v2366_v46, %v6732_v3  ;;  %v6740_v3 = vld [vmem:[#allocation88_spill] sm:$0xff] }
 0x303   :  { %v2370_v35 = vpop.f32.mrf.mxu0  ;;  %3171 = vmatmul.mubr.f32.gmra.mxu0 %v5359_v27  ;;  %v5375_v27 = vld [vmem:[#allocation2 + $0xb40] sm:$0xff] }
 0x304   :  { %v2819_v15 = vpop.f32.mrf.mxu1  ;;  %3620 = vmatmul.mubr.f32.gmra.mxu1 %v5360_v13  ;;  %5133 = vst [vmem:[#allocation7 + $0x6e8] sm:$0xff] %v4877_v56  ;;  %v4880_v47 = vmul.f32 2.0, %v2814_v1  ;;  %v2816_v39 = vadd.f32 %v2815_v23, %v2367_v62  ;;  %v2371_v6 = vadd.f32 %v2370_v35, %v6733_v12  ;;  %3176 = vmatprep.mubr.f32.mxu0 %v5361_v9  ;;  %v5376_v13 = vld [vmem:[#allocation2 + $0xb50] sm:$0xff]  ;;  %v5377_v9 = vld [vmem:[#allocation2 + $0xb88] sm:$0xff] }
 0x305   :  { %3625 = vmatprep.mubr.f32.mxu1 %v5362_v19  ;;  %v2372_v51 = vpop.f32.mrf.mxu0  ;;  %v6741_v12 = vld [vmem:[#allocation89_spill] sm:$0xff]  ;;  %v5378_v19 = vld [vmem:[#allocation2 + $0xb98] sm:$0xff] }
 0x306   :  { %v2821_v44 = vpop.f32.mrf.mxu1  ;;  %5136 = vst [vmem:[#allocation7 + $0x700] sm:$0xff] %v4880_v47  ;;  %v4881_v10 = vmul.f32 2.0, %v2816_v39  ;;  %v2820_v43 = vadd.f32 %v2819_v15, %v2371_v6  ;;  %v2373_v25 = vadd.f32 %v2372_v51, %v6734_v33  ;;  %v6742_v33 = vld [vmem:[#allocation90_spill] sm:$0xff] }
 0x307   :  { %v2376_v50 = vpop.f32.mrf.mxu0  ;;  %3177 = vmatmul.mubr.f32.gmra.mxu0 %v5363_v2  ;;  %v5379_v2 = vld [vmem:[#allocation2 + $0xb80] sm:$0xff] }
 0x308   :  { %v2825_v30 = vpop.f32.mrf.mxu1  ;;  %3626 = vmatmul.mubr.f32.gmra.mxu1 %v5364_v28  ;;  %5137 = vst [vmem:[#allocation7 + $0x708] sm:$0xff] %v4881_v10  ;;  %v4884_v16 = vmul.f32 2.0, %v2820_v43  ;;  %v2822_v29 = vadd.f32 %v2821_v44, %v2373_v25  ;;  %v2377_v32 = vadd.f32 %v2376_v50, %v6735_v14  ;;  %3182 = vmatprep.mubr.f32.mxu0 %v5365_v41  ;;  %v5380_v28 = vld [vmem:[#allocation2 + $0xb90] sm:$0xff]  ;;  %v6743_v14 = vld [vmem:[#allocation91_spill] sm:$0xff]  ;;  %v5381_v41 = vld [vmem:[#allocation2 + $0xbc8] sm:$0xff] }
 0x309   :  { %3631 = vmatprep.mubr.f32.mxu1 %v5366_v36  ;;  %v2378_v52 = vpop.f32.mrf.mxu0  ;;  %v5382_v36 = vld [vmem:[#allocation2 + $0xbd8] sm:$0xff] }
 0x30a   :  { %v2827_v34 = vpop.f32.mrf.mxu1  ;;  %5140 = vst [vmem:[#allocation7 + $0x720] sm:$0xff] %v4884_v16  ;;  %v4885_v22 = vmul.f32 2.0, %v2822_v29  ;;  %v2826_v48 = vadd.f32 %v2825_v30, %v2377_v32  ;;  %v2379_v18 = vadd.f32 %v2378_v52, %v6736_v24  ;;  %v6744_v24 = vld [vmem:[#allocation92_spill] sm:$0xff] }
 0x30b   :  { %v2382_v17 = vpop.f32.mrf.mxu0  ;;  %3183 = vmatmul.mubr.f32.gmra.mxu0 %v5367_v57  ;;  %v5383_v57 = vld [vmem:[#allocation2 + $0xbc0] sm:$0xff] }
 0x30c   :  { %v2831_v55 = vpop.f32.mrf.mxu1  ;;  %3632 = vmatmul.mubr.f32.gmra.mxu1 %v5368_v54  ;;  %5141 = vst [vmem:[#allocation7 + $0x728] sm:$0xff] %v4885_v22  ;;  %v4888_v38 = vmul.f32 2.0, %v2826_v48  ;;  %v2828_v42 = vadd.f32 %v2827_v34, %v2379_v18  ;;  %v2383_v37 = vadd.f32 %v2382_v17, %v6737_v45  ;;  %3188 = vmatprep.mubr.f32.mxu0 %v5369_v59  ;;  %v5384_v54 = vld [vmem:[#allocation2 + $0xbd0] sm:$0xff]  ;;  %v5385_v59 = vld [vmem:[#allocation2 + $0xc08] sm:$0xff] }
 0x30d   :  { %3637 = vmatprep.mubr.f32.mxu1 %v5370_v7  ;;  %v2384_v60 = vpop.f32.mrf.mxu0  ;;  %v6745_v45 = vld [vmem:[#allocation93_spill] sm:$0xff]  ;;  %v5386_v7 = vld [vmem:[#allocation2 + $0xc18] sm:$0xff] }
 0x30e   :  { %v2833_v49 = vpop.f32.mrf.mxu1  ;;  %5144 = vst [vmem:[#allocation7 + $0x740] sm:$0xff] %v4888_v38  ;;  %v4889_v5 = vmul.f32 2.0, %v2828_v42  ;;  %v2832_v20 = vadd.f32 %v2831_v55, %v2383_v37  ;;  %v2385_v26 = vadd.f32 %v2384_v60, %v6738_v58  ;;  %v6746_v58 = vld [vmem:[#allocation94_spill] sm:$0xff] }
 0x30f   :  { %v2388_v0 = vpop.f32.mrf.mxu0  ;;  %3189 = vmatmul.mubr.f32.gmra.mxu0 %v5371_v40 }
 0x310   :  { %v2837_v63 = vpop.f32.mrf.mxu1  ;;  %3638 = vmatmul.mubr.f32.gmra.mxu1 %v5372_v53  ;;  %5145 = vst [vmem:[#allocation7 + $0x748] sm:$0xff] %v4889_v5  ;;  %v4892_v8 = vmul.f32 2.0, %v2832_v20  ;;  %v2834_v61 = vadd.f32 %v2833_v49, %v2385_v26  ;;  %v2389_v11 = vadd.f32 %v2388_v0, %v6739_v4  ;;  %3194 = vmatprep.mubr.f32.mxu0 %v5373_v21  ;;  %v5388_v53 = vld [vmem:[#allocation2 + $0xc10] sm:$0xff]  ;;  %v5390_v21 = vld [vmem:[#allocation2 + $0xc58] sm:$0xff] }
 0x311   :  { %3643 = vmatprep.mubr.f32.mxu1 %v5374_v31  ;;  %v2390_v46 = vpop.f32.mrf.mxu0 }
 0x312   :  { %v2839_v23 = vpop.f32.mrf.mxu1  ;;  %5148 = vst [vmem:[#allocation7 + $0x760] sm:$0xff] %v4892_v8  ;;  %v4893_v56 = vmul.f32 2.0, %v2834_v61  ;;  %v2838_v1 = vadd.f32 %v2837_v63, %v2389_v11  ;;  %v2391_v62 = vadd.f32 %v2390_v46, %v6740_v3  ;;  %v5387_v63 = vld [vmem:[#allocation2 + $0xc00] sm:$0xff]  ;;  %v5389_v11 = vld [vmem:[#allocation2 + $0xc48] sm:$0xff] }
 0x313   :  { %v2394_v35 = vpop.f32.mrf.mxu0  ;;  %3195 = vmatmul.mubr.f32.gmra.mxu0 %v5375_v27  ;;  %v5391_v3 = vld [vmem:[#allocation2 + $0xc40] sm:$0xff]  ;;  %v5393_v27 = vld [vmem:[#allocation2 + $0xc88] sm:$0xff] }
 0x314   :  { %v2843_v15 = vpop.f32.mrf.mxu1  ;;  %3644 = vmatmul.mubr.f32.gmra.mxu1 %v5376_v13  ;;  %5149 = vst [vmem:[#allocation7 + $0x768] sm:$0xff] %v4893_v56  ;;  %v4896_v47 = vmul.f32 2.0, %v2838_v1  ;;  %v2840_v39 = vadd.f32 %v2839_v23, %v2391_v62  ;;  %v2395_v6 = vadd.f32 %v2394_v35, %v6741_v12  ;;  %3200 = vmatprep.mubr.f32.mxu0 %v5377_v9  ;;  %v5392_v35 = vld [vmem:[#allocation2 + $0xc50] sm:$0xff]  ;;  %v5394_v13 = vld [vmem:[#allocation2 + $0xc98] sm:$0xff]  ;;  %v5395_v9 = vld [vmem:[#allocation2 + $0xc80] sm:$0xff] }
 0x315   :  { %3649 = vmatprep.mubr.f32.mxu1 %v5378_v19  ;;  %v2396_v51 = vpop.f32.mrf.mxu0 }
 0x316   :  { %v2845_v44 = vpop.f32.mrf.mxu1  ;;  %5152 = vst [vmem:[#allocation7 + $0x780] sm:$0xff] %v4896_v47  ;;  %v4897_v10 = vmul.f32 2.0, %v2840_v39  ;;  %v2844_v43 = vadd.f32 %v2843_v15, %v2395_v6  ;;  %v2397_v25 = vadd.f32 %v2396_v51, %v6742_v33  ;;  %v5396_v51 = vld [vmem:[#allocation2 + $0xc90] sm:$0xff] }
 0x317   :  { %v2400_v50 = vpop.f32.mrf.mxu0  ;;  %3201 = vmatmul.mubr.f32.gmra.mxu0 %v5379_v2  ;;  %v5399_v2 = vld [vmem:[#allocation2 + $0xcc0] sm:$0xff] }
 0x318   :  { %v2849_v30 = vpop.f32.mrf.mxu1  ;;  %3650 = vmatmul.mubr.f32.gmra.mxu1 %v5380_v28  ;;  %5153 = vst [vmem:[#allocation7 + $0x788] sm:$0xff] %v4897_v10  ;;  %v4900_v16 = vmul.f32 2.0, %v2844_v43  ;;  %v2846_v29 = vadd.f32 %v2845_v44, %v2397_v25  ;;  %v2401_v32 = vadd.f32 %v2400_v50, %v6743_v14  ;;  %3206 = vmatprep.mubr.f32.mxu0 %v5381_v41  ;;  %v5397_v10 = vld [vmem:[#allocation2 + $0xcc8] sm:$0xff]  ;;  %v5398_v43 = vld [vmem:[#allocation2 + $0xcd8] sm:$0xff] }
 0x319   :  { %3655 = vmatprep.mubr.f32.mxu1 %v5382_v36  ;;  %v2402_v52 = vpop.f32.mrf.mxu0  ;;  %v5401_v14 = vld [vmem:[#allocation2 + $0xd08] sm:$0xff] }
 0x31a   :  { %v2851_v34 = vpop.f32.mrf.mxu1  ;;  %5156 = vst [vmem:[#allocation7 + $0x7a0] sm:$0xff] %v4900_v16  ;;  %v4901_v22 = vmul.f32 2.0, %v2846_v29  ;;  %v2850_v48 = vadd.f32 %v2849_v30, %v2401_v32  ;;  %v2403_v18 = vadd.f32 %v2402_v52, %v6744_v24  ;;  %v5400_v16 = vld [vmem:[#allocation2 + $0xcd0] sm:$0xff]  ;;  %v5402_v32 = vld [vmem:[#allocation2 + $0xd18] sm:$0xff] }
 0x31b   :  { %v2406_v17 = vpop.f32.mrf.mxu0  ;;  %3207 = vmatmul.mubr.f32.gmra.mxu0 %v5383_v57  ;;  %v5404_v24 = vld [vmem:[#allocation2 + $0xd10] sm:$0xff] }
 0x31c   :  { %v2855_v55 = vpop.f32.mrf.mxu1  ;;  %3656 = vmatmul.mubr.f32.gmra.mxu1 %v5384_v54  ;;  %5157 = vst [vmem:[#allocation7 + $0x7a8] sm:$0xff] %v4901_v22  ;;  %v4904_v38 = vmul.f32 2.0, %v2850_v48  ;;  %v2852_v42 = vadd.f32 %v2851_v34, %v2403_v18  ;;  %v2407_v37 = vadd.f32 %v2406_v17, %v6745_v45  ;;  %3212 = vmatprep.mubr.f32.mxu0 %v5385_v59  ;;  %v5403_v22 = vld [vmem:[#allocation2 + $0xd00] sm:$0xff]  ;;  %v5405_v17 = vld [vmem:[#allocation2 + $0xd48] sm:$0xff]  ;;  %v5408_v59 = vld [vmem:[#allocation2 + $0xd50] sm:$0xff] }
 0x31d   :  { %3661 = vmatprep.mubr.f32.mxu1 %v5386_v7  ;;  %v2408_v60 = vpop.f32.mrf.mxu0  ;;  %v5407_v45 = vld [vmem:[#allocation2 + $0xd40] sm:$0xff] }
 0x31e   :  { %v2857_v49 = vpop.f32.mrf.mxu1  ;;  %5160 = vst [vmem:[#allocation7 + $0x7c0] sm:$0xff] %v4904_v38  ;;  %v4905_v5 = vmul.f32 2.0, %v2852_v42  ;;  %v2856_v20 = vadd.f32 %v2855_v55, %v2407_v37  ;;  %v2409_v26 = vadd.f32 %v2408_v60, %v6746_v58  ;;  %v5406_v55 = vld [vmem:[#allocation2 + $0xd58] sm:$0xff]  ;;  %v5409_v60 = vld [vmem:[#allocation2 + $0xd88] sm:$0xff] }
 0x31f   :  { %v2926_v0 = vpop.f32.mrf.mxu0  ;;  %3213 = vmatmul.mubr.f32.gmra.mxu0 %v5387_v63 }
 0x320   :  { %v3375_v40 = vpop.f32.mrf.mxu1  ;;  %3662 = vmatmul.mubr.f32.gmra.mxu1 %v5388_v53  ;;  %5161 = vst [vmem:[#allocation7 + $0x7c8] sm:$0xff] %v4905_v5  ;;  %v4908_v8 = vmul.f32 2.0, %v2856_v20  ;;  %v2858_v61 = vadd.f32 %v2857_v49, %v2409_v26  ;;  %3218 = vmatprep.mubr.f32.mxu0 %v5389_v11  ;;  %v5410_v49 = vld [vmem:[#allocation2 + $0xd98] sm:$0xff] }
 0x321   :  { %v6186_v4 = vadd.f32 %v3375_v40, %v2926_v0  ;;  %3667 = vmatprep.mubr.f32.mxu1 %v5390_v21  ;;  %v2928_v31 = vpop.f32.mrf.mxu0  ;;  %v5411_v0 = vld [vmem:[#allocation2 + $0xd80] sm:$0xff]  ;;  %v5412_v40 = vld [vmem:[#allocation2 + $0xd90] sm:$0xff] }
 0x322   :  { %v3377_v46 = vpop.f32.mrf.mxu1  ;;  %5164 = vst [vmem:[#allocation7 + $0x7e0] sm:$0xff] %v4908_v8  ;;  %v4909_v23 = vmul.f32 2.0, %v2858_v61  ;;  %v5413_v8 = vld [vmem:[#allocation2 + $0xdc8] sm:$0xff]  ;;  %v5414_v61 = vld [vmem:[#allocation2 + $0xdd8] sm:$0xff] }
 0x323   :  { %v6188_v56 = vadd.f32 %v3377_v46, %v2928_v31  ;;  %v2932_v1 = vpop.f32.mrf.mxu0  ;;  %3219 = vmatmul.mubr.f32.gmra.mxu0 %v5391_v3  ;;  %v5416_v3 = vld [vmem:[#allocation2 + $0xdd0] sm:$0xff] }
 0x324   :  { %v3381_v62 = vpop.f32.mrf.mxu1  ;;  %3668 = vmatmul.mubr.f32.gmra.mxu1 %v5392_v35  ;;  %5165 = vst [vmem:[#allocation7 + $0x7e8] sm:$0xff] %v4909_v23  ;;  %3224 = vmatprep.mubr.f32.mxu0 %v5393_v27  ;;  %v5415_v23 = vld [vmem:[#allocation2 + $0xdc0] sm:$0xff]  ;;  %v5417_v35 = vld [vmem:[#allocation2 + $0xe08] sm:$0xff]  ;;  %v5418_v27 = vld [vmem:[#allocation2 + $0xe18] sm:$0xff] }
 0x325   :  { %v6190_v15 = vadd.f32 %v3381_v62, %v2932_v1  ;;  %3673 = vmatprep.mubr.f32.mxu1 %v5394_v13  ;;  %v2934_v47 = vpop.f32.mrf.mxu0 }
 0x326   :  { %v3383_v39 = vpop.f32.mrf.mxu1 }
 0x327   :  { %v6192_v12 = vadd.f32 %v3383_v39, %v2934_v47  ;;  %v2938_v6 = vpop.f32.mrf.mxu0  ;;  %3225 = vmatmul.mubr.f32.gmra.mxu0 %v5395_v9  ;;  %v5419_v9 = vld [vmem:[#allocation2 + $0xe00] sm:$0xff] }
 0x328   :  { %v3387_v19 = vpop.f32.mrf.mxu1  ;;  %3674 = vmatmul.mubr.f32.gmra.mxu1 %v5396_v51  ;;  %3230 = vmatprep.mubr.f32.mxu0 %v5397_v10  ;;  %v5420_v51 = vld [vmem:[#allocation2 + $0xe10] sm:$0xff] }
 0x329   :  { %v6194_v44 = vadd.f32 %v3387_v19, %v2938_v6  ;;  %3679 = vmatprep.mubr.f32.mxu1 %v5398_v43  ;;  %v2940_v33 = vpop.f32.mrf.mxu0  ;;  %v5421_v43 = vld [vmem:[#allocation2 + $0xe48] sm:$0xff] }
 0x32a   :  { %v3389_v25 = vpop.f32.mrf.mxu1 }
 0x32b   :  { %v6196_v50 = vadd.f32 %v3389_v25, %v2940_v33  ;;  %v2944_v30 = vpop.f32.mrf.mxu0  ;;  %3231 = vmatmul.mubr.f32.gmra.mxu0 %v5399_v2  ;;  %v5422_v33 = vld [vmem:[#allocation2 + $0xe58] sm:$0xff] }
 0x32c   :  { %v3393_v28 = vpop.f32.mrf.mxu1  ;;  %3680 = vmatmul.mubr.f32.gmra.mxu1 %v5400_v16  ;;  %3236 = vmatprep.mubr.f32.mxu0 %v5401_v14  ;;  %v5423_v16 = vld [vmem:[#allocation2 + $0xe40] sm:$0xff] }
 0x32d   :  { %v6198_v29 = vadd.f32 %v3393_v28, %v2944_v30  ;;  %3685 = vmatprep.mubr.f32.mxu1 %v5402_v32  ;;  %v2946_v41 = vpop.f32.mrf.mxu0  ;;  %v5424_v32 = vld [vmem:[#allocation2 + $0xe50] sm:$0xff] }
 0x32e   :  { %v3395_v36 = vpop.f32.mrf.mxu1 }
 0x32f   :  { %v6200_v52 = vadd.f32 %v3395_v36, %v2946_v41  ;;  %v2950_v34 = vpop.f32.mrf.mxu0  ;;  %3237 = vmatmul.mubr.f32.gmra.mxu0 %v5403_v22  ;;  %v5425_v36 = vld [vmem:[#allocation2 + $0xe88] sm:$0xff] }
 0x330   :  { %v3399_v48 = vpop.f32.mrf.mxu1  ;;  %3686 = vmatmul.mubr.f32.gmra.mxu1 %v5404_v24  ;;  %3242 = vmatprep.mubr.f32.mxu0 %v5405_v17 }
 0x331   :  { %v6202_v18 = vadd.f32 %v3399_v48, %v2950_v34  ;;  %3691 = vmatprep.mubr.f32.mxu1 %v5406_v55  ;;  %v2952_v57 = vpop.f32.mrf.mxu0  ;;  %v5426_v34 = vld [vmem:[#allocation2 + $0xe98] sm:$0xff]  ;;  %v5427_v55 = vld [vmem:[#allocation2 + $0xe80] sm:$0xff] }
 0x332   :  { %v3401_v54 = vpop.f32.mrf.mxu1 }
 0x333   :  { %v6204_v38 = vadd.f32 %v3401_v54, %v2952_v57  ;;  %v2956_v42 = vpop.f32.mrf.mxu0  ;;  %3243 = vmatmul.mubr.f32.gmra.mxu0 %v5407_v45  ;;  %v5428_v54 = vld [vmem:[#allocation2 + $0xe90] sm:$0xff]  ;;  %v5429_v45 = vld [vmem:[#allocation2 + $0xec8] sm:$0xff] }
 0x334   :  { %v3405_v37 = vpop.f32.mrf.mxu1  ;;  %3692 = vmatmul.mubr.f32.gmra.mxu1 %v5408_v59  ;;  %3248 = vmatprep.mubr.f32.mxu0 %v5409_v60 }
 0x335   :  { %v6206_v7 = vadd.f32 %v3405_v37, %v2956_v42  ;;  %3697 = vmatprep.mubr.f32.mxu1 %v5410_v49  ;;  %v2958_v5 = vpop.f32.mrf.mxu0  ;;  %v5430_v37 = vld [vmem:[#allocation2 + $0xed8] sm:$0xff] }
 0x336   :  { %v3407_v20 = vpop.f32.mrf.mxu1 }
 0x337   :  { %v6208_v58 = vadd.f32 %v3407_v20, %v2958_v5  ;;  %v2962_v26 = vpop.f32.mrf.mxu0  ;;  %3249 = vmatmul.mubr.f32.gmra.mxu0 %v5411_v0  ;;  %v5431_v20 = vld [vmem:[#allocation2 + $0xec0] sm:$0xff]  ;;  %v5432_v0 = vld [vmem:[#allocation2 + $0xed0] sm:$0xff] }
 0x338   :  { %v3411_v63 = vpop.f32.mrf.mxu1  ;;  %3698 = vmatmul.mubr.f32.gmra.mxu1 %v5412_v40  ;;  %3254 = vmatprep.mubr.f32.mxu0 %v5413_v8  ;;  %v5433_v40 = vld [vmem:[#allocation2 + $0xf08] sm:$0xff]  ;;  %v5434_v8 = vld [vmem:[#allocation2 + $0xf18] sm:$0xff] }
 0x339   :  { %v6210_v53 = vadd.f32 %v3411_v63, %v2962_v26  ;;  %3703 = vmatprep.mubr.f32.mxu1 %v5414_v61  ;;  %v2964_v11 = vpop.f32.mrf.mxu0 }
 0x33a   :  { %v3413_v21 = vpop.f32.mrf.mxu1 }
 0x33b   :  { %v6212_v31 = vadd.f32 %v3413_v21, %v2964_v11  ;;  %v2968_v46 = vpop.f32.mrf.mxu0  ;;  %3255 = vmatmul.mubr.f32.gmra.mxu0 %v5415_v23  ;;  %v5435_v23 = vld [vmem:[#allocation2 + $0xf00] sm:$0xff] }
 0x33c   :  { %v3417_v1 = vpop.f32.mrf.mxu1  ;;  %3704 = vmatmul.mubr.f32.gmra.mxu1 %v5416_v3  ;;  %3260 = vmatprep.mubr.f32.mxu0 %v5417_v35  ;;  %v5436_v3 = vld [vmem:[#allocation2 + $0xf10] sm:$0xff] }
 0x33d   :  { %v6214_v62 = vadd.f32 %v3417_v1, %v2968_v46  ;;  %3709 = vmatprep.mubr.f32.mxu1 %v5418_v27  ;;  %v2970_v13 = vpop.f32.mrf.mxu0  ;;  %v5437_v27 = vld [vmem:[#allocation2 + $0xf48] sm:$0xff] }
 0x33e   :  { %v3419_v47 = vpop.f32.mrf.mxu1 }
 0x33f   :  { %v6216_v39 = vadd.f32 %v3419_v47, %v2970_v13  ;;  %v2974_v6 = vpop.f32.mrf.mxu0  ;;  %3261 = vmatmul.mubr.f32.gmra.mxu0 %v5419_v9  ;;  %v5438_v13 = vld [vmem:[#allocation2 + $0xf58] sm:$0xff] }
 0x340   :  { %v3423_v19 = vpop.f32.mrf.mxu1  ;;  %3710 = vmatmul.mubr.f32.gmra.mxu1 %v5420_v51  ;;  %3266 = vmatprep.mubr.f32.mxu0 %v5421_v43  ;;  %v5439_v51 = vld [vmem:[#allocation2 + $0xf40] sm:$0xff] }
 0x341   :  { %v6218_v10 = vadd.f32 %v3423_v19, %v2974_v6  ;;  %3715 = vmatprep.mubr.f32.mxu1 %v5422_v33  ;;  %v2976_v25 = vpop.f32.mrf.mxu0  ;;  %v5440_v33 = vld [vmem:[#allocation2 + $0xf50] sm:$0xff] }
 0x342   :  { %v3425_v30 = vpop.f32.mrf.mxu1 }
 0x343   :  { %v6220_v2 = vadd.f32 %v3425_v30, %v2976_v25  ;;  %v2980_v28 = vpop.f32.mrf.mxu0  ;;  %3267 = vmatmul.mubr.f32.gmra.mxu0 %v5423_v16  ;;  %v5441_v30 = vld [vmem:[#allocation2 + $0xf88] sm:$0xff] }
 0x344   :  { %v3429_v14 = vpop.f32.mrf.mxu1  ;;  %3716 = vmatmul.mubr.f32.gmra.mxu1 %v5424_v32  ;;  %3272 = vmatprep.mubr.f32.mxu0 %v5425_v36 }
 0x345   :  { %v6222_v41 = vadd.f32 %v3429_v14, %v2980_v28  ;;  %3721 = vmatprep.mubr.f32.mxu1 %v5426_v34  ;;  %v2982_v22 = vpop.f32.mrf.mxu0  ;;  %v5442_v28 = vld [vmem:[#allocation2 + $0xf98] sm:$0xff]  ;;  %v5443_v34 = vld [vmem:[#allocation2 + $0xf80] sm:$0xff] }
 0x346   :  { %v3431_v48 = vpop.f32.mrf.mxu1 }
 0x347   :  { %v6224_v24 = vadd.f32 %v3431_v48, %v2982_v22  ;;  %v2986_v17 = vpop.f32.mrf.mxu0  ;;  %3273 = vmatmul.mubr.f32.gmra.mxu0 %v5427_v55  ;;  %v5444_v48 = vld [vmem:[#allocation2 + $0xf90] sm:$0xff]  ;;  %v5445_v55 = vld [vmem:[#allocation2 + $0xfc8] sm:$0xff] }
 0x348   :  { %v3435_v57 = vpop.f32.mrf.mxu1  ;;  %3722 = vmatmul.mubr.f32.gmra.mxu1 %v5428_v54  ;;  %3278 = vmatprep.mubr.f32.mxu0 %v5429_v45 }
 0x349   :  { %v6226_v42 = vadd.f32 %v3435_v57, %v2986_v17  ;;  %3727 = vmatprep.mubr.f32.mxu1 %v5430_v37  ;;  %v2988_v59 = vpop.f32.mrf.mxu0  ;;  %v5446_v57 = vld [vmem:[#allocation2 + $0xfd8] sm:$0xff] }
 0x34a   :  { %v3437_v60 = vpop.f32.mrf.mxu1 }
 0x34b   :  { %v6228_v49 = vadd.f32 %v3437_v60, %v2988_v59  ;;  %v2992_v5 = vpop.f32.mrf.mxu0  ;;  %3279 = vmatmul.mubr.f32.gmra.mxu0 %v5431_v20  ;;  %v5447_v60 = vld [vmem:[#allocation2 + $0xfc0] sm:$0xff]  ;;  %v5448_v20 = vld [vmem:[#allocation2 + $0xfd0] sm:$0xff] }
 0x34c   :  { %v3441_v26 = vpop.f32.mrf.mxu1  ;;  %3728 = vmatmul.mubr.f32.gmra.mxu1 %v5432_v0  ;;  %3284 = vmatprep.mubr.f32.mxu0 %v5433_v40  ;;  %v5449_v0 = vld [vmem:[#allocation2 + $0x28] sm:$0xff]  ;;  %v5450_v40 = vld [vmem:[#allocation2 + $0x38] sm:$0xff] }
 0x34d   :  { %v6230_v63 = vadd.f32 %v3441_v26, %v2992_v5  ;;  %3733 = vmatprep.mubr.f32.mxu1 %v5434_v8  ;;  %v2994_v61 = vpop.f32.mrf.mxu0 }
 0x34e   :  { %v3443_v11 = vpop.f32.mrf.mxu1 }
 0x34f   :  { %v6232_v21 = vadd.f32 %v3443_v11, %v2994_v61  ;;  %v2998_v46 = vpop.f32.mrf.mxu0  ;;  %3285 = vmatmul.mubr.f32.gmra.mxu0 %v5435_v23 }
 0x350   :  { %v3447_v1 = vpop.f32.mrf.mxu1  ;;  %3734 = vmatmul.mubr.f32.gmra.mxu1 %v5436_v3  ;;  %3290 = vmatprep.mubr.f32.mxu0 %v5437_v27  ;;  %v5452_v3 = vld [vmem:[#allocation2 + $0x30] sm:$0xff] }
 0x351   :  { %v6234_v35 = vadd.f32 %v3447_v1, %v2998_v46  ;;  %3739 = vmatprep.mubr.f32.mxu1 %v5438_v13  ;;  %v3000_v47 = vpop.f32.mrf.mxu0  ;;  %v5451_v1 = vld [vmem:[#allocation2 + $0x20] sm:$0xff]  ;;  %v5453_v13 = vld [vmem:[#allocation2 + $0x68] sm:$0xff] }
 0x352   :  { %v3449_v6 = vpop.f32.mrf.mxu1 }
 0x353   :  { %v6236_v9 = vadd.f32 %v3449_v6, %v3000_v47  ;;  %v3004_v19 = vpop.f32.mrf.mxu0  ;;  %3291 = vmatmul.mubr.f32.gmra.mxu0 %v5439_v51  ;;  %v5454_v47 = vld [vmem:[#allocation2 + $0x78] sm:$0xff] }
 0x354   :  { %v3453_v43 = vpop.f32.mrf.mxu1  ;;  %3740 = vmatmul.mubr.f32.gmra.mxu1 %v5440_v33  ;;  %3296 = vmatprep.mubr.f32.mxu0 %v5441_v30  ;;  %v5455_v30 = vld [vmem:[#allocation2 + $0x60] sm:$0xff] }
 0x355   :  { %v6238_v25 = vadd.f32 %v3453_v43, %v3004_v19  ;;  %3745 = vmatprep.mubr.f32.mxu1 %v5442_v28  ;;  %v3006_v16 = vpop.f32.mrf.mxu0  ;;  %v5456_v28 = vld [vmem:[#allocation2 + $0x70] sm:$0xff] }
 0x356   :  { %v3455_v14 = vpop.f32.mrf.mxu1 }
 0x357   :  { %v6240_v32 = vadd.f32 %v3455_v14, %v3006_v16  ;;  %v3010_v36 = vpop.f32.mrf.mxu0  ;;  %3297 = vmatmul.mubr.f32.gmra.mxu0 %v5443_v34  ;;  %v5457_v14 = vld [vmem:[#allocation2 + $0xa8] sm:$0xff] }
 0x358   :  { %v3459_v22 = vpop.f32.mrf.mxu1  ;;  %3746 = vmatmul.mubr.f32.gmra.mxu1 %v5444_v48  ;;  %3302 = vmatprep.mubr.f32.mxu0 %v5445_v55 }
 0x359   :  { %v6242_v17 = vadd.f32 %v3459_v22, %v3010_v36  ;;  %3751 = vmatprep.mubr.f32.mxu1 %v5446_v57  ;;  %v3012_v54 = vpop.f32.mrf.mxu0  ;;  %v5458_v36 = vld [vmem:[#allocation2 + $0xb8] sm:$0xff] }
 0x35a   :  { %v3461_v45 = vpop.f32.mrf.mxu1 }
 0x35b   :  { %v6244_v37 = vadd.f32 %v3461_v45, %v3012_v54  ;;  %v3016_v59 = vpop.f32.mrf.mxu0  ;;  %3303 = vmatmul.mubr.f32.gmra.mxu0 %v5447_v60  ;;  %v5459_v54 = vld [vmem:[#allocation2 + $0xa0] sm:$0xff]  ;;  %v5460_v45 = vld [vmem:[#allocation2 + $0xb0] sm:$0xff]  ;;  %v5461_v60 = vld [vmem:[#allocation2 + $0xe8] sm:$0xff] }
 0x35c   :  { %v3465_v5 = vpop.f32.mrf.mxu1  ;;  %3752 = vmatmul.mubr.f32.gmra.mxu1 %v5448_v20  ;;  %3822 = vmatprep.mubr.f32.mxu0 %v5449_v0 }
 0x35d   :  { %v6246_v26 = vadd.f32 %v3465_v5, %v3016_v59  ;;  %4271 = vmatprep.mubr.f32.mxu1 %v5450_v40  ;;  %v3018_v8 = vpop.f32.mrf.mxu0  ;;  %v5462_v5 = vld [vmem:[#allocation2 + $0xf8] sm:$0xff] }
 0x35e   :  { %v3467_v61 = vpop.f32.mrf.mxu1 }
 0x35f   :  { %v6248_v11 = vadd.f32 %v3467_v61, %v3018_v8  ;;  %v3022_v46 = vpop.f32.mrf.mxu0  ;;  %3823 = vmatmul.mubr.f32.vlgmr.msra.gmra.mxu0 %v5451_v1 }
 0x360   :  { %v3471_v23 = vpop.f32.mrf.mxu1  ;;  %4272 = vmatmul.mubr.f32.vlgmr.msra.gmra.mxu1 %v5452_v3  ;;  %3828 = vmatprep.mubr.f32.mxu0 %v5453_v13  ;;  %v5465_v3 = vld [vmem:[#allocation2 + $0x128] sm:$0xff]  ;;  %v5466_v13 = vld [vmem:[#allocation2 + $0x138] sm:$0xff] }
 0x361   :  { %v6250_v27 = vadd.f32 %v3471_v23, %v3022_v46  ;;  %4277 = vmatprep.mubr.f32.mxu1 %v5454_v47  ;;  %v3024_v6 = vpop.f32.mrf.mxu0  ;;  %v5463_v46 = vld [vmem:[#allocation2 + $0xe0] sm:$0xff]  ;;  %v5464_v23 = vld [vmem:[#allocation2 + $0xf0] sm:$0xff] }
 0x362   :  { %v3473_v19 = vpop.f32.mrf.mxu1 }
 0x363   :  { %v6252_v51 = vadd.f32 %v3473_v19, %v3024_v6  ;;  %v3028_v43 = vpop.f32.mrf.mxu0  ;;  %3829 = vmatmul.mubr.f32.gmra.mxu0 %v5455_v30  ;;  %v5467_v30 = vld [vmem:[#allocation2 + $0x120] sm:$0xff] }
 0x364   :  { %v3477_v33 = vpop.f32.mrf.mxu1  ;;  %4278 = vmatmul.mubr.f32.gmra.mxu1 %v5456_v28  ;;  %3834 = vmatprep.mubr.f32.mxu0 %v5457_v14  ;;  %v5468_v28 = vld [vmem:[#allocation2 + $0x130] sm:$0xff] }
 0x365   :  { %v6254_v16 = vadd.f32 %v3477_v33, %v3028_v43  ;;  %4283 = vmatprep.mubr.f32.mxu1 %v5458_v36  ;;  %v3030_v34 = vpop.f32.mrf.mxu0  ;;  %v5469_v36 = vld [vmem:[#allocation2 + $0x168] sm:$0xff] }
 0x366   :  { %v3479_v22 = vpop.f32.mrf.mxu1 }
 0x367   :  { %v6256_v48 = vadd.f32 %v3479_v22, %v3030_v34  ;;  %v3034_v55 = vpop.f32.mrf.mxu0  ;;  %3835 = vmatmul.mubr.f32.gmra.mxu0 %v5459_v54  ;;  %v5470_v34 = vld [vmem:[#allocation2 + $0x178] sm:$0xff] }
 0x368   :  { %v3483_v57 = vpop.f32.mrf.mxu1  ;;  %4284 = vmatmul.mubr.f32.gmra.mxu1 %v5460_v45  ;;  %3840 = vmatprep.mubr.f32.mxu0 %v5461_v60  ;;  %v5471_v60 = vld [vmem:[#allocation2 + $0x160] sm:$0xff] }
 0x369   :  { %v6258_v59 = vadd.f32 %v3483_v57, %v3034_v55  ;;  %4289 = vmatprep.mubr.f32.mxu1 %v5462_v5  ;;  %v3036_v20 = vpop.f32.mrf.mxu0  ;;  %v5472_v5 = vld [vmem:[#allocation2 + $0x170] sm:$0xff] }
 0x36a   :  { %v3485_v0 = vpop.f32.mrf.mxu1 }
 0x36b   :  { %v6260_v40 = vadd.f32 %v3485_v0, %v3036_v20  ;;  %v3040_v8 = vpop.f32.mrf.mxu0  ;;  %3841 = vmatmul.mubr.f32.gmra.mxu0 %v5463_v46  ;;  %v5473_v0 = vld [vmem:[#allocation2 + $0x1a8] sm:$0xff] }
 0x36c   :  { %v3489_v61 = vpop.f32.mrf.mxu1  ;;  %4290 = vmatmul.mubr.f32.gmra.mxu1 %v5464_v23  ;;  %3846 = vmatprep.mubr.f32.mxu0 %v5465_v3 }
 0x36d   :  { %v6262_v1 = vadd.f32 %v3489_v61, %v3040_v8  ;;  %4295 = vmatprep.mubr.f32.mxu1 %v5466_v13  ;;  %v3042_v47 = vpop.f32.mrf.mxu0  ;;  %v5474_v8 = vld [vmem:[#allocation2 + $0x1b8] sm:$0xff] }
 0x36e   :  { %v3491_v6 = vpop.f32.mrf.mxu1 }
 0x36f   :  { %v6264_v19 = vadd.f32 %v3491_v6, %v3042_v47  ;;  %v3046_v43 = vpop.f32.mrf.mxu0  ;;  %3847 = vmatmul.mubr.f32.gmra.mxu0 %v5467_v30  ;;  %v5475_v47 = vld [vmem:[#allocation2 + $0x1a0] sm:$0xff]  ;;  %v5476_v6 = vld [vmem:[#allocation2 + $0x1b0] sm:$0xff]  ;;  %v5478_v30 = vld [vmem:[#allocation2 + $0x1f8] sm:$0xff] }
 0x370   :  { %v3495_v33 = vpop.f32.mrf.mxu1  ;;  %4296 = vmatmul.mubr.f32.gmra.mxu1 %v5468_v28  ;;  %3852 = vmatprep.mubr.f32.mxu0 %v5469_v36 }
 0x371   :  { %v6266_v14 = vadd.f32 %v3495_v33, %v3046_v43  ;;  %4301 = vmatprep.mubr.f32.mxu1 %v5470_v34  ;;  %v3048_v22 = vpop.f32.mrf.mxu0  ;;  %v5477_v33 = vld [vmem:[#allocation2 + $0x1e8] sm:$0xff] }
 0x372   :  { %v3497_v55 = vpop.f32.mrf.mxu1 }
 0x373   :  { %v6268_v57 = vadd.f32 %v3497_v55, %v3048_v22  ;;  %v3052_v54 = vpop.f32.mrf.mxu0  ;;  %3853 = vmatmul.mubr.f32.gmra.mxu0 %v5471_v60 }
 0x374   :  { %v3501_v45 = vpop.f32.mrf.mxu1  ;;  %4302 = vmatmul.mubr.f32.gmra.mxu1 %v5472_v5  ;;  %3858 = vmatprep.mubr.f32.mxu0 %v5473_v0  ;;  %v5481_v5 = vld [vmem:[#allocation2 + $0x228] sm:$0xff]  ;;  %v5482_v0 = vld [vmem:[#allocation2 + $0x238] sm:$0xff] }
 0x375   :  { %v6270_v20 = vadd.f32 %v3501_v45, %v3052_v54  ;;  %4307 = vmatprep.mubr.f32.mxu1 %v5474_v8  ;;  %v3054_v61 = vpop.f32.mrf.mxu0  ;;  %v5479_v54 = vld [vmem:[#allocation2 + $0x1e0] sm:$0xff]  ;;  %v5480_v45 = vld [vmem:[#allocation2 + $0x1f0] sm:$0xff] }
 0x376   :  { %v3503_v46 = vpop.f32.mrf.mxu1 }
 0x377   :  { %v6272_v23 = vadd.f32 %v3503_v46, %v3054_v61  ;;  %v3058_v3 = vpop.f32.mrf.mxu0  ;;  %3859 = vmatmul.mubr.f32.gmra.mxu0 %v5475_v47  ;;  %v5483_v47 = vld [vmem:[#allocation2 + $0x220] sm:$0xff] }
 0x378   :  { %v3507_v13 = vpop.f32.mrf.mxu1  ;;  %4308 = vmatmul.mubr.f32.gmra.mxu1 %v5476_v6  ;;  %3864 = vmatprep.mubr.f32.mxu0 %v5477_v33  ;;  %v5484_v6 = vld [vmem:[#allocation2 + $0x230] sm:$0xff] }
 0x379   :  { %v6274_v43 = vadd.f32 %v3507_v13, %v3058_v3  ;;  %4313 = vmatprep.mubr.f32.mxu1 %v5478_v30  ;;  %v3060_v28 = vpop.f32.mrf.mxu0  ;;  %v5485_v30 = vld [vmem:[#allocation2 + $0x268] sm:$0xff] }
 0x37a   :  { %v3509_v36 = vpop.f32.mrf.mxu1 }
 0x37b   :  { %v6276_v34 = vadd.f32 %v3509_v36, %v3060_v28  ;;  %v3064_v22 = vpop.f32.mrf.mxu0  ;;  %3865 = vmatmul.mubr.f32.gmra.mxu0 %v5479_v54  ;;  %v5486_v28 = vld [vmem:[#allocation2 + $0x278] sm:$0xff] }
 0x37c   :  { %v3513_v55 = vpop.f32.mrf.mxu1  ;;  %4314 = vmatmul.mubr.f32.gmra.mxu1 %v5480_v45  ;;  %3870 = vmatprep.mubr.f32.mxu0 %v5481_v5  ;;  %v5487_v5 = vld [vmem:[#allocation2 + $0x260] sm:$0xff] }
 0x37d   :  { %v6278_v60 = vadd.f32 %v3513_v55, %v3064_v22  ;;  %4319 = vmatprep.mubr.f32.mxu1 %v5482_v0  ;;  %v3066_v8 = vpop.f32.mrf.mxu0  ;;  %v5488_v0 = vld [vmem:[#allocation2 + $0x270] sm:$0xff] }
 0x37e   :  { %v3515_v61 = vpop.f32.mrf.mxu1 }
 0x37f   :  { %v6280_v46 = vadd.f32 %v3515_v61, %v3066_v8  ;;  %v3070_v3 = vpop.f32.mrf.mxu0  ;;  %3871 = vmatmul.mubr.f32.gmra.mxu0 %v5483_v47  ;;  %v5489_v61 = vld [vmem:[#allocation2 + $0x2a8] sm:$0xff] }
 0x380   :  { %v3519_v13 = vpop.f32.mrf.mxu1  ;;  %4320 = vmatmul.mubr.f32.gmra.mxu1 %v5484_v6  ;;  %3876 = vmatprep.mubr.f32.mxu0 %v5485_v30 }
 0x381   :  { %6747 = vst [vmem:[#allocation11_spill] sm:$0xff] %v6280_v46  ;;  %v6282_v33 = vadd.f32 %v3519_v13, %v3070_v3  ;;  %4325 = vmatprep.mubr.f32.mxu1 %v5486_v28  ;;  %v3072_v36 = vpop.f32.mrf.mxu0  ;;  %v5490_v3 = vld [vmem:[#allocation2 + $0x2b8] sm:$0xff] }
 0x382   :  { %v3521_v22 = vpop.f32.mrf.mxu1 }
 0x383   :  { %6748 = vst [vmem:[#allocation12_spill] sm:$0xff] %v6282_v33  ;;  %v6284_v55 = vadd.f32 %v3521_v22, %v3072_v36  ;;  %v3076_v54 = vpop.f32.mrf.mxu0  ;;  %3877 = vmatmul.mubr.f32.gmra.mxu0 %v5487_v5  ;;  %v5491_v36 = vld [vmem:[#allocation2 + $0x2a0] sm:$0xff]  ;;  %v5492_v22 = vld [vmem:[#allocation2 + $0x2b0] sm:$0xff]  ;;  %v5493_v5 = vld [vmem:[#allocation2 + $0x2e8] sm:$0xff] }
 0x384   :  { %v3525_v45 = vpop.f32.mrf.mxu1  ;;  %4326 = vmatmul.mubr.f32.gmra.mxu1 %v5488_v0  ;;  %3882 = vmatprep.mubr.f32.mxu0 %v5489_v61 }
 0x385   :  { %6749 = vst [vmem:[#allocation13_spill] sm:$0xff] %v6284_v55  ;;  %v6286_v8 = vadd.f32 %v3525_v45, %v3076_v54  ;;  %4331 = vmatprep.mubr.f32.mxu1 %v5490_v3  ;;  %v3078_v13 = vpop.f32.mrf.mxu0  ;;  %v5494_v54 = vld [vmem:[#allocation2 + $0x2f8] sm:$0xff] }
 0x386   :  { %v3527_v47 = vpop.f32.mrf.mxu1 }
 0x387   :  { %6750 = vst [vmem:[#allocation14_spill] sm:$0xff] %v6286_v8  ;;  %v6288_v6 = vadd.f32 %v3527_v47, %v3078_v13  ;;  %v3082_v30 = vpop.f32.mrf.mxu0  ;;  %3883 = vmatmul.mubr.f32.gmra.mxu0 %v5491_v36  ;;  %v5495_v13 = vld [vmem:[#allocation2 + $0x2e0] sm:$0xff]  ;;  %v5496_v47 = vld [vmem:[#allocation2 + $0x2f0] sm:$0xff]  ;;  %v5497_v36 = vld [vmem:[#allocation2 + $0x328] sm:$0xff] }
 0x388   :  { %v3531_v28 = vpop.f32.mrf.mxu1  ;;  %4332 = vmatmul.mubr.f32.gmra.mxu1 %v5492_v22  ;;  %3888 = vmatprep.mubr.f32.mxu0 %v5493_v5 }
 0x389   :  { %6751 = vst [vmem:[#allocation15_spill] sm:$0xff] %v6288_v6  ;;  %v6290_v55 = vadd.f32 %v3531_v28, %v3082_v30  ;;  %4337 = vmatprep.mubr.f32.mxu1 %v5494_v54  ;;  %v3084_v45 = vpop.f32.mrf.mxu0  ;;  %v5498_v30 = vld [vmem:[#allocation2 + $0x338] sm:$0xff] }
 0x38a   :  { %v3533_v0 = vpop.f32.mrf.mxu1 }
 0x38b   :  { %6752 = vst [vmem:[#allocation16_spill] sm:$0xff] %v6290_v55  ;;  %v6292_v61 = vadd.f32 %v3533_v0, %v3084_v45  ;;  %v3088_v3 = vpop.f32.mrf.mxu0  ;;  %3889 = vmatmul.mubr.f32.gmra.mxu0 %v5495_v13  ;;  %v5499_v45 = vld [vmem:[#allocation2 + $0x320] sm:$0xff]  ;;  %v5500_v0 = vld [vmem:[#allocation2 + $0x330] sm:$0xff]  ;;  %v5501_v13 = vld [vmem:[#allocation2 + $0x368] sm:$0xff] }
 0x38c   :  { %v3537_v8 = vpop.f32.mrf.mxu1  ;;  %4338 = vmatmul.mubr.f32.gmra.mxu1 %v5496_v47  ;;  %3894 = vmatprep.mubr.f32.mxu0 %v5497_v36 }
 0x38d   :  { %6753 = vst [vmem:[#allocation17_spill] sm:$0xff] %v6292_v61  ;;  %v6294_v6 = vadd.f32 %v3537_v8, %v3088_v3  ;;  %4343 = vmatprep.mubr.f32.mxu1 %v5498_v30  ;;  %v3090_v28 = vpop.f32.mrf.mxu0  ;;  %v5502_v8 = vld [vmem:[#allocation2 + $0x378] sm:$0xff] }
 0x38e   :  { %v3539_v22 = vpop.f32.mrf.mxu1 }
 0x38f   :  { %6754 = vst [vmem:[#allocation18_spill] sm:$0xff] %v6294_v6  ;;  %v6296_v5 = vadd.f32 %v3539_v22, %v3090_v28  ;;  %v3094_v54 = vpop.f32.mrf.mxu0  ;;  %3895 = vmatmul.mubr.f32.gmra.mxu0 %v5499_v45  ;;  %v5503_v28 = vld [vmem:[#allocation2 + $0x360] sm:$0xff]  ;;  %v5504_v22 = vld [vmem:[#allocation2 + $0x370] sm:$0xff]  ;;  %v5505_v45 = vld [vmem:[#allocation2 + $0x3a8] sm:$0xff] }
 0x390   :  { %v3543_v55 = vpop.f32.mrf.mxu1  ;;  %4344 = vmatmul.mubr.f32.gmra.mxu1 %v5500_v0  ;;  %3900 = vmatprep.mubr.f32.mxu0 %v5501_v13 }
 0x391   :  { %6755 = vst [vmem:[#allocation19_spill] sm:$0xff] %v6296_v5  ;;  %v6298_v61 = vadd.f32 %v3543_v55, %v3094_v54  ;;  %4349 = vmatprep.mubr.f32.mxu1 %v5502_v8  ;;  %v3096_v3 = vpop.f32.mrf.mxu0  ;;  %v5506_v55 = vld [vmem:[#allocation2 + $0x3b8] sm:$0xff] }
 0x392   :  { %v3545_v47 = vpop.f32.mrf.mxu1 }
 0x393   :  { %6756 = vst [vmem:[#allocation20_spill] sm:$0xff] %v6298_v61  ;;  %v6300_v36 = vadd.f32 %v3545_v47, %v3096_v3  ;;  %v3100_v30 = vpop.f32.mrf.mxu0  ;;  %3901 = vmatmul.mubr.f32.gmra.mxu0 %v5503_v28  ;;  %v5507_v3 = vld [vmem:[#allocation2 + $0x3a0] sm:$0xff]  ;;  %v5508_v47 = vld [vmem:[#allocation2 + $0x3b0] sm:$0xff]  ;;  %v5509_v28 = vld [vmem:[#allocation2 + $0x3e8] sm:$0xff] }
 0x394   :  { %v3549_v6 = vpop.f32.mrf.mxu1  ;;  %4350 = vmatmul.mubr.f32.gmra.mxu1 %v5504_v22  ;;  %3906 = vmatprep.mubr.f32.mxu0 %v5505_v45 }
 0x395   :  { %6757 = vst [vmem:[#allocation21_spill] sm:$0xff] %v6300_v36  ;;  %v6302_v5 = vadd.f32 %v3549_v6, %v3100_v30  ;;  %4355 = vmatprep.mubr.f32.mxu1 %v5506_v55  ;;  %v3102_v54 = vpop.f32.mrf.mxu0  ;;  %v5510_v6 = vld [vmem:[#allocation2 + $0x3f8] sm:$0xff] }
 0x396   :  { %v3551_v0 = vpop.f32.mrf.mxu1 }
 0x397   :  { %6758 = vst [vmem:[#allocation22_spill] sm:$0xff] %v6302_v5  ;;  %v6304_v13 = vadd.f32 %v3551_v0, %v3102_v54  ;;  %v3106_v8 = vpop.f32.mrf.mxu0  ;;  %3907 = vmatmul.mubr.f32.gmra.mxu0 %v5507_v3  ;;  %v5511_v54 = vld [vmem:[#allocation2 + $0x3e0] sm:$0xff]  ;;  %v5512_v0 = vld [vmem:[#allocation2 + $0x3f0] sm:$0xff]  ;;  %v5513_v3 = vld [vmem:[#allocation2 + $0x428] sm:$0xff] }
 0x398   :  { %v3555_v61 = vpop.f32.mrf.mxu1  ;;  %4356 = vmatmul.mubr.f32.gmra.mxu1 %v5508_v47  ;;  %3912 = vmatprep.mubr.f32.mxu0 %v5509_v28 }
 0x399   :  { %6759 = vst [vmem:[#allocation23_spill] sm:$0xff] %v6304_v13  ;;  %v6306_v36 = vadd.f32 %v3555_v61, %v3106_v8  ;;  %4361 = vmatprep.mubr.f32.mxu1 %v5510_v6  ;;  %v3108_v30 = vpop.f32.mrf.mxu0  ;;  %v5514_v61 = vld [vmem:[#allocation2 + $0x438] sm:$0xff] }
 0x39a   :  { %v3557_v22 = vpop.f32.mrf.mxu1 }
 0x39b   :  { %6760 = vst [vmem:[#allocation24_spill] sm:$0xff] %v6306_v36  ;;  %v6308_v45 = vadd.f32 %v3557_v22, %v3108_v30  ;;  %v3112_v55 = vpop.f32.mrf.mxu0  ;;  %3913 = vmatmul.mubr.f32.gmra.mxu0 %v5511_v54  ;;  %v5515_v30 = vld [vmem:[#allocation2 + $0x420] sm:$0xff]  ;;  %v5516_v22 = vld [vmem:[#allocation2 + $0x430] sm:$0xff]  ;;  %v5517_v54 = vld [vmem:[#allocation2 + $0x468] sm:$0xff] }
 0x39c   :  { %v3561_v5 = vpop.f32.mrf.mxu1  ;;  %4362 = vmatmul.mubr.f32.gmra.mxu1 %v5512_v0  ;;  %3918 = vmatprep.mubr.f32.mxu0 %v5513_v3 }
 0x39d   :  { %6761 = vst [vmem:[#allocation25_spill] sm:$0xff] %v6308_v45  ;;  %v6310_v13 = vadd.f32 %v3561_v5, %v3112_v55  ;;  %4367 = vmatprep.mubr.f32.mxu1 %v5514_v61  ;;  %v3114_v8 = vpop.f32.mrf.mxu0  ;;  %v5518_v5 = vld [vmem:[#allocation2 + $0x478] sm:$0xff] }
 0x39e   :  { %v3563_v47 = vpop.f32.mrf.mxu1 }
 0x39f   :  { %6762 = vst [vmem:[#allocation26_spill] sm:$0xff] %v6310_v13  ;;  %v6312_v28 = vadd.f32 %v3563_v47, %v3114_v8  ;;  %v3118_v6 = vpop.f32.mrf.mxu0  ;;  %3919 = vmatmul.mubr.f32.gmra.mxu0 %v5515_v30  ;;  %v5519_v8 = vld [vmem:[#allocation2 + $0x460] sm:$0xff]  ;;  %v5520_v47 = vld [vmem:[#allocation2 + $0x470] sm:$0xff]  ;;  %v5521_v30 = vld [vmem:[#allocation2 + $0x4a8] sm:$0xff] }
 0x3a0   :  { %v3567_v36 = vpop.f32.mrf.mxu1  ;;  %4368 = vmatmul.mubr.f32.gmra.mxu1 %v5516_v22  ;;  %3924 = vmatprep.mubr.f32.mxu0 %v5517_v54 }
 0x3a1   :  { %6763 = vst [vmem:[#allocation27_spill] sm:$0xff] %v6312_v28  ;;  %v6314_v45 = vadd.f32 %v3567_v36, %v3118_v6  ;;  %4373 = vmatprep.mubr.f32.mxu1 %v5518_v5  ;;  %v3120_v55 = vpop.f32.mrf.mxu0  ;;  %v5522_v36 = vld [vmem:[#allocation2 + $0x4b8] sm:$0xff] }
 0x3a2   :  { %v3569_v0 = vpop.f32.mrf.mxu1 }
 0x3a3   :  { %6764 = vst [vmem:[#allocation28_spill] sm:$0xff] %v6314_v45  ;;  %v6316_v3 = vadd.f32 %v3569_v0, %v3120_v55  ;;  %v3124_v61 = vpop.f32.mrf.mxu0  ;;  %3925 = vmatmul.mubr.f32.gmra.mxu0 %v5519_v8  ;;  %v5523_v55 = vld [vmem:[#allocation2 + $0x4a0] sm:$0xff]  ;;  %v5524_v0 = vld [vmem:[#allocation2 + $0x4b0] sm:$0xff]  ;;  %v5525_v8 = vld [vmem:[#allocation2 + $0x4e8] sm:$0xff] }
 0x3a4   :  { %v3573_v13 = vpop.f32.mrf.mxu1  ;;  %4374 = vmatmul.mubr.f32.gmra.mxu1 %v5520_v47  ;;  %3930 = vmatprep.mubr.f32.mxu0 %v5521_v30 }
 0x3a5   :  { %6765 = vst [vmem:[#allocation29_spill] sm:$0xff] %v6316_v3  ;;  %v6318_v28 = vadd.f32 %v3573_v13, %v3124_v61  ;;  %4379 = vmatprep.mubr.f32.mxu1 %v5522_v36  ;;  %v3126_v6 = vpop.f32.mrf.mxu0  ;;  %v5526_v13 = vld [vmem:[#allocation2 + $0x4f8] sm:$0xff] }
 0x3a6   :  { %v3575_v22 = vpop.f32.mrf.mxu1 }
 0x3a7   :  { %6766 = vst [vmem:[#allocation30_spill] sm:$0xff] %v6318_v28  ;;  %v6320_v54 = vadd.f32 %v3575_v22, %v3126_v6  ;;  %v3130_v5 = vpop.f32.mrf.mxu0  ;;  %3931 = vmatmul.mubr.f32.gmra.mxu0 %v5523_v55  ;;  %v5527_v6 = vld [vmem:[#allocation2 + $0x4e0] sm:$0xff]  ;;  %v5528_v22 = vld [vmem:[#allocation2 + $0x4f0] sm:$0xff]  ;;  %v5529_v55 = vld [vmem:[#allocation2 + $0x528] sm:$0xff] }
 0x3a8   :  { %v3579_v45 = vpop.f32.mrf.mxu1  ;;  %4380 = vmatmul.mubr.f32.gmra.mxu1 %v5524_v0  ;;  %3936 = vmatprep.mubr.f32.mxu0 %v5525_v8 }
 0x3a9   :  { %6767 = vst [vmem:[#allocation31_spill] sm:$0xff] %v6320_v54  ;;  %v6322_v3 = vadd.f32 %v3579_v45, %v3130_v5  ;;  %4385 = vmatprep.mubr.f32.mxu1 %v5526_v13  ;;  %v3132_v61 = vpop.f32.mrf.mxu0  ;;  %v5530_v45 = vld [vmem:[#allocation2 + $0x538] sm:$0xff] }
 0x3aa   :  { %v3581_v47 = vpop.f32.mrf.mxu1 }
 0x3ab   :  { %6768 = vst [vmem:[#allocation32_spill] sm:$0xff] %v6322_v3  ;;  %v6324_v30 = vadd.f32 %v3581_v47, %v3132_v61  ;;  %v3136_v36 = vpop.f32.mrf.mxu0  ;;  %3937 = vmatmul.mubr.f32.gmra.mxu0 %v5527_v6  ;;  %v5531_v61 = vld [vmem:[#allocation2 + $0x520] sm:$0xff]  ;;  %v5532_v47 = vld [vmem:[#allocation2 + $0x530] sm:$0xff]  ;;  %v5533_v6 = vld [vmem:[#allocation2 + $0x568] sm:$0xff] }
 0x3ac   :  { %v3585_v28 = vpop.f32.mrf.mxu1  ;;  %4386 = vmatmul.mubr.f32.gmra.mxu1 %v5528_v22  ;;  %3942 = vmatprep.mubr.f32.mxu0 %v5529_v55 }
 0x3ad   :  { %6769 = vst [vmem:[#allocation33_spill] sm:$0xff] %v6324_v30  ;;  %v6326_v54 = vadd.f32 %v3585_v28, %v3136_v36  ;;  %4391 = vmatprep.mubr.f32.mxu1 %v5530_v45  ;;  %v3138_v5 = vpop.f32.mrf.mxu0  ;;  %v5534_v28 = vld [vmem:[#allocation2 + $0x578] sm:$0xff] }
 0x3ae   :  { %v3587_v0 = vpop.f32.mrf.mxu1 }
 0x3af   :  { %6770 = vst [vmem:[#allocation34_spill] sm:$0xff] %v6326_v54  ;;  %v6328_v8 = vadd.f32 %v3587_v0, %v3138_v5  ;;  %v3142_v13 = vpop.f32.mrf.mxu0  ;;  %3943 = vmatmul.mubr.f32.gmra.mxu0 %v5531_v61  ;;  %v5535_v5 = vld [vmem:[#allocation2 + $0x560] sm:$0xff]  ;;  %v5536_v0 = vld [vmem:[#allocation2 + $0x570] sm:$0xff]  ;;  %v5537_v61 = vld [vmem:[#allocation2 + $0x5a8] sm:$0xff] }
 0x3b0   :  { %v3591_v3 = vpop.f32.mrf.mxu1  ;;  %4392 = vmatmul.mubr.f32.gmra.mxu1 %v5532_v47  ;;  %3948 = vmatprep.mubr.f32.mxu0 %v5533_v6 }
 0x3b1   :  { %6771 = vst [vmem:[#allocation35_spill] sm:$0xff] %v6328_v8  ;;  %v6330_v30 = vadd.f32 %v3591_v3, %v3142_v13  ;;  %4397 = vmatprep.mubr.f32.mxu1 %v5534_v28  ;;  %v3144_v36 = vpop.f32.mrf.mxu0  ;;  %v5538_v3 = vld [vmem:[#allocation2 + $0x5b8] sm:$0xff] }
 0x3b2   :  { %v3593_v22 = vpop.f32.mrf.mxu1 }
 0x3b3   :  { %6772 = vst [vmem:[#allocation36_spill] sm:$0xff] %v6330_v30  ;;  %v6332_v55 = vadd.f32 %v3593_v22, %v3144_v36  ;;  %v3148_v45 = vpop.f32.mrf.mxu0  ;;  %3949 = vmatmul.mubr.f32.gmra.mxu0 %v5535_v5  ;;  %v5539_v36 = vld [vmem:[#allocation2 + $0x5a0] sm:$0xff]  ;;  %v5540_v22 = vld [vmem:[#allocation2 + $0x5b0] sm:$0xff]  ;;  %v5541_v5 = vld [vmem:[#allocation2 + $0x5e8] sm:$0xff] }
 0x3b4   :  { %v3597_v54 = vpop.f32.mrf.mxu1  ;;  %4398 = vmatmul.mubr.f32.gmra.mxu1 %v5536_v0  ;;  %3954 = vmatprep.mubr.f32.mxu0 %v5537_v61 }
 0x3b5   :  { %6773 = vst [vmem:[#allocation37_spill] sm:$0xff] %v6332_v55  ;;  %v6334_v8 = vadd.f32 %v3597_v54, %v3148_v45  ;;  %4403 = vmatprep.mubr.f32.mxu1 %v5538_v3  ;;  %v3150_v13 = vpop.f32.mrf.mxu0  ;;  %v5542_v54 = vld [vmem:[#allocation2 + $0x5f8] sm:$0xff] }
 0x3b6   :  { %v3599_v47 = vpop.f32.mrf.mxu1 }
 0x3b7   :  { %6774 = vst [vmem:[#allocation38_spill] sm:$0xff] %v6334_v8  ;;  %v6336_v6 = vadd.f32 %v3599_v47, %v3150_v13  ;;  %v3154_v28 = vpop.f32.mrf.mxu0  ;;  %3955 = vmatmul.mubr.f32.gmra.mxu0 %v5539_v36  ;;  %v5543_v13 = vld [vmem:[#allocation2 + $0x5e0] sm:$0xff]  ;;  %v5544_v47 = vld [vmem:[#allocation2 + $0x5f0] sm:$0xff]  ;;  %v5545_v36 = vld [vmem:[#allocation2 + $0x628] sm:$0xff] }
 0x3b8   :  { %v3603_v30 = vpop.f32.mrf.mxu1  ;;  %4404 = vmatmul.mubr.f32.gmra.mxu1 %v5540_v22  ;;  %3960 = vmatprep.mubr.f32.mxu0 %v5541_v5 }
 0x3b9   :  { %6775 = vst [vmem:[#allocation39_spill] sm:$0xff] %v6336_v6  ;;  %v6338_v55 = vadd.f32 %v3603_v30, %v3154_v28  ;;  %4409 = vmatprep.mubr.f32.mxu1 %v5542_v54  ;;  %v3156_v45 = vpop.f32.mrf.mxu0  ;;  %v5546_v30 = vld [vmem:[#allocation2 + $0x638] sm:$0xff] }
 0x3ba   :  { %v3605_v0 = vpop.f32.mrf.mxu1 }
 0x3bb   :  { %6776 = vst [vmem:[#allocation40_spill] sm:$0xff] %v6338_v55  ;;  %v6340_v61 = vadd.f32 %v3605_v0, %v3156_v45  ;;  %v3160_v3 = vpop.f32.mrf.mxu0  ;;  %3961 = vmatmul.mubr.f32.gmra.mxu0 %v5543_v13  ;;  %v5547_v45 = vld [vmem:[#allocation2 + $0x620] sm:$0xff]  ;;  %v5548_v0 = vld [vmem:[#allocation2 + $0x630] sm:$0xff]  ;;  %v5549_v13 = vld [vmem:[#allocation2 + $0x668] sm:$0xff] }
 0x3bc   :  { %v3609_v8 = vpop.f32.mrf.mxu1  ;;  %4410 = vmatmul.mubr.f32.gmra.mxu1 %v5544_v47  ;;  %3966 = vmatprep.mubr.f32.mxu0 %v5545_v36 }
 0x3bd   :  { %6777 = vst [vmem:[#allocation41_spill] sm:$0xff] %v6340_v61  ;;  %v6342_v6 = vadd.f32 %v3609_v8, %v3160_v3  ;;  %4415 = vmatprep.mubr.f32.mxu1 %v5546_v30  ;;  %v3162_v28 = vpop.f32.mrf.mxu0  ;;  %v5550_v8 = vld [vmem:[#allocation2 + $0x678] sm:$0xff] }
 0x3be   :  { %v3611_v22 = vpop.f32.mrf.mxu1 }
 0x3bf   :  { %6778 = vst [vmem:[#allocation42_spill] sm:$0xff] %v6342_v6  ;;  %v6344_v5 = vadd.f32 %v3611_v22, %v3162_v28  ;;  %v3166_v54 = vpop.f32.mrf.mxu0  ;;  %3967 = vmatmul.mubr.f32.gmra.mxu0 %v5547_v45  ;;  %v5551_v28 = vld [vmem:[#allocation2 + $0x660] sm:$0xff]  ;;  %v5552_v22 = vld [vmem:[#allocation2 + $0x670] sm:$0xff]  ;;  %v5553_v45 = vld [vmem:[#allocation2 + $0x6a8] sm:$0xff] }
 0x3c0   :  { %v3615_v55 = vpop.f32.mrf.mxu1  ;;  %4416 = vmatmul.mubr.f32.gmra.mxu1 %v5548_v0  ;;  %3972 = vmatprep.mubr.f32.mxu0 %v5549_v13 }
 0x3c1   :  { %6779 = vst [vmem:[#allocation43_spill] sm:$0xff] %v6344_v5  ;;  %v6346_v61 = vadd.f32 %v3615_v55, %v3166_v54  ;;  %4421 = vmatprep.mubr.f32.mxu1 %v5550_v8  ;;  %v3168_v3 = vpop.f32.mrf.mxu0  ;;  %v5554_v55 = vld [vmem:[#allocation2 + $0x6b8] sm:$0xff] }
 0x3c2   :  { %v3617_v47 = vpop.f32.mrf.mxu1 }
 0x3c3   :  { %6780 = vst [vmem:[#allocation44_spill] sm:$0xff] %v6346_v61  ;;  %v6348_v36 = vadd.f32 %v3617_v47, %v3168_v3  ;;  %v3172_v30 = vpop.f32.mrf.mxu0  ;;  %3973 = vmatmul.mubr.f32.gmra.mxu0 %v5551_v28  ;;  %v5555_v3 = vld [vmem:[#allocation2 + $0x6a0] sm:$0xff]  ;;  %v5556_v47 = vld [vmem:[#allocation2 + $0x6b0] sm:$0xff]  ;;  %v5557_v28 = vld [vmem:[#allocation2 + $0x6e8] sm:$0xff] }
 0x3c4   :  { %v3621_v6 = vpop.f32.mrf.mxu1  ;;  %4422 = vmatmul.mubr.f32.gmra.mxu1 %v5552_v22  ;;  %3978 = vmatprep.mubr.f32.mxu0 %v5553_v45 }
 0x3c5   :  { %6781 = vst [vmem:[#allocation45_spill] sm:$0xff] %v6348_v36  ;;  %v6350_v5 = vadd.f32 %v3621_v6, %v3172_v30  ;;  %4427 = vmatprep.mubr.f32.mxu1 %v5554_v55  ;;  %v3174_v54 = vpop.f32.mrf.mxu0  ;;  %v5558_v6 = vld [vmem:[#allocation2 + $0x6f8] sm:$0xff] }
 0x3c6   :  { %v3623_v0 = vpop.f32.mrf.mxu1 }
 0x3c7   :  { %6782 = vst [vmem:[#allocation46_spill] sm:$0xff] %v6350_v5  ;;  %v6352_v13 = vadd.f32 %v3623_v0, %v3174_v54  ;;  %v3178_v8 = vpop.f32.mrf.mxu0  ;;  %3979 = vmatmul.mubr.f32.gmra.mxu0 %v5555_v3  ;;  %v5559_v54 = vld [vmem:[#allocation2 + $0x6e0] sm:$0xff]  ;;  %v5560_v0 = vld [vmem:[#allocation2 + $0x6f0] sm:$0xff]  ;;  %v5561_v3 = vld [vmem:[#allocation2 + $0x728] sm:$0xff] }
 0x3c8   :  { %v3627_v61 = vpop.f32.mrf.mxu1  ;;  %4428 = vmatmul.mubr.f32.gmra.mxu1 %v5556_v47  ;;  %3984 = vmatprep.mubr.f32.mxu0 %v5557_v28 }
 0x3c9   :  { %6783 = vst [vmem:[#allocation47_spill] sm:$0xff] %v6352_v13  ;;  %v6354_v36 = vadd.f32 %v3627_v61, %v3178_v8  ;;  %4433 = vmatprep.mubr.f32.mxu1 %v5558_v6  ;;  %v3180_v30 = vpop.f32.mrf.mxu0  ;;  %v5562_v61 = vld [vmem:[#allocation2 + $0x738] sm:$0xff] }
 0x3ca   :  { %v3629_v22 = vpop.f32.mrf.mxu1 }
 0x3cb   :  { %6784 = vst [vmem:[#allocation48_spill] sm:$0xff] %v6354_v36  ;;  %v6356_v45 = vadd.f32 %v3629_v22, %v3180_v30  ;;  %v3184_v55 = vpop.f32.mrf.mxu0  ;;  %3985 = vmatmul.mubr.f32.gmra.mxu0 %v5559_v54  ;;  %v5563_v30 = vld [vmem:[#allocation2 + $0x720] sm:$0xff]  ;;  %v5564_v22 = vld [vmem:[#allocation2 + $0x730] sm:$0xff]  ;;  %v5565_v54 = vld [vmem:[#allocation2 + $0x768] sm:$0xff] }
 0x3cc   :  { %v3633_v5 = vpop.f32.mrf.mxu1  ;;  %4434 = vmatmul.mubr.f32.gmra.mxu1 %v5560_v0  ;;  %3990 = vmatprep.mubr.f32.mxu0 %v5561_v3 }
 0x3cd   :  { %6785 = vst [vmem:[#allocation49_spill] sm:$0xff] %v6356_v45  ;;  %v6358_v13 = vadd.f32 %v3633_v5, %v3184_v55  ;;  %4439 = vmatprep.mubr.f32.mxu1 %v5562_v61  ;;  %v3186_v8 = vpop.f32.mrf.mxu0  ;;  %v5566_v5 = vld [vmem:[#allocation2 + $0x778] sm:$0xff] }
 0x3ce   :  { %v3635_v47 = vpop.f32.mrf.mxu1 }
 0x3cf   :  { %6786 = vst [vmem:[#allocation50_spill] sm:$0xff] %v6358_v13  ;;  %v6360_v28 = vadd.f32 %v3635_v47, %v3186_v8  ;;  %v3190_v6 = vpop.f32.mrf.mxu0  ;;  %3991 = vmatmul.mubr.f32.gmra.mxu0 %v5563_v30  ;;  %v5567_v8 = vld [vmem:[#allocation2 + $0x760] sm:$0xff]  ;;  %v5568_v47 = vld [vmem:[#allocation2 + $0x770] sm:$0xff]  ;;  %v5569_v30 = vld [vmem:[#allocation2 + $0x7a8] sm:$0xff] }
 0x3d0   :  { %v3639_v36 = vpop.f32.mrf.mxu1  ;;  %4440 = vmatmul.mubr.f32.gmra.mxu1 %v5564_v22  ;;  %3996 = vmatprep.mubr.f32.mxu0 %v5565_v54 }
 0x3d1   :  { %6787 = vst [vmem:[#allocation51_spill] sm:$0xff] %v6360_v28  ;;  %v6362_v45 = vadd.f32 %v3639_v36, %v3190_v6  ;;  %4445 = vmatprep.mubr.f32.mxu1 %v5566_v5  ;;  %v3192_v55 = vpop.f32.mrf.mxu0  ;;  %v5570_v36 = vld [vmem:[#allocation2 + $0x7b8] sm:$0xff] }
 0x3d2   :  { %v3641_v0 = vpop.f32.mrf.mxu1 }
 0x3d3   :  { %6788 = vst [vmem:[#allocation52_spill] sm:$0xff] %v6362_v45  ;;  %v6364_v3 = vadd.f32 %v3641_v0, %v3192_v55  ;;  %v3196_v61 = vpop.f32.mrf.mxu0  ;;  %3997 = vmatmul.mubr.f32.gmra.mxu0 %v5567_v8  ;;  %v5571_v55 = vld [vmem:[#allocation2 + $0x7a0] sm:$0xff]  ;;  %v5572_v0 = vld [vmem:[#allocation2 + $0x7b0] sm:$0xff]  ;;  %v5573_v8 = vld [vmem:[#allocation2 + $0x7e8] sm:$0xff] }
 0x3d4   :  { %v3645_v13 = vpop.f32.mrf.mxu1  ;;  %4446 = vmatmul.mubr.f32.gmra.mxu1 %v5568_v47  ;;  %4002 = vmatprep.mubr.f32.mxu0 %v5569_v30 }
 0x3d5   :  { %6789 = vst [vmem:[#allocation53_spill] sm:$0xff] %v6364_v3  ;;  %v6366_v28 = vadd.f32 %v3645_v13, %v3196_v61  ;;  %4451 = vmatprep.mubr.f32.mxu1 %v5570_v36  ;;  %v3198_v6 = vpop.f32.mrf.mxu0  ;;  %v5574_v13 = vld [vmem:[#allocation2 + $0x7f8] sm:$0xff] }
 0x3d6   :  { %v3647_v22 = vpop.f32.mrf.mxu1 }
 0x3d7   :  { %6790 = vst [vmem:[#allocation54_spill] sm:$0xff] %v6366_v28  ;;  %v6368_v54 = vadd.f32 %v3647_v22, %v3198_v6  ;;  %v3202_v5 = vpop.f32.mrf.mxu0  ;;  %4003 = vmatmul.mubr.f32.gmra.mxu0 %v5571_v55  ;;  %v5575_v6 = vld [vmem:[#allocation2 + $0x7e0] sm:$0xff]  ;;  %v5576_v22 = vld [vmem:[#allocation2 + $0x7f0] sm:$0xff]  ;;  %v5577_v55 = vld [vmem:[#allocation2 + $0x828] sm:$0xff] }
 0x3d8   :  { %v3651_v45 = vpop.f32.mrf.mxu1  ;;  %4452 = vmatmul.mubr.f32.gmra.mxu1 %v5572_v0  ;;  %4008 = vmatprep.mubr.f32.mxu0 %v5573_v8 }
 0x3d9   :  { %6791 = vst [vmem:[#allocation55_spill] sm:$0xff] %v6368_v54  ;;  %v6370_v3 = vadd.f32 %v3651_v45, %v3202_v5  ;;  %4457 = vmatprep.mubr.f32.mxu1 %v5574_v13  ;;  %v3204_v61 = vpop.f32.mrf.mxu0  ;;  %v5578_v45 = vld [vmem:[#allocation2 + $0x838] sm:$0xff] }
 0x3da   :  { %v3653_v47 = vpop.f32.mrf.mxu1 }
 0x3db   :  { %6792 = vst [vmem:[#allocation56_spill] sm:$0xff] %v6370_v3  ;;  %v6372_v30 = vadd.f32 %v3653_v47, %v3204_v61  ;;  %v3208_v36 = vpop.f32.mrf.mxu0  ;;  %4009 = vmatmul.mubr.f32.gmra.mxu0 %v5575_v6  ;;  %v5579_v61 = vld [vmem:[#allocation2 + $0x820] sm:$0xff]  ;;  %v5580_v47 = vld [vmem:[#allocation2 + $0x830] sm:$0xff]  ;;  %v5581_v6 = vld [vmem:[#allocation2 + $0x868] sm:$0xff] }
 0x3dc   :  { %v3657_v28 = vpop.f32.mrf.mxu1  ;;  %4458 = vmatmul.mubr.f32.gmra.mxu1 %v5576_v22  ;;  %4014 = vmatprep.mubr.f32.mxu0 %v5577_v55 }
 0x3dd   :  { %6793 = vst [vmem:[#allocation57_spill] sm:$0xff] %v6372_v30  ;;  %v6374_v54 = vadd.f32 %v3657_v28, %v3208_v36  ;;  %4463 = vmatprep.mubr.f32.mxu1 %v5578_v45  ;;  %v3210_v5 = vpop.f32.mrf.mxu0  ;;  %v5582_v28 = vld [vmem:[#allocation2 + $0x878] sm:$0xff] }
 0x3de   :  { %v3659_v0 = vpop.f32.mrf.mxu1 }
 0x3df   :  { %6794 = vst [vmem:[#allocation58_spill] sm:$0xff] %v6374_v54  ;;  %v6376_v8 = vadd.f32 %v3659_v0, %v3210_v5  ;;  %v3214_v13 = vpop.f32.mrf.mxu0  ;;  %4015 = vmatmul.mubr.f32.gmra.mxu0 %v5579_v61  ;;  %v5583_v5 = vld [vmem:[#allocation2 + $0x860] sm:$0xff]  ;;  %v5584_v0 = vld [vmem:[#allocation2 + $0x870] sm:$0xff]  ;;  %v5585_v61 = vld [vmem:[#allocation2 + $0x8a8] sm:$0xff] }
 0x3e0   :  { %v3663_v3 = vpop.f32.mrf.mxu1  ;;  %4464 = vmatmul.mubr.f32.gmra.mxu1 %v5580_v47  ;;  %4020 = vmatprep.mubr.f32.mxu0 %v5581_v6 }
 0x3e1   :  { %6795 = vst [vmem:[#allocation59_spill] sm:$0xff] %v6376_v8  ;;  %v6378_v30 = vadd.f32 %v3663_v3, %v3214_v13  ;;  %4469 = vmatprep.mubr.f32.mxu1 %v5582_v28  ;;  %v3216_v36 = vpop.f32.mrf.mxu0  ;;  %v5586_v3 = vld [vmem:[#allocation2 + $0x8b8] sm:$0xff] }
 0x3e2   :  { %v3665_v22 = vpop.f32.mrf.mxu1 }
 0x3e3   :  { %6796 = vst [vmem:[#allocation60_spill] sm:$0xff] %v6378_v30  ;;  %v6380_v55 = vadd.f32 %v3665_v22, %v3216_v36  ;;  %v3220_v45 = vpop.f32.mrf.mxu0  ;;  %4021 = vmatmul.mubr.f32.gmra.mxu0 %v5583_v5  ;;  %v5587_v36 = vld [vmem:[#allocation2 + $0x8a0] sm:$0xff]  ;;  %v5588_v22 = vld [vmem:[#allocation2 + $0x8b0] sm:$0xff]  ;;  %v5589_v5 = vld [vmem:[#allocation2 + $0x8e8] sm:$0xff] }
 0x3e4   :  { %v3669_v54 = vpop.f32.mrf.mxu1  ;;  %4470 = vmatmul.mubr.f32.gmra.mxu1 %v5584_v0  ;;  %4026 = vmatprep.mubr.f32.mxu0 %v5585_v61 }
 0x3e5   :  { %6797 = vst [vmem:[#allocation61_spill] sm:$0xff] %v6380_v55  ;;  %v6382_v8 = vadd.f32 %v3669_v54, %v3220_v45  ;;  %4475 = vmatprep.mubr.f32.mxu1 %v5586_v3  ;;  %v3222_v13 = vpop.f32.mrf.mxu0  ;;  %v5590_v54 = vld [vmem:[#allocation2 + $0x8f8] sm:$0xff] }
 0x3e6   :  { %v3671_v47 = vpop.f32.mrf.mxu1 }
 0x3e7   :  { %6798 = vst [vmem:[#allocation62_spill] sm:$0xff] %v6382_v8  ;;  %v6384_v6 = vadd.f32 %v3671_v47, %v3222_v13  ;;  %v3226_v28 = vpop.f32.mrf.mxu0  ;;  %4027 = vmatmul.mubr.f32.gmra.mxu0 %v5587_v36  ;;  %v5591_v13 = vld [vmem:[#allocation2 + $0x8e0] sm:$0xff]  ;;  %v5592_v47 = vld [vmem:[#allocation2 + $0x8f0] sm:$0xff]  ;;  %v5593_v36 = vld [vmem:[#allocation2 + $0x928] sm:$0xff] }
 0x3e8   :  { %v3675_v30 = vpop.f32.mrf.mxu1  ;;  %4476 = vmatmul.mubr.f32.gmra.mxu1 %v5588_v22  ;;  %4032 = vmatprep.mubr.f32.mxu0 %v5589_v5 }
 0x3e9   :  { %6799 = vst [vmem:[#allocation63_spill] sm:$0xff] %v6384_v6  ;;  %v6386_v55 = vadd.f32 %v3675_v30, %v3226_v28  ;;  %4481 = vmatprep.mubr.f32.mxu1 %v5590_v54  ;;  %v3228_v45 = vpop.f32.mrf.mxu0  ;;  %v5594_v30 = vld [vmem:[#allocation2 + $0x938] sm:$0xff] }
 0x3ea   :  { %v3677_v0 = vpop.f32.mrf.mxu1 }
 0x3eb   :  { %6800 = vst [vmem:[#allocation64_spill] sm:$0xff] %v6386_v55  ;;  %v6388_v61 = vadd.f32 %v3677_v0, %v3228_v45  ;;  %v3232_v3 = vpop.f32.mrf.mxu0  ;;  %4033 = vmatmul.mubr.f32.gmra.mxu0 %v5591_v13  ;;  %v5595_v45 = vld [vmem:[#allocation2 + $0x920] sm:$0xff]  ;;  %v5596_v0 = vld [vmem:[#allocation2 + $0x930] sm:$0xff]  ;;  %v5597_v13 = vld [vmem:[#allocation2 + $0x968] sm:$0xff] }
 0x3ec   :  { %v3681_v8 = vpop.f32.mrf.mxu1  ;;  %4482 = vmatmul.mubr.f32.gmra.mxu1 %v5592_v47  ;;  %4038 = vmatprep.mubr.f32.mxu0 %v5593_v36 }
 0x3ed   :  { %6801 = vst [vmem:[#allocation65_spill] sm:$0xff] %v6388_v61  ;;  %v6390_v6 = vadd.f32 %v3681_v8, %v3232_v3  ;;  %4487 = vmatprep.mubr.f32.mxu1 %v5594_v30  ;;  %v3234_v28 = vpop.f32.mrf.mxu0  ;;  %v5598_v8 = vld [vmem:[#allocation2 + $0x978] sm:$0xff] }
 0x3ee   :  { %v3683_v22 = vpop.f32.mrf.mxu1 }
 0x3ef   :  { %6802 = vst [vmem:[#allocation66_spill] sm:$0xff] %v6390_v6  ;;  %v6392_v5 = vadd.f32 %v3683_v22, %v3234_v28  ;;  %v3238_v54 = vpop.f32.mrf.mxu0  ;;  %4039 = vmatmul.mubr.f32.gmra.mxu0 %v5595_v45  ;;  %v5599_v28 = vld [vmem:[#allocation2 + $0x960] sm:$0xff]  ;;  %v5600_v22 = vld [vmem:[#allocation2 + $0x970] sm:$0xff]  ;;  %v5601_v45 = vld [vmem:[#allocation2 + $0x9a8] sm:$0xff] }
 0x3f0   :  { %v3687_v55 = vpop.f32.mrf.mxu1  ;;  %4488 = vmatmul.mubr.f32.gmra.mxu1 %v5596_v0  ;;  %4044 = vmatprep.mubr.f32.mxu0 %v5597_v13 }
 0x3f1   :  { %6803 = vst [vmem:[#allocation67_spill] sm:$0xff] %v6392_v5  ;;  %v6394_v61 = vadd.f32 %v3687_v55, %v3238_v54  ;;  %4493 = vmatprep.mubr.f32.mxu1 %v5598_v8  ;;  %v3240_v3 = vpop.f32.mrf.mxu0  ;;  %v5602_v55 = vld [vmem:[#allocation2 + $0x9b8] sm:$0xff] }
 0x3f2   :  { %v3689_v47 = vpop.f32.mrf.mxu1 }
 0x3f3   :  { %6804 = vst [vmem:[#allocation68_spill] sm:$0xff] %v6394_v61  ;;  %v6396_v36 = vadd.f32 %v3689_v47, %v3240_v3  ;;  %v3244_v30 = vpop.f32.mrf.mxu0  ;;  %4045 = vmatmul.mubr.f32.gmra.mxu0 %v5599_v28  ;;  %v5603_v3 = vld [vmem:[#allocation2 + $0x9a0] sm:$0xff]  ;;  %v5604_v47 = vld [vmem:[#allocation2 + $0x9b0] sm:$0xff]  ;;  %v5605_v28 = vld [vmem:[#allocation2 + $0x9e8] sm:$0xff] }
 0x3f4   :  { %v3693_v6 = vpop.f32.mrf.mxu1  ;;  %4494 = vmatmul.mubr.f32.gmra.mxu1 %v5600_v22  ;;  %4050 = vmatprep.mubr.f32.mxu0 %v5601_v45 }
 0x3f5   :  { %6805 = vst [vmem:[#allocation69_spill] sm:$0xff] %v6396_v36  ;;  %v6398_v5 = vadd.f32 %v3693_v6, %v3244_v30  ;;  %4499 = vmatprep.mubr.f32.mxu1 %v5602_v55  ;;  %v3246_v54 = vpop.f32.mrf.mxu0  ;;  %v5606_v6 = vld [vmem:[#allocation2 + $0x9f8] sm:$0xff] }
 0x3f6   :  { %v3695_v0 = vpop.f32.mrf.mxu1 }
 0x3f7   :  { %6806 = vst [vmem:[#allocation70_spill] sm:$0xff] %v6398_v5  ;;  %v6400_v13 = vadd.f32 %v3695_v0, %v3246_v54  ;;  %v3250_v8 = vpop.f32.mrf.mxu0  ;;  %4051 = vmatmul.mubr.f32.gmra.mxu0 %v5603_v3  ;;  %v5607_v54 = vld [vmem:[#allocation2 + $0x9e0] sm:$0xff]  ;;  %v5608_v0 = vld [vmem:[#allocation2 + $0x9f0] sm:$0xff]  ;;  %v5609_v3 = vld [vmem:[#allocation2 + $0xa28] sm:$0xff] }
 0x3f8   :  { %v3699_v61 = vpop.f32.mrf.mxu1  ;;  %4500 = vmatmul.mubr.f32.gmra.mxu1 %v5604_v47  ;;  %4056 = vmatprep.mubr.f32.mxu0 %v5605_v28 }
 0x3f9   :  { %6807 = vst [vmem:[#allocation71_spill] sm:$0xff] %v6400_v13  ;;  %v6402_v36 = vadd.f32 %v3699_v61, %v3250_v8  ;;  %4505 = vmatprep.mubr.f32.mxu1 %v5606_v6  ;;  %v3252_v30 = vpop.f32.mrf.mxu0  ;;  %v5610_v61 = vld [vmem:[#allocation2 + $0xa38] sm:$0xff] }
 0x3fa   :  { %v3701_v22 = vpop.f32.mrf.mxu1 }
 0x3fb   :  { %6808 = vst [vmem:[#allocation72_spill] sm:$0xff] %v6402_v36  ;;  %v6404_v45 = vadd.f32 %v3701_v22, %v3252_v30  ;;  %v3256_v55 = vpop.f32.mrf.mxu0  ;;  %4057 = vmatmul.mubr.f32.gmra.mxu0 %v5607_v54  ;;  %v5611_v30 = vld [vmem:[#allocation2 + $0xa20] sm:$0xff]  ;;  %v5612_v22 = vld [vmem:[#allocation2 + $0xa30] sm:$0xff]  ;;  %v5613_v54 = vld [vmem:[#allocation2 + $0xa68] sm:$0xff] }
 0x3fc   :  { %v3705_v5 = vpop.f32.mrf.mxu1  ;;  %4506 = vmatmul.mubr.f32.gmra.mxu1 %v5608_v0  ;;  %4062 = vmatprep.mubr.f32.mxu0 %v5609_v3 }
 0x3fd   :  { %6809 = vst [vmem:[#allocation73_spill] sm:$0xff] %v6404_v45  ;;  %v6406_v13 = vadd.f32 %v3705_v5, %v3256_v55  ;;  %4511 = vmatprep.mubr.f32.mxu1 %v5610_v61  ;;  %v3258_v8 = vpop.f32.mrf.mxu0  ;;  %v5614_v5 = vld [vmem:[#allocation2 + $0xa78] sm:$0xff] }
 0x3fe   :  { %v3707_v47 = vpop.f32.mrf.mxu1 }
 0x3ff   :  { %6810 = vst [vmem:[#allocation74_spill] sm:$0xff] %v6406_v13  ;;  %v6408_v28 = vadd.f32 %v3707_v47, %v3258_v8  ;;  %v3262_v6 = vpop.f32.mrf.mxu0  ;;  %4063 = vmatmul.mubr.f32.gmra.mxu0 %v5611_v30  ;;  %v5615_v8 = vld [vmem:[#allocation2 + $0xa60] sm:$0xff]  ;;  %v5616_v47 = vld [vmem:[#allocation2 + $0xa70] sm:$0xff]  ;;  %v5617_v30 = vld [vmem:[#allocation2 + $0xaa8] sm:$0xff] }
 0x400   :  { %v3711_v36 = vpop.f32.mrf.mxu1  ;;  %4512 = vmatmul.mubr.f32.gmra.mxu1 %v5612_v22  ;;  %4068 = vmatprep.mubr.f32.mxu0 %v5613_v54 }
 0x401   :  { %6811 = vst [vmem:[#allocation75_spill] sm:$0xff] %v6408_v28  ;;  %v6410_v45 = vadd.f32 %v3711_v36, %v3262_v6  ;;  %4517 = vmatprep.mubr.f32.mxu1 %v5614_v5  ;;  %v3264_v55 = vpop.f32.mrf.mxu0  ;;  %v5618_v36 = vld [vmem:[#allocation2 + $0xab8] sm:$0xff] }
 0x402   :  { %v3713_v0 = vpop.f32.mrf.mxu1 }
 0x403   :  { %6812 = vst [vmem:[#allocation76_spill] sm:$0xff] %v6410_v45  ;;  %v6412_v3 = vadd.f32 %v3713_v0, %v3264_v55  ;;  %v3268_v61 = vpop.f32.mrf.mxu0  ;;  %4069 = vmatmul.mubr.f32.gmra.mxu0 %v5615_v8  ;;  %v5619_v55 = vld [vmem:[#allocation2 + $0xaa0] sm:$0xff]  ;;  %v5620_v0 = vld [vmem:[#allocation2 + $0xab0] sm:$0xff]  ;;  %v5621_v8 = vld [vmem:[#allocation2 + $0xae8] sm:$0xff] }
 0x404   :  { %v3717_v13 = vpop.f32.mrf.mxu1  ;;  %4518 = vmatmul.mubr.f32.gmra.mxu1 %v5616_v47  ;;  %4074 = vmatprep.mubr.f32.mxu0 %v5617_v30 }
 0x405   :  { %6813 = vst [vmem:[#allocation77_spill] sm:$0xff] %v6412_v3  ;;  %v6414_v28 = vadd.f32 %v3717_v13, %v3268_v61  ;;  %4523 = vmatprep.mubr.f32.mxu1 %v5618_v36  ;;  %v3270_v6 = vpop.f32.mrf.mxu0  ;;  %v5622_v13 = vld [vmem:[#allocation2 + $0xaf8] sm:$0xff] }
 0x406   :  { %v3719_v22 = vpop.f32.mrf.mxu1 }
 0x407   :  { %6814 = vst [vmem:[#allocation78_spill] sm:$0xff] %v6414_v28  ;;  %v6416_v54 = vadd.f32 %v3719_v22, %v3270_v6  ;;  %v3274_v5 = vpop.f32.mrf.mxu0  ;;  %4075 = vmatmul.mubr.f32.gmra.mxu0 %v5619_v55  ;;  %v5623_v6 = vld [vmem:[#allocation2 + $0xae0] sm:$0xff]  ;;  %v5624_v22 = vld [vmem:[#allocation2 + $0xaf0] sm:$0xff]  ;;  %v5625_v55 = vld [vmem:[#allocation2 + $0xb28] sm:$0xff] }
 0x408   :  { %v3723_v45 = vpop.f32.mrf.mxu1  ;;  %4524 = vmatmul.mubr.f32.gmra.mxu1 %v5620_v0  ;;  %4080 = vmatprep.mubr.f32.mxu0 %v5621_v8 }
 0x409   :  { %6815 = vst [vmem:[#allocation79_spill] sm:$0xff] %v6416_v54  ;;  %v6418_v3 = vadd.f32 %v3723_v45, %v3274_v5  ;;  %4529 = vmatprep.mubr.f32.mxu1 %v5622_v13  ;;  %v3276_v61 = vpop.f32.mrf.mxu0  ;;  %v5626_v45 = vld [vmem:[#allocation2 + $0xb38] sm:$0xff] }
 0x40a   :  { %v3725_v47 = vpop.f32.mrf.mxu1 }
 0x40b   :  { %6816 = vst [vmem:[#allocation80_spill] sm:$0xff] %v6418_v3  ;;  %v6420_v30 = vadd.f32 %v3725_v47, %v3276_v61  ;;  %v3280_v36 = vpop.f32.mrf.mxu0  ;;  %4081 = vmatmul.mubr.f32.gmra.mxu0 %v5623_v6  ;;  %v5627_v61 = vld [vmem:[#allocation2 + $0xb20] sm:$0xff]  ;;  %v5628_v47 = vld [vmem:[#allocation2 + $0xb30] sm:$0xff]  ;;  %v5629_v6 = vld [vmem:[#allocation2 + $0xb68] sm:$0xff] }
 0x40c   :  { %v3729_v28 = vpop.f32.mrf.mxu1  ;;  %4530 = vmatmul.mubr.f32.gmra.mxu1 %v5624_v22  ;;  %4086 = vmatprep.mubr.f32.mxu0 %v5625_v55 }
 0x40d   :  { %6817 = vst [vmem:[#allocation81_spill] sm:$0xff] %v6420_v30  ;;  %v6422_v54 = vadd.f32 %v3729_v28, %v3280_v36  ;;  %4535 = vmatprep.mubr.f32.mxu1 %v5626_v45  ;;  %v3282_v5 = vpop.f32.mrf.mxu0  ;;  %v5630_v28 = vld [vmem:[#allocation2 + $0xb78] sm:$0xff] }
 0x40e   :  { %v3731_v0 = vpop.f32.mrf.mxu1 }
 0x40f   :  { %6818 = vst [vmem:[#allocation82_spill] sm:$0xff] %v6422_v54  ;;  %v6424_v8 = vadd.f32 %v3731_v0, %v3282_v5  ;;  %v3286_v13 = vpop.f32.mrf.mxu0  ;;  %4087 = vmatmul.mubr.f32.gmra.mxu0 %v5627_v61  ;;  %v5631_v5 = vld [vmem:[#allocation2 + $0xb60] sm:$0xff]  ;;  %v5632_v0 = vld [vmem:[#allocation2 + $0xb70] sm:$0xff]  ;;  %v5633_v61 = vld [vmem:[#allocation2 + $0xba8] sm:$0xff] }
 0x410   :  { %v3735_v3 = vpop.f32.mrf.mxu1  ;;  %4536 = vmatmul.mubr.f32.gmra.mxu1 %v5628_v47  ;;  %4092 = vmatprep.mubr.f32.mxu0 %v5629_v6 }
 0x411   :  { %6819 = vst [vmem:[#allocation83_spill] sm:$0xff] %v6424_v8  ;;  %v6426_v30 = vadd.f32 %v3735_v3, %v3286_v13  ;;  %4541 = vmatprep.mubr.f32.mxu1 %v5630_v28  ;;  %v3288_v36 = vpop.f32.mrf.mxu0  ;;  %v5634_v3 = vld [vmem:[#allocation2 + $0xbb8] sm:$0xff] }
 0x412   :  { %v3737_v22 = vpop.f32.mrf.mxu1 }
 0x413   :  { %6820 = vst [vmem:[#allocation84_spill] sm:$0xff] %v6426_v30  ;;  %v6428_v55 = vadd.f32 %v3737_v22, %v3288_v36  ;;  %v3292_v45 = vpop.f32.mrf.mxu0  ;;  %4093 = vmatmul.mubr.f32.gmra.mxu0 %v5631_v5  ;;  %v5635_v36 = vld [vmem:[#allocation2 + $0xba0] sm:$0xff]  ;;  %v5636_v22 = vld [vmem:[#allocation2 + $0xbb0] sm:$0xff]  ;;  %v5637_v5 = vld [vmem:[#allocation2 + $0xbe8] sm:$0xff] }
 0x414   :  { %v3741_v54 = vpop.f32.mrf.mxu1  ;;  %4542 = vmatmul.mubr.f32.gmra.mxu1 %v5632_v0  ;;  %4098 = vmatprep.mubr.f32.mxu0 %v5633_v61 }
 0x415   :  { %6821 = vst [vmem:[#allocation85_spill] sm:$0xff] %v6428_v55  ;;  %v6430_v8 = vadd.f32 %v3741_v54, %v3292_v45  ;;  %4547 = vmatprep.mubr.f32.mxu1 %v5634_v3  ;;  %v3294_v13 = vpop.f32.mrf.mxu0  ;;  %v5638_v54 = vld [vmem:[#allocation2 + $0xbf8] sm:$0xff] }
 0x416   :  { %v3743_v47 = vpop.f32.mrf.mxu1 }
 0x417   :  { %6822 = vst [vmem:[#allocation86_spill] sm:$0xff] %v6430_v8  ;;  %v6432_v6 = vadd.f32 %v3743_v47, %v3294_v13  ;;  %v3298_v28 = vpop.f32.mrf.mxu0  ;;  %4099 = vmatmul.mubr.f32.gmra.mxu0 %v5635_v36  ;;  %v5639_v13 = vld [vmem:[#allocation2 + $0xbe0] sm:$0xff]  ;;  %v5640_v47 = vld [vmem:[#allocation2 + $0xbf0] sm:$0xff]  ;;  %v5641_v36 = vld [vmem:[#allocation2 + $0xc28] sm:$0xff] }
 0x418   :  { %v3747_v30 = vpop.f32.mrf.mxu1  ;;  %4548 = vmatmul.mubr.f32.gmra.mxu1 %v5636_v22  ;;  %4104 = vmatprep.mubr.f32.mxu0 %v5637_v5 }
 0x419   :  { %6823 = vst [vmem:[#allocation87_spill] sm:$0xff] %v6432_v6  ;;  %v6434_v55 = vadd.f32 %v3747_v30, %v3298_v28  ;;  %4553 = vmatprep.mubr.f32.mxu1 %v5638_v54  ;;  %v3300_v45 = vpop.f32.mrf.mxu0  ;;  %v5642_v30 = vld [vmem:[#allocation2 + $0xc38] sm:$0xff] }
 0x41a   :  { %v3749_v0 = vpop.f32.mrf.mxu1 }
 0x41b   :  { %6824 = vst [vmem:[#allocation88_spill] sm:$0xff] %v6434_v55  ;;  %v6436_v61 = vadd.f32 %v3749_v0, %v3300_v45  ;;  %v3304_v3 = vpop.f32.mrf.mxu0  ;;  %4105 = vmatmul.mubr.f32.gmra.mxu0 %v5639_v13  ;;  %v5643_v55 = vld [vmem:[#allocation2 + $0xc20] sm:$0xff]  ;;  %v5644_v0 = vld [vmem:[#allocation2 + $0xc30] sm:$0xff] }
 0x41c   :  { %v3753_v8 = vpop.f32.mrf.mxu1  ;;  %4554 = vmatmul.mubr.f32.gmra.mxu1 %v5640_v47  ;;  %4110 = vmatprep.mubr.f32.mxu0 %v5641_v36 }
 0x41d   :  { %6825 = vst [vmem:[#allocation89_spill] sm:$0xff] %v6436_v61  ;;  %v6438_v6 = vadd.f32 %v3753_v8, %v3304_v3  ;;  %4559 = vmatprep.mubr.f32.mxu1 %v5642_v30  ;;  %v3306_v28 = vpop.f32.mrf.mxu0  ;;  %v5645_v61 = vld [vmem:[#allocation2 + $0xc68] sm:$0xff]  ;;  %v5646_v8 = vld [vmem:[#allocation2 + $0xc78] sm:$0xff] }
 0x41e   :  { %v3755_v22 = vpop.f32.mrf.mxu1 }
 0x41f   :  { %6826 = vst [vmem:[#allocation90_spill] sm:$0xff] %v6438_v6  ;;  %v6440_v5 = vadd.f32 %v3755_v22, %v3306_v28  ;;  %v3824_v54 = vpop.f32.mrf.mxu0  ;;  %4111 = vmatmul.mubr.f32.gmra.mxu0 %v5643_v55  ;;  %v5647_v28 = vld [vmem:[#allocation2 + $0xc60] sm:$0xff] }
 0x420   :  { %v4273_v45 = vpop.f32.mrf.mxu1  ;;  %4560 = vmatmul.mubr.f32.gmra.mxu1 %v5644_v0  ;;  %v3825_v13 = vadd.f32 %v3824_v54, %v6186_v4  ;;  %4116 = vmatprep.mubr.f32.mxu0 %v5645_v61  ;;  %v5649_v4 = vld [vmem:[#allocation2 + $0xca8] sm:$0xff]  ;;  %v5650_v61 = vld [vmem:[#allocation2 + $0xcb8] sm:$0xff] }
 0x421   :  { %6827 = vst [vmem:[#allocation91_spill] sm:$0xff] %v6440_v5  ;;  %4565 = vmatprep.mubr.f32.mxu1 %v5646_v8  ;;  %v3826_v3 = vpop.f32.mrf.mxu0  ;;  %v5648_v5 = vld [vmem:[#allocation2 + $0xc70] sm:$0xff] }
 0x422   :  { %v4275_v47 = vpop.f32.mrf.mxu1  ;;  %v4274_v36 = vadd.f32 %v4273_v45, %v3825_v13  ;;  %v3827_v30 = vadd.f32 %v3826_v3, %v6188_v56 }
 0x423   :  { %v3830_v6 = vpop.f32.mrf.mxu0  ;;  %4117 = vmatmul.mubr.f32.gmra.mxu0 %v5647_v28  ;;  %v5651_v28 = vld [vmem:[#allocation2 + $0xca0] sm:$0xff] }
 0x424   :  { %v4279_v22 = vpop.f32.mrf.mxu1  ;;  %4566 = vmatmul.mubr.f32.gmra.mxu1 %v5648_v5  ;;  %v4658_v55 = vmul.f32 2.0, %v4274_v36  ;;  %v4276_v33 = vadd.f32 %v4275_v47, %v3827_v30  ;;  %v3831_v0 = vadd.f32 %v3830_v6, %v6190_v15  ;;  %4122 = vmatprep.mubr.f32.mxu0 %v5649_v4  ;;  %v5652_v5 = vld [vmem:[#allocation2 + $0xcb0] sm:$0xff]  ;;  %v5653_v36 = vld [vmem:[#allocation2 + $0xce8] sm:$0xff]  ;;  %v5654_v30 = vld [vmem:[#allocation2 + $0xcf8] sm:$0xff] }
 0x425   :  { %4571 = vmatprep.mubr.f32.mxu1 %v5650_v61  ;;  %v3832_v54 = vpop.f32.mrf.mxu0  ;;  %v5655_v61 = vld [vmem:[#allocation2 + $0xce0] sm:$0xff] }
 0x426   :  { %v4281_v8 = vpop.f32.mrf.mxu1  ;;  %4914 = vst [vmem:[#allocation7 + $0x10] sm:$0xff] %v4658_v55  ;;  %v4659_v45 = vmul.f32 2.0, %v4276_v33  ;;  %v4280_v13 = vadd.f32 %v4279_v22, %v3831_v0  ;;  %v3833_v56 = vadd.f32 %v3832_v54, %v6192_v12 }
 0x427   :  { %v3836_v3 = vpop.f32.mrf.mxu0  ;;  %4123 = vmatmul.mubr.f32.gmra.mxu0 %v5651_v28 }
 0x428   :  { %v4285_v46 = vpop.f32.mrf.mxu1  ;;  %4572 = vmatmul.mubr.f32.gmra.mxu1 %v5652_v5  ;;  %4915 = vst [vmem:[#allocation7 + $0x18] sm:$0xff] %v4659_v45  ;;  %v4662_v47 = vmul.f32 2.0, %v4280_v13  ;;  %v4282_v15 = vadd.f32 %v4281_v8, %v3833_v56  ;;  %v3837_v6 = vadd.f32 %v3836_v3, %v6194_v44  ;;  %4128 = vmatprep.mubr.f32.mxu0 %v5653_v36  ;;  %v5656_v45 = vld [vmem:[#allocation2 + $0xcf0] sm:$0xff]  ;;  %v5657_v56 = vld [vmem:[#allocation2 + $0xd28] sm:$0xff]  ;;  %v5658_v3 = vld [vmem:[#allocation2 + $0xd38] sm:$0xff] }
 0x429   :  { %4577 = vmatprep.mubr.f32.mxu1 %v5654_v30  ;;  %v3838_v55 = vpop.f32.mrf.mxu0  ;;  %v5660_v30 = vld [vmem:[#allocation2 + $0xd30] sm:$0xff] }
 0x42a   :  { %v4287_v33 = vpop.f32.mrf.mxu1  ;;  %4918 = vst [vmem:[#allocation7 + $0x30] sm:$0xff] %v4662_v47  ;;  %v4663_v22 = vmul.f32 2.0, %v4282_v15  ;;  %v4286_v12 = vadd.f32 %v4285_v46, %v3837_v6  ;;  %v3839_v0 = vadd.f32 %v3838_v55, %v6196_v50  ;;  %v5659_v6 = vld [vmem:[#allocation2 + $0xd20] sm:$0xff] }
 0x42b   :  { %v3842_v4 = vpop.f32.mrf.mxu0  ;;  %4129 = vmatmul.mubr.f32.gmra.mxu0 %v5655_v61 }
 0x42c   :  { %v4291_v54 = vpop.f32.mrf.mxu1  ;;  %4578 = vmatmul.mubr.f32.gmra.mxu1 %v5656_v45  ;;  %4919 = vst [vmem:[#allocation7 + $0x38] sm:$0xff] %v4663_v22  ;;  %v4666_v8 = vmul.f32 2.0, %v4286_v12  ;;  %v4288_v44 = vadd.f32 %v4287_v33, %v3839_v0  ;;  %v3843_v13 = vadd.f32 %v3842_v4, %v6198_v29  ;;  %4134 = vmatprep.mubr.f32.mxu0 %v5657_v56  ;;  %v5661_v22 = vld [vmem:[#allocation2 + $0xd68] sm:$0xff]  ;;  %v5662_v12 = vld [vmem:[#allocation2 + $0xd78] sm:$0xff] }
 0x42d   :  { %4583 = vmatprep.mubr.f32.mxu1 %v5658_v3  ;;  %v3844_v28 = vpop.f32.mrf.mxu0 }
 0x42e   :  { %v4293_v5 = vpop.f32.mrf.mxu1  ;;  %4922 = vst [vmem:[#allocation7 + $0x50] sm:$0xff] %v4666_v8  ;;  %v4667_v46 = vmul.f32 2.0, %v4288_v44  ;;  %v4292_v50 = vadd.f32 %v4291_v54, %v3843_v13  ;;  %v3845_v47 = vadd.f32 %v3844_v28, %v6200_v52  ;;  %v5663_v8 = vld [vmem:[#allocation2 + $0xd60] sm:$0xff]  ;;  %v5664_v13 = vld [vmem:[#allocation2 + $0xd70] sm:$0xff]  ;;  %v5665_v28 = vld [vmem:[#allocation2 + $0xda8] sm:$0xff] }
 0x42f   :  { %v3848_v15 = vpop.f32.mrf.mxu0  ;;  %4135 = vmatmul.mubr.f32.gmra.mxu0 %v5659_v6 }
 0x430   :  { %v4297_v36 = vpop.f32.mrf.mxu1  ;;  %4584 = vmatmul.mubr.f32.gmra.mxu1 %v5660_v30  ;;  %4923 = vst [vmem:[#allocation7 + $0x58] sm:$0xff] %v4667_v46  ;;  %v4670_v55 = vmul.f32 2.0, %v4292_v50  ;;  %v4294_v29 = vadd.f32 %v4293_v5, %v3845_v47  ;;  %v3849_v33 = vadd.f32 %v3848_v15, %v6202_v18  ;;  %4140 = vmatprep.mubr.f32.mxu0 %v5661_v22  ;;  %v5666_v5 = vld [vmem:[#allocation2 + $0xdb8] sm:$0xff]  ;;  %v5669_v22 = vld [vmem:[#allocation2 + $0xde8] sm:$0xff] }
 0x431   :  { %4589 = vmatprep.mubr.f32.mxu1 %v5662_v12  ;;  %v3850_v0 = vpop.f32.mrf.mxu0  ;;  %v5670_v12 = vld [vmem:[#allocation2 + $0xdf8] sm:$0xff] }
 0x432   :  { %v4299_v4 = vpop.f32.mrf.mxu1  ;;  %4926 = vst [vmem:[#allocation7 + $0x70] sm:$0xff] %v4670_v55  ;;  %v4671_v61 = vmul.f32 2.0, %v4294_v29  ;;  %v4298_v52 = vadd.f32 %v4297_v36, %v3849_v33  ;;  %v3851_v54 = vadd.f32 %v3850_v0, %v6204_v38  ;;  %v5667_v36 = vld [vmem:[#allocation2 + $0xda0] sm:$0xff]  ;;  %v5668_v55 = vld [vmem:[#allocation2 + $0xdb0] sm:$0xff] }
 0x433   :  { %v3854_v45 = vpop.f32.mrf.mxu0  ;;  %4141 = vmatmul.mubr.f32.gmra.mxu0 %v5663_v8 }
 0x434   :  { %v4303_v44 = vpop.f32.mrf.mxu1  ;;  %4590 = vmatmul.mubr.f32.gmra.mxu1 %v5664_v13  ;;  %4927 = vst [vmem:[#allocation7 + $0x78] sm:$0xff] %v4671_v61  ;;  %v4674_v56 = vmul.f32 2.0, %v4298_v52  ;;  %v4300_v18 = vadd.f32 %v4299_v4, %v3851_v54  ;;  %v3855_v3 = vadd.f32 %v3854_v45, %v6206_v7  ;;  %4146 = vmatprep.mubr.f32.mxu0 %v5665_v28  ;;  %v5671_v45 = vld [vmem:[#allocation2 + $0xde0] sm:$0xff] }
 0x435   :  { %4595 = vmatprep.mubr.f32.mxu1 %v5666_v5  ;;  %v3856_v46 = vpop.f32.mrf.mxu0 }
 0x436   :  { %v4305_v50 = vpop.f32.mrf.mxu1  ;;  %4930 = vst [vmem:[#allocation7 + $0x90] sm:$0xff] %v4674_v56  ;;  %v4675_v47 = vmul.f32 2.0, %v4300_v18  ;;  %v4304_v38 = vadd.f32 %v4303_v44, %v3855_v3  ;;  %v3857_v15 = vadd.f32 %v3856_v46, %v6208_v58  ;;  %v5672_v44 = vld [vmem:[#allocation2 + $0xdf0] sm:$0xff]  ;;  %v5673_v18 = vld [vmem:[#allocation2 + $0xe28] sm:$0xff]  ;;  %v5674_v3 = vld [vmem:[#allocation2 + $0xe38] sm:$0xff] }
 0x437   :  { %v3860_v6 = vpop.f32.mrf.mxu0  ;;  %4147 = vmatmul.mubr.f32.gmra.mxu0 %v5667_v36 }
 0x438   :  { %v4309_v30 = vpop.f32.mrf.mxu1  ;;  %4596 = vmatmul.mubr.f32.gmra.mxu1 %v5668_v55  ;;  %4931 = vst [vmem:[#allocation7 + $0x98] sm:$0xff] %v4675_v47  ;;  %v4678_v29 = vmul.f32 2.0, %v4304_v38  ;;  %v4306_v7 = vadd.f32 %v4305_v50, %v3857_v15  ;;  %v3861_v33 = vadd.f32 %v3860_v6, %v6210_v53  ;;  %4152 = vmatprep.mubr.f32.mxu0 %v5669_v22  ;;  %v5675_v38 = vld [vmem:[#allocation2 + $0xe20] sm:$0xff]  ;;  %v5676_v6 = vld [vmem:[#allocation2 + $0xe30] sm:$0xff]  ;;  %v5677_v55 = vld [vmem:[#allocation2 + $0xe68] sm:$0xff] }
 0x439   :  { %4601 = vmatprep.mubr.f32.mxu1 %v5670_v12  ;;  %v3862_v0 = vpop.f32.mrf.mxu0 }
 0x43a   :  { %v4311_v4 = vpop.f32.mrf.mxu1  ;;  %4934 = vst [vmem:[#allocation7 + $0xb0] sm:$0xff] %v4678_v29  ;;  %v4679_v61 = vmul.f32 2.0, %v4306_v7  ;;  %v4310_v58 = vadd.f32 %v4309_v30, %v3861_v33  ;;  %v3863_v52 = vadd.f32 %v3862_v0, %v6212_v31  ;;  %v5678_v29 = vld [vmem:[#allocation2 + $0xe78] sm:$0xff] }
 0x43b   :  { %v3866_v54 = vpop.f32.mrf.mxu0  ;;  %4153 = vmatmul.mubr.f32.gmra.mxu0 %v5671_v45  ;;  %v5681_v45 = vld [vmem:[#allocation2 + $0xea8] sm:$0xff] }
 0x43c   :  { %v4315_v8 = vpop.f32.mrf.mxu1  ;;  %4602 = vmatmul.mubr.f32.gmra.mxu1 %v5672_v44  ;;  %4935 = vst [vmem:[#allocation7 + $0xb8] sm:$0xff] %v4679_v61  ;;  %v4682_v13 = vmul.f32 2.0, %v4310_v58  ;;  %v4312_v53 = vadd.f32 %v4311_v4, %v3863_v52  ;;  %v3867_v56 = vadd.f32 %v3866_v54, %v6214_v62  ;;  %4158 = vmatprep.mubr.f32.mxu0 %v5673_v18  ;;  %v5679_v4 = vld [vmem:[#allocation2 + $0xe60] sm:$0xff]  ;;  %v5680_v58 = vld [vmem:[#allocation2 + $0xe70] sm:$0xff] }
 0x43d   :  { %4607 = vmatprep.mubr.f32.mxu1 %v5674_v3  ;;  %v3868_v28 = vpop.f32.mrf.mxu0  ;;  %v5683_v3 = vld [vmem:[#allocation2 + $0xea0] sm:$0xff] }
 0x43e   :  { %v4317_v5 = vpop.f32.mrf.mxu1  ;;  %4938 = vst [vmem:[#allocation7 + $0xd0] sm:$0xff] %v4682_v13  ;;  %v4683_v46 = vmul.f32 2.0, %v4312_v53  ;;  %v4316_v31 = vadd.f32 %v4315_v8, %v3867_v56  ;;  %v3869_v50 = vadd.f32 %v3868_v28, %v6216_v39  ;;  %v5682_v8 = vld [vmem:[#allocation2 + $0xeb8] sm:$0xff] }
 0x43f   :  { %v3872_v47 = vpop.f32.mrf.mxu0  ;;  %4159 = vmatmul.mubr.f32.gmra.mxu0 %v5675_v38 }
 0x440   :  { %v4321_v15 = vpop.f32.mrf.mxu1  ;;  %4608 = vmatmul.mubr.f32.gmra.mxu1 %v5676_v6  ;;  %4939 = vst [vmem:[#allocation7 + $0xd8] sm:$0xff] %v4683_v46  ;;  %v4686_v36 = vmul.f32 2.0, %v4316_v31  ;;  %v4318_v62 = vadd.f32 %v4317_v5, %v3869_v50  ;;  %v3873_v30 = vadd.f32 %v3872_v47, %v6218_v10  ;;  %4164 = vmatprep.mubr.f32.mxu0 %v5677_v55  ;;  %v5684_v5 = vld [vmem:[#allocation2 + $0xeb0] sm:$0xff]  ;;  %v5685_v50 = vld [vmem:[#allocation2 + $0xee8] sm:$0xff]  ;;  %v5686_v47 = vld [vmem:[#allocation2 + $0xef8] sm:$0xff] }
 0x441   :  { %4613 = vmatprep.mubr.f32.mxu1 %v5678_v29  ;;  %v3874_v7 = vpop.f32.mrf.mxu0  ;;  %v5688_v29 = vld [vmem:[#allocation2 + $0xef0] sm:$0xff] }
 0x442   :  { %v4323_v33 = vpop.f32.mrf.mxu1  ;;  %4942 = vst [vmem:[#allocation7 + $0xf0] sm:$0xff] %v4686_v36  ;;  %v4687_v22 = vmul.f32 2.0, %v4318_v62  ;;  %v4322_v39 = vadd.f32 %v4321_v15, %v3873_v30  ;;  %v3875_v12 = vadd.f32 %v3874_v7, %v6220_v2  ;;  %v5687_v30 = vld [vmem:[#allocation2 + $0xee0] sm:$0xff] }
 0x443   :  { %v3878_v0 = vpop.f32.mrf.mxu0  ;;  %4165 = vmatmul.mubr.f32.gmra.mxu0 %v5679_v4 }
 0x444   :  { %v4327_v61 = vpop.f32.mrf.mxu1  ;;  %4614 = vmatmul.mubr.f32.gmra.mxu1 %v5680_v58  ;;  %4943 = vst [vmem:[#allocation7 + $0xf8] sm:$0xff] %v4687_v22  ;;  %v4690_v52 = vmul.f32 2.0, %v4322_v39  ;;  %v4324_v10 = vadd.f32 %v4323_v33, %v3875_v12  ;;  %v3879_v54 = vadd.f32 %v3878_v0, %v6222_v41  ;;  %4170 = vmatprep.mubr.f32.mxu0 %v5681_v45  ;;  %v5689_v22 = vld [vmem:[#allocation2 + $0xf28] sm:$0xff]  ;;  %v5690_v39 = vld [vmem:[#allocation2 + $0xf38] sm:$0xff] }
 0x445   :  { %4619 = vmatprep.mubr.f32.mxu1 %v5682_v8  ;;  %v3880_v44 = vpop.f32.mrf.mxu0 }
 0x446   :  { %v4329_v13 = vpop.f32.mrf.mxu1  ;;  %4946 = vst [vmem:[#allocation7 + $0x110] sm:$0xff] %v4690_v52  ;;  %v4691_v53 = vmul.f32 2.0, %v4324_v10  ;;  %v4328_v2 = vadd.f32 %v4327_v61, %v3879_v54  ;;  %v3881_v56 = vadd.f32 %v3880_v44, %v6224_v24  ;;  %v5691_v52 = vld [vmem:[#allocation2 + $0xf20] sm:$0xff]  ;;  %v5692_v54 = vld [vmem:[#allocation2 + $0xf30] sm:$0xff]  ;;  %v5693_v44 = vld [vmem:[#allocation2 + $0xf68] sm:$0xff] }
 0x447   :  { %v3884_v18 = vpop.f32.mrf.mxu0  ;;  %4171 = vmatmul.mubr.f32.gmra.mxu0 %v5683_v3 }
 0x448   :  { %v4333_v28 = vpop.f32.mrf.mxu1  ;;  %4620 = vmatmul.mubr.f32.gmra.mxu1 %v5684_v5  ;;  %4947 = vst [vmem:[#allocation7 + $0x118] sm:$0xff] %v4691_v53  ;;  %v4694_v46 = vmul.f32 2.0, %v4328_v2  ;;  %v4330_v41 = vadd.f32 %v4329_v13, %v3881_v56  ;;  %v3885_v31 = vadd.f32 %v3884_v18, %v6226_v42  ;;  %4176 = vmatprep.mubr.f32.mxu0 %v5685_v50  ;;  %v5694_v13 = vld [vmem:[#allocation2 + $0xf78] sm:$0xff]  ;;  %v5697_v50 = vld [vmem:[#allocation2 + $0xfa8] sm:$0xff] }
 0x449   :  { %4625 = vmatprep.mubr.f32.mxu1 %v5686_v47  ;;  %v3886_v38 = vpop.f32.mrf.mxu0  ;;  %v5698_v47 = vld [vmem:[#allocation2 + $0xfb8] sm:$0xff] }
 0x44a   :  { %v4335_v15 = vpop.f32.mrf.mxu1  ;;  %4950 = vst [vmem:[#allocation7 + $0x130] sm:$0xff] %v4694_v46  ;;  %v4695_v6 = vmul.f32 2.0, %v4330_v41  ;;  %v4334_v24 = vadd.f32 %v4333_v28, %v3885_v31  ;;  %v3887_v36 = vadd.f32 %v3886_v38, %v6228_v49  ;;  %v5695_v28 = vld [vmem:[#allocation2 + $0xf60] sm:$0xff]  ;;  %v5696_v46 = vld [vmem:[#allocation2 + $0xf70] sm:$0xff] }
 0x44b   :  { %v3890_v62 = vpop.f32.mrf.mxu0  ;;  %4177 = vmatmul.mubr.f32.gmra.mxu0 %v5687_v30 }
 0x44c   :  { %v4339_v55 = vpop.f32.mrf.mxu1  ;;  %4626 = vmatmul.mubr.f32.gmra.mxu1 %v5688_v29  ;;  %4951 = vst [vmem:[#allocation7 + $0x138] sm:$0xff] %v4695_v6  ;;  %v4698_v7 = vmul.f32 2.0, %v4334_v24  ;;  %v4336_v42 = vadd.f32 %v4335_v15, %v3887_v36  ;;  %v3891_v33 = vadd.f32 %v3890_v62, %v6230_v63  ;;  %4182 = vmatprep.mubr.f32.mxu0 %v5689_v22  ;;  %v5699_v62 = vld [vmem:[#allocation2 + $0xfa0] sm:$0xff] }
 0x44d   :  { %4631 = vmatprep.mubr.f32.mxu1 %v5690_v39  ;;  %v3892_v12 = vpop.f32.mrf.mxu0 }
 0x44e   :  { %v4341_v0 = vpop.f32.mrf.mxu1  ;;  %4954 = vst [vmem:[#allocation7 + $0x150] sm:$0xff] %v4698_v7  ;;  %v4699_v4 = vmul.f32 2.0, %v4336_v42  ;;  %v4340_v49 = vadd.f32 %v4339_v55, %v3891_v33  ;;  %v3893_v61 = vadd.f32 %v3892_v12, %v6232_v21  ;;  %v5700_v55 = vld [vmem:[#allocation2 + $0xfb0] sm:$0xff]  ;;  %v5701_v42 = vld [vmem:[#allocation2 + $0xfe8] sm:$0xff]  ;;  %v5702_v33 = vld [vmem:[#allocation2 + $0xff8] sm:$0xff] }
 0x44f   :  { %v3896_v58 = vpop.f32.mrf.mxu0  ;;  %4183 = vmatmul.mubr.f32.gmra.mxu0 %v5691_v52 }
 0x450   :  { %v4345_v10 = vpop.f32.mrf.mxu1  ;;  %4632 = vmatmul.mubr.f32.gmra.mxu1 %v5692_v54  ;;  %4955 = vst [vmem:[#allocation7 + $0x158] sm:$0xff] %v4699_v4  ;;  %v4702_v45 = vmul.f32 2.0, %v4340_v49  ;;  %v4342_v63 = vadd.f32 %v4341_v0, %v3893_v61  ;;  %v3897_v8 = vadd.f32 %v3896_v58, %v6234_v35  ;;  %4188 = vmatprep.mubr.f32.mxu0 %v5693_v44  ;;  %v5703_v49 = vld [vmem:[#allocation2 + $0xfe0] sm:$0xff]  ;;  %v5704_v58 = vld [vmem:[#allocation2 + $0xff0] sm:$0xff] }
 0x451   :  { %4637 = vmatprep.mubr.f32.mxu1 %v5694_v13  ;;  %v3898_v53 = vpop.f32.mrf.mxu0 }
 0x452   :  { %v4347_v2 = vpop.f32.mrf.mxu1  ;;  %4958 = vst [vmem:[#allocation7 + $0x170] sm:$0xff] %v4702_v45  ;;  %v4703_v56 = vmul.f32 2.0, %v4342_v63  ;;  %v4346_v21 = vadd.f32 %v4345_v10, %v3897_v8  ;;  %v3899_v18 = vadd.f32 %v3898_v53, %v6236_v9 }
 0x453   :  { %v3902_v3 = vpop.f32.mrf.mxu0  ;;  %4189 = vmatmul.mubr.f32.gmra.mxu0 %v5695_v28 }
 0x454   :  { %v4351_v5 = vpop.f32.mrf.mxu1  ;;  %4638 = vmatmul.mubr.f32.gmra.mxu1 %v5696_v46  ;;  %4959 = vst [vmem:[#allocation7 + $0x178] sm:$0xff] %v4703_v56  ;;  %v4706_v41 = vmul.f32 2.0, %v4346_v21  ;;  %v4348_v35 = vadd.f32 %v4347_v2, %v3899_v18  ;;  %v3903_v31 = vadd.f32 %v3902_v3, %v6238_v25  ;;  %4194 = vmatprep.mubr.f32.mxu0 %v5697_v50 }
 0x455   :  { %4643 = vmatprep.mubr.f32.mxu1 %v5698_v47  ;;  %v3904_v38 = vpop.f32.mrf.mxu0 }
 0x456   :  { %v4353_v15 = vpop.f32.mrf.mxu1  ;;  %4962 = vst [vmem:[#allocation7 + $0x190] sm:$0xff] %v4706_v41  ;;  %v4707_v6 = vmul.f32 2.0, %v4348_v35  ;;  %v4352_v9 = vadd.f32 %v4351_v5, %v3903_v31  ;;  %v3905_v24 = vadd.f32 %v3904_v38, %v6240_v32 }
 0x457   :  { %v3908_v36 = vpop.f32.mrf.mxu0  ;;  %4195 = vmatmul.mubr.f32.gmra.mxu0 %v5699_v62 }
 0x458   :  { %v4357_v30 = vpop.f32.mrf.mxu1  ;;  %4644 = vmatmul.mubr.f32.gmra.mxu1 %v5700_v55  ;;  %4963 = vst [vmem:[#allocation7 + $0x198] sm:$0xff] %v4707_v6  ;;  %v4710_v29 = vmul.f32 2.0, %v4352_v9  ;;  %v4354_v25 = vadd.f32 %v4353_v15, %v3905_v24  ;;  %v3909_v7 = vadd.f32 %v3908_v36, %v6242_v17  ;;  %4200 = vmatprep.mubr.f32.mxu0 %v5701_v42 }
 0x459   :  { %4649 = vmatprep.mubr.f32.mxu1 %v5702_v33  ;;  %v3910_v22 = vpop.f32.mrf.mxu0 }
 0x45a   :  { %v4359_v39 = vpop.f32.mrf.mxu1  ;;  %4966 = vst [vmem:[#allocation7 + $0x1b0] sm:$0xff] %v4710_v29  ;;  %v4711_v12 = vmul.f32 2.0, %v4354_v25  ;;  %v4358_v32 = vadd.f32 %v4357_v30, %v3909_v7  ;;  %v3911_v0 = vadd.f32 %v3910_v22, %v6244_v37 }
 0x45b   :  { %v3914_v4 = vpop.f32.mrf.mxu0  ;;  %4201 = vmatmul.mubr.f32.gmra.mxu0 %v5703_v49 }
 0x45c   :  { %v4363_v61 = vpop.f32.mrf.mxu1  ;;  %4650 = vmatmul.mubr.f32.gmra.mxu1 %v5704_v58  ;;  %4967 = vst [vmem:[#allocation7 + $0x1b8] sm:$0xff] %v4711_v12  ;;  %v4714_v52 = vmul.f32 2.0, %v4358_v32  ;;  %v4360_v17 = vadd.f32 %v4359_v39, %v3911_v0  ;;  %v3915_v10 = vadd.f32 %v3914_v4, %v6246_v26 }
 0x45d   :  { %v3916_v54 = vpop.f32.mrf.mxu0 }
 0x45e   :  { %v4365_v45 = vpop.f32.mrf.mxu1  ;;  %4970 = vst [vmem:[#allocation7 + $0x1d0] sm:$0xff] %v4714_v52  ;;  %v4715_v63 = vmul.f32 2.0, %v4360_v17  ;;  %v4364_v8 = vadd.f32 %v4363_v61, %v3915_v10  ;;  %v3917_v44 = vadd.f32 %v3916_v54, %v6248_v11 }
 0x45f   :  { %v3920_v13 = vpop.f32.mrf.mxu0 }
 0x460   :  { %v4369_v37 = vpop.f32.mrf.mxu1  ;;  %4971 = vst [vmem:[#allocation7 + $0x1d8] sm:$0xff] %v4715_v63  ;;  %v4718_v53 = vmul.f32 2.0, %v4364_v8  ;;  %v4366_v2 = vadd.f32 %v4365_v45, %v3917_v44  ;;  %v3921_v56 = vadd.f32 %v3920_v13, %v6250_v27 }
 0x461   :  { %v3922_v21 = vpop.f32.mrf.mxu0 }
 0x462   :  { %v4371_v18 = vpop.f32.mrf.mxu1  ;;  %4974 = vst [vmem:[#allocation7 + $0x1f0] sm:$0xff] %v4718_v53  ;;  %v4719_v3 = vmul.f32 2.0, %v4366_v2  ;;  %v4370_v28 = vadd.f32 %v4369_v37, %v3921_v56  ;;  %v3923_v26 = vadd.f32 %v3922_v21, %v6252_v51 }
 0x463   :  { %v3926_v5 = vpop.f32.mrf.mxu0 }
 0x464   :  { %v4375_v46 = vpop.f32.mrf.mxu1  ;;  %4975 = vst [vmem:[#allocation7 + $0x1f8] sm:$0xff] %v4719_v3  ;;  %v4722_v41 = vmul.f32 2.0, %v4370_v28  ;;  %v4372_v35 = vadd.f32 %v4371_v18, %v3923_v26  ;;  %v3927_v11 = vadd.f32 %v3926_v5, %v6254_v16 }
 0x465   :  { %v3928_v31 = vpop.f32.mrf.mxu0 }
 0x466   :  { %v4377_v50 = vpop.f32.mrf.mxu1  ;;  %4978 = vst [vmem:[#allocation7 + $0x210] sm:$0xff] %v4722_v41  ;;  %v4723_v47 = vmul.f32 2.0, %v4372_v35  ;;  %v4376_v38 = vadd.f32 %v4375_v46, %v3927_v11  ;;  %v3929_v27 = vadd.f32 %v3928_v31, %v6256_v48 }
 0x467   :  { %v3932_v15 = vpop.f32.mrf.mxu0 }
 0x468   :  { %v4381_v6 = vpop.f32.mrf.mxu1  ;;  %4979 = vst [vmem:[#allocation7 + $0x218] sm:$0xff] %v4723_v47  ;;  %v4726_v9 = vmul.f32 2.0, %v4376_v38  ;;  %v4378_v24 = vadd.f32 %v4377_v50, %v3929_v27  ;;  %v3933_v51 = vadd.f32 %v3932_v15, %v6258_v59 }
 0x469   :  { %v3934_v36 = vpop.f32.mrf.mxu0 }
 0x46a   :  { %v4383_v62 = vpop.f32.mrf.mxu1  ;;  %4982 = vst [vmem:[#allocation7 + $0x230] sm:$0xff] %v4726_v9  ;;  %v4727_v30 = vmul.f32 2.0, %v4378_v24  ;;  %v4382_v55 = vadd.f32 %v4381_v6, %v3933_v51  ;;  %v3935_v16 = vadd.f32 %v3934_v36, %v6260_v40 }
 0x46b   :  { %v3938_v29 = vpop.f32.mrf.mxu0 }
 0x46c   :  { %v4387_v25 = vpop.f32.mrf.mxu1  ;;  %4983 = vst [vmem:[#allocation7 + $0x238] sm:$0xff] %v4727_v30  ;;  %v4730_v7 = vmul.f32 2.0, %v4382_v55  ;;  %v4384_v42 = vadd.f32 %v4383_v62, %v3935_v16  ;;  %v3939_v48 = vadd.f32 %v3938_v29, %v6262_v1 }
 0x46d   :  { %v3940_v33 = vpop.f32.mrf.mxu0 }
 0x46e   :  { %v4389_v22 = vpop.f32.mrf.mxu1  ;;  %4986 = vst [vmem:[#allocation7 + $0x250] sm:$0xff] %v4730_v7  ;;  %v4731_v39 = vmul.f32 2.0, %v4384_v42  ;;  %v4388_v12 = vadd.f32 %v4387_v25, %v3939_v48  ;;  %v3941_v59 = vadd.f32 %v3940_v33, %v6264_v19  ;;  %v6831_v42 = vld [vmem:[#allocation14_spill] sm:$0xff] }
 0x46f   :  { %v3944_v32 = vpop.f32.mrf.mxu0 }
 0x470   :  { %v4393_v0 = vpop.f32.mrf.mxu1  ;;  %4987 = vst [vmem:[#allocation7 + $0x258] sm:$0xff] %v4731_v39  ;;  %v4734_v4 = vmul.f32 2.0, %v4388_v12  ;;  %v4390_v49 = vadd.f32 %v4389_v22, %v3941_v59  ;;  %v3945_v40 = vadd.f32 %v3944_v32, %v6266_v14  ;;  %v6832_v59 = vld [vmem:[#allocation15_spill] sm:$0xff] }
 0x471   :  { %v3946_v61 = vpop.f32.mrf.mxu0 }
 0x472   :  { %v4395_v58 = vpop.f32.mrf.mxu1  ;;  %4990 = vst [vmem:[#allocation7 + $0x270] sm:$0xff] %v4734_v4  ;;  %v4735_v52 = vmul.f32 2.0, %v4390_v49  ;;  %v4394_v17 = vadd.f32 %v4393_v0, %v3945_v40  ;;  %v3947_v1 = vadd.f32 %v3946_v61, %v6268_v57  ;;  %v6833_v61 = vld [vmem:[#allocation16_spill] sm:$0xff] }
 0x473   :  { %v3950_v10 = vpop.f32.mrf.mxu0 }
 0x474   :  { %v4399_v54 = vpop.f32.mrf.mxu1  ;;  %4991 = vst [vmem:[#allocation7 + $0x278] sm:$0xff] %v4735_v52  ;;  %v4738_v45 = vmul.f32 2.0, %v4394_v17  ;;  %v4396_v63 = vadd.f32 %v4395_v58, %v3947_v1  ;;  %v3951_v19 = vadd.f32 %v3950_v10, %v6270_v20 }
 0x475   :  { %v3952_v8 = vpop.f32.mrf.mxu0 }
 0x476   :  { %v4401_v44 = vpop.f32.mrf.mxu1  ;;  %4994 = vst [vmem:[#allocation7 + $0x290] sm:$0xff] %v4738_v45  ;;  %v4739_v13 = vmul.f32 2.0, %v4396_v63  ;;  %v4400_v37 = vadd.f32 %v4399_v54, %v3951_v19  ;;  %v3953_v14 = vadd.f32 %v3952_v8, %v6272_v23  ;;  %v6834_v54 = vld [vmem:[#allocation17_spill] sm:$0xff] }
 0x477   :  { %v3956_v53 = vpop.f32.mrf.mxu0 }
 0x478   :  { %v4405_v2 = vpop.f32.mrf.mxu1  ;;  %4995 = vst [vmem:[#allocation7 + $0x298] sm:$0xff] %v4739_v13  ;;  %v4742_v56 = vmul.f32 2.0, %v4400_v37  ;;  %v4402_v21 = vadd.f32 %v4401_v44, %v3953_v14  ;;  %v3957_v57 = vadd.f32 %v3956_v53, %v6274_v43  ;;  %v6828_v43 = vld [vmem:[#allocation11_spill] sm:$0xff]  ;;  %v6835_v13 = vld [vmem:[#allocation18_spill] sm:$0xff] }
 0x479   :  { %v3958_v18 = vpop.f32.mrf.mxu0 }
 0x47a   :  { %v4407_v3 = vpop.f32.mrf.mxu1  ;;  %4998 = vst [vmem:[#allocation7 + $0x2b0] sm:$0xff] %v4742_v56  ;;  %v4743_v28 = vmul.f32 2.0, %v4402_v21  ;;  %v4406_v26 = vadd.f32 %v4405_v2, %v3957_v57  ;;  %v3959_v20 = vadd.f32 %v3958_v18, %v6276_v34  ;;  %v6829_v34 = vld [vmem:[#allocation12_spill] sm:$0xff]  ;;  %v6836_v21 = vld [vmem:[#allocation19_spill] sm:$0xff] }
 0x47b   :  { %v3962_v5 = vpop.f32.mrf.mxu0 }
 0x47c   :  { %v4411_v46 = vpop.f32.mrf.mxu1  ;;  %4999 = vst [vmem:[#allocation7 + $0x2b8] sm:$0xff] %v4743_v28  ;;  %v4746_v41 = vmul.f32 2.0, %v4406_v26  ;;  %v4408_v35 = vadd.f32 %v4407_v3, %v3959_v20  ;;  %v3963_v23 = vadd.f32 %v3962_v5, %v6278_v60  ;;  %v6830_v60 = vld [vmem:[#allocation13_spill] sm:$0xff]  ;;  %v6837_v20 = vld [vmem:[#allocation20_spill] sm:$0xff] }
 0x47d   :  { %v3964_v11 = vpop.f32.mrf.mxu0 }
 0x47e   :  { %v4413_v31 = vpop.f32.mrf.mxu1  ;;  %5002 = vst [vmem:[#allocation7 + $0x2d0] sm:$0xff] %v4746_v41  ;;  %v4747_v50 = vmul.f32 2.0, %v4408_v35  ;;  %v4412_v47 = vadd.f32 %v4411_v46, %v3963_v23  ;;  %v3965_v38 = vadd.f32 %v3964_v11, %v6828_v43  ;;  %v6838_v11 = vld [vmem:[#allocation21_spill] sm:$0xff] }
 0x47f   :  { %v3968_v27 = vpop.f32.mrf.mxu0 }
 0x480   :  { %v4417_v15 = vpop.f32.mrf.mxu1  ;;  %5003 = vst [vmem:[#allocation7 + $0x2d8] sm:$0xff] %v4747_v50  ;;  %v4750_v6 = vmul.f32 2.0, %v4412_v47  ;;  %v4414_v9 = vadd.f32 %v4413_v31, %v3965_v38  ;;  %v3969_v24 = vadd.f32 %v3968_v27, %v6829_v34  ;;  %v6839_v27 = vld [vmem:[#allocation22_spill] sm:$0xff] }
 0x481   :  { %v3970_v51 = vpop.f32.mrf.mxu0 }
 0x482   :  { %v4419_v36 = vpop.f32.mrf.mxu1  ;;  %5006 = vst [vmem:[#allocation7 + $0x2f0] sm:$0xff] %v4750_v6  ;;  %v4751_v62 = vmul.f32 2.0, %v4414_v9  ;;  %v4418_v30 = vadd.f32 %v4417_v15, %v3969_v24  ;;  %v3971_v55 = vadd.f32 %v3970_v51, %v6830_v60  ;;  %v6840_v51 = vld [vmem:[#allocation23_spill] sm:$0xff] }
 0x483   :  { %v3974_v16 = vpop.f32.mrf.mxu0 }
 0x484   :  { %v4423_v29 = vpop.f32.mrf.mxu1  ;;  %5007 = vst [vmem:[#allocation7 + $0x2f8] sm:$0xff] %v4751_v62  ;;  %v4754_v25 = vmul.f32 2.0, %v4418_v30  ;;  %v4420_v7 = vadd.f32 %v4419_v36, %v3971_v55  ;;  %v3975_v48 = vadd.f32 %v3974_v16, %v6831_v42  ;;  %v6841_v16 = vld [vmem:[#allocation24_spill] sm:$0xff] }
 0x485   :  { %v3976_v33 = vpop.f32.mrf.mxu0 }
 0x486   :  { %v4425_v22 = vpop.f32.mrf.mxu1  ;;  %5010 = vst [vmem:[#allocation7 + $0x310] sm:$0xff] %v4754_v25  ;;  %v4755_v39 = vmul.f32 2.0, %v4420_v7  ;;  %v4424_v12 = vadd.f32 %v4423_v29, %v3975_v48  ;;  %v3977_v32 = vadd.f32 %v3976_v33, %v6832_v59  ;;  %v6842_v33 = vld [vmem:[#allocation25_spill] sm:$0xff] }
 0x487   :  { %v3980_v0 = vpop.f32.mrf.mxu0 }
 0x488   :  { %v4429_v4 = vpop.f32.mrf.mxu1  ;;  %5011 = vst [vmem:[#allocation7 + $0x318] sm:$0xff] %v4755_v39  ;;  %v4758_v49 = vmul.f32 2.0, %v4424_v12  ;;  %v4426_v40 = vadd.f32 %v4425_v22, %v3977_v32  ;;  %v3981_v58 = vadd.f32 %v3980_v0, %v6833_v61  ;;  %v6843_v0 = vld [vmem:[#allocation26_spill] sm:$0xff] }
 0x489   :  { %v3982_v52 = vpop.f32.mrf.mxu0 }
 0x48a   :  { %v4431_v17 = vpop.f32.mrf.mxu1  ;;  %5014 = vst [vmem:[#allocation7 + $0x330] sm:$0xff] %v4758_v49  ;;  %v4759_v1 = vmul.f32 2.0, %v4426_v40  ;;  %v4430_v10 = vadd.f32 %v4429_v4, %v3981_v58  ;;  %v3983_v45 = vadd.f32 %v3982_v52, %v6834_v54  ;;  %v6844_v52 = vld [vmem:[#allocation27_spill] sm:$0xff] }
 0x48b   :  { %v3986_v63 = vpop.f32.mrf.mxu0 }
 0x48c   :  { %v4435_v19 = vpop.f32.mrf.mxu1  ;;  %5015 = vst [vmem:[#allocation7 + $0x338] sm:$0xff] %v4759_v1  ;;  %v4762_v8 = vmul.f32 2.0, %v4430_v10  ;;  %v4432_v44 = vadd.f32 %v4431_v17, %v3983_v45  ;;  %v3987_v37 = vadd.f32 %v3986_v63, %v6835_v13  ;;  %v6845_v63 = vld [vmem:[#allocation28_spill] sm:$0xff] }
 0x48d   :  { %v3988_v14 = vpop.f32.mrf.mxu0 }
 0x48e   :  { %v4437_v53 = vpop.f32.mrf.mxu1  ;;  %5018 = vst [vmem:[#allocation7 + $0x350] sm:$0xff] %v4762_v8  ;;  %v4763_v2 = vmul.f32 2.0, %v4432_v44  ;;  %v4436_v56 = vadd.f32 %v4435_v19, %v3987_v37  ;;  %v3989_v57 = vadd.f32 %v3988_v14, %v6836_v21  ;;  %v6846_v14 = vld [vmem:[#allocation29_spill] sm:$0xff] }
 0x48f   :  { %v3992_v18 = vpop.f32.mrf.mxu0 }
 0x490   :  { %v4441_v3 = vpop.f32.mrf.mxu1  ;;  %5019 = vst [vmem:[#allocation7 + $0x358] sm:$0xff] %v4763_v2  ;;  %v4766_v28 = vmul.f32 2.0, %v4436_v56  ;;  %v4438_v26 = vadd.f32 %v4437_v53, %v3989_v57  ;;  %v3993_v5 = vadd.f32 %v3992_v18, %v6837_v20  ;;  %v6847_v18 = vld [vmem:[#allocation30_spill] sm:$0xff] }
 0x491   :  { %v3994_v46 = vpop.f32.mrf.mxu0 }
 0x492   :  { %v4443_v41 = vpop.f32.mrf.mxu1  ;;  %5022 = vst [vmem:[#allocation7 + $0x370] sm:$0xff] %v4766_v28  ;;  %v4767_v35 = vmul.f32 2.0, %v4438_v26  ;;  %v4442_v23 = vadd.f32 %v4441_v3, %v3993_v5  ;;  %v3995_v31 = vadd.f32 %v3994_v46, %v6838_v11  ;;  %v6848_v46 = vld [vmem:[#allocation31_spill] sm:$0xff] }
 0x493   :  { %v3998_v50 = vpop.f32.mrf.mxu0 }
 0x494   :  { %v4447_v47 = vpop.f32.mrf.mxu1  ;;  %5023 = vst [vmem:[#allocation7 + $0x378] sm:$0xff] %v4767_v35  ;;  %v4770_v43 = vmul.f32 2.0, %v4442_v23  ;;  %v4444_v38 = vadd.f32 %v4443_v41, %v3995_v31  ;;  %v3999_v15 = vadd.f32 %v3998_v50, %v6839_v27  ;;  %v6849_v50 = vld [vmem:[#allocation32_spill] sm:$0xff] }
 0x495   :  { %v4000_v6 = vpop.f32.mrf.mxu0 }
 0x496   :  { %v4449_v9 = vpop.f32.mrf.mxu1  ;;  %5026 = vst [vmem:[#allocation7 + $0x390] sm:$0xff] %v4770_v43  ;;  %v4771_v34 = vmul.f32 2.0, %v4444_v38  ;;  %v4448_v24 = vadd.f32 %v4447_v47, %v3999_v15  ;;  %v4001_v36 = vadd.f32 %v4000_v6, %v6840_v51  ;;  %v6850_v6 = vld [vmem:[#allocation33_spill] sm:$0xff] }
 0x497   :  { %v4004_v62 = vpop.f32.mrf.mxu0 }
 0x498   :  { %v4453_v30 = vpop.f32.mrf.mxu1  ;;  %5027 = vst [vmem:[#allocation7 + $0x398] sm:$0xff] %v4771_v34  ;;  %v4774_v60 = vmul.f32 2.0, %v4448_v24  ;;  %v4450_v55 = vadd.f32 %v4449_v9, %v4001_v36  ;;  %v4005_v29 = vadd.f32 %v4004_v62, %v6841_v16  ;;  %v6851_v62 = vld [vmem:[#allocation34_spill] sm:$0xff] }
 0x499   :  { %v4006_v25 = vpop.f32.mrf.mxu0 }
 0x49a   :  { %v4455_v7 = vpop.f32.mrf.mxu1  ;;  %5030 = vst [vmem:[#allocation7 + $0x3b0] sm:$0xff] %v4774_v60  ;;  %v4775_v42 = vmul.f32 2.0, %v4450_v55  ;;  %v4454_v48 = vadd.f32 %v4453_v30, %v4005_v29  ;;  %v4007_v22 = vadd.f32 %v4006_v25, %v6842_v33  ;;  %v6852_v25 = vld [vmem:[#allocation35_spill] sm:$0xff] }
 0x49b   :  { %v4010_v39 = vpop.f32.mrf.mxu0 }
 0x49c   :  { %v4459_v12 = vpop.f32.mrf.mxu1  ;;  %5031 = vst [vmem:[#allocation7 + $0x3b8] sm:$0xff] %v4775_v42  ;;  %v4778_v59 = vmul.f32 2.0, %v4454_v48  ;;  %v4456_v32 = vadd.f32 %v4455_v7, %v4007_v22  ;;  %v4011_v4 = vadd.f32 %v4010_v39, %v6843_v0  ;;  %v6853_v39 = vld [vmem:[#allocation36_spill] sm:$0xff] }
 0x49d   :  { %v4012_v49 = vpop.f32.mrf.mxu0 }
 0x49e   :  { %v4461_v40 = vpop.f32.mrf.mxu1  ;;  %5034 = vst [vmem:[#allocation7 + $0x3d0] sm:$0xff] %v4778_v59  ;;  %v4779_v61 = vmul.f32 2.0, %v4456_v32  ;;  %v4460_v58 = vadd.f32 %v4459_v12, %v4011_v4  ;;  %v4013_v17 = vadd.f32 %v4012_v49, %v6844_v52  ;;  %v6854_v49 = vld [vmem:[#allocation37_spill] sm:$0xff] }
 0x49f   :  { %v4016_v1 = vpop.f32.mrf.mxu0 }
 0x4a0   :  { %v4465_v10 = vpop.f32.mrf.mxu1  ;;  %5035 = vst [vmem:[#allocation7 + $0x3d8] sm:$0xff] %v4779_v61  ;;  %v4782_v54 = vmul.f32 2.0, %v4460_v58  ;;  %v4462_v45 = vadd.f32 %v4461_v40, %v4013_v17  ;;  %v4017_v19 = vadd.f32 %v4016_v1, %v6845_v63  ;;  %v6855_v1 = vld [vmem:[#allocation38_spill] sm:$0xff] }
 0x4a1   :  { %v4018_v8 = vpop.f32.mrf.mxu0 }
 0x4a2   :  { %v4467_v44 = vpop.f32.mrf.mxu1  ;;  %5038 = vst [vmem:[#allocation7 + $0x3f0] sm:$0xff] %v4782_v54  ;;  %v4783_v13 = vmul.f32 2.0, %v4462_v45  ;;  %v4466_v37 = vadd.f32 %v4465_v10, %v4017_v19  ;;  %v4019_v53 = vadd.f32 %v4018_v8, %v6846_v14  ;;  %v6856_v8 = vld [vmem:[#allocation39_spill] sm:$0xff] }
 0x4a3   :  { %v4022_v2 = vpop.f32.mrf.mxu0 }
 0x4a4   :  { %v4471_v56 = vpop.f32.mrf.mxu1  ;;  %5039 = vst [vmem:[#allocation7 + $0x3f8] sm:$0xff] %v4783_v13  ;;  %v4786_v21 = vmul.f32 2.0, %v4466_v37  ;;  %v4468_v57 = vadd.f32 %v4467_v44, %v4019_v53  ;;  %v4023_v3 = vadd.f32 %v4022_v2, %v6847_v18  ;;  %v6857_v2 = vld [vmem:[#allocation40_spill] sm:$0xff] }
 0x4a5   :  { %v4024_v28 = vpop.f32.mrf.mxu0 }
 0x4a6   :  { %v4473_v26 = vpop.f32.mrf.mxu1  ;;  %5042 = vst [vmem:[#allocation7 + $0x410] sm:$0xff] %v4786_v21  ;;  %v4787_v20 = vmul.f32 2.0, %v4468_v57  ;;  %v4472_v5 = vadd.f32 %v4471_v56, %v4023_v3  ;;  %v4025_v41 = vadd.f32 %v4024_v28, %v6848_v46  ;;  %v6858_v28 = vld [vmem:[#allocation41_spill] sm:$0xff] }
 0x4a7   :  { %v4028_v35 = vpop.f32.mrf.mxu0 }
 0x4a8   :  { %v4477_v23 = vpop.f32.mrf.mxu1  ;;  %5043 = vst [vmem:[#allocation7 + $0x418] sm:$0xff] %v4787_v20  ;;  %v4790_v11 = vmul.f32 2.0, %v4472_v5  ;;  %v4474_v31 = vadd.f32 %v4473_v26, %v4025_v41  ;;  %v4029_v47 = vadd.f32 %v4028_v35, %v6849_v50  ;;  %v6859_v35 = vld [vmem:[#allocation42_spill] sm:$0xff] }
 0x4a9   :  { %v4030_v43 = vpop.f32.mrf.mxu0 }
 0x4aa   :  { %v4479_v38 = vpop.f32.mrf.mxu1  ;;  %5046 = vst [vmem:[#allocation7 + $0x430] sm:$0xff] %v4790_v11  ;;  %v4791_v27 = vmul.f32 2.0, %v4474_v31  ;;  %v4478_v15 = vadd.f32 %v4477_v23, %v4029_v47  ;;  %v4031_v9 = vadd.f32 %v4030_v43, %v6850_v6  ;;  %v6860_v43 = vld [vmem:[#allocation43_spill] sm:$0xff] }
 0x4ab   :  { %v4034_v34 = vpop.f32.mrf.mxu0 }
 0x4ac   :  { %v4483_v24 = vpop.f32.mrf.mxu1  ;;  %5047 = vst [vmem:[#allocation7 + $0x438] sm:$0xff] %v4791_v27  ;;  %v4794_v51 = vmul.f32 2.0, %v4478_v15  ;;  %v4480_v36 = vadd.f32 %v4479_v38, %v4031_v9  ;;  %v4035_v30 = vadd.f32 %v4034_v34, %v6851_v62  ;;  %v6861_v34 = vld [vmem:[#allocation44_spill] sm:$0xff] }
 0x4ad   :  { %v4036_v60 = vpop.f32.mrf.mxu0 }
 0x4ae   :  { %v4485_v55 = vpop.f32.mrf.mxu1  ;;  %5050 = vst [vmem:[#allocation7 + $0x450] sm:$0xff] %v4794_v51  ;;  %v4795_v16 = vmul.f32 2.0, %v4480_v36  ;;  %v4484_v29 = vadd.f32 %v4483_v24, %v4035_v30  ;;  %v4037_v7 = vadd.f32 %v4036_v60, %v6852_v25  ;;  %v6862_v60 = vld [vmem:[#allocation45_spill] sm:$0xff] }
 0x4af   :  { %v4040_v42 = vpop.f32.mrf.mxu0 }
 0x4b0   :  { %v4489_v48 = vpop.f32.mrf.mxu1  ;;  %5051 = vst [vmem:[#allocation7 + $0x458] sm:$0xff] %v4795_v16  ;;  %v4798_v33 = vmul.f32 2.0, %v4484_v29  ;;  %v4486_v22 = vadd.f32 %v4485_v55, %v4037_v7  ;;  %v4041_v12 = vadd.f32 %v4040_v42, %v6853_v39  ;;  %v6863_v42 = vld [vmem:[#allocation46_spill] sm:$0xff] }
 0x4b1   :  { %v4042_v59 = vpop.f32.mrf.mxu0 }
 0x4b2   :  { %v4491_v32 = vpop.f32.mrf.mxu1  ;;  %5054 = vst [vmem:[#allocation7 + $0x470] sm:$0xff] %v4798_v33  ;;  %v4799_v0 = vmul.f32 2.0, %v4486_v22  ;;  %v4490_v4 = vadd.f32 %v4489_v48, %v4041_v12  ;;  %v4043_v40 = vadd.f32 %v4042_v59, %v6854_v49  ;;  %v6864_v59 = vld [vmem:[#allocation47_spill] sm:$0xff] }
 0x4b3   :  { %v4046_v61 = vpop.f32.mrf.mxu0 }
 0x4b4   :  { %v4495_v58 = vpop.f32.mrf.mxu1  ;;  %5055 = vst [vmem:[#allocation7 + $0x478] sm:$0xff] %v4799_v0  ;;  %v4802_v52 = vmul.f32 2.0, %v4490_v4  ;;  %v4492_v17 = vadd.f32 %v4491_v32, %v4043_v40  ;;  %v4047_v10 = vadd.f32 %v4046_v61, %v6855_v1  ;;  %v6865_v61 = vld [vmem:[#allocation48_spill] sm:$0xff] }
 0x4b5   :  { %v4048_v54 = vpop.f32.mrf.mxu0 }
 0x4b6   :  { %v4497_v45 = vpop.f32.mrf.mxu1  ;;  %5058 = vst [vmem:[#allocation7 + $0x490] sm:$0xff] %v4802_v52  ;;  %v4803_v63 = vmul.f32 2.0, %v4492_v17  ;;  %v4496_v19 = vadd.f32 %v4495_v58, %v4047_v10  ;;  %v4049_v44 = vadd.f32 %v4048_v54, %v6856_v8  ;;  %v6866_v54 = vld [vmem:[#allocation49_spill] sm:$0xff] }
 0x4b7   :  { %v4052_v13 = vpop.f32.mrf.mxu0 }
 0x4b8   :  { %v4501_v37 = vpop.f32.mrf.mxu1  ;;  %5059 = vst [vmem:[#allocation7 + $0x498] sm:$0xff] %v4803_v63  ;;  %v4806_v14 = vmul.f32 2.0, %v4496_v19  ;;  %v4498_v53 = vadd.f32 %v4497_v45, %v4049_v44  ;;  %v4053_v56 = vadd.f32 %v4052_v13, %v6857_v2  ;;  %v6867_v13 = vld [vmem:[#allocation50_spill] sm:$0xff] }
 0x4b9   :  { %v4054_v21 = vpop.f32.mrf.mxu0 }
 0x4ba   :  { %v4503_v57 = vpop.f32.mrf.mxu1  ;;  %5062 = vst [vmem:[#allocation7 + $0x4b0] sm:$0xff] %v4806_v14  ;;  %v4807_v18 = vmul.f32 2.0, %v4498_v53  ;;  %v4502_v3 = vadd.f32 %v4501_v37, %v4053_v56  ;;  %v4055_v26 = vadd.f32 %v4054_v21, %v6858_v28  ;;  %v6868_v21 = vld [vmem:[#allocation51_spill] sm:$0xff] }
 0x4bb   :  { %v4058_v20 = vpop.f32.mrf.mxu0 }
 0x4bc   :  { %v4507_v5 = vpop.f32.mrf.mxu1  ;;  %5063 = vst [vmem:[#allocation7 + $0x4b8] sm:$0xff] %v4807_v18  ;;  %v4810_v46 = vmul.f32 2.0, %v4502_v3  ;;  %v4504_v41 = vadd.f32 %v4503_v57, %v4055_v26  ;;  %v4059_v23 = vadd.f32 %v4058_v20, %v6859_v35  ;;  %v6869_v20 = vld [vmem:[#allocation52_spill] sm:$0xff] }
 0x4bd   :  { %v4060_v11 = vpop.f32.mrf.mxu0 }
 0x4be   :  { %v4509_v31 = vpop.f32.mrf.mxu1  ;;  %5066 = vst [vmem:[#allocation7 + $0x4d0] sm:$0xff] %v4810_v46  ;;  %v4811_v50 = vmul.f32 2.0, %v4504_v41  ;;  %v4508_v47 = vadd.f32 %v4507_v5, %v4059_v23  ;;  %v4061_v38 = vadd.f32 %v4060_v11, %v6860_v43  ;;  %v6870_v11 = vld [vmem:[#allocation53_spill] sm:$0xff] }
 0x4bf   :  { %v4064_v27 = vpop.f32.mrf.mxu0 }
 0x4c0   :  { %v4513_v15 = vpop.f32.mrf.mxu1  ;;  %5067 = vst [vmem:[#allocation7 + $0x4d8] sm:$0xff] %v4811_v50  ;;  %v4814_v6 = vmul.f32 2.0, %v4508_v47  ;;  %v4510_v9 = vadd.f32 %v4509_v31, %v4061_v38  ;;  %v4065_v24 = vadd.f32 %v4064_v27, %v6861_v34  ;;  %v6871_v27 = vld [vmem:[#allocation54_spill] sm:$0xff] }
 0x4c1   :  { %v4066_v51 = vpop.f32.mrf.mxu0 }
 0x4c2   :  { %v4515_v36 = vpop.f32.mrf.mxu1  ;;  %5070 = vst [vmem:[#allocation7 + $0x4f0] sm:$0xff] %v4814_v6  ;;  %v4815_v62 = vmul.f32 2.0, %v4510_v9  ;;  %v4514_v30 = vadd.f32 %v4513_v15, %v4065_v24  ;;  %v4067_v55 = vadd.f32 %v4066_v51, %v6862_v60  ;;  %v6872_v51 = vld [vmem:[#allocation55_spill] sm:$0xff] }
 0x4c3   :  { %v4070_v16 = vpop.f32.mrf.mxu0 }
 0x4c4   :  { %v4519_v29 = vpop.f32.mrf.mxu1  ;;  %5071 = vst [vmem:[#allocation7 + $0x4f8] sm:$0xff] %v4815_v62  ;;  %v4818_v25 = vmul.f32 2.0, %v4514_v30  ;;  %v4516_v7 = vadd.f32 %v4515_v36, %v4067_v55  ;;  %v4071_v48 = vadd.f32 %v4070_v16, %v6863_v42  ;;  %v6873_v16 = vld [vmem:[#allocation56_spill] sm:$0xff] }
 0x4c5   :  { %v4072_v33 = vpop.f32.mrf.mxu0 }
 0x4c6   :  { %v4521_v22 = vpop.f32.mrf.mxu1  ;;  %5074 = vst [vmem:[#allocation7 + $0x510] sm:$0xff] %v4818_v25  ;;  %v4819_v39 = vmul.f32 2.0, %v4516_v7  ;;  %v4520_v12 = vadd.f32 %v4519_v29, %v4071_v48  ;;  %v4073_v32 = vadd.f32 %v4072_v33, %v6864_v59  ;;  %v6874_v33 = vld [vmem:[#allocation57_spill] sm:$0xff] }
 0x4c7   :  { %v4076_v0 = vpop.f32.mrf.mxu0 }
 0x4c8   :  { %v4525_v4 = vpop.f32.mrf.mxu1  ;;  %5075 = vst [vmem:[#allocation7 + $0x518] sm:$0xff] %v4819_v39  ;;  %v4822_v49 = vmul.f32 2.0, %v4520_v12  ;;  %v4522_v40 = vadd.f32 %v4521_v22, %v4073_v32  ;;  %v4077_v58 = vadd.f32 %v4076_v0, %v6865_v61  ;;  %v6875_v0 = vld [vmem:[#allocation58_spill] sm:$0xff] }
 0x4c9   :  { %v4078_v52 = vpop.f32.mrf.mxu0 }
 0x4ca   :  { %v4527_v17 = vpop.f32.mrf.mxu1  ;;  %5078 = vst [vmem:[#allocation7 + $0x530] sm:$0xff] %v4822_v49  ;;  %v4823_v1 = vmul.f32 2.0, %v4522_v40  ;;  %v4526_v10 = vadd.f32 %v4525_v4, %v4077_v58  ;;  %v4079_v45 = vadd.f32 %v4078_v52, %v6866_v54  ;;  %v6876_v52 = vld [vmem:[#allocation59_spill] sm:$0xff] }
 0x4cb   :  { %v4082_v63 = vpop.f32.mrf.mxu0 }
 0x4cc   :  { %v4531_v19 = vpop.f32.mrf.mxu1  ;;  %5079 = vst [vmem:[#allocation7 + $0x538] sm:$0xff] %v4823_v1  ;;  %v4826_v8 = vmul.f32 2.0, %v4526_v10  ;;  %v4528_v44 = vadd.f32 %v4527_v17, %v4079_v45  ;;  %v4083_v37 = vadd.f32 %v4082_v63, %v6867_v13  ;;  %v6877_v63 = vld [vmem:[#allocation60_spill] sm:$0xff] }
 0x4cd   :  { %v4084_v14 = vpop.f32.mrf.mxu0 }
 0x4ce   :  { %v4533_v53 = vpop.f32.mrf.mxu1  ;;  %5082 = vst [vmem:[#allocation7 + $0x550] sm:$0xff] %v4826_v8  ;;  %v4827_v2 = vmul.f32 2.0, %v4528_v44  ;;  %v4532_v56 = vadd.f32 %v4531_v19, %v4083_v37  ;;  %v4085_v57 = vadd.f32 %v4084_v14, %v6868_v21  ;;  %v6878_v14 = vld [vmem:[#allocation61_spill] sm:$0xff] }
 0x4cf   :  { %v4088_v18 = vpop.f32.mrf.mxu0 }
 0x4d0   :  { %v4537_v3 = vpop.f32.mrf.mxu1  ;;  %5083 = vst [vmem:[#allocation7 + $0x558] sm:$0xff] %v4827_v2  ;;  %v4830_v28 = vmul.f32 2.0, %v4532_v56  ;;  %v4534_v26 = vadd.f32 %v4533_v53, %v4085_v57  ;;  %v4089_v5 = vadd.f32 %v4088_v18, %v6869_v20  ;;  %v6879_v18 = vld [vmem:[#allocation62_spill] sm:$0xff] }
 0x4d1   :  { %v4090_v46 = vpop.f32.mrf.mxu0 }
 0x4d2   :  { %v4539_v41 = vpop.f32.mrf.mxu1  ;;  %5086 = vst [vmem:[#allocation7 + $0x570] sm:$0xff] %v4830_v28  ;;  %v4831_v35 = vmul.f32 2.0, %v4534_v26  ;;  %v4538_v23 = vadd.f32 %v4537_v3, %v4089_v5  ;;  %v4091_v31 = vadd.f32 %v4090_v46, %v6870_v11  ;;  %v6880_v46 = vld [vmem:[#allocation63_spill] sm:$0xff] }
 0x4d3   :  { %v4094_v50 = vpop.f32.mrf.mxu0 }
 0x4d4   :  { %v4543_v47 = vpop.f32.mrf.mxu1  ;;  %5087 = vst [vmem:[#allocation7 + $0x578] sm:$0xff] %v4831_v35  ;;  %v4834_v43 = vmul.f32 2.0, %v4538_v23  ;;  %v4540_v38 = vadd.f32 %v4539_v41, %v4091_v31  ;;  %v4095_v15 = vadd.f32 %v4094_v50, %v6871_v27  ;;  %v6881_v50 = vld [vmem:[#allocation64_spill] sm:$0xff] }
 0x4d5   :  { %v4096_v6 = vpop.f32.mrf.mxu0 }
 0x4d6   :  { %v4545_v9 = vpop.f32.mrf.mxu1  ;;  %5090 = vst [vmem:[#allocation7 + $0x590] sm:$0xff] %v4834_v43  ;;  %v4835_v34 = vmul.f32 2.0, %v4540_v38  ;;  %v4544_v24 = vadd.f32 %v4543_v47, %v4095_v15  ;;  %v4097_v36 = vadd.f32 %v4096_v6, %v6872_v51  ;;  %v6882_v6 = vld [vmem:[#allocation65_spill] sm:$0xff] }
 0x4d7   :  { %v4100_v62 = vpop.f32.mrf.mxu0 }
 0x4d8   :  { %v4549_v30 = vpop.f32.mrf.mxu1  ;;  %5091 = vst [vmem:[#allocation7 + $0x598] sm:$0xff] %v4835_v34  ;;  %v4838_v60 = vmul.f32 2.0, %v4544_v24  ;;  %v4546_v55 = vadd.f32 %v4545_v9, %v4097_v36  ;;  %v4101_v29 = vadd.f32 %v4100_v62, %v6873_v16  ;;  %v6883_v62 = vld [vmem:[#allocation66_spill] sm:$0xff] }
 0x4d9   :  { %v4102_v25 = vpop.f32.mrf.mxu0 }
 0x4da   :  { %v4551_v7 = vpop.f32.mrf.mxu1  ;;  %5094 = vst [vmem:[#allocation7 + $0x5b0] sm:$0xff] %v4838_v60  ;;  %v4839_v42 = vmul.f32 2.0, %v4546_v55  ;;  %v4550_v48 = vadd.f32 %v4549_v30, %v4101_v29  ;;  %v4103_v22 = vadd.f32 %v4102_v25, %v6874_v33  ;;  %v6884_v25 = vld [vmem:[#allocation67_spill] sm:$0xff] }
 0x4db   :  { %v4106_v39 = vpop.f32.mrf.mxu0 }
 0x4dc   :  { %v4555_v12 = vpop.f32.mrf.mxu1  ;;  %5095 = vst [vmem:[#allocation7 + $0x5b8] sm:$0xff] %v4839_v42  ;;  %v4842_v59 = vmul.f32 2.0, %v4550_v48  ;;  %v4552_v32 = vadd.f32 %v4551_v7, %v4103_v22  ;;  %v4107_v4 = vadd.f32 %v4106_v39, %v6875_v0  ;;  %v6885_v39 = vld [vmem:[#allocation68_spill] sm:$0xff] }
 0x4dd   :  { %v4108_v49 = vpop.f32.mrf.mxu0 }
 0x4de   :  { %v4557_v40 = vpop.f32.mrf.mxu1  ;;  %5098 = vst [vmem:[#allocation7 + $0x5d0] sm:$0xff] %v4842_v59  ;;  %v4843_v61 = vmul.f32 2.0, %v4552_v32  ;;  %v4556_v58 = vadd.f32 %v4555_v12, %v4107_v4  ;;  %v4109_v17 = vadd.f32 %v4108_v49, %v6876_v52  ;;  %v6886_v49 = vld [vmem:[#allocation69_spill] sm:$0xff] }
 0x4df   :  { %v4112_v1 = vpop.f32.mrf.mxu0 }
 0x4e0   :  { %v4561_v10 = vpop.f32.mrf.mxu1  ;;  %5099 = vst [vmem:[#allocation7 + $0x5d8] sm:$0xff] %v4843_v61  ;;  %v4846_v54 = vmul.f32 2.0, %v4556_v58  ;;  %v4558_v45 = vadd.f32 %v4557_v40, %v4109_v17  ;;  %v4113_v19 = vadd.f32 %v4112_v1, %v6877_v63  ;;  %v6887_v1 = vld [vmem:[#allocation70_spill] sm:$0xff] }
 0x4e1   :  { %v4114_v8 = vpop.f32.mrf.mxu0 }
 0x4e2   :  { %v4563_v44 = vpop.f32.mrf.mxu1  ;;  %5102 = vst [vmem:[#allocation7 + $0x5f0] sm:$0xff] %v4846_v54  ;;  %v4847_v13 = vmul.f32 2.0, %v4558_v45  ;;  %v4562_v37 = vadd.f32 %v4561_v10, %v4113_v19  ;;  %v4115_v53 = vadd.f32 %v4114_v8, %v6878_v14  ;;  %v6888_v8 = vld [vmem:[#allocation71_spill] sm:$0xff] }
 0x4e3   :  { %v4118_v2 = vpop.f32.mrf.mxu0 }
 0x4e4   :  { %v4567_v56 = vpop.f32.mrf.mxu1  ;;  %5103 = vst [vmem:[#allocation7 + $0x5f8] sm:$0xff] %v4847_v13  ;;  %v4850_v21 = vmul.f32 2.0, %v4562_v37  ;;  %v4564_v57 = vadd.f32 %v4563_v44, %v4115_v53  ;;  %v4119_v3 = vadd.f32 %v4118_v2, %v6879_v18  ;;  %v6889_v2 = vld [vmem:[#allocation72_spill] sm:$0xff] }
 0x4e5   :  { %v4120_v28 = vpop.f32.mrf.mxu0 }
 0x4e6   :  { %v4569_v26 = vpop.f32.mrf.mxu1  ;;  %5106 = vst [vmem:[#allocation7 + $0x610] sm:$0xff] %v4850_v21  ;;  %v4851_v20 = vmul.f32 2.0, %v4564_v57  ;;  %v4568_v5 = vadd.f32 %v4567_v56, %v4119_v3  ;;  %v4121_v41 = vadd.f32 %v4120_v28, %v6880_v46  ;;  %v6890_v28 = vld [vmem:[#allocation73_spill] sm:$0xff] }
 0x4e7   :  { %v4124_v35 = vpop.f32.mrf.mxu0 }
 0x4e8   :  { %v4573_v23 = vpop.f32.mrf.mxu1  ;;  %5107 = vst [vmem:[#allocation7 + $0x618] sm:$0xff] %v4851_v20  ;;  %v4854_v11 = vmul.f32 2.0, %v4568_v5  ;;  %v4570_v31 = vadd.f32 %v4569_v26, %v4121_v41  ;;  %v4125_v47 = vadd.f32 %v4124_v35, %v6881_v50  ;;  %v6891_v35 = vld [vmem:[#allocation74_spill] sm:$0xff] }
 0x4e9   :  { %v4126_v43 = vpop.f32.mrf.mxu0 }
 0x4ea   :  { %v4575_v38 = vpop.f32.mrf.mxu1  ;;  %5110 = vst [vmem:[#allocation7 + $0x630] sm:$0xff] %v4854_v11  ;;  %v4855_v27 = vmul.f32 2.0, %v4570_v31  ;;  %v4574_v15 = vadd.f32 %v4573_v23, %v4125_v47  ;;  %v4127_v9 = vadd.f32 %v4126_v43, %v6882_v6  ;;  %v6892_v43 = vld [vmem:[#allocation75_spill] sm:$0xff] }
 0x4eb   :  { %v4130_v34 = vpop.f32.mrf.mxu0 }
 0x4ec   :  { %v4579_v24 = vpop.f32.mrf.mxu1  ;;  %5111 = vst [vmem:[#allocation7 + $0x638] sm:$0xff] %v4855_v27  ;;  %v4858_v51 = vmul.f32 2.0, %v4574_v15  ;;  %v4576_v36 = vadd.f32 %v4575_v38, %v4127_v9  ;;  %v4131_v30 = vadd.f32 %v4130_v34, %v6883_v62  ;;  %v6893_v34 = vld [vmem:[#allocation76_spill] sm:$0xff] }
 0x4ed   :  { %v4132_v60 = vpop.f32.mrf.mxu0 }
 0x4ee   :  { %v4581_v55 = vpop.f32.mrf.mxu1  ;;  %5114 = vst [vmem:[#allocation7 + $0x650] sm:$0xff] %v4858_v51  ;;  %v4859_v16 = vmul.f32 2.0, %v4576_v36  ;;  %v4580_v29 = vadd.f32 %v4579_v24, %v4131_v30  ;;  %v4133_v7 = vadd.f32 %v4132_v60, %v6884_v25  ;;  %v6894_v60 = vld [vmem:[#allocation77_spill] sm:$0xff] }
 0x4ef   :  { %v4136_v42 = vpop.f32.mrf.mxu0 }
 0x4f0   :  { %v4585_v48 = vpop.f32.mrf.mxu1  ;;  %5115 = vst [vmem:[#allocation7 + $0x658] sm:$0xff] %v4859_v16  ;;  %v4862_v33 = vmul.f32 2.0, %v4580_v29  ;;  %v4582_v22 = vadd.f32 %v4581_v55, %v4133_v7  ;;  %v4137_v12 = vadd.f32 %v4136_v42, %v6885_v39  ;;  %v6895_v42 = vld [vmem:[#allocation78_spill] sm:$0xff] }
 0x4f1   :  { %v4138_v59 = vpop.f32.mrf.mxu0 }
 0x4f2   :  { %v4587_v32 = vpop.f32.mrf.mxu1  ;;  %5118 = vst [vmem:[#allocation7 + $0x670] sm:$0xff] %v4862_v33  ;;  %v4863_v0 = vmul.f32 2.0, %v4582_v22  ;;  %v4586_v4 = vadd.f32 %v4585_v48, %v4137_v12  ;;  %v4139_v40 = vadd.f32 %v4138_v59, %v6886_v49  ;;  %v6896_v59 = vld [vmem:[#allocation79_spill] sm:$0xff] }
 0x4f3   :  { %v4142_v61 = vpop.f32.mrf.mxu0 }
 0x4f4   :  { %v4591_v58 = vpop.f32.mrf.mxu1  ;;  %5119 = vst [vmem:[#allocation7 + $0x678] sm:$0xff] %v4863_v0  ;;  %v4866_v52 = vmul.f32 2.0, %v4586_v4  ;;  %v4588_v17 = vadd.f32 %v4587_v32, %v4139_v40  ;;  %v4143_v10 = vadd.f32 %v4142_v61, %v6887_v1  ;;  %v6897_v61 = vld [vmem:[#allocation80_spill] sm:$0xff] }
 0x4f5   :  { %v4144_v54 = vpop.f32.mrf.mxu0 }
 0x4f6   :  { %v4593_v45 = vpop.f32.mrf.mxu1  ;;  %5122 = vst [vmem:[#allocation7 + $0x690] sm:$0xff] %v4866_v52  ;;  %v4867_v63 = vmul.f32 2.0, %v4588_v17  ;;  %v4592_v19 = vadd.f32 %v4591_v58, %v4143_v10  ;;  %v4145_v44 = vadd.f32 %v4144_v54, %v6888_v8  ;;  %v6898_v54 = vld [vmem:[#allocation81_spill] sm:$0xff] }
 0x4f7   :  { %v4148_v13 = vpop.f32.mrf.mxu0 }
 0x4f8   :  { %v4597_v37 = vpop.f32.mrf.mxu1  ;;  %5123 = vst [vmem:[#allocation7 + $0x698] sm:$0xff] %v4867_v63  ;;  %v4870_v14 = vmul.f32 2.0, %v4592_v19  ;;  %v4594_v53 = vadd.f32 %v4593_v45, %v4145_v44  ;;  %v4149_v56 = vadd.f32 %v4148_v13, %v6889_v2  ;;  %v6899_v13 = vld [vmem:[#allocation82_spill] sm:$0xff] }
 0x4f9   :  { %v4150_v21 = vpop.f32.mrf.mxu0 }
 0x4fa   :  { %v4599_v57 = vpop.f32.mrf.mxu1  ;;  %5126 = vst [vmem:[#allocation7 + $0x6b0] sm:$0xff] %v4870_v14  ;;  %v4871_v18 = vmul.f32 2.0, %v4594_v53  ;;  %v4598_v3 = vadd.f32 %v4597_v37, %v4149_v56  ;;  %v4151_v26 = vadd.f32 %v4150_v21, %v6890_v28  ;;  %v6900_v21 = vld [vmem:[#allocation83_spill] sm:$0xff] }
 0x4fb   :  { %v4154_v20 = vpop.f32.mrf.mxu0 }
 0x4fc   :  { %v4603_v5 = vpop.f32.mrf.mxu1  ;;  %5127 = vst [vmem:[#allocation7 + $0x6b8] sm:$0xff] %v4871_v18  ;;  %v4874_v46 = vmul.f32 2.0, %v4598_v3  ;;  %v4600_v41 = vadd.f32 %v4599_v57, %v4151_v26  ;;  %v4155_v23 = vadd.f32 %v4154_v20, %v6891_v35  ;;  %v6901_v20 = vld [vmem:[#allocation84_spill] sm:$0xff] }
 0x4fd   :  { %v4156_v11 = vpop.f32.mrf.mxu0 }
 0x4fe   :  { %v4605_v31 = vpop.f32.mrf.mxu1  ;;  %5130 = vst [vmem:[#allocation7 + $0x6d0] sm:$0xff] %v4874_v46  ;;  %v4875_v50 = vmul.f32 2.0, %v4600_v41  ;;  %v4604_v47 = vadd.f32 %v4603_v5, %v4155_v23  ;;  %v4157_v38 = vadd.f32 %v4156_v11, %v6892_v43  ;;  %v6902_v11 = vld [vmem:[#allocation85_spill] sm:$0xff] }
 0x4ff   :  { %v4160_v27 = vpop.f32.mrf.mxu0 }
 0x500   :  { %v4609_v15 = vpop.f32.mrf.mxu1  ;;  %5131 = vst [vmem:[#allocation7 + $0x6d8] sm:$0xff] %v4875_v50  ;;  %v4878_v6 = vmul.f32 2.0, %v4604_v47  ;;  %v4606_v9 = vadd.f32 %v4605_v31, %v4157_v38  ;;  %v4161_v24 = vadd.f32 %v4160_v27, %v6893_v34  ;;  %v6903_v27 = vld [vmem:[#allocation86_spill] sm:$0xff] }
 0x501   :  { %v4162_v51 = vpop.f32.mrf.mxu0 }
 0x502   :  { %v4611_v36 = vpop.f32.mrf.mxu1  ;;  %5134 = vst [vmem:[#allocation7 + $0x6f0] sm:$0xff] %v4878_v6  ;;  %v4879_v62 = vmul.f32 2.0, %v4606_v9  ;;  %v4610_v30 = vadd.f32 %v4609_v15, %v4161_v24  ;;  %v4163_v55 = vadd.f32 %v4162_v51, %v6894_v60  ;;  %v6904_v51 = vld [vmem:[#allocation87_spill] sm:$0xff] }
 0x503   :  { %v4166_v16 = vpop.f32.mrf.mxu0 }
 0x504   :  { %v4615_v29 = vpop.f32.mrf.mxu1  ;;  %5135 = vst [vmem:[#allocation7 + $0x6f8] sm:$0xff] %v4879_v62  ;;  %v4882_v25 = vmul.f32 2.0, %v4610_v30  ;;  %v4612_v7 = vadd.f32 %v4611_v36, %v4163_v55  ;;  %v4167_v48 = vadd.f32 %v4166_v16, %v6895_v42  ;;  %v6905_v16 = vld [vmem:[#allocation88_spill] sm:$0xff] }
 0x505   :  { %v4168_v33 = vpop.f32.mrf.mxu0 }
 0x506   :  { %v4617_v22 = vpop.f32.mrf.mxu1  ;;  %5138 = vst [vmem:[#allocation7 + $0x710] sm:$0xff] %v4882_v25  ;;  %v4883_v39 = vmul.f32 2.0, %v4612_v7  ;;  %v4616_v12 = vadd.f32 %v4615_v29, %v4167_v48  ;;  %v4169_v32 = vadd.f32 %v4168_v33, %v6896_v59  ;;  %v6906_v33 = vld [vmem:[#allocation89_spill] sm:$0xff] }
 0x507   :  { %v4172_v0 = vpop.f32.mrf.mxu0 }
 0x508   :  { %v4621_v4 = vpop.f32.mrf.mxu1  ;;  %5139 = vst [vmem:[#allocation7 + $0x718] sm:$0xff] %v4883_v39  ;;  %v4886_v49 = vmul.f32 2.0, %v4616_v12  ;;  %v4618_v40 = vadd.f32 %v4617_v22, %v4169_v32  ;;  %v4173_v58 = vadd.f32 %v4172_v0, %v6897_v61  ;;  %v6907_v0 = vld [vmem:[#allocation90_spill] sm:$0xff] }
 0x509   :  { %v4174_v52 = vpop.f32.mrf.mxu0 }
 0x50a   :  { %v4623_v17 = vpop.f32.mrf.mxu1  ;;  %5142 = vst [vmem:[#allocation7 + $0x730] sm:$0xff] %v4886_v49  ;;  %v4887_v1 = vmul.f32 2.0, %v4618_v40  ;;  %v4622_v10 = vadd.f32 %v4621_v4, %v4173_v58  ;;  %v4175_v45 = vadd.f32 %v4174_v52, %v6898_v54  ;;  %v6908_v58 = vld [vmem:[#allocation91_spill] sm:$0xff] }
 0x50b   :  { %v4178_v63 = vpop.f32.mrf.mxu0 }
 0x50c   :  { %v4627_v19 = vpop.f32.mrf.mxu1  ;;  %5143 = vst [vmem:[#allocation7 + $0x738] sm:$0xff] %v4887_v1  ;;  %v4890_v8 = vmul.f32 2.0, %v4622_v10  ;;  %v4624_v44 = vadd.f32 %v4623_v17, %v4175_v45  ;;  %v4179_v37 = vadd.f32 %v4178_v63, %v6899_v13 }
 0x50d   :  { %v4180_v14 = vpop.f32.mrf.mxu0 }
 0x50e   :  { %v4629_v53 = vpop.f32.mrf.mxu1  ;;  %5146 = vst [vmem:[#allocation7 + $0x750] sm:$0xff] %v4890_v8  ;;  %v4891_v2 = vmul.f32 2.0, %v4624_v44  ;;  %v4628_v56 = vadd.f32 %v4627_v19, %v4179_v37  ;;  %v4181_v57 = vadd.f32 %v4180_v14, %v6900_v21 }
 0x50f   :  { %v4184_v18 = vpop.f32.mrf.mxu0 }
 0x510   :  { %v4633_v3 = vpop.f32.mrf.mxu1  ;;  %5147 = vst [vmem:[#allocation7 + $0x758] sm:$0xff] %v4891_v2  ;;  %v4894_v28 = vmul.f32 2.0, %v4628_v56  ;;  %v4630_v26 = vadd.f32 %v4629_v53, %v4181_v57  ;;  %v4185_v5 = vadd.f32 %v4184_v18, %v6901_v20 }
 0x511   :  { %v4186_v46 = vpop.f32.mrf.mxu0 }
 0x512   :  { %v4635_v41 = vpop.f32.mrf.mxu1  ;;  %5150 = vst [vmem:[#allocation7 + $0x770] sm:$0xff] %v4894_v28  ;;  %v4895_v35 = vmul.f32 2.0, %v4630_v26  ;;  %v4634_v23 = vadd.f32 %v4633_v3, %v4185_v5  ;;  %v4187_v31 = vadd.f32 %v4186_v46, %v6902_v11 }
 0x513   :  { %v4190_v50 = vpop.f32.mrf.mxu0 }
 0x514   :  { %v4639_v47 = vpop.f32.mrf.mxu1  ;;  %5151 = vst [vmem:[#allocation7 + $0x778] sm:$0xff] %v4895_v35  ;;  %v4898_v43 = vmul.f32 2.0, %v4634_v23  ;;  %v4636_v38 = vadd.f32 %v4635_v41, %v4187_v31  ;;  %v4191_v15 = vadd.f32 %v4190_v50, %v6903_v27 }
 0x515   :  { %v4192_v6 = vpop.f32.mrf.mxu0 }
 0x516   :  { %v4641_v9 = vpop.f32.mrf.mxu1  ;;  %5154 = vst [vmem:[#allocation7 + $0x790] sm:$0xff] %v4898_v43  ;;  %v4899_v34 = vmul.f32 2.0, %v4636_v38  ;;  %v4640_v24 = vadd.f32 %v4639_v47, %v4191_v15  ;;  %v4193_v36 = vadd.f32 %v4192_v6, %v6904_v51 }
 0x517   :  { %v4196_v62 = vpop.f32.mrf.mxu0 }
 0x518   :  { %v4645_v30 = vpop.f32.mrf.mxu1  ;;  %5155 = vst [vmem:[#allocation7 + $0x798] sm:$0xff] %v4899_v34  ;;  %v4902_v60 = vmul.f32 2.0, %v4640_v24  ;;  %v4642_v55 = vadd.f32 %v4641_v9, %v4193_v36  ;;  %v4197_v29 = vadd.f32 %v4196_v62, %v6905_v16 }
 0x519   :  { %v4198_v25 = vpop.f32.mrf.mxu0 }
 0x51a   :  { %v4647_v7 = vpop.f32.mrf.mxu1  ;;  %5158 = vst [vmem:[#allocation7 + $0x7b0] sm:$0xff] %v4902_v60  ;;  %v4903_v42 = vmul.f32 2.0, %v4642_v55  ;;  %v4646_v48 = vadd.f32 %v4645_v30, %v4197_v29  ;;  %v4199_v22 = vadd.f32 %v4198_v25, %v6906_v33 }
 0x51b   :  { %v4202_v39 = vpop.f32.mrf.mxu0 }
 0x51c   :  { %v4651_v12 = vpop.f32.mrf.mxu1  ;;  %5159 = vst [vmem:[#allocation7 + $0x7b8] sm:$0xff] %v4903_v42  ;;  %v4906_v59 = vmul.f32 2.0, %v4646_v48  ;;  %v4648_v32 = vadd.f32 %v4647_v7, %v4199_v22  ;;  %v4203_v4 = vadd.f32 %v4202_v39, %v6907_v0 }
 0x51d   :  { %v4204_v49 = vpop.f32.mrf.mxu0 }
 0x51e   :  { %5162 = vst [vmem:[#allocation7 + $0x7d0] sm:$0xff] %v4906_v59  ;;  %v4907_v40 = vmul.f32 2.0, %v4648_v32  ;;  %v4652_v61 = vadd.f32 %v4651_v12, %v4203_v4  ;;  %v4205_v52 = vadd.f32 %v4204_v49, %v6908_v58  ;;  %v4653_v17 = vpop.f32.mrf.mxu1 }
 0x520   :  { %5163 = vst [vmem:[#allocation7 + $0x7d8] sm:$0xff] %v4907_v40  ;;  %v4910_v1 = vmul.f32 2.0, %v4652_v61  ;;  %v4654_v10 = vadd.f32 %v4653_v17, %v4205_v52 }
 0x522   :  { %5166 = vst [vmem:[#allocation7 + $0x7f0] sm:$0xff] %v4910_v1  ;;  %v4911_v54 = vmul.f32 2.0, %v4654_v10 }
 0x524   :  { %5167 = vst [vmem:[#allocation7 + $0x7f8] sm:$0xff] %v4911_v54 }
 0x525   :  { %5756 = shalt.err (!%p5753_p0)
}
 0x526   :  { %5179 = dma.vmem_to_hbm [thread:$0]  %s5174_s1, 32768, %s6578_s2, [#allocation4], %s5775_s19, %s5775_s19, %s5776_s20  }
 0x527   :  { %5769 = dma.done.wait [#allocation4], 32768  }
 0x528   :  { %5770 = vsyncadd [#allocation4], 4294934528 }
 0x529   :  { %5183 = vsyncpa [#allocation3], 1 }
 0x52a   :  { %5184 = vsyncpa [#allocation6], 1 }
 0x52b   :  { %5185 = vsyncpa [#allocation4], 1 }

</bundles_post_ra>
